<compile_context>
chip_gen: v5e
topology: v5e:2x2
jax: 0.10.0
libtpu: 0.0.40
codegen_flags: <defaults>
</compile_context>

<pallas_src>
import functools
import math

import jax
import jax.numpy as jnp
import numpy as np
from jax import lax
from jax.experimental import pallas as pl
from jax.experimental.pallas import tpu as pltpu


C_L1 = math.sqrt(3.0 / (4.0 * math.pi))  # real l=1 spherical-harmonic constant


def fibonacci_sphere(n):
    i = jnp.arange(n, dtype=jnp.float32) + 0.5
    phi = jnp.arccos(jnp.clip(1.0 - 2.0 * i / n, -1.0, 1.0))
    theta = jnp.pi * (1.0 + 5.0 ** 0.5) * i
    x = jnp.cos(theta) * jnp.sin(phi)
    y = jnp.sin(theta) * jnp.sin(phi)
    z = jnp.cos(phi)
    return jnp.stack([x, y, z], axis=-1)  # [S, 3]


# --------------------------------------------------------------------------- fused kernel
def _fused_kernel(x3n_ref, xn3_ref, d2_ref, dvolT_ref,
                  s2t_ref, wtT_ref, btT_ref,
                  y1mc_ref, y1x_ref,
                  wh1T_ref, bh1_ref,
                  wb2T_ref, bb2_ref,
                  wc2T_ref, bc2_ref,
                  wpT_ref, bp_ref,
                  e_ref, c_ref, pinv_ref,
                  *, H, W, D, S_pad):
    N = H * W * D
    inv_n = 1.0 / N

    x3n = x3n_ref[0]       # [3, N]    xyz rows (lane-dense points)
    xn3 = xn3_ref[0]       # [N, 3]    same points, point-major (sphere projection)
    d2 = d2_ref[0]         # [2, N]    row 0 = density (flat row-major H,W,D), row 1 = ones
    d_volT = dvolT_ref[0]  # [W*D, H]  density with z on lanes, (y*D + x) on sublanes

    x0 = x3n[0:1, :]
    x1 = x3n[1:2, :]
    x2 = x3n[2:3, :]       # [1, N] each

    # ------------------- TFN stand-in: sphere projections + density moments ------------
    s2t = s2t_ref[...]                                                    # [3, S_pad]
    # proj[n, s] = <x_n, s2_s> ; padded s columns are exactly 0 (zero s2 columns)
    proj = (xn3[:, 0:1] * s2t[0:1, :]
            + xn3[:, 1:2] * s2t[1:2, :]
            + xn3[:, 2:3] * s2t[2:3, :])                                  # [N, S_pad]
    pr = jnp.maximum(proj, 0.0)
    # one fused moment matmul: [density; ones] @ [pr | pr^2]  -> g1, g2, g3
    rhs2 = jnp.concatenate([pr, pr * pr], axis=1)                         # [N, 2*S_pad]
    mm = jnp.dot(d2, rhs2, preferred_element_type=jnp.float32) * inv_n    # [2, 2*S_pad]
    g1 = mm[0:1, 0:S_pad]                                                 # density . pr
    g2 = mm[0:1, S_pad:2 * S_pad]                                         # density . pr^2
    g3 = mm[1:2, 0:S_pad]                                                 # ones    . pr
    # lift to 256 channels on the VPU: F[c, s] = relu(sum_k wt[k, c] * g_k[s] + bt[c])
    wtT = wtT_ref[...]                                                    # [256, 3]
    f_t = jnp.maximum(wtT[:, 0:1] * g1 + wtT[:, 1:2] * g2 + wtT[:, 2:3] * g3
                      + btT_ref[...], 0.0)                                # [256, S_pad]
    f_bf = f_t.astype(jnp.bfloat16)

    # ------------------- fused basis+code head layer 1 (one bf16 MXU pass) -------------
    h = jnp.maximum(jnp.dot(wh1T_ref[...], f_bf,
                            preferred_element_type=jnp.float32) + bh1_ref[...], 0.0)  # [192, S_pad]
    h_bf = h.astype(jnp.bfloat16)
    hb = h_bf[0:64, :]      # basis hidden  [64,  S_pad]
    hc = h_bf[64:192, :]    # code hidden   [128, S_pad]

    # ------------------- basis head -> l=1 SHT -> L2 normalize (frame E) ---------------
    basis_t = jnp.dot(wb2T_ref[...], hb,
                      preferred_element_type=jnp.float32) + bb2_ref[...]               # [3, S_pad]
    # l1_t[ch, m] = sum_s basis[ch, s] * Y1m(s) * w_quad ; normalize over the channel axis
    l1_t = jnp.dot(basis_t, y1mc_ref[...], preferred_element_type=jnp.float32)         # [3, 3]
    nrm = jnp.sqrt(jnp.sum(l1_t * l1_t, axis=0, keepdims=True))                        # [1, 3]
    e_ref[0] = l1_t / jnp.maximum(nrm, 1e-6)     # E^T (wrapper transposes back to [m, ch])

    # ------------------- code head -> SHT -> type-1 latent code ------------------------
    code_t = jnp.dot(wc2T_ref[...], hc,
                     preferred_element_type=jnp.float32) + bc2_ref[...]                # [64, S_pad]
    # latent^T[c, m] with m already in (x, y, z) order (permutation folded into y1x)
    lat_t = jnp.dot(code_t, y1x_ref[...], preferred_element_type=jnp.float32)          # [64, 3]

    # ------------------- zernike(l=1) einsum + points_inv_layer -> coords ---------------
    # q[c, n] = C_L1 * sum_m latent[m, c] * x_m(n)  — K=3 kept on the VPU
    q = C_L1 * (lat_t[:, 0:1] * x0 + lat_t[:, 1:2] * x1 + lat_t[:, 2:3] * x2)          # [64, N]
    r2 = x0 * x0 + x1 * x1 + x2 * x2                                                   # [1, N]
    q_aug = jnp.concatenate([q, r2 * q], axis=0).astype(jnp.bfloat16)                  # [128, N]
    coords = jnp.dot(wpT_ref[...], q_aug,
                     preferred_element_type=jnp.float32) + bp_ref[...]                 # [3, N]
    c_ref[0] = coords                                                                  # lane-dense

    # ------------------- grid_sample(density, coords, align_corners=True, zeros) -------
    # Volume layout (PyTorch NCDHW after the permute): Di = H (z), Hi = W (y), Wi = D (x);
    # flat voxel index = z*(W*D) + y*D + x == row-major flattening of x_density[B,H,W,D].
    Di, Hi, Wi = H, W, D
    cx = coords[0:1, :]
    cy = coords[1:2, :]
    cz = coords[2:3, :]
    ix = (cx + 1.0) * (0.5 * (Wi - 1))
    iy = (cy + 1.0) * (0.5 * (Hi - 1))
    iz = (cz + 1.0) * (0.5 * (Di - 1))
    ix0 = jnp.floor(ix)
    iy0 = jnp.floor(iy)
    iz0 = jnp.floor(iz)
    tx = ix - ix0
    ty = iy - iy0
    tz = iz - iz0

    # (a) weighted z one-hot, both dz corners folded in:   zoh[z, n]
    iota_z = lax.broadcasted_iota(jnp.int32, (Di, N), 0)
    zoh = jnp.zeros((Di, N), jnp.float32)
    for dz in (0, 1):
        zz = iz0 + dz
        wz = tz if dz else (1.0 - tz)                                   # [1, N]
        vz = ((zz >= 0) & (zz < Di)).astype(jnp.float32)                # zeros padding
        zc = jnp.clip(zz, 0, Di - 1).astype(jnp.int32)                  # [1, N]
        zoh = zoh + jnp.where(iota_z == zc, wz * vz, 0.0)               # [Di, N]
    # z-interpolated planes per point (MXU): plane[yx, n] = sum_z d_volT[yx, z] * zoh[z, n]
    plane = jnp.dot(d_volT, zoh, preferred_element_type=jnp.float32)    # [Hi*Wi, N]

    # (b) weighted yx one-hot, all four (dy, dx) corners folded in:  yxw[yx, n]
    iota_yx = lax.broadcasted_iota(jnp.int32, (Hi * Wi, N), 0)
    yxw = jnp.zeros((Hi * Wi, N), jnp.float32)
    for dy in (0, 1):
        yy = iy0 + dy
        wy = ty if dy else (1.0 - ty)
        vy = (yy >= 0) & (yy < Hi)
        yc = jnp.clip(yy, 0, Hi - 1).astype(jnp.int32)
        for dx in (0, 1):
            xx = ix0 + dx
            wx = tx if dx else (1.0 - tx)
            vx = (xx >= 0) & (xx < Wi)
            xc = jnp.clip(xx, 0, Wi - 1).astype(jnp.int32)
            w = wy * wx * (vy & vx).astype(jnp.float32)                 # [1, N]
            idx = yc * Wi + xc                                          # [1, N]
            yxw = yxw + jnp.where(iota_yx == idx, w, 0.0)               # [Hi*Wi, N]

    # final contraction over the yx plane index (XLU sublane reduce)
    pinv_ref[0] = jnp.sum(plane * yxw, axis=0, keepdims=True)           # [1, N]


# --------------------------------------------------------------------------- wrapper
_PARAM_ORDER = ("s2t", "wtT", "btT", "y1mc", "y1x",
                "wh1T", "bh1", "wb2T", "bb2",
                "wc2T", "bc2", "wpT", "bp")


def run_fused(x3n, xn3, d2, dvolT, kp, H, W, D):
    B = x3n.shape[0]
    N = H * W * D
    S_pad = kp["s2t"].shape[1]
    params = [kp[k] for k in _PARAM_ORDER]

    kernel = functools.partial(_fused_kernel, H=H, W=W, D=D, S_pad=S_pad)

    in_specs = ([pl.BlockSpec((1, 3, N), lambda b: (b, 0, 0)),
                 pl.BlockSpec((1, N, 3), lambda b: (b, 0, 0)),
                 pl.BlockSpec((1, 2, N), lambda b: (b, 0, 0)),
                 pl.BlockSpec((1, W * D, H), lambda b: (b, 0, 0))]
                + [pl.BlockSpec(p.shape, lambda b: (0, 0)) for p in params])
    out_specs = (pl.BlockSpec((1, 3, 3), lambda b: (b, 0, 0)),
                 pl.BlockSpec((1, 3, N), lambda b: (b, 0, 0)),
                 pl.BlockSpec((1, 1, N), lambda b: (b, 0, 0)))
    out_shape = (jax.ShapeDtypeStruct((B, 3, 3), jnp.float32),   # E^T
                 jax.ShapeDtypeStruct((B, 3, N), jnp.float32),   # coords (lane-dense)
                 jax.ShapeDtypeStruct((B, 1, N), jnp.float32))   # sampled density

    return pl.pallas_call(
        kernel,
        out_shape=out_shape,
        grid=(B,),
        in_specs=in_specs,
        out_specs=out_specs,
        compiler_params=pltpu.CompilerParams(dimension_semantics=("parallel",)),
    )(x3n, xn3, d2, dvolT, *params)


def init_params(key, sphere_samples=64, s_pad=128):
    ks = jax.random.split(key, 6)

    def lin(k, fi, fo):
        return jax.random.normal(k, (fi, fo), jnp.float32) / math.sqrt(fi)

    # "natural" (PyTorch-layout) weights
    wt = lin(ks[0], 3, 256)
    wb1 = lin(ks[1], 256, 64)
    wb2 = lin(ks[2], 64, 3)
    wc1 = lin(ks[3], 256, 128)
    wc2 = lin(ks[4], 128, 64)
    wp = lin(ks[5], 128, 3)

    s2 = fibonacci_sphere(sphere_samples)                        # [S, 3]
    quad = 4.0 * math.pi / sphere_samples
    # real l=1 SH basis (m = -1, 0, 1 ~ y, z, x) with quadrature weight, columns per m
    y1mc = C_L1 * quad * jnp.stack([s2[:, 1], s2[:, 2], s2[:, 0]], axis=-1)   # [S, 3]
    # same basis with the m axis already permuted to (x, y, z): contracts with raw xyz
    y1x = C_L1 * quad * s2                                                    # [S, 3]

    # zero-pad the sphere axis to a full 128-lane vreg width; padded samples contribute
    # nothing (zero s2 columns -> zero moments; zero Y1 rows -> zero SHT weight).
    pad = s_pad - sphere_samples
    s2_p = jnp.pad(s2, ((0, pad), (0, 0)))
    y1mc_p = jnp.pad(y1mc, ((0, pad), (0, 0)))
    y1x_p = jnp.pad(y1x, ((0, pad), (0, 0)))

    # points_inv_layer weight reordered for the [q ; r2*q] concat (PyTorch flatten is
    # (i, j) with j minor -> rows 0::2 are the r^0 part, rows 1::2 the r^2 part).
    w_comb = jnp.concatenate([wp[0::2, :], wp[1::2, :]], axis=0)              # [128, 3]

    # basis-head + code-head first layers fused into one [192, 256] bf16 weight
    wh1T = jnp.concatenate([wb1.T, wc1.T], axis=0).astype(jnp.bfloat16)       # [192, 256]

    return {
        "s2t": s2_p.T,                                                # [3, S_pad]
        "wtT": wt.T, "btT": jnp.zeros((256, 1), jnp.float32),         # [256, 3], [256, 1]
        "y1mc": y1mc_p,                                               # [S_pad, 3]
        "y1x": y1x_p,                                                 # [S_pad, 3]
        "wh1T": wh1T, "bh1": jnp.zeros((192, 1), jnp.float32),        # fused head layer 1
        "wb2T": wb2.T.astype(jnp.bfloat16),                           # [3, 64]
        "bb2": jnp.zeros((3, 1), jnp.float32),
        "wc2T": wc2.T.astype(jnp.bfloat16),                           # [64, 128]
        "bc2": jnp.zeros((64, 1), jnp.float32),
        "wpT": w_comb.T.astype(jnp.bfloat16),                         # [3, 128]
        "bp": jnp.zeros((3, 1), jnp.float32),
    }


def cafi_forward(x, x_density, kp, num_frames=1):
    # x: [B, H, W, D, 3]   x_density: [B, H, W, D]
    B, H, W, D, _ = x.shape
    N = H * W * D
    xn3 = x.reshape(B, N, 3).astype(jnp.float32)
    x3n = jnp.transpose(xn3, (0, 2, 1))                              # [B, 3, N] lane-dense
    drow = x_density.reshape(B, 1, N).astype(jnp.float32)
    d2 = jnp.concatenate([drow, jnp.ones_like(drow)], axis=1)        # [B, 2, N]
    dvolT = jnp.transpose(x_density.reshape(B, H, W * D).astype(jnp.float32),
                          (0, 2, 1))                                 # [B, W*D, H]

    e_t, coords_3n, pinv_row = run_fused(x3n, xn3, d2, dvolT, kp, H, W, D)

    coords = jnp.transpose(coords_3n, (0, 2, 1)).reshape(B, H, W, D, 3)
    points_inv = pinv_row.reshape(B, H, W, D)
    e = jnp.transpose(e_t, (0, 2, 1))                                # back to [B, m, channel]
    E = [e for _ in range(num_frames)]                               # num_frames == 1 (default)
    return {"points_inv": points_inv, "E": E, "coords": coords}


# --------------------------------------------------------------------------- reference
def grid_sample_ref(x_density, coords):
    """Direct 8-corner trilinear reference (align_corners=True, zeros padding), matching
    PyTorch grid_sample on the NCDHW-permuted volume. Used only to validate the
    factorized in-kernel gather against the kernel's own coords."""
    B, H, W, D = x_density.shape
    N = H * W * D
    vol = x_density.reshape(B, N).astype(jnp.float32)
    c = coords.reshape(B, N, 3)
    cx, cy, cz = c[..., 0], c[..., 1], c[..., 2]
    ix = (cx + 1.0) * (0.5 * (D - 1))
    iy = (cy + 1.0) * (0.5 * (W - 1))
    iz = (cz + 1.0) * (0.5 * (H - 1))
    ix0, iy0, iz0 = jnp.floor(ix), jnp.floor(iy), jnp.floor(iz)
    tx, ty, tz = ix - ix0, iy - iy0, iz - iz0
    out = jnp.zeros((B, N), jnp.float32)
    for dz in (0, 1):
        zz = iz0 + dz
        wz = tz if dz else (1.0 - tz)
        vz = (zz >= 0) & (zz < H)
        zc = jnp.clip(zz, 0, H - 1).astype(jnp.int32)
        for dy in (0, 1):
            yy = iy0 + dy
            wy = ty if dy else (1.0 - ty)
            vy = (yy >= 0) & (yy < W)
            yc = jnp.clip(yy, 0, W - 1).astype(jnp.int32)
            for dx in (0, 1):
                xx = ix0 + dx
                wx = tx if dx else (1.0 - tx)
                vx = (xx >= 0) & (xx < D)
                xc = jnp.clip(xx, 0, D - 1).astype(jnp.int32)
                idx = zc * (W * D) + yc * D + xc
                w = wz * wy * wx * (vz & vy & vx).astype(jnp.float32)
                vals = jnp.take_along_axis(vol, idx, axis=1)
                out = out + w * vals
    return out.reshape(B, H, W, D)


# --------------------------------------------------------------------------- main
if __name__ == "__main__":
    key = jax.random.PRNGKey(0)
    k_x, k_d, k_p = jax.random.split(key, 3)

    # non-cubic grid on purpose (checks the grid_sample axis mapping), N = 512
    B, H, W, D = 2, 8, 16, 4
    S = 64
    x = jax.random.uniform(k_x, (B, H, W, D, 3), jnp.float32, minval=-1.0, maxval=1.0)
    x_density = jax.random.uniform(k_d, (B, H, W, D), jnp.float32)

    params = init_params(k_p, sphere_samples=S, s_pad=128)

    fwd = jax.jit(functools.partial(cafi_forward, num_frames=1))
    out = fwd(x, x_density, params)
    jax.block_until_ready(out["points_inv"])
    jax.block_until_ready(out["coords"])
    jax.block_until_ready(out["E"][0])

    assert out["points_inv"].shape == (B, H, W, D)
    assert out["coords"].shape == (B, H, W, D, 3)
    assert out["E"][0].shape == (B, 3, 3)
    assert bool(jnp.all(jnp.isfinite(out["points_inv"])))
    assert bool(jnp.all(jnp.isfinite(out["coords"])))
    assert bool(jnp.all(jnp.isfinite(out["E"][0])))

    # validate the factorized in-kernel trilinear gather against the direct 8-corner
    # formulation evaluated on the kernel's own coords (same f32 inputs, loose tol).
    pinv_ref = jax.jit(grid_sample_ref)(x_density, out["coords"])
    np.testing.assert_allclose(np.asarray(out["points_inv"]), np.asarray(pinv_ref),
                               atol=2e-3, rtol=2e-3)

    print("KERNEL_OK")
</pallas_src>

<mosaic_0001>
module attributes {stable_mosaic.version = 11 : i64} {
  func.func @_fused_kernel(%arg0: i32, %arg1: memref<1x3x512xf32, #tpu.memory_space<vmem>>, %arg2: memref<1x512x3xf32, #tpu.memory_space<vmem>>, %arg3: memref<1x2x512xf32, #tpu.memory_space<vmem>>, %arg4: memref<1x64x8xf32, #tpu.memory_space<vmem>>, %arg5: memref<3x128xf32, #tpu.memory_space<vmem>>, %arg6: memref<256x3xf32, #tpu.memory_space<vmem>>, %arg7: memref<256x1xf32, #tpu.memory_space<vmem>>, %arg8: memref<128x3xf32, #tpu.memory_space<vmem>>, %arg9: memref<128x3xf32, #tpu.memory_space<vmem>>, %arg10: memref<192x256xbf16, #tpu.memory_space<vmem>>, %arg11: memref<192x1xf32, #tpu.memory_space<vmem>>, %arg12: memref<3x64xbf16, #tpu.memory_space<vmem>>, %arg13: memref<3x1xf32, #tpu.memory_space<vmem>>, %arg14: memref<64x128xbf16, #tpu.memory_space<vmem>>, %arg15: memref<64x1xf32, #tpu.memory_space<vmem>>, %arg16: memref<3x128xbf16, #tpu.memory_space<vmem>>, %arg17: memref<3x1xf32, #tpu.memory_space<vmem>>, %arg18: memref<1x3x3xf32, #tpu.memory_space<vmem>>, %arg19: memref<1x3x512xf32, #tpu.memory_space<vmem>>, %arg20: memref<1x1x512xf32, #tpu.memory_space<vmem>>) attributes {dimension_semantics = [#tpu.dimension_semantics<parallel>], iteration_bounds = array<i64: 2>, scalar_prefetch = 0 : i64, scratch_operands = 0 : i64, tpu.core_type = #tpu.core_type<tc>, window_params = [{transform_indices = @transform_0, window_bounds = array<i64: 1, 3, 512>}, {transform_indices = @transform_1, window_bounds = array<i64: 1, 512, 3>}, {transform_indices = @transform_2, window_bounds = array<i64: 1, 2, 512>}, {transform_indices = @transform_3, window_bounds = array<i64: 1, 64, 8>}, {pipeline_mode = #tpu.pipeline_mode<synchronous>, transform_indices = @transform_4, window_bounds = array<i64: 3, 128>}, {pipeline_mode = #tpu.pipeline_mode<synchronous>, transform_indices = @transform_5, window_bounds = array<i64: 256, 3>}, {pipeline_mode = #tpu.pipeline_mode<synchronous>, transform_indices = @transform_6, window_bounds = array<i64: 256, 1>}, {pipeline_mode = #tpu.pipeline_mode<synchronous>, transform_indices = @transform_7, window_bounds = array<i64: 128, 3>}, {pipeline_mode = #tpu.pipeline_mode<synchronous>, transform_indices = @transform_8, window_bounds = array<i64: 128, 3>}, {pipeline_mode = #tpu.pipeline_mode<synchronous>, transform_indices = @transform_9, window_bounds = array<i64: 192, 256>}, {pipeline_mode = #tpu.pipeline_mode<synchronous>, transform_indices = @transform_10, window_bounds = array<i64: 192, 1>}, {pipeline_mode = #tpu.pipeline_mode<synchronous>, transform_indices = @transform_11, window_bounds = array<i64: 3, 64>}, {pipeline_mode = #tpu.pipeline_mode<synchronous>, transform_indices = @transform_12, window_bounds = array<i64: 3, 1>}, {pipeline_mode = #tpu.pipeline_mode<synchronous>, transform_indices = @transform_13, window_bounds = array<i64: 64, 128>}, {pipeline_mode = #tpu.pipeline_mode<synchronous>, transform_indices = @transform_14, window_bounds = array<i64: 64, 1>}, {pipeline_mode = #tpu.pipeline_mode<synchronous>, transform_indices = @transform_15, window_bounds = array<i64: 3, 128>}, {pipeline_mode = #tpu.pipeline_mode<synchronous>, transform_indices = @transform_16, window_bounds = array<i64: 3, 1>}, {transform_indices = @transform_17, window_bounds = array<i64: 1, 3, 3>}, {transform_indices = @transform_18, window_bounds = array<i64: 1, 3, 512>}, {transform_indices = @transform_19, window_bounds = array<i64: 1, 1, 512>}]} {
    %c0 = arith.constant 0 : index
    %c0_0 = arith.constant 0 : index
    %c0_1 = arith.constant 0 : index
    %0 = vector.load %arg1[%c0, %c0_0, %c0_1] : memref<1x3x512xf32, #tpu.memory_space<vmem>>, vector<1x3x512xf32>
    %1 = vector.shape_cast %0 : vector<1x3x512xf32> to vector<3x512xf32>
    %c0_2 = arith.constant 0 : index
    %c0_3 = arith.constant 0 : index
    %c0_4 = arith.constant 0 : index
    %2 = vector.load %arg2[%c0_2, %c0_3, %c0_4] : memref<1x512x3xf32, #tpu.memory_space<vmem>>, vector<1x512x3xf32>
    %3 = vector.shape_cast %2 : vector<1x512x3xf32> to vector<512x3xf32>
    %c0_5 = arith.constant 0 : index
    %c0_6 = arith.constant 0 : index
    %c0_7 = arith.constant 0 : index
    %4 = vector.load %arg3[%c0_5, %c0_6, %c0_7] : memref<1x2x512xf32, #tpu.memory_space<vmem>>, vector<1x2x512xf32>
    %5 = vector.shape_cast %4 : vector<1x2x512xf32> to vector<2x512xf32>
    %c0_8 = arith.constant 0 : index
    %c0_9 = arith.constant 0 : index
    %c0_10 = arith.constant 0 : index
    %6 = vector.load %arg4[%c0_8, %c0_9, %c0_10] : memref<1x64x8xf32, #tpu.memory_space<vmem>>, vector<1x64x8xf32>
    %7 = vector.shape_cast %6 : vector<1x64x8xf32> to vector<64x8xf32>
    %8 = vector.extract_strided_slice %1 {offsets = [0, 0], sizes = [1, 512], strides = [1, 1]} : vector<3x512xf32> to vector<1x512xf32>
    %9 = vector.extract_strided_slice %1 {offsets = [1, 0], sizes = [1, 512], strides = [1, 1]} : vector<3x512xf32> to vector<1x512xf32>
    %10 = vector.extract_strided_slice %1 {offsets = [2, 0], sizes = [1, 512], strides = [1, 1]} : vector<3x512xf32> to vector<1x512xf32>
    %c0_11 = arith.constant 0 : index
    %c0_12 = arith.constant 0 : index
    %11 = vector.load %arg5[%c0_11, %c0_12] : memref<3x128xf32, #tpu.memory_space<vmem>>, vector<3x128xf32>
    %12 = vector.extract_strided_slice %3 {offsets = [0, 0], sizes = [512, 1], strides = [1, 1]} : vector<512x3xf32> to vector<512x1xf32>
    %13 = vector.extract_strided_slice %11 {offsets = [0, 0], sizes = [1, 128], strides = [1, 1]} : vector<3x128xf32> to vector<1x128xf32>
    %14 = vector.broadcast %12 : vector<512x1xf32> to vector<512x128xf32>
    %15 = vector.broadcast %13 : vector<1x128xf32> to vector<512x128xf32>
    %16 = arith.mulf %14, %15 : vector<512x128xf32>
    %17 = vector.extract_strided_slice %3 {offsets = [0, 1], sizes = [512, 1], strides = [1, 1]} : vector<512x3xf32> to vector<512x1xf32>
    %18 = vector.extract_strided_slice %11 {offsets = [1, 0], sizes = [1, 128], strides = [1, 1]} : vector<3x128xf32> to vector<1x128xf32>
    %19 = vector.broadcast %17 : vector<512x1xf32> to vector<512x128xf32>
    %20 = vector.broadcast %18 : vector<1x128xf32> to vector<512x128xf32>
    %21 = arith.mulf %19, %20 : vector<512x128xf32>
    %22 = arith.addf %16, %21 : vector<512x128xf32>
    %23 = vector.extract_strided_slice %3 {offsets = [0, 2], sizes = [512, 1], strides = [1, 1]} : vector<512x3xf32> to vector<512x1xf32>
    %24 = vector.extract_strided_slice %11 {offsets = [2, 0], sizes = [1, 128], strides = [1, 1]} : vector<3x128xf32> to vector<1x128xf32>
    %25 = vector.broadcast %23 : vector<512x1xf32> to vector<512x128xf32>
    %26 = vector.broadcast %24 : vector<1x128xf32> to vector<512x128xf32>
    %27 = arith.mulf %25, %26 : vector<512x128xf32>
    %28 = arith.addf %22, %27 : vector<512x128xf32>
    %cst = arith.constant 0.000000e+00 : f32
    %29 = vector.broadcast %cst : f32 to vector<512x128xf32>
    %30 = arith.maximumf %28, %29 : vector<512x128xf32>
    %31 = arith.mulf %30, %30 : vector<512x128xf32>
    %32 = tpu.concatenate %30, %31 in 1 : vector<512x128xf32>, vector<512x128xf32> -> vector<512x256xf32>
    %cst_13 = arith.constant dense<0.000000e+00> : vector<2x256xf32>
    %33 = tpu.matmul %5, %32, %cst_13 {dimension_numbers = #tpu.dot_dimension_numbers<[1], [0], [0], [1], [0, 0, 1, 1], [], []>} : vector<2x512xf32>, vector<512x256xf32>, vector<2x256xf32> -> vector<2x256xf32>
    %cst_14 = arith.constant 0.001953125 : f32
    %34 = vector.broadcast %cst_14 : f32 to vector<2x256xf32>
    %35 = arith.mulf %33, %34 : vector<2x256xf32>
    %36 = vector.extract_strided_slice %35 {offsets = [0, 0], sizes = [1, 128], strides = [1, 1]} : vector<2x256xf32> to vector<1x128xf32>
    %37 = vector.extract_strided_slice %35 {offsets = [0, 128], sizes = [1, 128], strides = [1, 1]} : vector<2x256xf32> to vector<1x128xf32>
    %38 = vector.extract_strided_slice %35 {offsets = [1, 0], sizes = [1, 128], strides = [1, 1]} : vector<2x256xf32> to vector<1x128xf32>
    %c0_15 = arith.constant 0 : index
    %c0_16 = arith.constant 0 : index
    %39 = vector.load %arg6[%c0_15, %c0_16] : memref<256x3xf32, #tpu.memory_space<vmem>>, vector<256x3xf32>
    %40 = vector.extract_strided_slice %39 {offsets = [0, 0], sizes = [256, 1], strides = [1, 1]} : vector<256x3xf32> to vector<256x1xf32>
    %41 = vector.broadcast %40 : vector<256x1xf32> to vector<256x128xf32>
    %42 = vector.broadcast %36 : vector<1x128xf32> to vector<256x128xf32>
    %43 = arith.mulf %41, %42 : vector<256x128xf32>
    %44 = vector.extract_strided_slice %39 {offsets = [0, 1], sizes = [256, 1], strides = [1, 1]} : vector<256x3xf32> to vector<256x1xf32>
    %45 = vector.broadcast %44 : vector<256x1xf32> to vector<256x128xf32>
    %46 = vector.broadcast %37 : vector<1x128xf32> to vector<256x128xf32>
    %47 = arith.mulf %45, %46 : vector<256x128xf32>
    %48 = arith.addf %43, %47 : vector<256x128xf32>
    %49 = vector.extract_strided_slice %39 {offsets = [0, 2], sizes = [256, 1], strides = [1, 1]} : vector<256x3xf32> to vector<256x1xf32>
    %50 = vector.broadcast %49 : vector<256x1xf32> to vector<256x128xf32>
    %51 = vector.broadcast %38 : vector<1x128xf32> to vector<256x128xf32>
    %52 = arith.mulf %50, %51 : vector<256x128xf32>
    %53 = arith.addf %48, %52 : vector<256x128xf32>
    %c0_17 = arith.constant 0 : index
    %c0_18 = arith.constant 0 : index
    %54 = vector.load %arg7[%c0_17, %c0_18] : memref<256x1xf32, #tpu.memory_space<vmem>>, vector<256x1xf32>
    %55 = vector.broadcast %54 : vector<256x1xf32> to vector<256x128xf32>
    %56 = arith.addf %53, %55 : vector<256x128xf32>
    %cst_19 = arith.constant 0.000000e+00 : f32
    %57 = vector.broadcast %cst_19 : f32 to vector<256x128xf32>
    %58 = arith.maximumf %56, %57 : vector<256x128xf32>
    %59 = arith.truncf %58 : vector<256x128xf32> to vector<256x128xbf16>
    %c0_20 = arith.constant 0 : index
    %c0_21 = arith.constant 0 : index
    %60 = vector.load %arg10[%c0_20, %c0_21] : memref<192x256xbf16, #tpu.memory_space<vmem>>, vector<192x256xbf16>
    %cst_22 = arith.constant dense<0.000000e+00> : vector<192x128xf32>
    %61 = tpu.matmul %60, %59, %cst_22 {dimension_numbers = #tpu.dot_dimension_numbers<[1], [0], [0], [1], [0, 0, 1, 1], [], []>} : vector<192x256xbf16>, vector<256x128xbf16>, vector<192x128xf32> -> vector<192x128xf32>
    %c0_23 = arith.constant 0 : index
    %c0_24 = arith.constant 0 : index
    %62 = vector.load %arg11[%c0_23, %c0_24] : memref<192x1xf32, #tpu.memory_space<vmem>>, vector<192x1xf32>
    %63 = vector.broadcast %62 : vector<192x1xf32> to vector<192x128xf32>
    %64 = arith.addf %61, %63 : vector<192x128xf32>
    %cst_25 = arith.constant 0.000000e+00 : f32
    %65 = vector.broadcast %cst_25 : f32 to vector<192x128xf32>
    %66 = arith.maximumf %64, %65 : vector<192x128xf32>
    %67 = arith.truncf %66 : vector<192x128xf32> to vector<192x128xbf16>
    %68 = vector.extract_strided_slice %67 {offsets = [0, 0], sizes = [64, 128], strides = [1, 1]} : vector<192x128xbf16> to vector<64x128xbf16>
    %69 = vector.extract_strided_slice %67 {offsets = [64, 0], sizes = [128, 128], strides = [1, 1]} : vector<192x128xbf16> to vector<128x128xbf16>
    %c0_26 = arith.constant 0 : index
    %c0_27 = arith.constant 0 : index
    %70 = vector.load %arg12[%c0_26, %c0_27] : memref<3x64xbf16, #tpu.memory_space<vmem>>, vector<3x64xbf16>
    %cst_28 = arith.constant dense<0.000000e+00> : vector<3x128xf32>
    %71 = tpu.matmul %70, %68, %cst_28 {dimension_numbers = #tpu.dot_dimension_numbers<[1], [0], [0], [1], [0, 0, 1, 1], [], []>} : vector<3x64xbf16>, vector<64x128xbf16>, vector<3x128xf32> -> vector<3x128xf32>
    %c0_29 = arith.constant 0 : index
    %c0_30 = arith.constant 0 : index
    %72 = vector.load %arg13[%c0_29, %c0_30] : memref<3x1xf32, #tpu.memory_space<vmem>>, vector<3x1xf32>
    %73 = vector.broadcast %72 : vector<3x1xf32> to vector<3x128xf32>
    %74 = arith.addf %71, %73 : vector<3x128xf32>
    %c0_31 = arith.constant 0 : index
    %c0_32 = arith.constant 0 : index
    %75 = vector.load %arg8[%c0_31, %c0_32] : memref<128x3xf32, #tpu.memory_space<vmem>>, vector<128x3xf32>
    %cst_33 = arith.constant dense<0.000000e+00> : vector<3x3xf32>
    %76 = tpu.matmul %74, %75, %cst_33 {dimension_numbers = #tpu.dot_dimension_numbers<[1], [0], [0], [1], [0, 0, 1, 1], [], []>} : vector<3x128xf32>, vector<128x3xf32>, vector<3x3xf32> -> vector<3x3xf32>
    %77 = arith.mulf %76, %76 : vector<3x3xf32>
    %cst_34 = arith.constant dense<0.000000e+00> : vector<3xf32>
    %78 = vector.multi_reduction <add>, %77, %cst_34 [0] : vector<3x3xf32> to vector<3xf32>
    %79 = vector.shape_cast %78 : vector<3xf32> to vector<1x3xf32>
    %80 = math.sqrt %79 : vector<1x3xf32>
    %cst_35 = arith.constant 9.99999997E-7 : f32
    %81 = vector.broadcast %cst_35 : f32 to vector<1x3xf32>
    %82 = arith.maximumf %80, %81 : vector<1x3xf32>
    %83 = vector.broadcast %82 : vector<1x3xf32> to vector<3x3xf32>
    %84 = arith.divf %76, %83 : vector<3x3xf32>
    %c0_36 = arith.constant 0 : index
    %c0_37 = arith.constant 0 : index
    %c0_38 = arith.constant 0 : index
    %85 = vector.load %arg18[%c0_36, %c0_37, %c0_38] : memref<1x3x3xf32, #tpu.memory_space<vmem>>, vector<1x3x3xf32>
    %86 = vector.shape_cast %85 : vector<1x3x3xf32> to vector<3x3xf32>
    %87 = vector.shape_cast %84 : vector<3x3xf32> to vector<1x3x3xf32>
    tpu.vector_store %arg18[%c0_36, %c0_37, %c0_38], %87 {strides = array<i32>} : memref<1x3x3xf32, #tpu.memory_space<vmem>>, vector<1x3x3xf32>,
    %c0_39 = arith.constant 0 : index
    %c0_40 = arith.constant 0 : index
    %88 = vector.load %arg14[%c0_39, %c0_40] : memref<64x128xbf16, #tpu.memory_space<vmem>>, vector<64x128xbf16>
    %cst_41 = arith.constant dense<0.000000e+00> : vector<64x128xf32>
    %89 = tpu.matmul %88, %69, %cst_41 {dimension_numbers = #tpu.dot_dimension_numbers<[1], [0], [0], [1], [0, 0, 1, 1], [], []>} : vector<64x128xbf16>, vector<128x128xbf16>, vector<64x128xf32> -> vector<64x128xf32>
    %c0_42 = arith.constant 0 : index
    %c0_43 = arith.constant 0 : index
    %90 = vector.load %arg15[%c0_42, %c0_43] : memref<64x1xf32, #tpu.memory_space<vmem>>, vector<64x1xf32>
    %91 = vector.broadcast %90 : vector<64x1xf32> to vector<64x128xf32>
    %92 = arith.addf %89, %91 : vector<64x128xf32>
    %c0_44 = arith.constant 0 : index
    %c0_45 = arith.constant 0 : index
    %93 = vector.load %arg9[%c0_44, %c0_45] : memref<128x3xf32, #tpu.memory_space<vmem>>, vector<128x3xf32>
    %cst_46 = arith.constant dense<0.000000e+00> : vector<64x3xf32>
    %94 = tpu.matmul %92, %93, %cst_46 {dimension_numbers = #tpu.dot_dimension_numbers<[1], [0], [0], [1], [0, 0, 1, 1], [], []>} : vector<64x128xf32>, vector<128x3xf32>, vector<64x3xf32> -> vector<64x3xf32>
    %95 = vector.extract_strided_slice %94 {offsets = [0, 0], sizes = [64, 1], strides = [1, 1]} : vector<64x3xf32> to vector<64x1xf32>
    %96 = vector.broadcast %95 : vector<64x1xf32> to vector<64x512xf32>
    %97 = vector.broadcast %8 : vector<1x512xf32> to vector<64x512xf32>
    %98 = arith.mulf %96, %97 : vector<64x512xf32>
    %99 = vector.extract_strided_slice %94 {offsets = [0, 1], sizes = [64, 1], strides = [1, 1]} : vector<64x3xf32> to vector<64x1xf32>
    %100 = vector.broadcast %99 : vector<64x1xf32> to vector<64x512xf32>
    %101 = vector.broadcast %9 : vector<1x512xf32> to vector<64x512xf32>
    %102 = arith.mulf %100, %101 : vector<64x512xf32>
    %103 = arith.addf %98, %102 : vector<64x512xf32>
    %104 = vector.extract_strided_slice %94 {offsets = [0, 2], sizes = [64, 1], strides = [1, 1]} : vector<64x3xf32> to vector<64x1xf32>
    %105 = vector.broadcast %104 : vector<64x1xf32> to vector<64x512xf32>
    %106 = vector.broadcast %10 : vector<1x512xf32> to vector<64x512xf32>
    %107 = arith.mulf %105, %106 : vector<64x512xf32>
    %108 = arith.addf %103, %107 : vector<64x512xf32>
    %cst_47 = arith.constant 0.488602519 : f32
    %109 = vector.broadcast %cst_47 : f32 to vector<64x512xf32>
    %110 = arith.mulf %109, %108 : vector<64x512xf32>
    %111 = arith.mulf %8, %8 : vector<1x512xf32>
    %112 = arith.mulf %9, %9 : vector<1x512xf32>
    %113 = arith.addf %111, %112 : vector<1x512xf32>
    %114 = arith.mulf %10, %10 : vector<1x512xf32>
    %115 = arith.addf %113, %114 : vector<1x512xf32>
    %116 = vector.broadcast %115 : vector<1x512xf32> to vector<64x512xf32>
    %117 = arith.mulf %116, %110 : vector<64x512xf32>
    %118 = tpu.concatenate %110, %117 in 0 : vector<64x512xf32>, vector<64x512xf32> -> vector<128x512xf32>
    %119 = arith.truncf %118 : vector<128x512xf32> to vector<128x512xbf16>
    %c0_48 = arith.constant 0 : index
    %c0_49 = arith.constant 0 : index
    %120 = vector.load %arg16[%c0_48, %c0_49] : memref<3x128xbf16, #tpu.memory_space<vmem>>, vector<3x128xbf16>
    %cst_50 = arith.constant dense<0.000000e+00> : vector<3x512xf32>
    %121 = tpu.matmul %120, %119, %cst_50 {dimension_numbers = #tpu.dot_dimension_numbers<[1], [0], [0], [1], [0, 0, 1, 1], [], []>} : vector<3x128xbf16>, vector<128x512xbf16>, vector<3x512xf32> -> vector<3x512xf32>
    %c0_51 = arith.constant 0 : index
    %c0_52 = arith.constant 0 : index
    %122 = vector.load %arg17[%c0_51, %c0_52] : memref<3x1xf32, #tpu.memory_space<vmem>>, vector<3x1xf32>
    %123 = vector.broadcast %122 : vector<3x1xf32> to vector<3x512xf32>
    %124 = arith.addf %121, %123 : vector<3x512xf32>
    %c0_53 = arith.constant 0 : index
    %c0_54 = arith.constant 0 : index
    %c0_55 = arith.constant 0 : index
    %125 = vector.load %arg19[%c0_53, %c0_54, %c0_55] : memref<1x3x512xf32, #tpu.memory_space<vmem>>, vector<1x3x512xf32>
    %126 = vector.shape_cast %125 : vector<1x3x512xf32> to vector<3x512xf32>
    %127 = vector.shape_cast %124 : vector<3x512xf32> to vector<1x3x512xf32>
    tpu.vector_store %arg19[%c0_53, %c0_54, %c0_55], %127 {strides = array<i32>} : memref<1x3x512xf32, #tpu.memory_space<vmem>>, vector<1x3x512xf32>,
    %128 = vector.extract_strided_slice %124 {offsets = [0, 0], sizes = [1, 512], strides = [1, 1]} : vector<3x512xf32> to vector<1x512xf32>
    %129 = vector.extract_strided_slice %124 {offsets = [1, 0], sizes = [1, 512], strides = [1, 1]} : vector<3x512xf32> to vector<1x512xf32>
    %130 = vector.extract_strided_slice %124 {offsets = [2, 0], sizes = [1, 512], strides = [1, 1]} : vector<3x512xf32> to vector<1x512xf32>
    %cst_56 = arith.constant 1.000000e+00 : f32
    %131 = vector.broadcast %cst_56 : f32 to vector<1x512xf32>
    %132 = arith.addf %128, %131 : vector<1x512xf32>
    %cst_57 = arith.constant 1.500000e+00 : f32
    %133 = vector.broadcast %cst_57 : f32 to vector<1x512xf32>
    %134 = arith.mulf %132, %133 : vector<1x512xf32>
    %cst_58 = arith.constant 1.000000e+00 : f32
    %135 = vector.broadcast %cst_58 : f32 to vector<1x512xf32>
    %136 = arith.addf %129, %135 : vector<1x512xf32>
    %cst_59 = arith.constant 7.500000e+00 : f32
    %137 = vector.broadcast %cst_59 : f32 to vector<1x512xf32>
    %138 = arith.mulf %136, %137 : vector<1x512xf32>
    %cst_60 = arith.constant 1.000000e+00 : f32
    %139 = vector.broadcast %cst_60 : f32 to vector<1x512xf32>
    %140 = arith.addf %130, %139 : vector<1x512xf32>
    %cst_61 = arith.constant 3.500000e+00 : f32
    %141 = vector.broadcast %cst_61 : f32 to vector<1x512xf32>
    %142 = arith.mulf %140, %141 : vector<1x512xf32>
    %143 = math.floor %134 : vector<1x512xf32>
    %144 = math.floor %138 : vector<1x512xf32>
    %145 = math.floor %142 : vector<1x512xf32>
    %146 = arith.subf %134, %143 : vector<1x512xf32>
    %147 = arith.subf %138, %144 : vector<1x512xf32>
    %148 = arith.subf %142, %145 : vector<1x512xf32>
    %149 = tpu.iota {dimensions = array<i32: 0>} : vector<8x512xi32>
    %cst_62 = arith.constant 0.000000e+00 : f32
    %150 = vector.broadcast %cst_62 : f32 to vector<8x512xf32>
    %cst_63 = arith.constant 0.000000e+00 : f32
    %151 = vector.broadcast %cst_63 : f32 to vector<1x512xf32>
    %152 = arith.addf %145, %151 : vector<1x512xf32>
    %cst_64 = arith.constant 1.000000e+00 : f32
    %153 = vector.broadcast %cst_64 : f32 to vector<1x512xf32>
    %154 = arith.subf %153, %148 : vector<1x512xf32>
    %cst_65 = arith.constant 0.000000e+00 : f32
    %155 = vector.broadcast %cst_65 : f32 to vector<1x512xf32>
    %156 = arith.cmpf oge, %152, %155 : vector<1x512xf32>
    %cst_66 = arith.constant 8.000000e+00 : f32
    %157 = vector.broadcast %cst_66 : f32 to vector<1x512xf32>
    %158 = arith.cmpf olt, %152, %157 : vector<1x512xf32>
    %159 = arith.andi %156, %158 : vector<1x512xi1>
    %160 = arith.extui %159 : vector<1x512xi1> to vector<1x512xi32>
    %161 = arith.sitofp %160 : vector<1x512xi32> to vector<1x512xf32>
    %c0_i32 = arith.constant 0 : i32
    %c7_i32 = arith.constant 7 : i32
    %162 = arith.sitofp %c0_i32 : i32 to f32
    %163 = vector.broadcast %162 : f32 to vector<1x512xf32>
    %164 = arith.maximumf %163, %152 : vector<1x512xf32>
    %165 = arith.sitofp %c7_i32 : i32 to f32
    %166 = vector.broadcast %165 : f32 to vector<1x512xf32>
    %167 = arith.minimumf %166, %164 : vector<1x512xf32>
    %168 = arith.fptosi %167 : vector<1x512xf32> to vector<1x512xi32>
    %169 = vector.broadcast %168 : vector<1x512xi32> to vector<8x512xi32>
    %170 = arith.cmpi eq, %149, %169 : vector<8x512xi32>
    %171 = arith.mulf %154, %161 : vector<1x512xf32>
    %cst_67 = arith.constant 0.000000e+00 : f32
    %172 = vector.shape_cast %171 : vector<1x512xf32> to vector<1x512xf32>
    %173 = vector.broadcast %172 : vector<1x512xf32> to vector<8x512xf32>
    %174 = vector.broadcast %cst_67 : f32 to vector<8x512xf32>
    %175 = arith.select %170, %173, %174 : vector<8x512xi1>, vector<8x512xf32>
    %176 = arith.addf %150, %175 : vector<8x512xf32>
    %cst_68 = arith.constant 1.000000e+00 : f32
    %177 = vector.broadcast %cst_68 : f32 to vector<1x512xf32>
    %178 = arith.addf %145, %177 : vector<1x512xf32>
    %cst_69 = arith.constant 0.000000e+00 : f32
    %179 = vector.broadcast %cst_69 : f32 to vector<1x512xf32>
    %180 = arith.cmpf oge, %178, %179 : vector<1x512xf32>
    %cst_70 = arith.constant 8.000000e+00 : f32
    %181 = vector.broadcast %cst_70 : f32 to vector<1x512xf32>
    %182 = arith.cmpf olt, %178, %181 : vector<1x512xf32>
    %183 = arith.andi %180, %182 : vector<1x512xi1>
    %184 = arith.extui %183 : vector<1x512xi1> to vector<1x512xi32>
    %185 = arith.sitofp %184 : vector<1x512xi32> to vector<1x512xf32>
    %c0_i32_71 = arith.constant 0 : i32
    %c7_i32_72 = arith.constant 7 : i32
    %186 = arith.sitofp %c0_i32_71 : i32 to f32
    %187 = vector.broadcast %186 : f32 to vector<1x512xf32>
    %188 = arith.maximumf %187, %178 : vector<1x512xf32>
    %189 = arith.sitofp %c7_i32_72 : i32 to f32
    %190 = vector.broadcast %189 : f32 to vector<1x512xf32>
    %191 = arith.minimumf %190, %188 : vector<1x512xf32>
    %192 = arith.fptosi %191 : vector<1x512xf32> to vector<1x512xi32>
    %193 = vector.broadcast %192 : vector<1x512xi32> to vector<8x512xi32>
    %194 = arith.cmpi eq, %149, %193 : vector<8x512xi32>
    %195 = arith.mulf %148, %185 : vector<1x512xf32>
    %cst_73 = arith.constant 0.000000e+00 : f32
    %196 = vector.shape_cast %195 : vector<1x512xf32> to vector<1x512xf32>
    %197 = vector.broadcast %196 : vector<1x512xf32> to vector<8x512xf32>
    %198 = vector.broadcast %cst_73 : f32 to vector<8x512xf32>
    %199 = arith.select %194, %197, %198 : vector<8x512xi1>, vector<8x512xf32>
    %200 = arith.addf %176, %199 : vector<8x512xf32>
    %cst_74 = arith.constant dense<0.000000e+00> : vector<64x512xf32>
    %201 = tpu.matmul %7, %200, %cst_74 {dimension_numbers = #tpu.dot_dimension_numbers<[1], [0], [0], [1], [0, 0, 1, 1], [], []>} : vector<64x8xf32>, vector<8x512xf32>, vector<64x512xf32> -> vector<64x512xf32>
    %202 = tpu.iota {dimensions = array<i32: 0>} : vector<64x512xi32>
    %cst_75 = arith.constant 0.000000e+00 : f32
    %203 = vector.broadcast %cst_75 : f32 to vector<64x512xf32>
    %cst_76 = arith.constant 0.000000e+00 : f32
    %204 = vector.broadcast %cst_76 : f32 to vector<1x512xf32>
    %205 = arith.addf %144, %204 : vector<1x512xf32>
    %cst_77 = arith.constant 1.000000e+00 : f32
    %206 = vector.broadcast %cst_77 : f32 to vector<1x512xf32>
    %207 = arith.subf %206, %147 : vector<1x512xf32>
    %cst_78 = arith.constant 0.000000e+00 : f32
    %208 = vector.broadcast %cst_78 : f32 to vector<1x512xf32>
    %209 = arith.cmpf oge, %205, %208 : vector<1x512xf32>
    %cst_79 = arith.constant 1.600000e+01 : f32
    %210 = vector.broadcast %cst_79 : f32 to vector<1x512xf32>
    %211 = arith.cmpf olt, %205, %210 : vector<1x512xf32>
    %212 = arith.andi %209, %211 : vector<1x512xi1>
    %c0_i32_80 = arith.constant 0 : i32
    %c15_i32 = arith.constant 15 : i32
    %213 = arith.sitofp %c0_i32_80 : i32 to f32
    %214 = vector.broadcast %213 : f32 to vector<1x512xf32>
    %215 = arith.maximumf %214, %205 : vector<1x512xf32>
    %216 = arith.sitofp %c15_i32 : i32 to f32
    %217 = vector.broadcast %216 : f32 to vector<1x512xf32>
    %218 = arith.minimumf %217, %215 : vector<1x512xf32>
    %219 = arith.fptosi %218 : vector<1x512xf32> to vector<1x512xi32>
    %cst_81 = arith.constant 0.000000e+00 : f32
    %220 = vector.broadcast %cst_81 : f32 to vector<1x512xf32>
    %221 = arith.addf %143, %220 : vector<1x512xf32>
    %cst_82 = arith.constant 1.000000e+00 : f32
    %222 = vector.broadcast %cst_82 : f32 to vector<1x512xf32>
    %223 = arith.subf %222, %146 : vector<1x512xf32>
    %cst_83 = arith.constant 0.000000e+00 : f32
    %224 = vector.broadcast %cst_83 : f32 to vector<1x512xf32>
    %225 = arith.cmpf oge, %221, %224 : vector<1x512xf32>
    %cst_84 = arith.constant 4.000000e+00 : f32
    %226 = vector.broadcast %cst_84 : f32 to vector<1x512xf32>
    %227 = arith.cmpf olt, %221, %226 : vector<1x512xf32>
    %228 = arith.andi %225, %227 : vector<1x512xi1>
    %c0_i32_85 = arith.constant 0 : i32
    %c3_i32 = arith.constant 3 : i32
    %229 = arith.sitofp %c0_i32_85 : i32 to f32
    %230 = vector.broadcast %229 : f32 to vector<1x512xf32>
    %231 = arith.maximumf %230, %221 : vector<1x512xf32>
    %232 = arith.sitofp %c3_i32 : i32 to f32
    %233 = vector.broadcast %232 : f32 to vector<1x512xf32>
    %234 = arith.minimumf %233, %231 : vector<1x512xf32>
    %235 = arith.fptosi %234 : vector<1x512xf32> to vector<1x512xi32>
    %236 = arith.mulf %207, %223 : vector<1x512xf32>
    %237 = arith.andi %212, %228 : vector<1x512xi1>
    %238 = arith.extui %237 : vector<1x512xi1> to vector<1x512xi32>
    %239 = arith.sitofp %238 : vector<1x512xi32> to vector<1x512xf32>
    %240 = arith.mulf %236, %239 : vector<1x512xf32>
    %c4_i32 = arith.constant 4 : i32
    %241 = vector.broadcast %c4_i32 : i32 to vector<1x512xi32>
    %242 = arith.muli %219, %241 : vector<1x512xi32>
    %243 = arith.addi %242, %235 : vector<1x512xi32>
    %244 = vector.broadcast %243 : vector<1x512xi32> to vector<64x512xi32>
    %245 = arith.cmpi eq, %202, %244 : vector<64x512xi32>
    %cst_86 = arith.constant 0.000000e+00 : f32
    %246 = vector.shape_cast %240 : vector<1x512xf32> to vector<1x512xf32>
    %247 = vector.broadcast %246 : vector<1x512xf32> to vector<64x512xf32>
    %248 = vector.broadcast %cst_86 : f32 to vector<64x512xf32>
    %249 = arith.select %245, %247, %248 : vector<64x512xi1>, vector<64x512xf32>
    %250 = arith.addf %203, %249 : vector<64x512xf32>
    %cst_87 = arith.constant 1.000000e+00 : f32
    %251 = vector.broadcast %cst_87 : f32 to vector<1x512xf32>
    %252 = arith.addf %143, %251 : vector<1x512xf32>
    %cst_88 = arith.constant 0.000000e+00 : f32
    %253 = vector.broadcast %cst_88 : f32 to vector<1x512xf32>
    %254 = arith.cmpf oge, %252, %253 : vector<1x512xf32>
    %cst_89 = arith.constant 4.000000e+00 : f32
    %255 = vector.broadcast %cst_89 : f32 to vector<1x512xf32>
    %256 = arith.cmpf olt, %252, %255 : vector<1x512xf32>
    %257 = arith.andi %254, %256 : vector<1x512xi1>
    %c0_i32_90 = arith.constant 0 : i32
    %c3_i32_91 = arith.constant 3 : i32
    %258 = arith.sitofp %c0_i32_90 : i32 to f32
    %259 = vector.broadcast %258 : f32 to vector<1x512xf32>
    %260 = arith.maximumf %259, %252 : vector<1x512xf32>
    %261 = arith.sitofp %c3_i32_91 : i32 to f32
    %262 = vector.broadcast %261 : f32 to vector<1x512xf32>
    %263 = arith.minimumf %262, %260 : vector<1x512xf32>
    %264 = arith.fptosi %263 : vector<1x512xf32> to vector<1x512xi32>
    %265 = arith.mulf %207, %146 : vector<1x512xf32>
    %266 = arith.andi %212, %257 : vector<1x512xi1>
    %267 = arith.extui %266 : vector<1x512xi1> to vector<1x512xi32>
    %268 = arith.sitofp %267 : vector<1x512xi32> to vector<1x512xf32>
    %269 = arith.mulf %265, %268 : vector<1x512xf32>
    %c4_i32_92 = arith.constant 4 : i32
    %270 = vector.broadcast %c4_i32_92 : i32 to vector<1x512xi32>
    %271 = arith.muli %219, %270 : vector<1x512xi32>
    %272 = arith.addi %271, %264 : vector<1x512xi32>
    %273 = vector.broadcast %272 : vector<1x512xi32> to vector<64x512xi32>
    %274 = arith.cmpi eq, %202, %273 : vector<64x512xi32>
    %cst_93 = arith.constant 0.000000e+00 : f32
    %275 = vector.shape_cast %269 : vector<1x512xf32> to vector<1x512xf32>
    %276 = vector.broadcast %275 : vector<1x512xf32> to vector<64x512xf32>
    %277 = vector.broadcast %cst_93 : f32 to vector<64x512xf32>
    %278 = arith.select %274, %276, %277 : vector<64x512xi1>, vector<64x512xf32>
    %279 = arith.addf %250, %278 : vector<64x512xf32>
    %cst_94 = arith.constant 1.000000e+00 : f32
    %280 = vector.broadcast %cst_94 : f32 to vector<1x512xf32>
    %281 = arith.addf %144, %280 : vector<1x512xf32>
    %cst_95 = arith.constant 0.000000e+00 : f32
    %282 = vector.broadcast %cst_95 : f32 to vector<1x512xf32>
    %283 = arith.cmpf oge, %281, %282 : vector<1x512xf32>
    %cst_96 = arith.constant 1.600000e+01 : f32
    %284 = vector.broadcast %cst_96 : f32 to vector<1x512xf32>
    %285 = arith.cmpf olt, %281, %284 : vector<1x512xf32>
    %286 = arith.andi %283, %285 : vector<1x512xi1>
    %c0_i32_97 = arith.constant 0 : i32
    %c15_i32_98 = arith.constant 15 : i32
    %287 = arith.sitofp %c0_i32_97 : i32 to f32
    %288 = vector.broadcast %287 : f32 to vector<1x512xf32>
    %289 = arith.maximumf %288, %281 : vector<1x512xf32>
    %290 = arith.sitofp %c15_i32_98 : i32 to f32
    %291 = vector.broadcast %290 : f32 to vector<1x512xf32>
    %292 = arith.minimumf %291, %289 : vector<1x512xf32>
    %293 = arith.fptosi %292 : vector<1x512xf32> to vector<1x512xi32>
    %cst_99 = arith.constant 0.000000e+00 : f32
    %294 = vector.broadcast %cst_99 : f32 to vector<1x512xf32>
    %295 = arith.addf %143, %294 : vector<1x512xf32>
    %cst_100 = arith.constant 1.000000e+00 : f32
    %296 = vector.broadcast %cst_100 : f32 to vector<1x512xf32>
    %297 = arith.subf %296, %146 : vector<1x512xf32>
    %cst_101 = arith.constant 0.000000e+00 : f32
    %298 = vector.broadcast %cst_101 : f32 to vector<1x512xf32>
    %299 = arith.cmpf oge, %295, %298 : vector<1x512xf32>
    %cst_102 = arith.constant 4.000000e+00 : f32
    %300 = vector.broadcast %cst_102 : f32 to vector<1x512xf32>
    %301 = arith.cmpf olt, %295, %300 : vector<1x512xf32>
    %302 = arith.andi %299, %301 : vector<1x512xi1>
    %c0_i32_103 = arith.constant 0 : i32
    %c3_i32_104 = arith.constant 3 : i32
    %303 = arith.sitofp %c0_i32_103 : i32 to f32
    %304 = vector.broadcast %303 : f32 to vector<1x512xf32>
    %305 = arith.maximumf %304, %295 : vector<1x512xf32>
    %306 = arith.sitofp %c3_i32_104 : i32 to f32
    %307 = vector.broadcast %306 : f32 to vector<1x512xf32>
    %308 = arith.minimumf %307, %305 : vector<1x512xf32>
    %309 = arith.fptosi %308 : vector<1x512xf32> to vector<1x512xi32>
    %310 = arith.mulf %147, %297 : vector<1x512xf32>
    %311 = arith.andi %286, %302 : vector<1x512xi1>
    %312 = arith.extui %311 : vector<1x512xi1> to vector<1x512xi32>
    %313 = arith.sitofp %312 : vector<1x512xi32> to vector<1x512xf32>
    %314 = arith.mulf %310, %313 : vector<1x512xf32>
    %c4_i32_105 = arith.constant 4 : i32
    %315 = vector.broadcast %c4_i32_105 : i32 to vector<1x512xi32>
    %316 = arith.muli %293, %315 : vector<1x512xi32>
    %317 = arith.addi %316, %309 : vector<1x512xi32>
    %318 = vector.broadcast %317 : vector<1x512xi32> to vector<64x512xi32>
    %319 = arith.cmpi eq, %202, %318 : vector<64x512xi32>
    %cst_106 = arith.constant 0.000000e+00 : f32
    %320 = vector.shape_cast %314 : vector<1x512xf32> to vector<1x512xf32>
    %321 = vector.broadcast %320 : vector<1x512xf32> to vector<64x512xf32>
    %322 = vector.broadcast %cst_106 : f32 to vector<64x512xf32>
    %323 = arith.select %319, %321, %322 : vector<64x512xi1>, vector<64x512xf32>
    %324 = arith.addf %279, %323 : vector<64x512xf32>
    %cst_107 = arith.constant 1.000000e+00 : f32
    %325 = vector.broadcast %cst_107 : f32 to vector<1x512xf32>
    %326 = arith.addf %143, %325 : vector<1x512xf32>
    %cst_108 = arith.constant 0.000000e+00 : f32
    %327 = vector.broadcast %cst_108 : f32 to vector<1x512xf32>
    %328 = arith.cmpf oge, %326, %327 : vector<1x512xf32>
    %cst_109 = arith.constant 4.000000e+00 : f32
    %329 = vector.broadcast %cst_109 : f32 to vector<1x512xf32>
    %330 = arith.cmpf olt, %326, %329 : vector<1x512xf32>
    %331 = arith.andi %328, %330 : vector<1x512xi1>
    %c0_i32_110 = arith.constant 0 : i32
    %c3_i32_111 = arith.constant 3 : i32
    %332 = arith.sitofp %c0_i32_110 : i32 to f32
    %333 = vector.broadcast %332 : f32 to vector<1x512xf32>
    %334 = arith.maximumf %333, %326 : vector<1x512xf32>
    %335 = arith.sitofp %c3_i32_111 : i32 to f32
    %336 = vector.broadcast %335 : f32 to vector<1x512xf32>
    %337 = arith.minimumf %336, %334 : vector<1x512xf32>
    %338 = arith.fptosi %337 : vector<1x512xf32> to vector<1x512xi32>
    %339 = arith.mulf %147, %146 : vector<1x512xf32>
    %340 = arith.andi %286, %331 : vector<1x512xi1>
    %341 = arith.extui %340 : vector<1x512xi1> to vector<1x512xi32>
    %342 = arith.sitofp %341 : vector<1x512xi32> to vector<1x512xf32>
    %343 = arith.mulf %339, %342 : vector<1x512xf32>
    %c4_i32_112 = arith.constant 4 : i32
    %344 = vector.broadcast %c4_i32_112 : i32 to vector<1x512xi32>
    %345 = arith.muli %293, %344 : vector<1x512xi32>
    %346 = arith.addi %345, %338 : vector<1x512xi32>
    %347 = vector.broadcast %346 : vector<1x512xi32> to vector<64x512xi32>
    %348 = arith.cmpi eq, %202, %347 : vector<64x512xi32>
    %cst_113 = arith.constant 0.000000e+00 : f32
    %349 = vector.shape_cast %343 : vector<1x512xf32> to vector<1x512xf32>
    %350 = vector.broadcast %349 : vector<1x512xf32> to vector<64x512xf32>
    %351 = vector.broadcast %cst_113 : f32 to vector<64x512xf32>
    %352 = arith.select %348, %350, %351 : vector<64x512xi1>, vector<64x512xf32>
    %353 = arith.addf %324, %352 : vector<64x512xf32>
    %354 = arith.mulf %201, %353 : vector<64x512xf32>
    %cst_114 = arith.constant dense<0.000000e+00> : vector<512xf32>
    %355 = vector.multi_reduction <add>, %354, %cst_114 [0] : vector<64x512xf32> to vector<512xf32>
    %356 = vector.shape_cast %355 : vector<512xf32> to vector<1x512xf32>
    %c0_115 = arith.constant 0 : index
    %c0_116 = arith.constant 0 : index
    %c0_117 = arith.constant 0 : index
    %357 = vector.load %arg20[%c0_115, %c0_116, %c0_117] : memref<1x1x512xf32, #tpu.memory_space<vmem>>, vector<1x1x512xf32>
    %358 = vector.shape_cast %357 : vector<1x1x512xf32> to vector<1x512xf32>
    %359 = vector.shape_cast %356 : vector<1x512xf32> to vector<1x1x512xf32>
    tpu.vector_store %arg20[%c0_115, %c0_116, %c0_117], %359 {strides = array<i32>} : memref<1x1x512xf32, #tpu.memory_space<vmem>>, vector<1x1x512xf32>,
    return
  }
  func.func @transform_0(%arg0: i32) -> (i32, i32, i32) {
    %c0_i32 = arith.constant 0 : i32
    %c0_i32_0 = arith.constant 0 : i32
    %c0_i32_1 = arith.constant 0 : i32
    return %arg0, %c0_i32, %c0_i32_0 : i32, i32, i32
  }
  func.func @transform_1(%arg0: i32) -> (i32, i32, i32) {
    %c0_i32 = arith.constant 0 : i32
    %c0_i32_0 = arith.constant 0 : i32
    %c0_i32_1 = arith.constant 0 : i32
    return %arg0, %c0_i32, %c0_i32_0 : i32, i32, i32
  }
  func.func @transform_2(%arg0: i32) -> (i32, i32, i32) {
    %c0_i32 = arith.constant 0 : i32
    %c0_i32_0 = arith.constant 0 : i32
    %c0_i32_1 = arith.constant 0 : i32
    return %arg0, %c0_i32, %c0_i32_0 : i32, i32, i32
  }
  func.func @transform_3(%arg0: i32) -> (i32, i32, i32) {
    %c0_i32 = arith.constant 0 : i32
    %c0_i32_0 = arith.constant 0 : i32
    %c0_i32_1 = arith.constant 0 : i32
    return %arg0, %c0_i32, %c0_i32_0 : i32, i32, i32
  }
  func.func @transform_4(%arg0: i32) -> (i32, i32) {
    %c0_i32 = arith.constant 0 : i32
    %c0_i32_0 = arith.constant 0 : i32
    %c0_i32_1 = arith.constant 0 : i32
    return %c0_i32, %c0_i32_0 : i32, i32
  }
  func.func @transform_5(%arg0: i32) -> (i32, i32) {
    %c0_i32 = arith.constant 0 : i32
    %c0_i32_0 = arith.constant 0 : i32
    %c0_i32_1 = arith.constant 0 : i32
    return %c0_i32, %c0_i32_0 : i32, i32
  }
  func.func @transform_6(%arg0: i32) -> (i32, i32) {
    %c0_i32 = arith.constant 0 : i32
    %c0_i32_0 = arith.constant 0 : i32
    %c0_i32_1 = arith.constant 0 : i32
    return %c0_i32, %c0_i32_0 : i32, i32
  }
  func.func @transform_7(%arg0: i32) -> (i32, i32) {
    %c0_i32 = arith.constant 0 : i32
    %c0_i32_0 = arith.constant 0 : i32
    %c0_i32_1 = arith.constant 0 : i32
    return %c0_i32, %c0_i32_0 : i32, i32
  }
  func.func @transform_8(%arg0: i32) -> (i32, i32) {
    %c0_i32 = arith.constant 0 : i32
    %c0_i32_0 = arith.constant 0 : i32
    %c0_i32_1 = arith.constant 0 : i32
    return %c0_i32, %c0_i32_0 : i32, i32
  }
  func.func @transform_9(%arg0: i32) -> (i32, i32) {
    %c0_i32 = arith.constant 0 : i32
    %c0_i32_0 = arith.constant 0 : i32
    %c0_i32_1 = arith.constant 0 : i32
    return %c0_i32, %c0_i32_0 : i32, i32
  }
  func.func @transform_10(%arg0: i32) -> (i32, i32) {
    %c0_i32 = arith.constant 0 : i32
    %c0_i32_0 = arith.constant 0 : i32
    %c0_i32_1 = arith.constant 0 : i32
    return %c0_i32, %c0_i32_0 : i32, i32
  }
  func.func @transform_11(%arg0: i32) -> (i32, i32) {
    %c0_i32 = arith.constant 0 : i32
    %c0_i32_0 = arith.constant 0 : i32
    %c0_i32_1 = arith.constant 0 : i32
    return %c0_i32, %c0_i32_0 : i32, i32
  }
  func.func @transform_12(%arg0: i32) -> (i32, i32) {
    %c0_i32 = arith.constant 0 : i32
    %c0_i32_0 = arith.constant 0 : i32
    %c0_i32_1 = arith.constant 0 : i32
    return %c0_i32, %c0_i32_0 : i32, i32
  }
  func.func @transform_13(%arg0: i32) -> (i32, i32) {
    %c0_i32 = arith.constant 0 : i32
    %c0_i32_0 = arith.constant 0 : i32
    %c0_i32_1 = arith.constant 0 : i32
    return %c0_i32, %c0_i32_0 : i32, i32
  }
  func.func @transform_14(%arg0: i32) -> (i32, i32) {
    %c0_i32 = arith.constant 0 : i32
    %c0_i32_0 = arith.constant 0 : i32
    %c0_i32_1 = arith.constant 0 : i32
    return %c0_i32, %c0_i32_0 : i32, i32
  }
  func.func @transform_15(%arg0: i32) -> (i32, i32) {
    %c0_i32 = arith.constant 0 : i32
    %c0_i32_0 = arith.constant 0 : i32
    %c0_i32_1 = arith.constant 0 : i32
    return %c0_i32, %c0_i32_0 : i32, i32
  }
  func.func @transform_16(%arg0: i32) -> (i32, i32) {
    %c0_i32 = arith.constant 0 : i32
    %c0_i32_0 = arith.constant 0 : i32
    %c0_i32_1 = arith.constant 0 : i32
    return %c0_i32, %c0_i32_0 : i32, i32
  }
  func.func @transform_17(%arg0: i32) -> (i32, i32, i32) {
    %c0_i32 = arith.constant 0 : i32
    %c0_i32_0 = arith.constant 0 : i32
    %c0_i32_1 = arith.constant 0 : i32
    return %arg0, %c0_i32, %c0_i32_0 : i32, i32, i32
  }
  func.func @transform_18(%arg0: i32) -> (i32, i32, i32) {
    %c0_i32 = arith.constant 0 : i32
    %c0_i32_0 = arith.constant 0 : i32
    %c0_i32_1 = arith.constant 0 : i32
    return %arg0, %c0_i32, %c0_i32_0 : i32, i32, i32
  }
  func.func @transform_19(%arg0: i32) -> (i32, i32, i32) {
    %c0_i32 = arith.constant 0 : i32
    %c0_i32_0 = arith.constant 0 : i32
    %c0_i32_1 = arith.constant 0 : i32
    return %arg0, %c0_i32, %c0_i32_0 : i32, i32, i32
  }
}

</mosaic_0001>

<bundles_post_ra>
// kernel: cafi_forward.1
= control target key start
LH: loop header
LB: loop body
LE: loop exit
PB: predicated region body
PF: predicated region fallthrough
CT: control target
= control target key end

     0   :  { %s10529_s0 = inlined_call_operand.vmem [shape: f32[2,3,512], index: 0, kind: input, shape index: {}]   ;;  %s10530_s1 = inlined_call_operand.vmem [shape: f32[2,512,3], index: 1, kind: input, shape index: {}]   ;;  %s10531_s2 = inlined_call_operand.vmem [shape: f32[2,2,512], index: 2, kind: input, shape index: {}]   ;;  %s10532_s3 = inlined_call_operand.vmem [shape: f32[2,64,8], index: 3, kind: input, shape index: {}]   ;;  %s10533_s4 = inlined_call_operand.vmem [shape: f32[3,128], index: 4, kind: input, shape index: {}]   ;;  %s10534_s5 = inlined_call_operand.vmem [shape: f32[256,3], index: 5, kind: input, shape index: {}]   ;;  %s10535_s6 = inlined_call_operand.vmem [shape: f32[256,1], index: 6, kind: input, shape index: {}]   ;;  %s10536_s7 = inlined_call_operand.vmem [shape: f32[128,3], index: 7, kind: input, shape index: {}]   ;;  %s10537_s8 = inlined_call_operand.vmem [shape: f32[128,3], index: 8, kind: input, shape index: {}]   ;;  %s10538_s9 = inlined_call_operand.vmem [shape: bf16[192,256], index: 9, kind: input, shape index: {}]   ;;  %s10539_s10 = inlined_call_operand.vmem [shape: f32[192,1], index: 10, kind: input, shape index: {}]   ;;  %s10540_s11 = inlined_call_operand.vmem [shape: bf16[3,64], index: 11, kind: input, shape index: {}]   ;;  %s10541_s12 = inlined_call_operand.vmem [shape: f32[3,1], index: 12, kind: input, shape index: {}]   ;;  %s10542_s13 = inlined_call_operand.vmem [shape: bf16[64,128], index: 13, kind: input, shape index: {}]   ;;  %s10543_s14 = inlined_call_operand.vmem [shape: f32[64,1], index: 14, kind: input, shape index: {}]   ;;  %s10544_s15 = inlined_call_operand.vmem [shape: bf16[3,128], index: 15, kind: input, shape index: {}]   ;;  %s10545_s16 = inlined_call_operand.vmem [shape: f32[3,1], index: 16, kind: input, shape index: {}]   ;;  %s10546_s17 = inlined_call_operand.vmem [shape: f32[2,3,3], index: 17, kind: output, shape index: {0}]   ;;  %s10547_s18 = inlined_call_operand.vmem [shape: f32[2,3,512], index: 18, kind: output, shape index: {1}]   ;;  %s10548_s19 = inlined_call_operand.vmem [shape: f32[2,1,512], index: 19, kind: output, shape index: {2}]  }
   0x1   :  { %10627 = sst [smem:[#allocation136_spill]] %s10529_s0  ;;  %s6288_s0 = smov 0  }
   0x2   :  { %10628 = sst [smem:[#allocation137_spill]] %s10530_s1 }
   0x3   :  { %10629 = sst [smem:[#allocation138_spill]] %s10531_s2 }
   0x4   :  { %10630 = sst [smem:[#allocation139_spill]] %s10532_s3 }
   0x5 LB: > { %s5727_s30 = sadd.s32 4294967295, %s6182_s0   ;;  %p5731_p0 = scmp.ge.s32.totalorder %s6182_s0, 1  ;;  %s6182_s0 = sphi %s6288_s0, %s30_s0  }
   0x6   : > { %p572_p1 = scmp.lt.s32.totalorder %s6182_s0, 3 }
   0x8   : > { %p573_p2 = pnand %p5731_p0, %p572_p1 }
   0xa   : > { %576 = sbr.rel (%p573_p2) target bundleno = 2371 (0x943), region = 88 }
   0xf   : > { %p651_p3 = scmp.lt.s32.totalorder %s5727_s30, 1  ;;  %v10549_v0 = vmov 0   ;;  %s10631_s22 = sld [smem:[#allocation137_spill]]  ;;  %vm3604_vm0 = vcmask 523264   ;;  %vm3658_vm1 = vcmask 18432   ;;  %vm4406_vm8 = vcmask 1043456  }
  0x10   : > { %6051 = vset.pattern.permute.xlu2 %v10549_v0  ;;  %6050 = vset.pattern.permute.xlu1 %v10549_v0  ;;  %s11005_s26 = sld [smem:[#allocation136_spill]] }
  0x11   : > { %6049 = vset.pattern.permute.xlu0 %v10549_v0  ;;  %s11106_s30 = smov (!%p651_p3, %s5727_s30), 1  ;;  %s11038_s25 = sld [smem:[#allocation139_spill]] }
  0x12   : > { %s5920_s20 = sshll.u32 %s11106_s30, 9  ;;  %s5919_s24 = sshll.u32 %s11106_s30, 4 }
  0x15   : > { %s6305_s2 = scalar_lea.vmem %s10631_s22, %s5920_s20  ;;  %s5921_s20 = sshll.u32 %s11106_s30, 3 }
  0x16   : > { %v6308_v1 = vld [vmem:[%s6305_s2 + $0x20] sm:$0xff]  ;;  %v6311_v2 = vld [vmem:[%s6305_s2 + $0x10] sm:$0xff]  ;;  %v6320_v4 = vld [vmem:[%s6305_s2 + $0x28] sm:$0xff]  ;;  %s10921_s22 = sld [smem:[#allocation138_spill]]  ;;  %s8931_s27 = scalar_lea.vmem %s11005_s26, %s5919_s24 }
  0x17   : > { %v6314_v3 = vld [vmem:[%s6305_s2] sm:$0xff]  ;;  %783 = vperm.xlu2 %6051, %v6308_v1   ;;  %773 = vperm.xlu1 %6050, %v6311_v2   ;;  %v6323_v5 = vld [vmem:[%s6305_s2 + $0x18] sm:$0xff]  ;;  %v6326_v6 = vld [vmem:[%s6305_s2 + $0x8] sm:$0xff] }
  0x18   : > { %763 = vperm.xlu0 %6049, %v6314_v3   ;;  %10632 = vst [vmem:[#allocation2_spill] sm:$0xff] %v6326_v6  ;;  %v6332_v7 = vld [vmem:[%s6305_s2 + $0x40] sm:$0xff]  ;;  %v6335_v8 = vld [vmem:[%s6305_s2 + $0x38] sm:$0xff]  ;;  %v6338_v9 = vld [vmem:[%s6305_s2 + $0x30] sm:$0xff] }
  0x19   : > { %v6344_v10 = vld [vmem:[%s6305_s2 + $0x58] sm:$0xff]  ;;  %v6347_v11 = vld [vmem:[%s6305_s2 + $0x50] sm:$0xff]  ;;  %v6350_v12 = vld [vmem:[%s6305_s2 + $0x48] sm:$0xff] }
  0x1a   : > { %v6356_v13 = vld [vmem:[%s6305_s2 + $0x70] sm:$0xff]  ;;  %v6359_v14 = vld [vmem:[%s6305_s2 + $0x68] sm:$0xff]  ;;  %v6362_v15 = vld [vmem:[%s6305_s2 + $0x60] sm:$0xff] }
  0x1b   : > { %v6368_v16 = vld [vmem:[%s6305_s2 + $0x88] sm:$0xff]  ;;  %v6371_v17 = vld [vmem:[%s6305_s2 + $0x80] sm:$0xff]  ;;  %v6374_v18 = vld [vmem:[%s6305_s2 + $0x78] sm:$0xff] }
  0x1c   : > { %10633 = vst [vmem:[#allocation3_spill] sm:$0xff] %v6368_v16  ;;  %v6380_v19 = vld [vmem:[%s6305_s2 + $0xa0] sm:$0xff]  ;;  %v6383_v20 = vld [vmem:[%s6305_s2 + $0x98] sm:$0xff]  ;;  %v6386_v21 = vld [vmem:[%s6305_s2 + $0x90] sm:$0xff] }
  0x1d   : > { %10634 = vst [vmem:[#allocation4_spill] sm:$0xff] %v6386_v21  ;;  %v6392_v22 = vld [vmem:[%s6305_s2 + $0xb8] sm:$0xff]  ;;  %v6395_v23 = vld [vmem:[%s6305_s2 + $0xb0] sm:$0xff]  ;;  %v6398_v24 = vld [vmem:[%s6305_s2 + $0xa8] sm:$0xff] }
  0x1e   : > { %v6404_v25 = vld [vmem:[%s6305_s2 + $0xd0] sm:$0xff]  ;;  %v6407_v26 = vld [vmem:[%s6305_s2 + $0xc8] sm:$0xff]  ;;  %v6410_v27 = vld [vmem:[%s6305_s2 + $0xc0] sm:$0xff] }
  0x1f   : > { %788 = vperm.xlu2 %6051, %v6320_v4   ;;  %778 = vperm.xlu1 %6050, %v6323_v5   ;;  %v6416_v28 = vld [vmem:[%s6305_s2 + $0xe8] sm:$0xff]  ;;  %v6419_v29 = vld [vmem:[%s6305_s2 + $0xe0] sm:$0xff]  ;;  %v6422_v30 = vld [vmem:[%s6305_s2 + $0xd8] sm:$0xff] }
  0x20   : > { %768 = vperm.xlu0 %6049, %v6326_v6   ;;  %v6428_v31 = vld [vmem:[%s6305_s2 + $0x100] sm:$0xff]  ;;  %v6431_v32 = vld [vmem:[%s6305_s2 + $0xf8] sm:$0xff]  ;;  %v6434_v33 = vld [vmem:[%s6305_s2 + $0xf0] sm:$0xff] }
  0x21   : > { %10635 = vst [vmem:[#allocation5_spill] sm:$0xff] %v6428_v31  ;;  %v6440_v34 = vld [vmem:[%s6305_s2 + $0x118] sm:$0xff]  ;;  %v6443_v35 = vld [vmem:[%s6305_s2 + $0x110] sm:$0xff]  ;;  %v6446_v36 = vld [vmem:[%s6305_s2 + $0x108] sm:$0xff] }
  0x22   : > { %10636 = vst [vmem:[#allocation6_spill] sm:$0xff] %v6443_v35  ;;  %v6454_v38 = vld [vmem:[%s6305_s2 + $0x130] sm:$0xff]  ;;  %v6457_v39 = vld [vmem:[%s6305_s2 + $0x128] sm:$0xff]  ;;  %v6460_v40 = vld [vmem:[%s6305_s2 + $0x120] sm:$0xff] }
  0x23   : > { %10637 = vst [vmem:[#allocation7_spill] sm:$0xff] %v6446_v36  ;;  %v6468_v42 = vld [vmem:[%s6305_s2 + $0x148] sm:$0xff]  ;;  %v6471_v43 = vld [vmem:[%s6305_s2 + $0x140] sm:$0xff]  ;;  %v6474_v44 = vld [vmem:[%s6305_s2 + $0x138] sm:$0xff] }
  0x24   : > { %v6482_v46 = vld [vmem:[%s6305_s2 + $0x160] sm:$0xff]  ;;  %v6485_v47 = vld [vmem:[%s6305_s2 + $0x158] sm:$0xff]  ;;  %v6488_v48 = vld [vmem:[%s6305_s2 + $0x150] sm:$0xff] }
  0x25   : > { %v6500_v52 = vld [vmem:[%s6305_s2 + $0x178] sm:$0xff]  ;;  %v6503_v53 = vld [vmem:[%s6305_s2 + $0x170] sm:$0xff]  ;;  %v6506_v54 = vld [vmem:[%s6305_s2 + $0x168] sm:$0xff] }
  0x26   : > { %v6518_v58 = vld [vmem:[%s6305_s2 + $0x190] sm:$0xff]  ;;  %v6521_v59 = vld [vmem:[%s6305_s2 + $0x188] sm:$0xff]  ;;  %v6524_v60 = vld [vmem:[%s6305_s2 + $0x180] sm:$0xff] }
  0x27   : > { %803 = vperm.xlu2 %6051, %v6332_v7   ;;  %798 = vperm.xlu1 %6050, %v6335_v8   ;;  %10647 = vst [vmem:[#allocation17_spill] sm:$0xff] %v6518_v58  ;;  %v6536_v0 = vld [vmem:[%s6305_s2 + $0x1a8] sm:$0xff] }
  0x28   : > { %793 = vperm.xlu0 %6049, %v6338_v9   ;;  %10648 = vst [vmem:[#allocation18_spill] sm:$0xff] %v6521_v59 }
  0x29   : > { %10649 = vst [vmem:[#allocation19_spill] sm:$0xff] %v6524_v60 }
  0x2f   : > { %818 = vperm.xlu2 %6051, %v6344_v10   ;;  %813 = vperm.xlu1 %6050, %v6347_v11  }
  0x30   : > { %808 = vperm.xlu0 %6049, %v6350_v12  }
  0x37   : > { %833 = vperm.xlu2 %6051, %v6356_v13   ;;  %828 = vperm.xlu1 %6050, %v6359_v14  }
  0x38   : > { %823 = vperm.xlu0 %6049, %v6362_v15  }
  0x3f   : > { %848 = vperm.xlu2 %6051, %v6368_v16   ;;  %843 = vperm.xlu1 %6050, %v6371_v17  }
  0x40   : > { %838 = vperm.xlu0 %6049, %v6374_v18  }
  0x47   : > { %863 = vperm.xlu2 %6051, %v6380_v19   ;;  %858 = vperm.xlu1 %6050, %v6383_v20  }
  0x48   : > { %853 = vperm.xlu0 %6049, %v6386_v21  }
  0x4f   : > { %878 = vperm.xlu2 %6051, %v6392_v22   ;;  %873 = vperm.xlu1 %6050, %v6395_v23  }
  0x50   : > { %868 = vperm.xlu0 %6049, %v6398_v24  }
  0x57   : > { %893 = vperm.xlu2 %6051, %v6404_v25   ;;  %888 = vperm.xlu1 %6050, %v6407_v26  }
  0x58   : > { %883 = vperm.xlu0 %6049, %v6410_v27  }
  0x5f   : > { %908 = vperm.xlu2 %6051, %v6416_v28   ;;  %903 = vperm.xlu1 %6050, %v6419_v29  }
  0x60   : > { %898 = vperm.xlu0 %6049, %v6422_v30  }
  0x67   : > { %923 = vperm.xlu2 %6051, %v6428_v31   ;;  %918 = vperm.xlu1 %6050, %v6431_v32  }
  0x68   : > { %913 = vperm.xlu0 %6049, %v6434_v33  }
  0x6f   : > { %938 = vperm.xlu2 %6051, %v6440_v34   ;;  %933 = vperm.xlu1 %6050, %v6443_v35  }
  0x70   : > { %928 = vperm.xlu0 %6049, %v6446_v36  }
  0x71   : > { %v6451_v37 = vpop.permute.xlu2 %783 }
  0x72   : > { %10638 = vst [vmem:[#allocation8_spill] sm:$0xff] %v6451_v37 }
  0x77   : > { %953 = vperm.xlu2 %6051, %v6454_v38   ;;  %948 = vperm.xlu1 %6050, %v6457_v39  }
  0x78   : > { %943 = vperm.xlu0 %6049, %v6460_v40  }
  0x79   : > { %v6465_v41 = vpop.permute.xlu2 %788 }
  0x7a   : > { %10639 = vst [vmem:[#allocation9_spill] sm:$0xff] %v6465_v41  ;;  %v6578_v41 = vld [vmem:[%s6305_s2 + $0x1c8] sm:$0xff] }
  0x7f   : > { %968 = vperm.xlu2 %6051, %v6468_v42   ;;  %963 = vperm.xlu1 %6050, %v6471_v43  }
  0x80   : > { %958 = vperm.xlu0 %6049, %v6474_v44  }
  0x81   : > { %v6479_v45 = vpop.permute.xlu2 %803 }
  0x82   : > { %10640 = vst [vmem:[#allocation10_spill] sm:$0xff] %v6479_v45  ;;  %v6575_v45 = vld [vmem:[%s6305_s2 + $0x1d0] sm:$0xff] }
  0x83   : > { %10662 = vst [vmem:[#allocation32_spill] sm:$0xff] %v6575_v45 }
  0x87   : > { %983 = vperm.xlu2 %6051, %v6482_v46   ;;  %978 = vperm.xlu1 %6050, %v6485_v47  }
  0x88   : > { %973 = vperm.xlu0 %6049, %v6488_v48  }
  0x89   : > { %v6493_v49 = vpop.permute.xlu2 %818  ;;  %v6495_v50 = vpop.permute.xlu1 %773 }
  0x8a   : > { %10641 = vst [vmem:[#allocation11_spill] sm:$0xff] %v6493_v49  ;;  %v6497_v51 = vpop.permute.xlu0 %763  ;;  %v6572_v49 = vld [vmem:[%s6305_s2 + $0x1d8] sm:$0xff] }
  0x8b   : > { %10642 = vst [vmem:[#allocation12_spill] sm:$0xff] %v6495_v50  ;;  %v6560_v50 = vld [vmem:[%s6305_s2 + $0x1b0] sm:$0xff] }
  0x8c   : > { %10643 = vst [vmem:[#allocation13_spill] sm:$0xff] %v6497_v51  ;;  %v6557_v51 = vld [vmem:[%s6305_s2 + $0x1b8] sm:$0xff] }
  0x8d   : > { %10657 = vst [vmem:[#allocation27_spill] sm:$0xff] %v6557_v51 }
  0x8e   : > { %10661 = vst [vmem:[#allocation31_spill] sm:$0xff] %v6572_v49 }
  0x8f   : > { %998 = vperm.xlu2 %6051, %v6500_v52   ;;  %993 = vperm.xlu1 %6050, %v6503_v53  }
  0x90   : > { %988 = vperm.xlu0 %6049, %v6506_v54  }
  0x91   : > { %v6511_v55 = vpop.permute.xlu2 %833  ;;  %v6513_v56 = vpop.permute.xlu1 %778 }
  0x92   : > { %10644 = vst [vmem:[#allocation14_spill] sm:$0xff] %v6511_v55  ;;  %v6515_v57 = vpop.permute.xlu0 %768  ;;  %v6554_v55 = vld [vmem:[%s6305_s2 + $0x1c0] sm:$0xff] }
  0x93   : > { %10645 = vst [vmem:[#allocation15_spill] sm:$0xff] %v6513_v56  ;;  %v6542_v56 = vld [vmem:[%s6305_s2 + $0x198] sm:$0xff] }
  0x94   : > { %10646 = vst [vmem:[#allocation16_spill] sm:$0xff] %v6515_v57  ;;  %v6539_v57 = vld [vmem:[%s6305_s2 + $0x1a0] sm:$0xff] }
  0x95   : > { %10656 = vst [vmem:[#allocation26_spill] sm:$0xff] %v6554_v55 }
  0x97   : > { %1013 = vperm.xlu2 %6051, %v6518_v58   ;;  %1008 = vperm.xlu1 %6050, %v6521_v59  }
  0x98   : > { %1003 = vperm.xlu0 %6049, %v6524_v60  }
  0x99   : > { %v6529_v61 = vpop.permute.xlu2 %848  ;;  %v6531_v62 = vpop.permute.xlu1 %798 }
  0x9a   : > { %10650 = vst [vmem:[#allocation20_spill] sm:$0xff] %v6529_v61  ;;  %v6533_v63 = vpop.permute.xlu0 %793 }
  0x9b   : > { %10651 = vst [vmem:[#allocation21_spill] sm:$0xff] %v6531_v62 }
  0x9c   : > { %10652 = vst [vmem:[#allocation22_spill] sm:$0xff] %v6533_v63 }
  0x9f   : > { %1028 = vperm.xlu2 %6051, %v6536_v0   ;;  %1023 = vperm.xlu1 %6050, %v6539_v57  }
  0xa0   : > { %1018 = vperm.xlu0 %6049, %v6542_v56  }
  0xa1   : > { %v6547_v61 = vpop.permute.xlu2 %863  ;;  %v6549_v62 = vpop.permute.xlu1 %813 }
  0xa2   : > { %10653 = vst [vmem:[#allocation23_spill] sm:$0xff] %v6547_v61  ;;  %v6551_v63 = vpop.permute.xlu0 %808 }
  0xa3   : > { %10654 = vst [vmem:[#allocation24_spill] sm:$0xff] %v6549_v62 }
  0xa4   : > { %10655 = vst [vmem:[#allocation25_spill] sm:$0xff] %v6551_v63 }
  0xa7   : > { %1043 = vperm.xlu2 %6051, %v6554_v55   ;;  %1038 = vperm.xlu1 %6050, %v6557_v51   ;;  %v6593_v55 = vld [vmem:[%s6305_s2 + $0x1e8] sm:$0xff]  ;;  %v6596_v51 = vld [vmem:[%s6305_s2 + $0x1e0] sm:$0xff] }
  0xa8   : > { %1033 = vperm.xlu0 %6049, %v6560_v50  }
  0xa9   : > { %v6565_v61 = vpop.permute.xlu2 %878  ;;  %v6567_v62 = vpop.permute.xlu1 %828 }
  0xaa   : > { %10658 = vst [vmem:[#allocation28_spill] sm:$0xff] %v6565_v61  ;;  %v6569_v63 = vpop.permute.xlu0 %823 }
  0xab   : > { %10659 = vst [vmem:[#allocation29_spill] sm:$0xff] %v6567_v62 }
  0xac   : > { %10660 = vst [vmem:[#allocation30_spill] sm:$0xff] %v6569_v63  ;;  %v6590_v63 = vld [vmem:[%s6305_s2 + $0x1f0] sm:$0xff] }
  0xad   : > { %10666 = vst [vmem:[#allocation36_spill] sm:$0xff] %v6590_v63 }
  0xaf   : > { %1058 = vperm.xlu2 %6051, %v6572_v49   ;;  %1053 = vperm.xlu1 %6050, %v6575_v45  }
  0xb0   : > { %1048 = vperm.xlu0 %6049, %v6578_v41  }
  0xb1   : > { %v6583_v37 = vpop.permute.xlu2 %893  ;;  %v6585_v61 = vpop.permute.xlu1 %843 }
  0xb2   : > { %10663 = vst [vmem:[#allocation33_spill] sm:$0xff] %v6583_v37  ;;  %v6587_v62 = vpop.permute.xlu0 %838 }
  0xb3   : > { %10664 = vst [vmem:[#allocation34_spill] sm:$0xff] %v6585_v61  ;;  %v6608_v61 = vld [vmem:[%s6305_s2 + $0x1f8] sm:$0xff] }
  0xb4   : > { %10665 = vst [vmem:[#allocation35_spill] sm:$0xff] %v6587_v62  ;;  %v10564_v62 = vmov 1  }
  0xb5   : > { %10670 = vst [vmem:[#allocation40_spill] sm:$0xff] %v6608_v61 }
  0xb7   : > { %1073 = vperm.xlu2 %6051, %v6590_v63   ;;  %1068 = vperm.xlu1 %6050, %v6593_v55  }
  0xb8   : > { %1063 = vperm.xlu0 %6049, %v6596_v51  }
  0xb9   : > { %v6601_v49 = vpop.permute.xlu2 %908  ;;  %v6603_v45 = vpop.permute.xlu1 %858 }
  0xba   : > { %10667 = vst [vmem:[#allocation37_spill] sm:$0xff] %v6601_v49  ;;  %v6605_v37 = vpop.permute.xlu0 %853 }
  0xbb   : > { %10668 = vst [vmem:[#allocation38_spill] sm:$0xff] %v6603_v45 }
  0xbc   : > { %10669 = vst [vmem:[#allocation39_spill] sm:$0xff] %v6605_v37 }
  0xbf   : > { %6053 = vset.pattern.permute.xlu2 %v10564_v62  ;;  %6052 = vset.pattern.permute.xlu1 %v10564_v62 }
  0xc0   : > { %1078 = vperm.xlu0 %6049, %v6608_v61   ;;  %1151 = vperm.xlu2 %6053, %v6326_v6  }
  0xc1   : > { %1147 = vperm.xlu1 %6052, %v6314_v3   ;;  %v6615_v63 = vpop.permute.xlu2 %923  ;;  %v6617_v49 = vpop.permute.xlu1 %873 }
  0xc2   : > { %10671 = vst [vmem:[#allocation41_spill] sm:$0xff] %v6615_v63  ;;  %v6619_v45 = vpop.permute.xlu0 %868 }
  0xc3   : > { %10672 = vst [vmem:[#allocation42_spill] sm:$0xff] %v6617_v49 }
  0xc4   : > { %10673 = vst [vmem:[#allocation43_spill] sm:$0xff] %v6619_v45 }
  0xc8   : > { %6054 = vset.pattern.permute.xlu0 %v10564_v62  ;;  %1163 = vperm.xlu2 %6053, %v6308_v1  }
  0xc9   : > { %1159 = vperm.xlu1 %6052, %v6323_v5   ;;  %1155 = vperm.xlu0 %6054, %v6311_v2   ;;  %v6625_v37 = vpop.permute.xlu2 %938  ;;  %v6627_v61 = vpop.permute.xlu1 %888 }
  0xca   : > { %10674 = vst [vmem:[#allocation44_spill] sm:$0xff] %v6625_v37  ;;  %v6629_v6 = vpop.permute.xlu0 %883 }
  0xcb   : > { %10675 = vst [vmem:[#allocation45_spill] sm:$0xff] %v6627_v61 }
  0xcc   : > { %10676 = vst [vmem:[#allocation46_spill] sm:$0xff] %v6629_v6 }
  0xd0   : > { %1171 = vperm.xlu2 %6053, %v6338_v9  }
  0xd1   : > { %1167 = vperm.xlu1 %6052, %v6320_v4   ;;  %1175 = vperm.xlu0 %6054, %v6335_v8   ;;  %v6634_v63 = vpop.permute.xlu2 %953  ;;  %v6636_v62 = vpop.permute.xlu1 %903 }
  0xd2   : > { %10677 = vst [vmem:[#allocation47_spill] sm:$0xff] %v6634_v63  ;;  %v6638_v45 = vpop.permute.xlu0 %898 }
  0xd3   : > { %10678 = vst [vmem:[#allocation48_spill] sm:$0xff] %v6636_v62 }
  0xd4   : > { %10679 = vst [vmem:[#allocation49_spill] sm:$0xff] %v6638_v45 }
  0xd8   : > { %1183 = vperm.xlu2 %6053, %v6350_v12  }
  0xd9   : > { %1179 = vperm.xlu1 %6052, %v6332_v7   ;;  %1187 = vperm.xlu0 %6054, %v6347_v11   ;;  %v6643_v37 = vpop.permute.xlu2 %968  ;;  %v6645_v49 = vpop.permute.xlu1 %918 }
  0xda   : > { %10680 = vst [vmem:[#allocation50_spill] sm:$0xff] %v6643_v37  ;;  %v6647_v6 = vpop.permute.xlu0 %913 }
  0xdb   : > { %10681 = vst [vmem:[#allocation51_spill] sm:$0xff] %v6647_v6 }
  0xe0   : > { %1195 = vperm.xlu2 %6053, %v6362_v15  }
  0xe1   : > { %1191 = vperm.xlu1 %6052, %v6344_v10   ;;  %1199 = vperm.xlu0 %6054, %v6359_v14   ;;  %v6652_v63 = vpop.permute.xlu2 %983  ;;  %v6654_v45 = vpop.permute.xlu1 %933 }
  0xe2   : > { %10682 = vst [vmem:[#allocation52_spill] sm:$0xff] %v6652_v63  ;;  %v6656_v62 = vpop.permute.xlu0 %928 }
  0xe3   : > { %10683 = vst [vmem:[#allocation53_spill] sm:$0xff] %v6654_v45 }
  0xe4   : > { %10684 = vst [vmem:[#allocation54_spill] sm:$0xff] %v6656_v62 }
  0xe8   : > { %1207 = vperm.xlu2 %6053, %v6374_v18  }
  0xe9   : > { %1203 = vperm.xlu1 %6052, %v6356_v13   ;;  %1211 = vperm.xlu0 %6054, %v6371_v17   ;;  %v6661_v37 = vpop.permute.xlu2 %998  ;;  %v6663_v61 = vpop.permute.xlu1 %948 }
  0xea   : > { %10685 = vst [vmem:[#allocation55_spill] sm:$0xff] %v6661_v37  ;;  %v6665_v6 = vpop.permute.xlu0 %943  ;;  %v6835_v37 = vld [vmem:[%s10534_s5 + $0xd0] sm:$0xff] }
  0xeb   : > { %10686 = vst [vmem:[#allocation56_spill] sm:$0xff] %v6663_v61 }
  0xec   : > { %10687 = vst [vmem:[#allocation57_spill] sm:$0xff] %v6665_v6 }
  0xed   : > { %10745 = vst [vmem:[#allocation101_spill] sm:$0xff] %v6835_v37 }
  0xf0   : > { %1219 = vperm.xlu2 %6053, %v6386_v21  }
  0xf1   : > { %1215 = vperm.xlu1 %6052, %v6368_v16   ;;  %1223 = vperm.xlu0 %6054, %v6383_v20   ;;  %v6670_v45 = vpop.permute.xlu2 %1013  ;;  %v6672_v62 = vpop.permute.xlu1 %963 }
  0xf2   : > { %10688 = vst [vmem:[#allocation58_spill] sm:$0xff] %v6670_v45  ;;  %v6674_v63 = vpop.permute.xlu0 %958 }
  0xf3   : > { %10689 = vst [vmem:[#allocation59_spill] sm:$0xff] %v6672_v62 }
  0xf4   : > { %10690 = vst [vmem:[#allocation60_spill] sm:$0xff] %v6674_v63 }
  0xf8   : > { %1231 = vperm.xlu2 %6053, %v6398_v24  }
  0xf9   : > { %1227 = vperm.xlu1 %6052, %v6380_v19   ;;  %1235 = vperm.xlu0 %6054, %v6395_v23   ;;  %v6679_v17 = vpop.permute.xlu2 %1028  ;;  %v6681_v6 = vpop.permute.xlu1 %978 }
  0xfa   : > { %10691 = vst [vmem:[#allocation61_spill] sm:$0xff] %v6679_v17  ;;  %v6683_v61 = vpop.permute.xlu0 %973 }
  0xfb   : > { %10692 = vst [vmem:[#allocation62_spill] sm:$0xff] %v6681_v6 }
  0xfc   : > { %10693 = vst [vmem:[#allocation63_spill] sm:$0xff] %v6683_v61 }
 0x100   : > { %1243 = vperm.xlu2 %6053, %v6410_v27  }
 0x101   : > { %1239 = vperm.xlu1 %6052, %v6392_v22   ;;  %1247 = vperm.xlu0 %6054, %v6407_v26   ;;  %v6688_v45 = vpop.permute.xlu2 %1043  ;;  %v6690_v63 = vpop.permute.xlu1 %993 }
 0x102   : > { %10694 = vst [vmem:[#allocation64_spill] sm:$0xff] %v6688_v45  ;;  %v6692_v62 = vpop.permute.xlu0 %988 }
 0x103   : > { %10695 = vst [vmem:[#allocation65_spill] sm:$0xff] %v6690_v63 }
 0x104   : > { %10696 = vst [vmem:[#allocation66_spill] sm:$0xff] %v6692_v62 }
 0x108   : > { %1255 = vperm.xlu2 %6053, %v6422_v30  }
 0x109   : > { %1251 = vperm.xlu1 %6052, %v6404_v25   ;;  %1259 = vperm.xlu0 %6054, %v6419_v29   ;;  %v6697_v17 = vpop.permute.xlu2 %1058  ;;  %v6699_v61 = vpop.permute.xlu1 %1008 }
 0x10a   : > { %10697 = vst [vmem:[#allocation67_spill] sm:$0xff] %v6697_v17  ;;  %v6701_v16 = vpop.permute.xlu0 %1003 }
 0x10b   : > { %10698 = vst [vmem:[#allocation68_spill] sm:$0xff] %v6699_v61 }
 0x10c   : > { %10699 = vst [vmem:[#allocation69_spill] sm:$0xff] %v6701_v16 }
 0x110   : > { %1267 = vperm.xlu2 %6053, %v6434_v33  }
 0x111   : > { %1263 = vperm.xlu1 %6052, %v6416_v28   ;;  %1271 = vperm.xlu0 %6054, %v6431_v32   ;;  %v6706_v45 = vpop.permute.xlu2 %1073  ;;  %v6708_v21 = vpop.permute.xlu1 %1023 }
 0x112   : > { %10700 = vst [vmem:[#allocation70_spill] sm:$0xff] %v6706_v45  ;;  %v6710_v62 = vpop.permute.xlu0 %1018  ;;  %v10732_v45 = vld [vmem:[#allocation31_spill] sm:$0xff] }
 0x113   : > { %10701 = vst [vmem:[#allocation71_spill] sm:$0xff] %v6708_v21 }
 0x114   : > { %10702 = vst [vmem:[#allocation72_spill] sm:$0xff] %v6710_v62 }
 0x118   : > { %1279 = vperm.xlu2 %6053, %v6446_v36  }
 0x119   : > { %1275 = vperm.xlu1 %6052, %v6428_v31   ;;  %1283 = vperm.xlu0 %6054, %v6443_v35   ;;  %v6715_v61 = vpop.permute.xlu1 %1038 }
 0x11a   : > { %10703 = vst [vmem:[#allocation73_spill] sm:$0xff] %v6715_v61  ;;  %v6717_v16 = vpop.permute.xlu2 %1151  ;;  %v6719_v17 = vpop.permute.xlu0 %1033 }
 0x11b   : > { %10704 = vst [vmem:[#allocation74_spill] sm:$0xff] %v6719_v17 }
 0x120   : > { %1291 = vperm.xlu2 %6053, %v6460_v40  }
 0x121   : > { %1287 = vperm.xlu1 %6052, %v6440_v34   ;;  %1295 = vperm.xlu0 %6054, %v6457_v39   ;;  %v6724_v21 = vpop.permute.xlu1 %1053 }
 0x122   : > { %10705 = vst [vmem:[#allocation75_spill] sm:$0xff] %v6724_v21  ;;  %v6726_v62 = vpop.permute.xlu2 %1163  ;;  %v6728_v36 = vpop.permute.xlu0 %1048 }
 0x123   : > { %10706 = vst [vmem:[#allocation76_spill] sm:$0xff] %v6726_v62 }
 0x124   : > { %10707 = vst [vmem:[#allocation77_spill] sm:$0xff] %v6728_v36 }
 0x128   : > { %1303 = vperm.xlu2 %6053, %v6474_v44  }
 0x129   : > { %1299 = vperm.xlu1 %6052, %v6454_v38   ;;  %1307 = vperm.xlu0 %6054, %v6471_v43   ;;  %v6733_v61 = vpop.permute.xlu1 %1068 }
 0x12a   : > { %10708 = vst [vmem:[#allocation78_spill] sm:$0xff] %v6733_v61  ;;  %v6735_v17 = vpop.permute.xlu2 %1171  ;;  %v6737_v31 = vpop.permute.xlu0 %1063 }
 0x12b   : > { %10709 = vst [vmem:[#allocation79_spill] sm:$0xff] %v6735_v17 }
 0x12c   : > { %10710 = vst [vmem:[#allocation80_spill] sm:$0xff] %v6737_v31 }
 0x130   : > { %1315 = vperm.xlu2 %6053, %v6488_v48  }
 0x131   : > { %1311 = vperm.xlu1 %6052, %v6468_v42   ;;  %1319 = vperm.xlu0 %6054, %v6485_v47  }
 0x132   : > { %v6742_v21 = vpop.permute.xlu2 %1183  ;;  %v6744_v36 = vpop.permute.xlu0 %1078 }
 0x133   : > { %10711 = vst [vmem:[#allocation81_spill] sm:$0xff] %v6742_v21  ;;  %v6746_v35 = vpop.permute.xlu1 %1147 }
 0x134   : > { %10712 = vst [vmem:[#allocation82_spill] sm:$0xff] %v6744_v36 }
 0x135   : > { %10713 = vst [vmem:[#allocation83_spill] sm:$0xff] %v6746_v35 }
 0x138   : > { %1327 = vperm.xlu2 %6053, %v6506_v54  }
 0x139   : > { %1323 = vperm.xlu1 %6052, %v6482_v46   ;;  %1331 = vperm.xlu0 %6054, %v6503_v53  }
 0x13a   : > { %v6751_v61 = vpop.permute.xlu2 %1195 }
 0x13b   : > { %10714 = vst [vmem:[#allocation84_spill] sm:$0xff] %v6751_v61  ;;  %v6753_v31 = vpop.permute.xlu1 %1159  ;;  %v6755_v17 = vpop.permute.xlu0 %1155 }
 0x13c   : > { %10715 = vst [vmem:[#allocation85_spill] sm:$0xff] %v6753_v31 }
 0x13d   : > { %10716 = vst [vmem:[#allocation86_spill] sm:$0xff] %v6755_v17 }
 0x140   : > { %1339 = vperm.xlu2 %6053, %v6524_v60  }
 0x141   : > { %1335 = vperm.xlu1 %6052, %v6500_v52   ;;  %1343 = vperm.xlu0 %6054, %v6521_v59   ;;  %v10723_v59 = vld [vmem:[#allocation27_spill] sm:$0xff] }
 0x142   : > { %v6760_v36 = vpop.permute.xlu2 %1207 }
 0x143   : > { %10717 = vst [vmem:[#allocation87_spill] sm:$0xff] %v6760_v36  ;;  %v6762_v35 = vpop.permute.xlu1 %1167  ;;  %v6764_v21 = vpop.permute.xlu0 %1175 }
 0x144   : > { %10718 = vst [vmem:[#allocation88_spill] sm:$0xff] %v6762_v35 }
 0x145   : > { %10719 = vst [vmem:[#allocation89_spill] sm:$0xff] %v6764_v21 }
 0x148   : > { %1351 = vperm.xlu2 %6053, %v6542_v56  }
 0x149   : > { %1347 = vperm.xlu1 %6052, %v6518_v58   ;;  %1355 = vperm.xlu0 %6054, %v6539_v57   ;;  %v10727_v58 = vld [vmem:[#allocation26_spill] sm:$0xff] }
 0x14a   : > { %v6769_v31 = vpop.permute.xlu2 %1219 }
 0x14b   : > { %10720 = vst [vmem:[#allocation90_spill] sm:$0xff] %v6769_v31  ;;  %v6771_v17 = vpop.permute.xlu1 %1179  ;;  %v6773_v60 = vpop.permute.xlu0 %1187  ;;  %v10728_v31 = vld [vmem:[#allocation32_spill] sm:$0xff] }
 0x14c   : > { %10721 = vst [vmem:[#allocation91_spill] sm:$0xff] %v6771_v17 }
 0x14d   : > { %10722 = vst [vmem:[#allocation92_spill] sm:$0xff] %v6773_v60 }
 0x150   : > { %1363 = vperm.xlu2 %6053, %v6560_v50  }
 0x151   : > { %1359 = vperm.xlu1 %6052, %v6536_v0   ;;  %1367 = vperm.xlu0 %6054, %v10723_v59  }
 0x152   : > { %v6778_v35 = vpop.permute.xlu2 %1231 }
 0x153   : > { %10724 = vst [vmem:[#allocation27_spill] sm:$0xff] %v6778_v35  ;;  %v6780_v21 = vpop.permute.xlu1 %1191  ;;  %v6782_v61 = vpop.permute.xlu0 %1199 }
 0x154   : > { %10725 = vst [vmem:[#allocation93_spill] sm:$0xff] %v6780_v21 }
 0x155   : > { %10726 = vst [vmem:[#allocation94_spill] sm:$0xff] %v6782_v61 }
 0x158   : > { %1375 = vperm.xlu2 %6053, %v6578_v41  }
 0x159   : > { %1371 = vperm.xlu1 %6052, %v10727_v58   ;;  %1379 = vperm.xlu0 %6054, %v10728_v31  }
 0x15a   : > { %v6787_v17 = vpop.permute.xlu2 %1243 }
 0x15b   : > { %10729 = vst [vmem:[#allocation26_spill] sm:$0xff] %v6787_v17  ;;  %v6789_v60 = vpop.permute.xlu1 %1203  ;;  %v6791_v36 = vpop.permute.xlu0 %1211  ;;  %v6805_v17 = vld [vmem:[%s10534_s5 + $0xf0] sm:$0xff] }
 0x15c   : > { %10730 = vst [vmem:[#allocation32_spill] sm:$0xff] %v6789_v60  ;;  %v10737_v60 = vld [vmem:[#allocation40_spill] sm:$0xff] }
 0x15d   : > { %10731 = vst [vmem:[#allocation95_spill] sm:$0xff] %v6791_v36  ;;  %v10738_v36 = vld [vmem:[#allocation36_spill] sm:$0xff] }
 0x15e   : > { %10736 = vst [vmem:[#allocation98_spill] sm:$0xff] %v6805_v17 }
 0x160   : > { %1387 = vperm.xlu2 %6053, %v6596_v51  }
 0x161   : > { %1383 = vperm.xlu1 %6052, %v10732_v45   ;;  %1391 = vperm.xlu0 %6054, %v6593_v55  }
 0x162   : > { %v6796_v35 = vpop.permute.xlu2 %1255 }
 0x163   : > { %10733 = vst [vmem:[#allocation31_spill] sm:$0xff] %v6796_v35  ;;  %v6798_v21 = vpop.permute.xlu1 %1215  ;;  %v6800_v61 = vpop.permute.xlu0 %1223 }
 0x164   : > { %10734 = vst [vmem:[#allocation96_spill] sm:$0xff] %v6798_v21  ;;  %v6819_v21 = vld [vmem:[%s10534_s5 + $0xe8] sm:$0xff] }
 0x165   : > { %10735 = vst [vmem:[#allocation97_spill] sm:$0xff] %v6800_v61  ;;  %v10575_v61 = vmov 2  }
 0x166   : > { %10741 = vst [vmem:[#allocation99_spill] sm:$0xff] %v6819_v21 }
 0x168   : > { %1399 = vperm.xlu2 %6053, %v10737_v60  }
 0x169   : > { %1395 = vperm.xlu1 %6052, %v10738_v36   ;;  %2562 = vperm.xlu0 %6054, %v6805_v17   ;;  %v10742_v17 = vld [vmem:[#allocation2_spill] sm:$0xff] }
 0x16a   : > { %v6810_v63 = vpop.permute.xlu2 %1267 }
 0x16b   : > { %v6812_v62 = vpop.permute.xlu1 %1227  ;;  %v6814_v35 = vpop.permute.xlu0 %1235 }
 0x16c   : > { %10739 = vst [vmem:[#allocation40_spill] sm:$0xff] %v6812_v62 }
 0x16d   : > { %10740 = vst [vmem:[#allocation36_spill] sm:$0xff] %v6814_v35 }
 0x170   : > { %6056 = vset.pattern.permute.xlu2 %v10575_v61 }
 0x171   : > { %6055 = vset.pattern.permute.xlu1 %v10575_v61  ;;  %2558 = vperm.xlu0 %6054, %v6819_v21  }
 0x172   : > { %1540 = vperm.xlu2 %6056, %v6311_v2   ;;  %1536 = vperm.xlu1 %6055, %v10742_v17   ;;  %v6826_v6 = vpop.permute.xlu2 %1279 }
 0x173   : > { %10743 = vst [vmem:[#allocation2_spill] sm:$0xff] %v6826_v6  ;;  %v6828_v62 = vpop.permute.xlu1 %1239  ;;  %v6830_v35 = vpop.permute.xlu0 %1247  ;;  %v10747_v6 = vmov 2  }
 0x174   : > { %10744 = vst [vmem:[#allocation100_spill] sm:$0xff] %v6828_v62 }
 0x179   : > { %2546 = vperm.xlu0 %6054, %v6835_v37  }
 0x17a   : > { %1548 = vperm.xlu2 %6056, %v6308_v1   ;;  %1544 = vperm.xlu1 %6055, %v6323_v5   ;;  %v6840_v2 = vpop.permute.xlu2 %1291 }
 0x17b   : > { %10746 = vst [vmem:[#allocation102_spill] sm:$0xff] %v6840_v2  ;;  %v6842_v17 = vpop.permute.xlu1 %1251  ;;  %v6844_v61 = vpop.permute.xlu0 %1259 }
 0x181   : > { %6081 = vset.pattern.permute.xlu0 %v10747_v6  ;;  %v10806_v6 = vld [vmem:[#allocation49_spill] sm:$0xff] }
 0x182   : > { %1560 = vperm.xlu2 %6056, %v6335_v8   ;;  %1556 = vperm.xlu1 %6055, %v6338_v9   ;;  %v6849_v62 = vpop.permute.xlu2 %1303 }
 0x183   : > { %10748 = vst [vmem:[#allocation103_spill] sm:$0xff] %v6849_v62  ;;  %1532 = vperm.xlu0 %6081, %v6314_v3   ;;  %v6852_v37 = vpop.permute.xlu1 %1263  ;;  %v6854_v1 = vpop.permute.xlu0 %1271  ;;  %v10796_v62 = vld [vmem:[#allocation51_spill] sm:$0xff] }
 0x18a   : > { %1572 = vperm.xlu2 %6056, %v6347_v11   ;;  %1568 = vperm.xlu1 %6055, %v6350_v12   ;;  %v6858_v5 = vpop.permute.xlu2 %1315 }
 0x18b   : > { %10749 = vst [vmem:[#allocation104_spill] sm:$0xff] %v6858_v5  ;;  %1552 = vperm.xlu0 %6081, %v6320_v4   ;;  %v6861_v2 = vpop.permute.xlu1 %1275  ;;  %v6863_v8 = vpop.permute.xlu0 %1283  ;;  %v10803_v5 = vld [vmem:[#allocation46_spill] sm:$0xff] }
 0x18c   : > { %10750 = vst [vmem:[#allocation105_spill] sm:$0xff] %v6861_v2 }
 0x18d   : > { %10751 = vst [vmem:[#allocation106_spill] sm:$0xff] %v6863_v8  ;;  %v10782_v8 = vld [vmem:[#allocation9_spill] sm:$0xff] }
 0x192   : > { %1584 = vperm.xlu2 %6056, %v6359_v14   ;;  %1588 = vperm.xlu1 %6055, %v6356_v13   ;;  %v6867_v3 = vpop.permute.xlu2 %1327 }
 0x193   : > { %10752 = vst [vmem:[#allocation107_spill] sm:$0xff] %v6867_v3  ;;  %1564 = vperm.xlu0 %6081, %v6332_v7   ;;  %v6870_v9 = vpop.permute.xlu1 %1287  ;;  %v6872_v11 = vpop.permute.xlu0 %1295 }
 0x194   : > { %10753 = vst [vmem:[#allocation108_spill] sm:$0xff] %v6870_v9 }
 0x195   : > { %10754 = vst [vmem:[#allocation109_spill] sm:$0xff] %v6872_v11 }
 0x19a   : > { %1720 = vperm.xlu2 %6056, %v6500_v52   ;;  %1576 = vperm.xlu1 %6055, %v6344_v10   ;;  %v6876_v4 = vpop.permute.xlu2 %1339 }
 0x19b   : > { %10755 = vst [vmem:[#allocation110_spill] sm:$0xff] %v6876_v4  ;;  %1592 = vperm.xlu0 %6081, %v6374_v18   ;;  %v6879_v12 = vpop.permute.xlu1 %1299  ;;  %v6881_v14 = vpop.permute.xlu0 %1307 }
 0x19c   : > { %10756 = vst [vmem:[#allocation111_spill] sm:$0xff] %v6879_v12 }
 0x19d   : > { %10757 = vst [vmem:[#allocation112_spill] sm:$0xff] %v6881_v14  ;;  %v10800_v14 = vld [vmem:[#allocation37_spill] sm:$0xff] }
 0x1a2   : > { %1656 = vperm.xlu2 %6056, %v6431_v32   ;;  %1784 = vperm.xlu1 %6055, %v10737_v60   ;;  %v6885_v7 = vpop.permute.xlu2 %1351 }
 0x1a3   : > { %10758 = vst [vmem:[#allocation113_spill] sm:$0xff] %v6885_v7  ;;  %1580 = vperm.xlu0 %6081, %v6362_v15   ;;  %v6888_v13 = vpop.permute.xlu1 %1311  ;;  %v6890_v52 = vpop.permute.xlu0 %1319  ;;  %v10787_v7 = vld [vmem:[#allocation14_spill] sm:$0xff] }
 0x1a4   : > { %10759 = vst [vmem:[#allocation114_spill] sm:$0xff] %v6888_v13  ;;  %v10801_v13 = vld [vmem:[#allocation45_spill] sm:$0xff] }
 0x1a5   : > { %10760 = vst [vmem:[#allocation115_spill] sm:$0xff] %v6890_v52 }
 0x1aa   : > { %1652 = vperm.xlu2 %6056, %v6434_v33   ;;  %1780 = vperm.xlu1 %6055, %v10738_v36   ;;  %v6894_v10 = vpop.permute.xlu2 %1363 }
 0x1ab   : > { %10761 = vst [vmem:[#allocation116_spill] sm:$0xff] %v6894_v10  ;;  %1716 = vperm.xlu0 %6081, %v6503_v53   ;;  %v6897_v18 = vpop.permute.xlu1 %1323  ;;  %v6899_v32 = vpop.permute.xlu0 %1331 }
 0x1ac   : > { %10762 = vst [vmem:[#allocation117_spill] sm:$0xff] %v6897_v18  ;;  %v10807_v18 = vld [vmem:[#allocation52_spill] sm:$0xff] }
 0x1ad   : > { %10763 = vst [vmem:[#allocation118_spill] sm:$0xff] %v6899_v32  ;;  %v10814_v32 = vld [vmem:[#allocation65_spill] sm:$0xff] }
 0x1b2   : > { %1648 = vperm.xlu2 %6056, %v6416_v28   ;;  %1776 = vperm.xlu1 %6055, %v6593_v55   ;;  %v6903_v15 = vpop.permute.xlu2 %1375 }
 0x1b3   : > { %10764 = vst [vmem:[#allocation119_spill] sm:$0xff] %v6903_v15  ;;  %1712 = vperm.xlu0 %6081, %v6506_v54   ;;  %v6906_v60 = vpop.permute.xlu1 %1335  ;;  %v6908_v33 = vpop.permute.xlu0 %1343 }
 0x1b4   : > { %10765 = vst [vmem:[#allocation120_spill] sm:$0xff] %v6906_v60  ;;  %v10816_v60 = vld [vmem:[#allocation66_spill] sm:$0xff] }
 0x1b5   : > { %10766 = vst [vmem:[#allocation121_spill] sm:$0xff] %v6908_v33 }
 0x1ba   : > { %1644 = vperm.xlu2 %6056, %v6419_v29   ;;  %1772 = vperm.xlu1 %6055, %v6596_v51   ;;  %v6912_v36 = vpop.permute.xlu2 %1387 }
 0x1bb   : > { %10767 = vst [vmem:[#allocation122_spill] sm:$0xff] %v6912_v36  ;;  %1708 = vperm.xlu0 %6081, %v6482_v46   ;;  %v6915_v53 = vpop.permute.xlu1 %1347  ;;  %v6917_v28 = vpop.permute.xlu0 %1355 }
 0x1bc   : > { %10768 = vst [vmem:[#allocation123_spill] sm:$0xff] %v6915_v53  ;;  %v10784_v53 = vld [vmem:[#allocation11_spill] sm:$0xff] }
 0x1bd   : > { %10769 = vst [vmem:[#allocation124_spill] sm:$0xff] %v6917_v28  ;;  %v10788_v28 = vld [vmem:[#allocation15_spill] sm:$0xff] }
 0x1c2   : > { %1640 = vperm.xlu2 %6056, %v6422_v30   ;;  %1768 = vperm.xlu1 %6055, %v10732_v45   ;;  %v6921_v54 = vpop.permute.xlu2 %1399 }
 0x1c3   : > { %1704 = vperm.xlu0 %6081, %v6485_v47   ;;  %v6924_v55 = vpop.permute.xlu1 %1359  ;;  %v6926_v29 = vpop.permute.xlu0 %1367 }
 0x1c4   : > { %10770 = vst [vmem:[#allocation125_spill] sm:$0xff] %v6924_v55 }
 0x1c5   : > { %10771 = vst [vmem:[#allocation126_spill] sm:$0xff] %v6926_v29  ;;  %v10799_v29 = vld [vmem:[#allocation35_spill] sm:$0xff] }
 0x1ca   : > { %1636 = vperm.xlu2 %6056, %v6404_v25   ;;  %1764 = vperm.xlu1 %6055, %v10728_v31  }
 0x1cb   : > { %1700 = vperm.xlu0 %6081, %v6488_v48   ;;  %v6931_v46 = vpop.permute.xlu1 %1371  ;;  %v6933_v51 = vpop.permute.xlu0 %1379 }
 0x1cc   : > { %10772 = vst [vmem:[#allocation127_spill] sm:$0xff] %v6931_v46  ;;  %v6935_v30 = vpop.permute.xlu2 %1540 }
 0x1cd   : > { %10773 = vst [vmem:[#allocation128_spill] sm:$0xff] %v6933_v51  ;;  %v10805_v51 = vld [vmem:[#allocation48_spill] sm:$0xff] }
 0x1d2   : > { %1632 = vperm.xlu2 %6056, %v6407_v26   ;;  %1760 = vperm.xlu1 %6055, %v6578_v41  }
 0x1d3   : > { %1696 = vperm.xlu0 %6081, %v6468_v42   ;;  %v6940_v45 = vpop.permute.xlu1 %1383  ;;  %v6942_v47 = vpop.permute.xlu0 %1391 }
 0x1d4   : > { %10774 = vst [vmem:[#allocation129_spill] sm:$0xff] %v6940_v45  ;;  %v6944_v25 = vpop.permute.xlu2 %1548  ;;  %v10813_v45 = vld [vmem:[#allocation76_spill] sm:$0xff] }
 0x1da   : > { %1628 = vperm.xlu2 %6056, %v6410_v27   ;;  %1756 = vperm.xlu1 %6055, %v10727_v58  }
 0x1db   : > { %1692 = vperm.xlu0 %6081, %v6471_v43   ;;  %v6949_v31 = vpop.permute.xlu1 %1395  ;;  %v6951_v48 = vpop.permute.xlu0 %2562 }
 0x1dc   : > { %10775 = vst [vmem:[#allocation130_spill] sm:$0xff] %v6951_v48  ;;  %v6953_v26 = vpop.permute.xlu2 %1560 }
 0x1e2   : > { %1624 = vperm.xlu2 %6056, %v6392_v22   ;;  %1752 = vperm.xlu1 %6055, %v10723_v59  }
 0x1e3   : > { %1688 = vperm.xlu0 %6081, %v6474_v44   ;;  %v6958_v41 = vpop.permute.xlu0 %2558 }
 0x1e4   : > { %10776 = vst [vmem:[#allocation131_spill] sm:$0xff] %v6958_v41  ;;  %v6960_v42 = vpop.permute.xlu2 %1572  ;;  %v6962_v27 = vpop.permute.xlu1 %1536 }
 0x1e5   : > { %10777 = vst [vmem:[#allocation132_spill] sm:$0xff] %v6962_v27 }
 0x1ea   : > { %1620 = vperm.xlu2 %6056, %v6395_v23   ;;  %1748 = vperm.xlu1 %6055, %v6560_v50  }
 0x1eb   : > { %1684 = vperm.xlu0 %6081, %v6454_v38   ;;  %v6967_v43 = vpop.permute.xlu0 %2546  ;;  %v760_v38 = vld [vmem:[%s10533_s4] sm:$0x7] }
 0x1ec   : > { %10778 = vst [vmem:[#allocation133_spill] sm:$0xff] %v6967_v43  ;;  %v6969_v58 = vpop.permute.xlu2 %1584  ;;  %v6971_v22 = vpop.permute.xlu1 %1544  ;;  %v6985_v50 = vperm.slane %v760_v38, 1  ;;  %v6987_v43 = vperm.slane %v760_v38, 0 }
 0x1ee   : > { %v7015_v9 = vmul.f32 %v6987_v43, %v10784_v53  ;;  %v1433_v53 = vmul.f32 %v6985_v50, %v6810_v63 }
 0x1f2   : > { %1616 = vperm.xlu2 %6056, %v6398_v24   ;;  %1744 = vperm.xlu1 %6055, %v6536_v0   ;;  %v1434_v24 = vmul.f32 %v6985_v50, %v6854_v1  ;;  %v1113_v0 = vmul.f32 %v6987_v43, %v6645_v49  ;;  %v10781_v1 = vld [vmem:[#allocation8_spill] sm:$0xff]  ;;  %v10783_v49 = vld [vmem:[#allocation10_spill] sm:$0xff] }
 0x1f3   : > { %1680 = vperm.xlu0 %6081, %v6457_v39   ;;  %v6995_v39 = vperm.slane %v760_v38, 2  ;;  %v7011_v38 = vmul.f32 %v6987_v43, %v10783_v49  ;;  %v7029_v49 = vmul.f32 %v6987_v43, %v10788_v28  ;;  %v10794_v28 = vld [vmem:[#allocation25_spill] sm:$0xff] }
 0x1f4   : > { %v6976_v44 = vpop.permute.xlu2 %1720  ;;  %v6978_v59 = vpop.permute.xlu1 %1556  ;;  %v1498_v4 = vadd.f32 %v1434_v24, %v1113_v0  ;;  %v10785_v24 = vld [vmem:[#allocation12_spill] sm:$0xff]  ;;  %v10786_v0 = vld [vmem:[#allocation13_spill] sm:$0xff]  ;;  %v1091_v63 = vmul.f32 %v6987_v43, %v10794_v28  ;;  %v1097_v28 = vmul.f32 %v6987_v43, %v10799_v29  ;;  %v7080_v29 = vmul.f32 %v6987_v43, %v10803_v5 }
 0x1f5   : > { %10779 = vst [vmem:[#allocation134_spill] sm:$0xff] %v6976_v44  ;;  %v6980_v23 = vpop.permute.xlu0 %1532 }
 0x1f6   : > { %10780 = vst [vmem:[#allocation135_spill] sm:$0xff] %v6980_v23  ;;  %v10834_v23 = vld [vmem:[#allocation83_spill] sm:$0xff] }
 0x1f7   : > { %10804 = vst [vmem:[#allocation10_spill] sm:$0xff] %v7080_v29  ;;  %v10837_v29 = vld [vmem:[#allocation92_spill] sm:$0xff] }
 0x1fa   : > { %1612 = vperm.xlu2 %6056, %v6380_v19   ;;  %1740 = vperm.xlu1 %6055, %v6539_v57   ;;  %v1086_v19 = vmul.f32 %v6987_v43, %v10781_v1  ;;  %v7007_v57 = vmul.f32 %v6987_v43, %v10782_v8  ;;  %v7023_v1 = vmul.f32 %v6987_v43, %v10786_v0  ;;  %v10792_v0 = vld [vmem:[#allocation22_spill] sm:$0xff] }
 0x1fb   : > { %1676 = vperm.xlu0 %6081, %v6460_v40   ;;  %v1096_v8 = vmul.f32 %v6987_v43, %v10787_v7  ;;  %v1088_v12 = vmul.f32 %v6987_v43, %v10792_v0  ;;  %v10793_v7 = vld [vmem:[#allocation24_spill] sm:$0xff]  ;;  %v10797_v0 = vld [vmem:[#allocation30_spill] sm:$0xff] }
 0x1fc   : > { %v1657_v48 = vpop.permute.xlu2 %1656  ;;  %v6998_v41 = vpop.permute.xlu1 %1568  ;;  %v7045_v10 = vmul.f32 %v6987_v43, %v10793_v7  ;;  %v7059_v7 = vmul.f32 %v6987_v43, %v10797_v0  ;;  %v1404_v0 = vmul.f32 %v6985_v50, %v6717_v16  ;;  %v7092_v16 = vmul.f32 %v6987_v43, %v10807_v18 }
 0x1fd   : > { %v1819_v2 = vmul.f32 %v6995_v39, %v1657_v48  ;;  %v7001_v33 = vpop.permute.xlu0 %1552  ;;  %v7019_v48 = vmul.f32 %v6987_v43, %v10785_v24  ;;  %v10791_v24 = vld [vmem:[#allocation21_spill] sm:$0xff]  ;;  %v7110_v18 = vmul.f32 %v6987_v43, %v10816_v60  ;;  %v10824_v60 = vld [vmem:[#allocation87_spill] sm:$0xff] }
 0x1fe   : > { %v7039_v55 = vmul.f32 %v6987_v43, %v10791_v24  ;;  %v1112_v24 = vmul.f32 %v6987_v43, %v10796_v62  ;;  %10808 = vst [vmem:[#allocation11_spill] sm:$0xff] %v7092_v16  ;;  %v10818_v16 = vld [vmem:[#allocation67_spill] sm:$0xff] }
 0x1ff   : > { %v1883_v40 = vadd.f32 %v1819_v2, %v1498_v4  ;;  %v10789_v2 = vld [vmem:[#allocation16_spill] sm:$0xff]  ;;  %10817 = vst [vmem:[#allocation15_spill] sm:$0xff] %v7110_v18  ;;  %v10825_v18 = vld [vmem:[#allocation94_spill] sm:$0xff] }
 0x200   : > { %v1083_v4 = vmul.f32 %v6987_v43, %v10789_v2 }
 0x201   : > { %v7035_v11 = vmax.f32 %v1883_v40, 0.0  ;;  %v10795_v40 = vld [vmem:[#allocation29_spill] sm:$0xff] }
 0x202   : > { %1608 = vperm.xlu2 %6056, %v6383_v20   ;;  %1736 = vperm.xlu1 %6055, %v6542_v56   ;;  %v1095_v2 = vmul.f32 %v6987_v43, %v10795_v40  ;;  %v10798_v20 = vld [vmem:[#allocation33_spill] sm:$0xff]  ;;  %v1111_v40 = vmul.f32 %v6987_v43, %v10800_v14  ;;  %v7084_v14 = vmul.f32 %v6987_v43, %v10805_v51 }
 0x203   : > { %10790 = vst [vmem:[#allocation8_spill] sm:$0xff] %v7035_v11  ;;  %1672 = vperm.xlu0 %6081, %v6440_v34   ;;  %2074 = vmatpush.msra.mxu1 %v7035_v11  ;;  %v7063_v56 = vmul.f32 %v6987_v43, %v10798_v20  ;;  %v7071_v34 = vmul.f32 %v6987_v43, %v10801_v13 }
 0x204   : > { %v1653_v46 = vpop.permute.xlu2 %1652  ;;  %v1589_v62 = vpop.permute.xlu1 %1588  ;;  %v1497_v11 = vadd.f32 %v1433_v53, %v1112_v24  ;;  %v7088_v13 = vmul.f32 %v6987_v43, %v10806_v6  ;;  %v10809_v53 = vld [vmem:[#allocation55_spill] sm:$0xff]  ;;  %v10811_v24 = vld [vmem:[#allocation62_spill] sm:$0xff]  ;;  %v1407_v51 = vmul.f32 %v6985_v50, %v10813_v45  ;;  %v7106_v6 = vmul.f32 %v6987_v43, %v10814_v32 }
 0x205   : > { %10802 = vst [vmem:[#allocation9_spill] sm:$0xff] %v7071_v34  ;;  %v1818_v15 = vmul.f32 %v6995_v39, %v1653_v46  ;;  %v7076_v20 = vpop.permute.xlu0 %1564  ;;  %v7096_v46 = vmul.f32 %v6987_v43, %v10809_v53  ;;  %v7100_v5 = vmul.f32 %v6987_v43, %v10811_v24  ;;  %v7114_v53 = vmul.f32 %v6987_v43, %v10818_v16 }
 0x206   : > { %10815 = vst [vmem:[#allocation14_spill] sm:$0xff] %v7106_v6  ;;  %v1432_v32 = vmul.f32 %v6985_v50, %v6852_v37  ;;  %v1418_v45 = vmul.f32 %v6985_v50, %v10824_v60  ;;  %v1416_v16 = vmul.f32 %v6985_v50, %v10825_v18  ;;  %v10827_v6 = vld [vmem:[#allocation17_spill] sm:$0xff]  ;;  %v10831_v60 = vld [vmem:[#allocation78_spill] sm:$0xff] }
 0x207   : > { %10810 = vst [vmem:[#allocation12_spill] sm:$0xff] %v7096_v46  ;;  %v1882_v44 = vadd.f32 %v1818_v15, %v1497_v11  ;;  %v10820_v46 = vld [vmem:[#allocation32_spill] sm:$0xff]  ;;  %v7122_v11 = vadd.f32 %v1404_v0, %v1083_v4  ;;  %v10828_v4 = vld [vmem:[#allocation79_spill] sm:$0xff]  ;;  %v10829_v37 = vld [vmem:[#allocation81_spill] sm:$0xff]  ;;  %v7145_v18 = vmul.f32 %v6987_v43, %v10831_v60 }
 0x208   : > { %10812 = vst [vmem:[#allocation13_spill] sm:$0xff] %v7100_v5  ;;  %v1417_v24 = vmul.f32 %v6985_v50, %v10820_v46  ;;  %v10821_v5 = vld [vmem:[#allocation70_spill] sm:$0xff]  ;;  %v10826_v46 = vld [vmem:[#allocation4_spill] sm:$0xff]  ;;  %v1409_v0 = vmul.f32 %v6985_v50, %v10828_v4  ;;  %v1496_v52 = vadd.f32 %v1432_v32, %v1111_v40  ;;  %v1482_v27 = vadd.f32 %v1418_v45, %v1097_v28  ;;  %v10838_v40 = vld [vmem:[#allocation93_spill] sm:$0xff] }
 0x209   : > { %10819 = vst [vmem:[#allocation16_spill] sm:$0xff] %v7114_v53  ;;  %v7120_v21 = vmul.f32 %v6987_v43, %v10821_v5  ;;  %v7126_v15 = vmax.f32 %v1882_v44, 0.0  ;;  %v1802_v53 = vmul.f32 %v6995_v39, %v1589_v62  ;;  %v7135_v5 = vadd.f32 %v1407_v51, %v1086_v19  ;;  %v10832_v62 = vld [vmem:[#allocation80_spill] sm:$0xff]  ;;  %v10840_v45 = vld [vmem:[#allocation18_spill] sm:$0xff] }
 0x20a   : > { %10822 = vst [vmem:[#allocation21_spill] sm:$0xff] %v7122_v11  ;;  %1604 = vperm.xlu2 %6056, %v10826_v46   ;;  %1732 = vperm.xlu1 %6055, %v10827_v6   ;;  %v1412_v44 = vmul.f32 %v6985_v50, %v10829_v37  ;;  %v10830_v11 = vld [vmem:[#allocation6_spill] sm:$0xff]  ;;  %v7149_v46 = vmul.f32 %v6987_v43, %v10832_v62 }
 0x20b   : > { %10823 = vst [vmem:[#allocation22_spill] sm:$0xff] %v7126_v15  ;;  %1668 = vperm.xlu0 %6081, %v10830_v11   ;;  %2075 = vmatpush.msra.mxu1 %v7126_v15  ;;  %v1481_v19 = vadd.f32 %v1417_v24, %v1096_v8  ;;  %v1801_v51 = vmul.f32 %v6995_v39, %v6969_v58  ;;  %v10835_v11 = vld [vmem:[#allocation84_spill] sm:$0xff] }
 0x20c   : > { %10833 = vst [vmem:[#allocation24_spill] sm:$0xff] %v7149_v46  ;;  %v1649_v6 = vpop.permute.xlu2 %1648  ;;  %v1577_v4 = vpop.permute.xlu1 %1576  ;;  %v1403_v37 = vmul.f32 %v6985_v50, %v10834_v23  ;;  %v1415_v15 = vmul.f32 %v6985_v50, %v10835_v11  ;;  %v1480_v34 = vadd.f32 %v1416_v16, %v1095_v2  ;;  %v7159_v24 = vadd.f32 %v1409_v0, %v1088_v12  ;;  %v10836_v46 = vld [vmem:[#allocation82_spill] sm:$0xff]  ;;  %v10842_v0 = vld [vmem:[#allocation91_spill] sm:$0xff] }
 0x20d   : > { %v1817_v60 = vmul.f32 %v6995_v39, %v1649_v6  ;;  %v1593_v3 = vpop.permute.xlu0 %1592  ;;  %v1866_v8 = vadd.f32 %v1802_v53, %v1481_v19  ;;  %v7161_v58 = vadd.f32 %v1412_v44, %v1091_v63  ;;  %v1145_v36 = vmul.f32 %v6987_v43, %v10836_v46  ;;  %v10839_v53 = vld [vmem:[#allocation3_spill] sm:$0xff] }
 0x20e   : > { %v1803_v62 = vmul.f32 %v6995_v39, %v1593_v3  ;;  %v1413_v11 = vmul.f32 %v6985_v50, %v10837_v29  ;;  %v1414_v32 = vmul.f32 %v6985_v50, %v10838_v40  ;;  %v1865_v28 = vadd.f32 %v1801_v51, %v1480_v34  ;;  %v10843_v44 = vld [vmem:[#allocation7_spill] sm:$0xff] }
 0x20f   : > { %v1881_v23 = vadd.f32 %v1817_v60, %v1496_v52  ;;  %v7170_v2 = vadd.f32 %v1403_v37, %v7023_v1  ;;  %v1431_v3 = vmul.f32 %v6985_v50, %v6844_v61  ;;  %v1466_v12 = vmul.f32 %v6985_v50, %v6921_v54  ;;  %v10841_v1 = vld [vmem:[#allocation89_spill] sm:$0xff] }
 0x210   : > { %v1867_v6 = vadd.f32 %v1803_v62, %v1482_v27  ;;  %v1479_v52 = vadd.f32 %v1415_v15, %v7059_v7  ;;  %v1799_v29 = vmul.f32 %v6995_v39, %v1577_v4  ;;  %v1930_v34 = vmax.f32 %v1866_v8, 0.0 }
 0x211   : > { %v7176_v63 = vmax.f32 %v1881_v23, 0.0  ;;  %v1410_v16 = vmul.f32 %v6985_v50, %v10841_v1  ;;  %v1411_v61 = vmul.f32 %v6985_v50, %v10842_v0  ;;  %v1798_v54 = vmul.f32 %v6995_v39, %v6960_v42 }
 0x212   : > { %1600 = vperm.xlu2 %6056, %v10839_v53   ;;  %1728 = vperm.xlu1 %6055, %v10840_v45   ;;  %v1931_v27 = vmax.f32 %v1867_v6, 0.0  ;;  %v1477_v7 = vadd.f32 %v1413_v11, %v7045_v10  ;;  %v1478_v15 = vadd.f32 %v1414_v32, %v7015_v9  ;;  %v1929_v4 = vmax.f32 %v1865_v28, 0.0  ;;  %v10844_v9 = vld [vmem:[#allocation31_spill] sm:$0xff] }
 0x213   : > { %1664 = vperm.xlu0 %6081, %v10843_v44   ;;  %2076 = vmatpush.msra.mxu1 %v7176_v63  ;;  %v1495_v37 = vadd.f32 %v1431_v3, %v7084_v14  ;;  %v1530_v60 = vadd.f32 %v1466_v12, %v1145_v36  ;;  %v1994_v10 = vmul.f32 %v1930_v34, %v1930_v34  ;;  %v10845_v12 = vld [vmem:[#allocation85_spill] sm:$0xff]  ;;  %v7207_v45 = vld [vmem:[%s10534_s5 + $0x70] sm:$0xff]  ;;  %v10847_v0 = vmov 0  }
 0x214   : > { %2054 = vmatpush.msra.mxu2 %v1931_v27  ;;  %v1645_v46 = vpop.permute.xlu2 %1644  ;;  %v1785_v19 = vpop.permute.xlu1 %1784  ;;  %v1995_v51 = vmul.f32 %v1931_v27, %v1931_v27  ;;  %v1863_v11 = vadd.f32 %v1799_v29, %v1478_v15  ;;  %v1430_v40 = vmul.f32 %v6985_v50, %v10844_v9  ;;  %v1862_v28 = vadd.f32 %v1798_v54, %v1477_v7 }
 0x215   : > { %v1816_v62 = vmul.f32 %v6995_v39, %v1645_v46  ;;  %v1851_v42 = vmul.f32 %v6995_v39, %v1785_v19  ;;  %v1581_v8 = vpop.permute.xlu0 %1580  ;;  %v1797_v36 = vmul.f32 %v6995_v39, %v6998_v41  ;;  %v1993_v14 = vmul.f32 %v1929_v4, %v1929_v4  ;;  %v10846_v41 = vld [vmem:[#allocation88_spill] sm:$0xff]  ;;  %v6168_v46 = vld [vmem:[%s6305_s2 + $0x80] sm:$0xff]  ;;  %s665_s2 = scalar_lea.vmem %s10921_s22, %s5921_s20  ;;  %s5740_s20 = sshll.u32 %s11106_s30, 2 }
 0x216   : > { %v1800_v23 = vmul.f32 %v6995_v39, %v1581_v8  ;;  %2055 = vmatpush.msra.mxu2 %v1930_v34  ;;  %2134 = vmatpush.msra.mxu0 %v1995_v51  ;;  %v1406_v53 = vmul.f32 %v6985_v50, %v10845_v12  ;;  %v1465_v29 = vmul.f32 %v6985_v50, %v6949_v31  ;;  %v1927_v31 = vmax.f32 %v1863_v11, 0.0  ;;  %v10848_v19 = vld [vmem:[#allocation5_spill] sm:$0xff]  ;;  %s674_s22 = scalar_lea.vmem %s10546_s17, %s5740_s20  ;;  %s683_s28 = scalar_lea.vmem %s10548_s19, %s5740_s20 }
 0x217   : > { %v1880_v32 = vadd.f32 %v1816_v62, %v1495_v37  ;;  %v1915_v6 = vadd.f32 %v1851_v42, %v1530_v60  ;;  %v1408_v1 = vmul.f32 %v6985_v50, %v10846_v41  ;;  %v1474_v44 = vadd.f32 %v1410_v16, %v7039_v55 }
 0x218   : > { %2056 = vmatpush.msra.mxu2 %v1929_v4  ;;  %2135 = vmatpush.msra.mxu0 %v1994_v10  ;;  %v1864_v3 = vadd.f32 %v1800_v23, %v1479_v52  ;;  %v1796_v52 = vmul.f32 %v6995_v39, %v7076_v20  ;;  %v1475_v7 = vadd.f32 %v1411_v61, %v7011_v38  ;;  %v1926_v60 = vmax.f32 %v1862_v28, 0.0 }
 0x219   : > { %v7209_v27 = vmax.f32 %v1880_v32, 0.0  ;;  %v7211_v34 = vmax.f32 %v1915_v6, 0.0  ;;  %v1494_v15 = vadd.f32 %v1430_v40, %v7088_v13  ;;  %v1795_v51 = vmul.f32 %v6995_v39, %v6953_v26  ;;  %v10849_v32 = vld [vmem:[#allocation86_spill] sm:$0xff] }
 0x21a   : > { %2136 = vmatpush.msra.mxu0 %v1993_v14  ;;  %6057 = vset.pattern.permute.xlu2 %v10847_v0  ;;  %v1928_v54 = vmax.f32 %v1864_v3, 0.0  ;;  %v1861_v55 = vadd.f32 %v1797_v36, %v7161_v58  ;;  %v1529_v38 = vadd.f32 %v1465_v29, %v7120_v21  ;;  %v1794_v61 = vmul.f32 %v6995_v39, %v6978_v59  ;;  %v10850_v3 = vld [vmem:[#allocation26_spill] sm:$0xff]  ;;  %v10852_v29 = vld [vmem:[#allocation19_spill] sm:$0xff] }
 0x21b   : > { %1596 = vperm.xlu1 %6055, %v6168_v46   ;;  %1660 = vperm.xlu0 %6081, %v10848_v19   ;;  %v1991_v62 = vmul.f32 %v1927_v31, %v1927_v31  ;;  %v1860_v42 = vadd.f32 %v1796_v52, %v1475_v7  ;;  %v1429_v21 = vmul.f32 %v6985_v50, %v6842_v17 }
 0x21c   : > { %2320 = vperm.xlu2 %6057, %v7207_v45   ;;  %2057 = vmatpush.msra.mxu2 %v1928_v54  ;;  %v1641_v20 = vpop.permute.xlu2 %1640  ;;  %v1781_v4 = vpop.permute.xlu1 %1780  ;;  %v1992_v37 = vmul.f32 %v1928_v54, %v1928_v54  ;;  %v1464_v58 = vmul.f32 %v6985_v50, %v6942_v47  ;;  %v1793_v10 = vmul.f32 %v6995_v39, %v7001_v33  ;;  %v1925_v11 = vmax.f32 %v1861_v55, 0.0 }
 0x21d   : > { %2077 = vmatpush.msra.mxu1 %v7209_v27  ;;  %2114 = vmatpush.msra.mxu3 %v7211_v34  ;;  %v1815_v13 = vmul.f32 %v6995_v39, %v1641_v20  ;;  %v1850_v16 = vmul.f32 %v6995_v39, %v1781_v4  ;;  %v7232_v26 = vpop.permute.xlu0 %1716  ;;  %v1990_v9 = vmul.f32 %v1926_v60, %v1926_v60  ;;  %v1924_v33 = vmax.f32 %v1860_v42, 0.0  ;;  %v10853_v4 = vld [vmem:[#allocation10_spill] sm:$0xff]  ;;  %v10857_v42 = vld [vmem:[#allocation107_spill] sm:$0xff] }
 0x21e   : > { %2058 = vmatpush.msra.mxu2 %v1927_v31  ;;  %2137 = vmatpush.msra.mxu0 %v1992_v37  ;;  %v1859_v59 = vadd.f32 %v1795_v51, %v1474_v44  ;;  %v1470_v40 = vadd.f32 %v1406_v53, %v7029_v49  ;;  %v1405_v6 = vmul.f32 %v6985_v50, %v10849_v32  ;;  %v10851_v53 = vmov 1   ;;  %v10860_v32 = vld [vmem:[#allocation99_spill] sm:$0xff] }
 0x21f   : > { %v1879_v8 = vadd.f32 %v1815_v13, %v1494_v15  ;;  %v1914_v23 = vadd.f32 %v1850_v16, %v1529_v38  ;;  %v1472_v17 = vadd.f32 %v1408_v1, %v7007_v57  ;;  %v1792_v47 = vmul.f32 %v6995_v39, %v6944_v25  ;;  %v10855_v13 = vld [vmem:[#allocation9_spill] sm:$0xff] }
 0x220   : > { %2059 = vmatpush.msra.mxu2 %v1926_v60  ;;  %2138 = vmatpush.msra.mxu0 %v1991_v62  ;;  %v1858_v14 = vadd.f32 %v1794_v61, %v7159_v24  ;;  %v1427_v49 = vmul.f32 %v6985_v50, %v10850_v3  ;;  %v1428_v12 = vmul.f32 %v6985_v50, %v6830_v35  ;;  %v7266_v24 = vld [vmem:[%s10534_s5 + $0x78] sm:$0xff]  ;;  %v1923_v52 = vmax.f32 %v1859_v59, 0.0  ;;  %v10854_v60 = vld [vmem:[#allocation122_spill] sm:$0xff] }
 0x221   : > { %v7246_v28 = vmax.f32 %v1879_v8, 0.0  ;;  %v7250_v36 = vmax.f32 %v1914_v23, 0.0  ;;  %v1493_v57 = vadd.f32 %v1429_v21, %v7063_v56  ;;  %v1528_v25 = vadd.f32 %v1464_v58, %v7145_v18 }
 0x222   : > { %2060 = vmatpush.msra.mxu2 %v1925_v11  ;;  %2139 = vmatpush.msra.mxu0 %v1990_v9  ;;  %v1989_v41 = vmul.f32 %v1925_v11, %v1925_v11  ;;  %v1857_v56 = vadd.f32 %v1793_v10, %v1472_v17  ;;  %v1791_v54 = vmul.f32 %v6995_v39, %v6971_v22  ;;  %v1922_v46 = vmax.f32 %v1858_v14, 0.0  ;;  %v10858_v10 = vld [vmem:[#allocation115_spill] sm:$0xff]  ;;  %v10861_v17 = vld [vmem:[#allocation120_spill] sm:$0xff] }
 0x223   : > { %6058 = vset.pattern.permute.xlu1 %v10851_v53  ;;  %1724 = vperm.xlu0 %6081, %v10852_v29   ;;  %v1469_v7 = vadd.f32 %v1405_v6, %v7019_v48  ;;  %v1988_v15 = vmul.f32 %v1924_v33, %v1924_v33  ;;  %v1856_v19 = vadd.f32 %v1792_v47, %v7135_v5  ;;  %v10856_v5 = vld [vmem:[#allocation132_spill] sm:$0xff]  ;;  %v10859_v9 = vld [vmem:[#allocation135_spill] sm:$0xff] }
 0x224   : > { %6059 = vset.pattern.permute.xlu2 %v10851_v53  ;;  %2498 = vperm.xlu1 %6058, %v7207_v45   ;;  %v1637_v1 = vpop.permute.xlu2 %1636  ;;  %v1777_v35 = vpop.permute.xlu1 %1776  ;;  %v1790_v22 = vmul.f32 %v6995_v39, %v6935_v30  ;;  %v7282_v37 = vadd.f32 %v1427_v49, %v10853_v4  ;;  %v1463_v48 = vmul.f32 %v6985_v50, %v10854_v60  ;;  %v1921_v38 = vmax.f32 %v1857_v56, 0.0  ;;  %v10862_v47 = vld [vmem:[#allocation24_spill] sm:$0xff]  ;;  %v10868_v4 = vld [vmem:[#allocation129_spill] sm:$0xff] }
 0x225   : > { %2061 = vmatpush.msra.mxu2 %v1924_v33  ;;  %2078 = vmatpush.msra.mxu1 %v7246_v28  ;;  %v1814_v18 = vmul.f32 %v6995_v39, %v1637_v1  ;;  %v1849_v31 = vmul.f32 %v6995_v39, %v1777_v35  ;;  %v7273_v44 = vpop.permute.xlu0 %1712  ;;  %v1987_v55 = vmul.f32 %v1923_v52, %v1923_v52  ;;  %v1920_v8 = vmax.f32 %v1856_v19, 0.0  ;;  %v10863_v1 = vld [vmem:[#allocation21_spill] sm:$0xff] }
 0x226   : > { %2115 = vmatpush.msra.mxu3 %v7250_v36  ;;  %2140 = vmatpush.msra.mxu0 %v1989_v41  ;;  %v1492_v16 = vadd.f32 %v1428_v12, %v10855_v13  ;;  %v1789_v61 = vmul.f32 %v6995_v39, %v10856_v5  ;;  %v1855_v62 = vadd.f32 %v1791_v54, %v1470_v40  ;;  %v10865_v54 = vld [vmem:[#allocation134_spill] sm:$0xff] }
 0x227   : > { %2502 = vperm.xlu2 %6059, %v7266_v24   ;;  %2062 = vmatpush.msra.mxu2 %v1923_v52  ;;  %v1878_v51 = vadd.f32 %v1814_v18, %v1493_v57  ;;  %v1913_v20 = vadd.f32 %v1849_v31, %v1528_v25  ;;  %v1448_v21 = vmul.f32 %v6985_v50, %v10857_v42  ;;  %v7310_v25 = vld [vmem:[%s10534_s5 + $0xf8] sm:$0xff]  ;;  %v10864_v52 = vld [vmem:[#allocation118_spill] sm:$0xff] }
 0x228   : > { %2141 = vmatpush.msra.mxu0 %v1988_v15  ;;  %v1986_v58 = vmul.f32 %v1922_v46, %v1922_v46  ;;  %v1446_v11 = vmul.f32 %v6985_v50, %v10858_v10  ;;  %v1788_v59 = vmul.f32 %v6995_v39, %v10859_v9  ;;  %v1854_v6 = vadd.f32 %v1790_v22, %v1469_v7  ;;  %v10866_v7 = vld [vmem:[#allocation98_spill] sm:$0xff]  ;;  %v10872_v10 = vld [vmem:[#allocation13_spill] sm:$0xff] }
 0x229   : > { %2063 = vmatpush.msra.mxu2 %v1922_v46  ;;  %v7289_v30 = vmax.f32 %v1878_v51, 0.0  ;;  %v7293_v23 = vmax.f32 %v1913_v20, 0.0  ;;  %v1450_v40 = vmul.f32 %v6985_v50, %v10861_v17  ;;  %v1527_v33 = vadd.f32 %v1463_v48, %v10862_v47  ;;  %v10867_v51 = vld [vmem:[#allocation12_spill] sm:$0xff] }
 0x22a   : > { %2142 = vmatpush.msra.mxu0 %v1987_v55  ;;  %v1985_v14 = vmul.f32 %v1921_v38, %v1921_v38  ;;  %v1919_v41 = vmax.f32 %v1855_v62, 0.0  ;;  %v1853_v35 = vadd.f32 %v1789_v61, %v10863_v1  ;;  %v1449_v56 = vmul.f32 %v6985_v50, %v10864_v52  ;;  %v10870_v61 = vld [vmem:[#allocation14_spill] sm:$0xff]  ;;  %v10874_v17 = vld [vmem:[#allocation16_spill] sm:$0xff] }
 0x22b   : > { %2064 = vmatpush.msra.mxu2 %v1921_v38  ;;  %2751 = vperm.xlu0 %6081, %v10860_v32   ;;  %v1835_v18 = vmul.f32 %v6995_v39, %v10865_v54  ;;  %v1984_v31 = vmul.f32 %v1920_v8, %v1920_v8  ;;  %v1918_v15 = vmax.f32 %v1854_v6, 0.0  ;;  %v1852_v46 = vadd.f32 %v1788_v59, %v7170_v2  ;;  %v10869_v2 = vld [vmem:[#allocation117_spill] sm:$0xff] }
 0x22c   : > { %2143 = vmatpush.msra.mxu0 %v1986_v58  ;;  %6060 = vset.pattern.permute.xlu1 %v10847_v0  ;;  %v1633_v3 = vpop.permute.xlu2 %1632  ;;  %v1773_v49 = vpop.permute.xlu1 %1772  ;;  %v1514_v20 = vadd.f32 %v1450_v40, %v10867_v51  ;;  %v1462_v60 = vmul.f32 %v6985_v50, %v10868_v4  ;;  %v1834_v48 = vmul.f32 %v6995_v39, %v7232_v26  ;;  %v1917_v38 = vmax.f32 %v1853_v35, 0.0  ;;  %v10871_v58 = vld [vmem:[#allocation15_spill] sm:$0xff]  ;;  %v10873_v32 = vld [vmem:[#allocation101_spill] sm:$0xff]  ;;  %v10880_v4 = vld [vmem:[#allocation104_spill] sm:$0xff] }
 0x22d   : > { %2065 = vmatpush.msra.mxu2 %v1920_v8  ;;  %2079 = vmatpush.msra.mxu1 %v7289_v30  ;;  %v1813_v12 = vmul.f32 %v6995_v39, %v1633_v3  ;;  %v1848_v57 = vmul.f32 %v6995_v39, %v1773_v49  ;;  %v1709_v29 = vpop.permute.xlu0 %1708  ;;  %v1983_v55 = vmul.f32 %v1919_v41, %v1919_v41  ;;  %v1916_v6 = vmax.f32 %v1852_v46, 0.0  ;;  %v10878_v46 = vld [vmem:[#allocation100_spill] sm:$0xff] }
 0x22e   : > { %2116 = vmatpush.msra.mxu3 %v7293_v23  ;;  %2144 = vmatpush.msra.mxu0 %v1985_v14  ;;  %v1513_v62 = vadd.f32 %v1449_v56, %v10870_v61  ;;  %v1833_v42 = vmul.f32 %v6995_v39, %v7273_v44  ;;  %v1899_v26 = vadd.f32 %v1835_v18, %v1514_v20  ;;  %v10876_v54 = vmov 2   ;;  %v10883_v61 = vld [vmem:[#allocation63_spill] sm:$0xff] }
 0x22f   : > { %6061 = vset.pattern.permute.xlu2 %v10847_v0  ;;  %2400 = vperm.xlu1 %6060, %v10866_v7   ;;  %v1877_v19 = vadd.f32 %v1813_v12, %v1492_v16  ;;  %v1912_v22 = vadd.f32 %v1848_v57, %v1527_v33  ;;  %v1447_v16 = vmul.f32 %v6985_v50, %v10869_v2  ;;  %v10875_v12 = vld [vmem:[#allocation11_spill] sm:$0xff] }
 0x230   : > { %2405 = vperm.xlu2 %6061, %v7310_v25   ;;  %2066 = vmatpush.msra.mxu2 %v1919_v41  ;;  %v1512_v8 = vadd.f32 %v1448_v21, %v10871_v58  ;;  %v1510_v9 = vadd.f32 %v1446_v11, %v10872_v10  ;;  %v1982_v59 = vmul.f32 %v1918_v15, %v1918_v15  ;;  %v7346_v41 = vmax.f32 %v1899_v26, 0.0  ;;  %v10882_v2 = vld [vmem:[#allocation75_spill] sm:$0xff] }
 0x231   : > { %2145 = vmatpush.msra.mxu0 %v1984_v31  ;;  %v7327_v13 = vmax.f32 %v1877_v19, 0.0  ;;  %v7329_v5 = vmax.f32 %v1912_v22, 0.0  ;;  %v1526_v40 = vadd.f32 %v1462_v60, %v10874_v17  ;;  %v1832_v47 = vmul.f32 %v6995_v39, %v1709_v29  ;;  %v7358_v31 = vld [vmem:[%s10534_s5 + $0xc0] sm:$0xff]  ;;  %v10879_v22 = vld [vmem:[#allocation128_spill] sm:$0xff] }
 0x232   : > { %2067 = vmatpush.msra.mxu2 %v1918_v15  ;;  %v1898_v14 = vadd.f32 %v1834_v48, %v1513_v62  ;;  %v1981_v21 = vmul.f32 %v1917_v38, %v1917_v38  ;;  %v1511_v57 = vadd.f32 %v1447_v16, %v10875_v12  ;;  %v1897_v1 = vadd.f32 %v1833_v42, %v1512_v8 }
 0x233   : > { %2146 = vmatpush.msra.mxu0 %v1983_v55  ;;  %2739 = vperm.xlu0 %6081, %v10873_v32   ;;  %v1980_v35 = vmul.f32 %v1916_v6, %v1916_v6  ;;  %10877 = vst [vmem:[#allocation25_spill] sm:$0xff] %v7358_v31  ;;  %v1426_v19 = vmul.f32 %v6985_v50, %v10878_v46  ;;  %v10881_v55 = vld [vmem:[#allocation28_spill] sm:$0xff]  ;;  %v10890_v46 = vld [vmem:[#allocation50_spill] sm:$0xff] }
 0x234   : > { %2068 = vmatpush.msra.mxu2 %v1917_v38  ;;  %2080 = vmatpush.msra.mxu1 %v7327_v13  ;;  %v1629_v33 = vpop.permute.xlu2 %1628  ;;  %v1769_v44 = vpop.permute.xlu1 %1768  ;;  %v7353_v18 = vmax.f32 %v1898_v14, 0.0  ;;  %v1896_v7 = vadd.f32 %v1832_v47, %v1511_v57  ;;  %v1445_v60 = vmul.f32 %v6985_v50, %v10880_v4  ;;  %v7373_v48 = vmax.f32 %v1897_v1, 0.0 }
 0x235   : > { %2147 = vmatpush.msra.mxu0 %v1982_v59  ;;  %2117 = vmatpush.msra.mxu3 %v7329_v5  ;;  %v1812_v11 = vmul.f32 %v6995_v39, %v1629_v33  ;;  %v1847_v3 = vmul.f32 %v6995_v39, %v1769_v44  ;;  %v1705_v49 = vpop.permute.xlu0 %1704  ;;  %v1105_v38 = vmul.f32 %v6987_v43, %v10881_v55  ;;  %v7397_v33 = vld [vmem:[%s10534_s5 + $0x60] sm:$0xff]  ;;  %v7402_v44 = vld [vmem:[%s10534_s5 + $0xb0] sm:$0xff] }
 0x236   : > { %2069 = vmatpush.msra.mxu2 %v1916_v6  ;;  %v1831_v29 = vmul.f32 %v6995_v39, %v1705_v49  ;;  %v1140_v16 = vmul.f32 %v6987_v43, %v10882_v2  ;;  %v1124_v62 = vmul.f32 %v6987_v43, %v10883_v61  ;;  %10884 = vst [vmem:[#allocation29_spill] sm:$0xff] %v7402_v44 }
 0x237   : > { %2148 = vmatpush.msra.mxu0 %v1981_v21  ;;  %6062 = vset.pattern.permute.xlu1 %v10851_v53  ;;  %v1876_v52 = vadd.f32 %v1812_v11, %v7282_v37  ;;  %v1911_v56 = vadd.f32 %v1847_v3, %v1526_v40  ;;  %v1461_v37 = vmul.f32 %v6985_v50, %v10879_v22  ;;  %v10885_v21 = vld [vmem:[#allocation36_spill] sm:$0xff]  ;;  %v10886_v3 = vld [vmem:[#allocation119_spill] sm:$0xff] }
 0x238   : > { %2094 = vmatpush.msrb.mxu2 %v7346_v41  ;;  %6063 = vset.pattern.permute.xlu2 %v10876_v54  ;;  %v1895_v15 = vadd.f32 %v1831_v29, %v1510_v9  ;;  %v1490_v8 = vadd.f32 %v1426_v19, %v1105_v38  ;;  %v1509_v6 = vadd.f32 %v1445_v60, %v1124_v62  ;;  %v10887_v29 = vld [vmem:[#allocation114_spill] sm:$0xff] }
 0x239   : > { %2566 = vperm.xlu1 %6062, %v7310_v25   ;;  %2149 = vmatpush.msra.mxu0 %v1980_v35  ;;  %v7365_v51 = vmax.f32 %v1876_v52, 0.0  ;;  %v7367_v20 = vmax.f32 %v1911_v56, 0.0  ;;  %v1525_v10 = vadd.f32 %v1461_v37, %v1140_v16  ;;  %v1425_v11 = vmul.f32 %v6985_v50, %v10885_v21  ;;  %v10888_v52 = vld [vmem:[#allocation42_spill] sm:$0xff] }
 0x23a   : > { %2691 = vperm.xlu2 %6063, %v7207_v45   ;;  %2095 = vmatpush.msrb.mxu2 %v7353_v18  ;;  %v7384_v45 = vmax.f32 %v1896_v7, 0.0  ;;  %v7387_v58 = vmax.f32 %v1895_v15, 0.0  ;;  %v1460_v49 = vmul.f32 %v6985_v50, %v10886_v3  ;;  %v1444_v1 = vmul.f32 %v6985_v50, %v10887_v29  ;;  %v10889_v7 = vld [vmem:[#allocation77_spill] sm:$0xff] }
 0x23b   : > { %2731 = vperm.xlu0 %6081, %v7358_v31   ;;  %2081 = vmatpush.msra.mxu1 %v7365_v51  ;;  %v1104_v56 = vmul.f32 %v6987_v43, %v10888_v52  ;;  %v1139_v15 = vmul.f32 %v6987_v43, %v10889_v7  ;;  %v1123_v19 = vmul.f32 %v6987_v43, %v10890_v46 }
 0x23c   : > { %2096 = vmatpush.msrb.mxu2 %v7373_v48  ;;  %2118 = vmatpush.msra.mxu3 %v7367_v20  ;;  %v1625_v42 = vpop.permute.xlu2 %1624  ;;  %v1765_v26 = vpop.permute.xlu1 %1764 }
 0x23d   : > { %v1811_v9 = vmul.f32 %v6995_v39, %v1625_v42  ;;  %v1846_v59 = vmul.f32 %v6995_v39, %v1765_v26  ;;  %v1701_v32 = vpop.permute.xlu0 %1700  ;;  %v1489_v4 = vadd.f32 %v1425_v11, %v1104_v56  ;;  %v1524_v60 = vadd.f32 %v1460_v49, %v1139_v15  ;;  %v10891_v26 = vld [vmem:[#allocation43_spill] sm:$0xff]  ;;  %v10895_v49 = vld [vmem:[#allocation64_spill] sm:$0xff] }
 0x23e   : > { %2097 = vmatpush.msrb.mxu2 %v7384_v45  ;;  %v1830_v17 = vmul.f32 %v6995_v39, %v1701_v32  ;;  %v1508_v16 = vadd.f32 %v1444_v1, %v1123_v19  ;;  %v10893_v32 = vld [vmem:[#allocation127_spill] sm:$0xff]  ;;  %v1138_v29 = vmul.f32 %v6987_v43, %v10895_v49  ;;  %v10902_v49 = vld [vmem:[#allocation60_spill] sm:$0xff] }
 0x23f   : > { %v1875_v40 = vadd.f32 %v1811_v9, %v1490_v8  ;;  %v1910_v47 = vadd.f32 %v1846_v59, %v1525_v10  ;;  %v1103_v8 = vmul.f32 %v6987_v43, %v10891_v26  ;;  %v10892_v10 = vld [vmem:[#allocation27_spill] sm:$0xff] }
 0x240   : > { %2098 = vmatpush.msrb.mxu2 %v7387_v58  ;;  %v1894_v14 = vadd.f32 %v1830_v17, %v1509_v6  ;;  %v1424_v9 = vmul.f32 %v6985_v50, %v10892_v10  ;;  %v1459_v6 = vmul.f32 %v6985_v50, %v10893_v32  ;;  %v7442_v17 = vld [vmem:[%s10534_s5 + $0x68] sm:$0xff]  ;;  %v10896_v1 = vld [vmem:[#allocation59_spill] sm:$0xff] }
 0x241   : > { %6064 = vset.pattern.permute.xlu1 %v10876_v54  ;;  %v7409_v12 = vmax.f32 %v1875_v40, 0.0  ;;  %v7411_v57 = vmax.f32 %v1910_v47, 0.0  ;;  %v2236_v40 = vld [vmem:[%s10534_s5 + $0xa0] sm:$0xff]  ;;  %v1122_v52 = vmul.f32 %v6987_v43, %v10896_v1  ;;  %v2234_v32 = vld [vmem:[%s10534_s5 + $0x90] sm:$0xff] }
 0x242   : > { %6065 = vset.pattern.permute.xlu2 %v10847_v0  ;;  %2695 = vperm.xlu1 %6064, %v7266_v24   ;;  %v7417_v35 = vmax.f32 %v1894_v14, 0.0  ;;  %v10894_v14 = vld [vmem:[#allocation112_spill] sm:$0xff]  ;;  %v1488_v56 = vadd.f32 %v1424_v9, %v1103_v8  ;;  %v1523_v46 = vadd.f32 %v1459_v6, %v1138_v29  ;;  %v10899_v8 = vld [vmem:[#allocation23_spill] sm:$0xff]  ;;  %v1121_v29 = vmul.f32 %v6987_v43, %v10902_v49  ;;  %v7521_v49 = vld [vmem:[%s10534_s5 + $0xe0] sm:$0xff] }
 0x243   : > { %2310 = vperm.xlu2 %6065, %v7397_v33   ;;  %2723 = vperm.xlu0 %6081, %v7402_v44   ;;  %v1443_v21 = vmul.f32 %v6985_v50, %v10894_v14  ;;  %v1102_v10 = vmul.f32 %v6987_v43, %v10899_v8  ;;  %v10900_v9 = vld [vmem:[#allocation103_spill] sm:$0xff]  ;;  %v10901_v14 = vld [vmem:[#allocation73_spill] sm:$0xff]  ;;  %v10905_v8 = vld [vmem:[#allocation38_spill] sm:$0xff] }
 0x244   : > { %2082 = vmatpush.msra.mxu1 %v7409_v12  ;;  %2099 = vmatpush.msrb.mxu2 %v7417_v35  ;;  %v1621_v22 = vpop.permute.xlu2 %1620  ;;  %v1761_v37 = vpop.permute.xlu1 %1760  ;;  %v10932_v44 = vld [vmem:[#allocation121_spill] sm:$0xff] }
 0x245   : > { %2119 = vmatpush.msra.mxu3 %v7411_v57  ;;  %v1810_v55 = vmul.f32 %v6995_v39, %v1621_v22  ;;  %v1845_v38 = vmul.f32 %v6995_v39, %v1761_v37  ;;  %v1697_v2 = vpop.permute.xlu0 %1696 }
 0x246   : > { %v1829_v61 = vmul.f32 %v6995_v39, %v1697_v2  ;;  %v10897_v2 = vld [vmem:[#allocation40_spill] sm:$0xff] }
 0x247   : > { %v1874_v62 = vadd.f32 %v1810_v55, %v1489_v4  ;;  %v1909_v42 = vadd.f32 %v1845_v38, %v1524_v60  ;;  %v1507_v4 = vadd.f32 %v1443_v21, %v1122_v52  ;;  %v1137_v21 = vmul.f32 %v6987_v43, %v10901_v14  ;;  %v6169_v52 = vld [vmem:[%s10534_s5 + $0xf0] sm:$0xff]  ;;  %v10907_v14 = vld [vmem:[#allocation74_spill] sm:$0xff] }
 0x248   : > { %v1893_v59 = vadd.f32 %v1829_v61, %v1508_v16  ;;  %v1423_v16 = vmul.f32 %v6985_v50, %v10897_v2 }
 0x249   : > { %v7447_v47 = vmax.f32 %v1874_v62, 0.0  ;;  %v7454_v3 = vmax.f32 %v1909_v42, 0.0  ;;  %v10898_v62 = vld [vmem:[#allocation126_spill] sm:$0xff] }
 0x24a   : > { %6066 = vset.pattern.permute.xlu1 %v10851_v53  ;;  %v7452_v11 = vmax.f32 %v1893_v59, 0.0  ;;  %v1458_v42 = vmul.f32 %v6985_v50, %v10898_v62  ;;  %v1442_v59 = vmul.f32 %v6985_v50, %v10900_v9  ;;  %v1487_v1 = vadd.f32 %v1423_v16, %v1102_v10  ;;  %v10906_v9 = vld [vmem:[#allocation111_spill] sm:$0xff] }
 0x24b   : > { %6067 = vset.pattern.permute.xlu2 %v10851_v53  ;;  %2490 = vperm.xlu1 %6066, %v7397_v33   ;;  %v1101_v10 = vmul.f32 %v6987_v43, %v10905_v8  ;;  %v10911_v8 = vld [vmem:[#allocation90_spill] sm:$0xff] }
 0x24c   : > { %2494 = vperm.xlu2 %6067, %v7442_v17   ;;  %2715 = vperm.xlu0 %6081, %v2236_v40   ;;  %v1617_v7 = vpop.permute.xlu2 %1616  ;;  %v1757_v15 = vpop.permute.xlu1 %1756 }
 0x24d   : > { %2083 = vmatpush.msra.mxu1 %v7447_v47  ;;  %2100 = vmatpush.msrb.mxu2 %v7452_v11  ;;  %v1809_v19 = vmul.f32 %v6995_v39, %v1617_v7  ;;  %v1844_v22 = vmul.f32 %v6995_v39, %v1757_v15  ;;  %v1693_v37 = vpop.permute.xlu0 %1692  ;;  %v1522_v15 = vadd.f32 %v1458_v42, %v1137_v21 }
 0x24e   : > { %2120 = vmatpush.msra.mxu3 %v7454_v3  ;;  %v1828_v60 = vmul.f32 %v6995_v39, %v1693_v37  ;;  %v1506_v37 = vadd.f32 %v1442_v59, %v1121_v29  ;;  %v1441_v59 = vmul.f32 %v6985_v50, %v10906_v9  ;;  %v1136_v21 = vmul.f32 %v6987_v43, %v10907_v14  ;;  %v7526_v29 = vld [vmem:[%s10534_s5 + $0x88] sm:$0xff]  ;;  %v10912_v9 = vld [vmem:[#allocation125_spill] sm:$0xff] }
 0x24f   : > { %v1873_v55 = vadd.f32 %v1809_v19, %v1488_v56  ;;  %v1908_v38 = vadd.f32 %v1844_v22, %v1523_v46  ;;  %10908 = vst [vmem:[#allocation51_spill] sm:$0xff] %v7526_v29  ;;  %v1456_v14 = vmul.f32 %v6985_v50, %v10912_v9  ;;  %v10916_v9 = vld [vmem:[#allocation96_spill] sm:$0xff] }
 0x250   : > { %v1892_v61 = vadd.f32 %v1828_v60, %v1507_v4 }
 0x251   : > { %v7473_v26 = vmax.f32 %v1873_v55, 0.0  ;;  %v7484_v40 = vmax.f32 %v1908_v38, 0.0  ;;  %v10903_v38 = vld [vmem:[#allocation97_spill] sm:$0xff] }
 0x252   : > { %v7482_v6 = vmax.f32 %v1892_v61, 0.0  ;;  %v1422_v2 = vmul.f32 %v6985_v50, %v10903_v38 }
 0x253   : > { %6068 = vset.pattern.permute.xlu1 %v10876_v54  ;;  %2084 = vmatpush.msra.mxu1 %v7473_v26 }
 0x254   : > { %6069 = vset.pattern.permute.xlu2 %v10876_v54  ;;  %2755 = vperm.xlu1 %6068, %v6169_v52   ;;  %v1613_v56 = vpop.permute.xlu2 %1612  ;;  %v1753_v7 = vpop.permute.xlu1 %1752 }
 0x255   : > { %2759 = vperm.xlu2 %6069, %v7310_v25   ;;  %2707 = vperm.xlu0 %6081, %v2234_v32   ;;  %v1808_v46 = vmul.f32 %v6995_v39, %v1613_v56  ;;  %v1843_v19 = vmul.f32 %v6995_v39, %v1753_v7  ;;  %v1689_v22 = vpop.permute.xlu0 %1688  ;;  %v10904_v25 = vld [vmem:[#allocation116_spill] sm:$0xff]  ;;  %v1486_v56 = vadd.f32 %v1422_v2, %v1101_v10 }
 0x256   : > { %2101 = vmatpush.msrb.mxu2 %v7482_v6  ;;  %2121 = vmatpush.msra.mxu3 %v7484_v40  ;;  %v1827_v4 = vmul.f32 %v6995_v39, %v1689_v22  ;;  %v1457_v61 = vmul.f32 %v6985_v50, %v10904_v25  ;;  %v1421_v10 = vmul.f32 %v6985_v50, %v10911_v8 }
 0x257   : > { %v1872_v60 = vadd.f32 %v1808_v46, %v1487_v1  ;;  %v1907_v55 = vadd.f32 %v1843_v19, %v1522_v15  ;;  %v10909_v1 = vld [vmem:[#allocation47_spill] sm:$0xff]  ;;  %v6170_v19 = vld [vmem:[%s10534_s5 + $0xe8] sm:$0xff] }
 0x258   : > { %v1891_v16 = vadd.f32 %v1827_v4, %v1506_v37  ;;  %v1120_v52 = vmul.f32 %v6987_v43, %v10909_v1  ;;  %v1521_v46 = vadd.f32 %v1457_v61, %v1136_v21  ;;  %v10913_v1 = vld [vmem:[#allocation109_spill] sm:$0xff] }
 0x259   : > { %v7506_v62 = vmax.f32 %v1872_v60, 0.0  ;;  %v7508_v42 = vmax.f32 %v1907_v55, 0.0 }
 0x25a   : > { %v7514_v32 = vmax.f32 %v1891_v16, 0.0  ;;  %v1505_v60 = vadd.f32 %v1441_v59, %v1120_v52  ;;  %v10910_v16 = vld [vmem:[#allocation39_spill] sm:$0xff]  ;;  %v1440_v52 = vmul.f32 %v6985_v50, %v10913_v1  ;;  %v10917_v1 = vld [vmem:[#allocation124_spill] sm:$0xff] }
 0x25b   : > { %2085 = vmatpush.msra.mxu1 %v7506_v62  ;;  %2122 = vmatpush.msra.mxu3 %v7508_v42  ;;  %v1100_v25 = vmul.f32 %v6987_v43, %v10910_v16 }
 0x25c   : > { %6070 = vset.pattern.permute.xlu1 %v10847_v0  ;;  %2102 = vmatpush.msrb.mxu2 %v7514_v32  ;;  %v1609_v7 = vpop.permute.xlu2 %1608  ;;  %v1749_v15 = vpop.permute.xlu1 %1748 }
 0x25d   : > { %6071 = vset.pattern.permute.xlu2 %v10851_v53  ;;  %2395 = vperm.xlu1 %6070, %v6170_v19   ;;  %v1807_v22 = vmul.f32 %v6995_v39, %v1609_v7  ;;  %v1842_v37 = vmul.f32 %v6995_v39, %v1749_v15  ;;  %v1685_v4 = vpop.permute.xlu0 %1684 }
 0x25e   : > { %2554 = vperm.xlu2 %6071, %v7521_v49   ;;  %2703 = vperm.xlu0 %6081, %v7526_v29   ;;  %v1826_v55 = vmul.f32 %v6995_v39, %v1685_v4  ;;  %v1485_v4 = vadd.f32 %v1421_v10, %v1100_v25 }
 0x25f   : > { %v1871_v38 = vadd.f32 %v1807_v22, %v1486_v56  ;;  %v1906_v2 = vadd.f32 %v1842_v37, %v1521_v46  ;;  %v10914_v56 = vld [vmem:[#allocation61_spill] sm:$0xff]  ;;  %v10915_v46 = vld [vmem:[#allocation56_spill] sm:$0xff] }
 0x260   : > { %v1890_v61 = vadd.f32 %v1826_v55, %v1505_v60  ;;  %v1135_v15 = vmul.f32 %v6987_v43, %v10914_v56  ;;  %v1119_v19 = vmul.f32 %v6987_v43, %v10915_v46 }
 0x261   : > { %v7549_v21 = vmax.f32 %v1871_v38, 0.0  ;;  %v7551_v59 = vmax.f32 %v1906_v2, 0.0 }
 0x262   : > { %v7555_v7 = vmax.f32 %v1890_v61, 0.0  ;;  %v1520_v60 = vadd.f32 %v1456_v14, %v1135_v15  ;;  %v1504_v16 = vadd.f32 %v1440_v52, %v1119_v19  ;;  %v1420_v14 = vmul.f32 %v6985_v50, %v10916_v9  ;;  %v10918_v15 = vld [vmem:[#allocation102_spill] sm:$0xff] }
 0x263   : > { %2086 = vmatpush.msra.mxu1 %v7549_v21  ;;  %2123 = vmatpush.msra.mxu3 %v7551_v59  ;;  %v1455_v52 = vmul.f32 %v6985_v50, %v10917_v1  ;;  %v1439_v46 = vmul.f32 %v6985_v50, %v10918_v15 }
 0x264   : > { %2103 = vmatpush.msrb.mxu2 %v7555_v7  ;;  %v1605_v22 = vpop.permute.xlu2 %1604  ;;  %v1745_v37 = vpop.permute.xlu1 %1744 }
 0x265   : > { %6072 = vset.pattern.permute.xlu1 %v10876_v54  ;;  %v1806_v55 = vmul.f32 %v6995_v39, %v1605_v22  ;;  %v1841_v38 = vmul.f32 %v6995_v39, %v1745_v37  ;;  %v1681_v2 = vpop.permute.xlu0 %1680  ;;  %v10919_v22 = vld [vmem:[#allocation20_spill] sm:$0xff]  ;;  %v10920_v37 = vld [vmem:[#allocation71_spill] sm:$0xff] }
 0x266   : > { %6073 = vset.pattern.permute.xlu2 %v10876_v54  ;;  %2683 = vperm.xlu1 %6072, %v7397_v33   ;;  %v1825_v61 = vmul.f32 %v6995_v39, %v1681_v2 }
 0x267   : > { %6141 = vset.pattern.permute.xlu0 %v10847_v0  ;;  %2687 = vperm.xlu2 %6073, %v7442_v17   ;;  %v1870_v25 = vadd.f32 %v1806_v55, %v1485_v4  ;;  %v1905_v8 = vadd.f32 %v1841_v38, %v1520_v60  ;;  %v1134_v4 = vmul.f32 %v6987_v43, %v10920_v37  ;;  %v10922_v60 = vld [vmem:[#allocation57_spill] sm:$0xff]  ;;  %v2841_v38 = vld [vmem:[%s10535_s6 + $0x70] sm:$0xff] }
 0x268   : > { %2325 = vperm.xlu0 %6141, %v7266_v24   ;;  %v1889_v10 = vadd.f32 %v1825_v61, %v1504_v16  ;;  %v1099_v24 = vmul.f32 %v6987_v43, %v10919_v22  ;;  %v1118_v55 = vmul.f32 %v6987_v43, %v10922_v60  ;;  %v751_v37 = vld [vmem:[%s665_s2] sm:$0xff]  ;;  %s5922_s2 = sshll.u32 %s11106_s30, 6 }
 0x269   : > { %v7578_v56 = vmax.f32 %v1870_v25, 0.0  ;;  %v7580_v33 = vmax.f32 %v1905_v8, 0.0  ;;  %v1519_v25 = vadd.f32 %v1455_v52, %v1134_v4  ;;  %v2842_v8 = vld [vmem:[%s10535_s6 + $0x78] sm:$0xff]  ;;  %2045 = vst [vmem:[#allocation1] ss:$4 sm:$0xff] %v751_v37  ;;  %v10923_v4 = vld [vmem:[#allocation113_spill] sm:$0xff]  ;;  %s9405_s3 = scalar_lea.vmem %s11038_s25, %s5922_s2 }
 0x26a   : > { %v7584_v19 = vmax.f32 %v1889_v10, 0.0  ;;  %v1484_v61 = vadd.f32 %v1420_v14, %v1099_v24  ;;  %v1503_v15 = vadd.f32 %v1439_v46, %v1118_v55  ;;  %v1454_v60 = vmul.f32 %v6985_v50, %v10923_v4  ;;  %v10924_v55 = vld [vmem:[#allocation108_spill] sm:$0xff] }
 0x26b   : > { %2087 = vmatpush.msra.mxu1 %v7578_v56  ;;  %2124 = vmatpush.msra.mxu3 %v7580_v33 }
 0x26c   : > { %2104 = vmatpush.msrb.mxu2 %v7584_v19  ;;  %v1601_v2 = vpop.permute.xlu2 %1600  ;;  %v1741_v16 = vpop.permute.xlu1 %1740 }
 0x26d   : > { %v1805_v10 = vmul.f32 %v6995_v39, %v1601_v2  ;;  %v1840_v9 = vmul.f32 %v6995_v39, %v1741_v16  ;;  %v1677_v1 = vpop.permute.xlu0 %1676  ;;  %v1438_v16 = vmul.f32 %v6985_v50, %v10924_v55 }
 0x26e   : > { %6074 = vset.pattern.permute.xlu1 %v10847_v0  ;;  %v1824_v22 = vmul.f32 %v6995_v39, %v1677_v1 }
 0x26f   : > { %6075 = vset.pattern.permute.xlu2 %v10847_v0  ;;  %2931 = vperm.xlu1 %6074, %v2841_v38   ;;  %v1869_v14 = vadd.f32 %v1805_v10, %v1484_v61  ;;  %v1904_v52 = vadd.f32 %v1840_v9, %v1519_v25  ;;  %v10925_v38 = vld [vmem:[#allocation72_spill] sm:$0xff] }
 0x270   : > { %2315 = vperm.xlu0 %6141, %v7442_v17   ;;  %2936 = vperm.xlu2 %6075, %v2842_v8   ;;  %v1888_v24 = vadd.f32 %v1824_v22, %v1503_v15  ;;  %v1133_v61 = vmul.f32 %v6987_v43, %v10925_v38  ;;  %v10926_v17 = vld [vmem:[#allocation44_spill] sm:$0xff] }
 0x271   : > { %v7612_v2 = vmax.f32 %v1869_v14, 0.0  ;;  %v7614_v46 = vmax.f32 %v1904_v52, 0.0  ;;  %v1117_v25 = vmul.f32 %v6987_v43, %v10926_v17  ;;  %v7629_v8 = vld [vmem:[%s10534_s5 + $0x58] sm:$0xff]  ;;  %v7637_v52 = vld [vmem:[%s10534_s5 + $0x50] sm:$0xff]  ;;  %v10929_v17 = vld [vmem:[#allocation106_spill] sm:$0xff] }
 0x272   : > { %v7618_v1 = vmax.f32 %v1888_v24, 0.0  ;;  %v1518_v9 = vadd.f32 %v1454_v60, %v1133_v61  ;;  %v2046_v24 = vld.sshfl [vmem:[#allocation1] sm:$0xff pattern:$0x73625140] }
 0x273   : > { %2088 = vmatpush.msra.mxu1 %v7612_v2  ;;  %2125 = vmatpush.msra.mxu3 %v7614_v46  ;;  %v1502_v37 = vadd.f32 %v1438_v16, %v1117_v25  ;;  %v10928_v16 = vld [vmem:[#allocation123_spill] sm:$0xff]  ;;  %v1437_v25 = vmul.f32 %v6985_v50, %v10929_v17 }
 0x274   : > { %2105 = vmatpush.msrb.mxu2 %v7618_v1  ;;  %v1737_v10 = vpop.permute.xlu1 %1736  ;;  %v1453_v38 = vmul.f32 %v6985_v50, %v10928_v16  ;;  %2150 = vmatmul.f32.vlgmr.msra.gmra.mxu0 %v2046_v24 }
 0x275   : > { %v1839_v15 = vmul.f32 %v6995_v39, %v1737_v10  ;;  %v1673_v22 = vpop.permute.xlu0 %1672  ;;  %2070 = vmatmul.f32.vlgmr.msra.gmra.mxu2 %v2046_v24 }
 0x276   : > { %v1823_v14 = vmul.f32 %v6995_v39, %v1673_v22  ;;  %v7640_v55 = vpop.permute.xlu2 %2320  ;;  %v10931_v22 = vld [vmem:[#allocation53_spill] sm:$0xff] }
 0x277   : > { %2305 = vperm.xlu1 %6074, %v7629_v8   ;;  %v1903_v4 = vadd.f32 %v1839_v15, %v1518_v9  ;;  %10927 = vst [vmem:[#allocation30_spill] sm:$0xff] %v7640_v55  ;;  %v10930_v9 = vld [vmem:[#allocation58_spill] sm:$0xff] }
 0x278   : > { %2390 = vperm.xlu0 %6141, %v7521_v49   ;;  %6076 = vset.pattern.permute.xlu2 %v10851_v53  ;;  %v1887_v60 = vadd.f32 %v1823_v14, %v1502_v37  ;;  %v1132_v15 = vmul.f32 %v6987_v43, %v10930_v9  ;;  %v1116_v37 = vmul.f32 %v6987_v43, %v10931_v22 }
 0x279   : > { %2482 = vperm.xlu2 %6076, %v7637_v52   ;;  %v7647_v61 = vmax.f32 %v1903_v4, 0.0  ;;  %v1452_v22 = vmul.f32 %v6985_v50, %v10932_v44 }
 0x27a   : > { %v7651_v10 = vmax.f32 %v1887_v60, 0.0  ;;  %v1517_v16 = vadd.f32 %v1453_v38, %v1132_v15  ;;  %v1501_v55 = vadd.f32 %v1437_v25, %v1116_v37  ;;  %v10935_v25 = vld [vmem:[#allocation2_spill] sm:$0xff] }
 0x27b   : > { %2126 = vmatpush.msra.mxu3 %v7647_v61  ;;  %v1436_v37 = vmul.f32 %v6985_v50, %v10935_v25 }
 0x27c   : > { %2106 = vmatpush.msrb.mxu2 %v7651_v10  ;;  %v1733_v14 = vpop.permute.xlu1 %1732 }
 0x27d   : > { %v1838_v4 = vmul.f32 %v6995_v39, %v1733_v14  ;;  %v1669_v24 = vpop.permute.xlu0 %1668 }
 0x27e   : > { %v1822_v17 = vmul.f32 %v6995_v39, %v1669_v24 }
 0x27f   : > { %6077 = vset.pattern.permute.xlu1 %v10851_v53  ;;  %v1902_v60 = vadd.f32 %v1838_v4, %v1517_v16  ;;  %v10936_v16 = vld [vmem:[#allocation68_spill] sm:$0xff] }
 0x280   : > { %2300 = vperm.xlu0 %6141, %v7637_v52   ;;  %2486 = vperm.xlu1 %6077, %v7629_v8   ;;  %v1886_v9 = vadd.f32 %v1822_v17, %v1501_v55  ;;  %v1131_v4 = vmul.f32 %v6987_v43, %v10936_v16  ;;  %v10937_v55 = vld [vmem:[#allocation54_spill] sm:$0xff]  ;;  %v2857_v16 = vld [vmem:[%s10535_s6 + $0xf0] sm:$0xff] }
 0x281   : > { %6078 = vset.pattern.permute.xlu2 %v10876_v54  ;;  %v7667_v38 = vmax.f32 %v1902_v60, 0.0  ;;  %v7669_v15 = vpop.permute.xlu2 %2502  ;;  %v1115_v44 = vmul.f32 %v6987_v43, %v10937_v55  ;;  %v2840_v60 = vld [vmem:[%s10535_s6 + $0x68] sm:$0xff] }
 0x282   : > { %10934 = vst [vmem:[#allocation35_spill] sm:$0xff] %v7669_v15  ;;  %2747 = vperm.xlu2 %6078, %v7521_v49   ;;  %v7674_v14 = vmax.f32 %v1886_v9, 0.0  ;;  %v1516_v17 = vadd.f32 %v1452_v22, %v1131_v4  ;;  %v2858_v22 = vld [vmem:[%s10535_s6 + $0xf8] sm:$0xff] }
 0x283   : > { %10933 = vst [vmem:[#allocation33_spill] sm:$0xff] %v7667_v38  ;;  %2127 = vmatpush.msra.mxu3 %v7667_v38  ;;  %v1500_v25 = vadd.f32 %v1436_v37, %v1115_v44  ;;  %v10940_v44 = vld [vmem:[#allocation105_spill] sm:$0xff]  ;;  %v6171_v38 = vld [vmem:[%s10534_s5 + $0xd0] sm:$0xff] }
 0x284   : > { %2107 = vmatpush.msrb.mxu2 %v7674_v14  ;;  %v1729_v24 = vpop.permute.xlu1 %1728 }
 0x285   : > { %v1837_v49 = vmul.f32 %v6995_v39, %v1729_v24  ;;  %v1665_v9 = vpop.permute.xlu0 %1664  ;;  %v10939_v24 = vld [vmem:[#allocation95_spill] sm:$0xff] }
 0x286   : > { %v1821_v15 = vmul.f32 %v6995_v39, %v1665_v9  ;;  %v1419_v37 = vmul.f32 %v6985_v50, %v10939_v24  ;;  %v1435_v9 = vmul.f32 %v6985_v50, %v10940_v44 }
 0x287   : > { %v1901_v29 = vadd.f32 %v1837_v49, %v1516_v17  ;;  %v10942_v49 = vld [vmem:[#allocation34_spill] sm:$0xff] }
 0x288   : > { %2926 = vperm.xlu0 %6141, %v2840_v60   ;;  %6079 = vset.pattern.permute.xlu1 %v10847_v0  ;;  %v1885_v4 = vadd.f32 %v1821_v15, %v1500_v25  ;;  %v1098_v15 = vmul.f32 %v6987_v43, %v10942_v49  ;;  %v7722_v49 = vld [vmem:[%s10534_s5 + $0xd8] sm:$0xff] }
 0x289   : > { %3011 = vperm.xlu1 %6079, %v2857_v16   ;;  %v7694_v55 = vmax.f32 %v1901_v29, 0.0  ;;  %v10943_v29 = vld [vmem:[#allocation41_spill] sm:$0xff]  ;;  %v7714_v16 = vld [vmem:[%s10534_s5 + $0xc8] sm:$0xff] }
 0x28a   : > { %6080 = vset.pattern.permute.xlu2 %v10847_v0  ;;  %v7701_v17 = vmax.f32 %v1885_v4, 0.0  ;;  %v7703_v60 = vpop.permute.xlu2 %2405  ;;  %v1114_v25 = vmul.f32 %v6987_v43, %v10943_v29  ;;  %v1483_v44 = vadd.f32 %v1419_v37, %v1098_v15  ;;  %v10944_v37 = vld [vmem:[#allocation110_spill] sm:$0xff] }
 0x28b   : > { %10938 = vst [vmem:[#allocation37_spill] sm:$0xff] %v7694_v55  ;;  %3016 = vperm.xlu2 %6080, %v2858_v22   ;;  %2128 = vmatpush.msra.mxu3 %v7694_v55 }
 0x28c   : > { %10941 = vst [vmem:[#allocation45_spill] sm:$0xff] %v7703_v60  ;;  %2108 = vmatpush.msrb.mxu2 %v7701_v17  ;;  %v1499_v60 = vadd.f32 %v1435_v9, %v1114_v25  ;;  %v1451_v9 = vmul.f32 %v6985_v50, %v10944_v37  ;;  %v10948_v37 = vld [vmem:[#allocation22_spill] sm:$0xff] }
 0x28d   : > { %v1597_v4 = vpop.permute.xlu1 %1596  ;;  %v1661_v24 = vpop.permute.xlu0 %1660 }
 0x28e   : > { %v1804_v22 = vmul.f32 %v6995_v39, %v1597_v4  ;;  %v1820_v31 = vmul.f32 %v6995_v39, %v1661_v24  ;;  %v2027_v4 = vmul.f32 %v7346_v41, %v7346_v41  ;;  %v10945_v24 = vld [vmem:[#allocation8_spill] sm:$0xff]  ;;  %v2026_v41 = vmul.f32 %v7353_v18, %v7353_v18 }
 0x28f   : > { %v2009_v18 = vmul.f32 %v7176_v63, %v7176_v63  ;;  %v7773_v63 = vld.sshfl [vmem:[#allocation1 + $0x18] sm:$0xff pattern:$0x73625140] }
 0x290   : > { %2375 = vperm.xlu0 %6141, %v7714_v16   ;;  %v1868_v29 = vadd.f32 %v1804_v22, %v1483_v44  ;;  %v1884_v55 = vadd.f32 %v1820_v31, %v1499_v60  ;;  %v2011_v31 = vmul.f32 %v10945_v24, %v10945_v24  ;;  %v7738_v60 = vld.sshfl [vmem:[#allocation1 + $0x10] sm:$0xff pattern:$0x73625140]  ;;  %v7740_v44 = vld.sshfl [vmem:[#allocation1 + $0x8] sm:$0xff pattern:$0x73625140]  ;;  %v2010_v24 = vmul.f32 %v10948_v37, %v10948_v37 }
 0x291   : > { %2380 = vperm.xlu1 %6079, %v6171_v38   ;;  %v10946_v38 = vld [vmem:[#allocation69_spill] sm:$0xff]  ;;  %v2003_v37 = vmul.f32 %v7409_v12, %v7409_v12  ;;  %v2002_v12 = vmul.f32 %v7447_v47, %v7447_v47  ;;  %v7850_v47 = vld [vmem:[%s10534_s5 + $0x48] sm:$0xff] }
 0x292   : > { %v7729_v15 = vmax.f32 %v1868_v29, 0.0  ;;  %v7731_v25 = vmax.f32 %v1884_v55, 0.0  ;;  %v1130_v22 = vmul.f32 %v6987_v43, %v10946_v38  ;;  %v2837_v55 = vld [vmem:[%s10535_s6 + $0x50] sm:$0xff] }
 0x293   : > { %2385 = vperm.xlu2 %6080, %v7722_v49  }
 0x294   : > { %2089 = vmatpush.msra.mxu1 %v7729_v15  ;;  %2109 = vmatpush.msrb.mxu2 %v7731_v25  ;;  %v7746_v50 = vpop.permute.xlu2 %2691  ;;  %v1515_v43 = vadd.f32 %v1451_v9, %v1130_v22  ;;  %v2024_v9 = vmul.f32 %v7384_v45, %v7384_v45  ;;  %v2043_v45 = vmul.f32 %v7211_v34, %v7211_v34 }
 0x295   : > { %10947 = vst [vmem:[#allocation46_spill] sm:$0xff] %v7746_v50  ;;  %v1725_v29 = vpop.permute.xlu0 %1724  ;;  %2110 = vmatmul.f32.vlgmr.msrb.gmra.mxu2 %v7738_v60  ;;  %2090 = vmatmul.f32.vlgmr.msra.gmra.mxu1 %v7740_v44  ;;  %v2021_v34 = vmul.f32 %v7452_v11, %v7452_v11  ;;  %v2020_v11 = vmul.f32 %v7482_v6, %v7482_v6 }
 0x296   : > { %2154 = vmatpush.msrb.mxu1 %v2011_v31  ;;  %2174 = vmatpush.msra.mxu2 %v2027_v4  ;;  %v1836_v38 = vmul.f32 %v6995_v39, %v1725_v29  ;;  %v7758_v50 = vpop.permute.xlu1 %2498  ;;  %v2025_v4 = vmul.f32 %v7373_v48, %v7373_v48  ;;  %v2008_v39 = vmul.f32 %v7209_v27, %v7209_v27  ;;  %v7783_v27 = vld [vmem:[%s10534_s5 + $0x38] sm:$0xff] }
 0x297   : > { %v2007_v48 = vmul.f32 %v7246_v28, %v7246_v28  ;;  %v2006_v28 = vmul.f32 %v7289_v30, %v7289_v30  ;;  %v2005_v29 = vmul.f32 %v7327_v13, %v7327_v13  ;;  %v2004_v13 = vmul.f32 %v7365_v51, %v7365_v51  ;;  %v7825_v51 = vld [vmem:[%s10534_s5 + $0xb8] sm:$0xff] }
 0x298   : > { %2155 = vmatpush.msrb.mxu1 %v2010_v24  ;;  %2175 = vmatpush.msra.mxu2 %v2026_v41  ;;  %v1900_v31 = vadd.f32 %v1836_v38, %v1515_v43  ;;  %v2023_v41 = vmul.f32 %v7387_v58, %v7387_v58  ;;  %v2022_v58 = vmul.f32 %v7417_v35, %v7417_v35 }
 0x299   : > { %2911 = vperm.xlu0 %6141, %v2837_v55   ;;  %6082 = vset.pattern.permute.xlu1 %v10851_v53  ;;  %v2041_v35 = vmul.f32 %v7293_v23, %v7293_v23  ;;  %v2040_v23 = vmul.f32 %v7329_v5, %v7329_v5  ;;  %v2019_v24 = vmul.f32 %v7514_v32, %v7514_v32 }
 0x29a   : > { %2156 = vmatpush.msrb.mxu1 %v2009_v18  ;;  %2550 = vperm.xlu1 %6082, %v7722_v49   ;;  %v7770_v22 = vmax.f32 %v1900_v31, 0.0  ;;  %v2039_v6 = vmul.f32 %v7367_v20, %v7367_v20  ;;  %v2018_v5 = vmul.f32 %v7555_v7, %v7555_v7  ;;  %v2038_v32 = vmul.f32 %v7411_v57, %v7411_v57  ;;  %v7841_v20 = vld [vmem:[%s10534_s5 + $0x40] sm:$0xff] }
 0x29b   : > { %2176 = vmatpush.msra.mxu2 %v2025_v4  ;;  %6083 = vset.pattern.permute.xlu2 %v10876_v54  ;;  %v2001_v7 = vmul.f32 %v7473_v26, %v7473_v26  ;;  %v2017_v43 = vmul.f32 %v7584_v19, %v7584_v19  ;;  %v2037_v38 = vmul.f32 %v7454_v3, %v7454_v3  ;;  %v2835_v4 = vld [vmem:[%s10535_s6 + $0x40] sm:$0xff] }
 0x29c   : > { %2157 = vmatpush.msrb.mxu1 %v2008_v39  ;;  %2675 = vperm.xlu2 %6083, %v7637_v52   ;;  %v2042_v52 = vmul.f32 %v7250_v36, %v7250_v36  ;;  %v2839_v36 = vld [vmem:[%s10535_s6 + $0x60] sm:$0xff]  ;;  %v2016_v26 = vmul.f32 %v7618_v1, %v7618_v1  ;;  %v2000_v19 = vmul.f32 %v7506_v62, %v7506_v62 }
 0x29d   : > { %2177 = vmatpush.msra.mxu2 %v2024_v9  ;;  %2129 = vmatpush.msra.mxu3 %v7770_v22  ;;  %v7790_v55 = vpop.permute.xlu2 %2310  ;;  %v2036_v18 = vmul.f32 %v7484_v40, %v7484_v40  ;;  %v1999_v3 = vmul.f32 %v7549_v21, %v7549_v21  ;;  %v2015_v1 = vmul.f32 %v7651_v10, %v7651_v10 }
 0x29e   : > { %2158 = vmatpush.msrb.mxu1 %v2007_v48  ;;  %2130 = vmatmul.f32.vlgmr.msra.gmra.mxu3 %v7773_v63  ;;  %v2035_v62 = vmul.f32 %v7508_v42, %v7508_v42  ;;  %v1998_v40 = vmul.f32 %v7578_v56, %v7578_v56  ;;  %v2014_v39 = vmul.f32 %v7674_v14, %v7674_v14  ;;  %v10950_v48 = vld [vmem:[#allocation37_spill] sm:$0xff] }
 0x29f   : > { %2178 = vmatpush.msra.mxu2 %v2023_v41  ;;  %2194 = vmatpush.msrb.mxu3 %v2043_v45  ;;  %v2034_v21 = vmul.f32 %v7551_v59, %v7551_v59  ;;  %v1997_v10 = vmul.f32 %v7612_v2, %v7612_v2  ;;  %v2013_v42 = vmul.f32 %v7701_v17, %v7701_v17  ;;  %v7902_v17 = vld [vmem:[%s10534_s5 + $0x28] sm:$0xff] }
 0x2a0   : > { %2159 = vmatpush.msrb.mxu1 %v2006_v28  ;;  %v2033_v56 = vmul.f32 %v7580_v33, %v7580_v33  ;;  %v1996_v59 = vmul.f32 %v7729_v15, %v7729_v15  ;;  %v2012_v2 = vmul.f32 %v7731_v25, %v7731_v25  ;;  %v2032_v33 = vmul.f32 %v7614_v46, %v7614_v46  ;;  %v10949_v46 = vld [vmem:[#allocation33_spill] sm:$0xff] }
 0x2a1   : > { %2285 = vperm.xlu0 %6141, %v7783_v27   ;;  %2179 = vmatpush.msra.mxu2 %v2022_v58  ;;  %v7802_v30 = vpop.permute.xlu1 %2400  ;;  %v2031_v15 = vmul.f32 %v7647_v61, %v7647_v61  ;;  %v2030_v9 = vmul.f32 %v10949_v46, %v10949_v46  ;;  %v2029_v41 = vmul.f32 %v10950_v48, %v10950_v48  ;;  %v2855_v61 = vld [vmem:[%s10535_s6 + $0xe0] sm:$0xff] }
 0x2a2   : > { %2195 = vmatpush.msrb.mxu3 %v2042_v52  ;;  %2160 = vmatpush.msrb.mxu1 %v2005_v29  ;;  %v2833_v52 = vld [vmem:[%s10535_s6 + $0x30] sm:$0xff]  ;;  %v10951_v29 = vld [vmem:[#allocation25_spill] sm:$0xff] }
 0x2a3   : > { %6084 = vset.pattern.permute.xlu1 %v10876_v54  ;;  %2180 = vmatpush.msra.mxu2 %v2021_v34  ;;  %v7952_v34 = vld [vmem:[%s10534_s5 + $0x18] sm:$0xff] }
 0x2a4   : > { %2679 = vperm.xlu1 %6084, %v7629_v8   ;;  %2196 = vmatpush.msrb.mxu3 %v2041_v35 }
 0x2a5   : > { %6085 = vset.pattern.permute.xlu2 %v10847_v0  ;;  %2161 = vmatpush.msrb.mxu1 %v2004_v13 }
 0x2a6   : > { %2921 = vperm.xlu2 %6085, %v2839_v36   ;;  %2181 = vmatpush.msra.mxu2 %v2020_v11  ;;  %v7829_v8 = vpop.permute.xlu2 %2494  ;;  %v7968_v11 = vld [vmem:[%s10534_s5 + $0x98] sm:$0xff] }
 0x2a7   : > { %2197 = vmatpush.msrb.mxu3 %v2040_v23  ;;  %2162 = vmatpush.msrb.mxu1 %v2003_v37  ;;  %10953 = vst [vmem:[#allocation49_spill] sm:$0xff] %v7968_v11 }
 0x2a8   : > { %2182 = vmatpush.msra.mxu2 %v2019_v24 }
 0x2a9   : > { %2365 = vperm.xlu0 %6141, %v7825_v51   ;;  %2198 = vmatpush.msrb.mxu3 %v2039_v6  ;;  %v2831_v6 = vld [vmem:[%s10535_s6 + $0x20] sm:$0xff] }
 0x2aa   : > { %2163 = vmatpush.msrb.mxu1 %v2002_v12  ;;  %2183 = vmatpush.msra.mxu2 %v2018_v5  ;;  %v2222_v5 = vld [vmem:[%s10534_s5 + $0x30] sm:$0xff] }
 0x2ab   : > { %2199 = vmatpush.msrb.mxu3 %v2038_v32  ;;  %v7853_v57 = vpop.permute.xlu1 %2566  ;;  %v2838_v32 = vld [vmem:[%s10535_s6 + $0x58] sm:$0xff] }
 0x2ac   : > { %6086 = vset.pattern.permute.xlu1 %v10847_v0  ;;  %2164 = vmatpush.msrb.mxu1 %v2001_v7 }
 0x2ad   : > { %2290 = vperm.xlu1 %6086, %v7841_v20   ;;  %2184 = vmatpush.msra.mxu2 %v2017_v43  ;;  %v8001_v43 = vld [vmem:[%s10534_s5 + $0x8] sm:$0xff] }
 0x2ae   : > { %2200 = vmatpush.msrb.mxu3 %v2037_v38  ;;  %2295 = vperm.xlu2 %6085, %v7850_v47   ;;  %10956 = vst [vmem:[#allocation62_spill] sm:$0xff] %v8001_v43 }
 0x2af   : > { %2165 = vmatpush.msrb.mxu1 %v2000_v19  ;;  %2185 = vmatpush.msra.mxu2 %v2016_v26  ;;  %v7874_v31 = vpop.permute.xlu2 %2759  ;;  %v10959_v19 = vld [vmem:[#allocation51_spill] sm:$0xff] }
 0x2b0   : > { %2201 = vmatpush.msrb.mxu3 %v2036_v18 }
 0x2b1   : > { %2901 = vperm.xlu0 %6141, %v2835_v4   ;;  %2166 = vmatpush.msrb.mxu1 %v1999_v3  ;;  %v2853_v4 = vld [vmem:[%s10535_s6 + $0xd0] sm:$0xff] }
 0x2b2   : > { %2186 = vmatpush.msra.mxu2 %v2015_v1  ;;  %2202 = vmatpush.msrb.mxu3 %v2035_v62  ;;  %v2829_v3 = vld [vmem:[%s10535_s6 + $0x10] sm:$0xff] }
 0x2b3   : > { %2167 = vmatpush.msrb.mxu1 %v1998_v40 }
 0x2b4   : > { %2187 = vmatpush.msra.mxu2 %v2014_v39  ;;  %2203 = vmatpush.msrb.mxu3 %v2034_v21  ;;  %v7889_v14 = vpop.permute.xlu1 %2695  ;;  %v2854_v39 = vld [vmem:[%s10535_s6 + $0xd8] sm:$0xff]  ;;  %v10961_v21 = vld [vmem:[#allocation29_spill] sm:$0xff] }
 0x2b5   : > { %6087 = vset.pattern.permute.xlu1 %v10851_v53  ;;  %2168 = vmatpush.msrb.mxu1 %v1997_v10 }
 0x2b6   : > { %2188 = vmatpush.msra.mxu2 %v2013_v42  ;;  %2204 = vmatpush.msrb.mxu3 %v2033_v56 }
 0x2b7   : > { %6088 = vset.pattern.permute.xlu2 %v10851_v53  ;;  %2474 = vperm.xlu1 %6087, %v7841_v20  }
 0x2b8   : > { %2478 = vperm.xlu2 %6088, %v7850_v47   ;;  %2169 = vmatpush.msrb.mxu1 %v1996_v59  ;;  %v7907_v25 = vpop.permute.xlu2 %2554  ;;  %v3146_v59 = vld [vmem:[%s10539_s10 + $0xb8] sm:$0xff] }
 0x2b9   : > { %2189 = vmatpush.msra.mxu2 %v2012_v2  ;;  %2205 = vmatpush.msrb.mxu3 %v2032_v33  ;;  %v6172_v33 = vld [vmem:[%s10534_s5 + $0xb0] sm:$0xff] }
 0x2ba   : > { %2275 = vperm.xlu0 %6141, %v7902_v17   ;;  %2190 = vmatmul.f32.vlgmr.msra.gmra.mxu2 %v7738_v60  ;;  %v2028_v60 = vmul.f32 %v7770_v22, %v7770_v22  ;;  %v2856_v22 = vld [vmem:[%s10535_s6 + $0xe8] sm:$0xff] }
 0x2bb   : > { %2206 = vmatpush.msrb.mxu3 %v2031_v15  ;;  %2170 = vmatmul.f32.vlgmr.msrb.gmra.mxu1 %v7740_v44  ;;  %v7927_v44 = vld [vmem:[%s10534_s5 + $0xa8] sm:$0xff] }
 0x2bd   : > { %2207 = vmatpush.msrb.mxu3 %v2030_v9  ;;  %v7916_v45 = vpop.permute.xlu1 %2490  ;;  %v3143_v9 = vld [vmem:[%s10539_s10 + $0xa0] sm:$0xff] }
 0x2bf   : > { %2208 = vmatpush.msrb.mxu3 %v2029_v41  ;;  %6089 = vset.pattern.permute.xlu1 %v10876_v54 }
 0x2c0   : > { %6090 = vset.pattern.permute.xlu2 %v10847_v0  ;;  %2743 = vperm.xlu1 %6089, %v7722_v49   ;;  %v7944_v49 = vpop.permute.xlu0 %2751 }
 0x2c1   : > { %2209 = vmatpush.msrb.mxu3 %v2028_v60  ;;  %3001 = vperm.xlu2 %6090, %v2855_v61   ;;  %v7933_v28 = vpop.permute.xlu2 %2687  ;;  %v8073_v61 = vld [vmem:[%s10534_s5 + $0x20] sm:$0xff]  ;;  %v3126_v60 = vld [vmem:[%s10539_s10 + $0x18] sm:$0xff] }
 0x2c2   : > { %2355 = vperm.xlu0 %6141, %v7927_v44   ;;  %2210 = vmatmul.f32.vlgmr.msrb.gmra.mxu3 %v7773_v63 }
 0x2c6   : > { %v7938_v58 = vpop.permute.xlu1 %2755 }
 0x2c8   : > { %6091 = vset.pattern.permute.xlu1 %v10847_v0  ;;  %v7960_v36 = vpop.permute.xlu0 %2739 }
 0x2c9   : > { %2370 = vperm.xlu2 %6090, %v10951_v29   ;;  %3006 = vperm.xlu1 %6091, %v2856_v22   ;;  %10952 = vst [vmem:[#allocation48_spill] sm:$0xff] %v7960_v36 }
 0x2ca   : > { %2891 = vperm.xlu0 %6141, %v2833_v52   ;;  %v7947_v63 = vpop.permute.xlu2 %2936 }
 0x2cf   : > { %v7954_v35 = vpop.permute.xlu1 %2395 }
 0x2d0   : > { %v7977_v37 = vpop.permute.xlu0 %2731 }
 0x2d1   : > { %6093 = vset.pattern.permute.xlu2 %v10851_v53  ;;  %6092 = vset.pattern.permute.xlu1 %v10851_v53  ;;  %10954 = vst [vmem:[#allocation52_spill] sm:$0xff] %v7977_v37 }
 0x2d2   : > { %2265 = vperm.xlu0 %6141, %v7952_v34   ;;  %2542 = vperm.xlu2 %6093, %v7714_v16  }
 0x2d3   : > { %2538 = vperm.xlu1 %6092, %v10951_v29   ;;  %v7963_v13 = vpop.permute.xlu2 %2482 }
 0x2d8   : > { %v7970_v23 = vpop.permute.xlu1 %2683  ;;  %v7996_v7 = vpop.permute.xlu0 %2723 }
 0x2d9   : > { %10955 = vst [vmem:[#allocation55_spill] sm:$0xff] %v7996_v7 }
 0x2da   : > { %2345 = vperm.xlu0 %6141, %v7968_v11   ;;  %6095 = vset.pattern.permute.xlu2 %v10876_v54 }
 0x2db   : > { %6094 = vset.pattern.permute.xlu1 %v10876_v54  ;;  %2671 = vperm.xlu2 %6095, %v7850_v47  }
 0x2dc   : > { %2667 = vperm.xlu1 %6094, %v7841_v20   ;;  %v7979_v24 = vpop.permute.xlu2 %2747 }
 0x2e0   : > { %v8011_v26 = vpop.permute.xlu0 %2715 }
 0x2e1   : > { %v7987_v12 = vpop.permute.xlu1 %2931  ;;  %10958 = vst [vmem:[#allocation65_spill] sm:$0xff] %v8011_v26 }
 0x2e2   : > { %2881 = vperm.xlu0 %6141, %v2831_v6   ;;  %v3123_v6 = vld [vmem:[%s10539_s10] sm:$0xff] }
 0x2e3   : > { %6097 = vset.pattern.permute.xlu2 %v10847_v0 }
 0x2e4   : > { %6096 = vset.pattern.permute.xlu1 %v10847_v0  ;;  %2280 = vperm.xlu2 %6097, %v2222_v5  }
 0x2e5   : > { %2916 = vperm.xlu1 %6096, %v2838_v32   ;;  %v7994_v20 = vpop.permute.xlu2 %3016 }
 0x2e8   : > { %v8027_v62 = vpop.permute.xlu0 %2707 }
 0x2e9   : > { %v8004_v47 = vpop.permute.xlu1 %2305  ;;  %10960 = vst [vmem:[#allocation66_spill] sm:$0xff] %v8027_v62 }
 0x2ea   : > { %2255 = vperm.xlu0 %6141, %v8001_v43  }
 0x2ec   : > { %6099 = vset.pattern.permute.xlu2 %v10851_v53 }
 0x2ed   : > { %6098 = vset.pattern.permute.xlu1 %v10851_v53  ;;  %2470 = vperm.xlu2 %6099, %v7783_v27   ;;  %v8009_v38 = vpop.permute.xlu2 %2385 }
 0x2ee   : > { %2466 = vperm.xlu1 %6098, %v2222_v5   ;;  %10957 = vst [vmem:[#allocation76_spill] sm:$0xff] %v8009_v38 }
 0x2f0   : > { %v8043_v56 = vpop.permute.xlu0 %2703 }
 0x2f1   : > { %10962 = vst [vmem:[#allocation67_spill] sm:$0xff] %v8043_v56  ;;  %v2151_v56 = vpop.f32.mrf.mxu0 }
 0x2f2   : > { %2335 = vperm.xlu0 %6141, %v10959_v19   ;;  %v8014_v18 = vpop.permute.xlu1 %2486  ;;  %v3140_v19 = vld [vmem:[%s10539_s10 + $0x88] sm:$0xff] }
 0x2f5   : > { %6101 = vset.pattern.permute.xlu2 %v10847_v0 }
 0x2f6   : > { %6100 = vset.pattern.permute.xlu1 %v10876_v54  ;;  %2991 = vperm.xlu2 %6101, %v2853_v4   ;;  %v8025_v1 = vpop.permute.xlu2 %2675 }
 0x2f7   : > { %2735 = vperm.xlu1 %6100, %v7714_v16   ;;  %v2843_v16 = vld [vmem:[%s10535_s6 + $0x80] sm:$0xff] }
 0x2f8   : > { %v8058_v46 = vpop.permute.xlu0 %2325 }
 0x2fa   : > { %2871 = vperm.xlu0 %6141, %v2829_v3   ;;  %v2851_v3 = vld [vmem:[%s10535_s6 + $0xc0] sm:$0xff] }
 0x2fb   : > { %v8029_v40 = vpop.permute.xlu1 %3011 }
 0x2fe   : > { %2360 = vperm.xlu2 %6101, %v10961_v21  }
 0x2ff   : > { %6102 = vset.pattern.permute.xlu1 %v10847_v0 }
 0x300   : > { %2996 = vperm.xlu1 %6102, %v2854_v39   ;;  %v8039_v10 = vpop.permute.xlu2 %2921  ;;  %v8082_v22 = vpop.permute.xlu0 %2315 }
 0x302   : > { %2941 = vperm.xlu0 %6141, %v2843_v16   ;;  %v2071_v16 = vpop.f32.mrf.mxu2 }
 0x303   : > { %v8041_v42 = vpop.permute.xlu1 %2380 }
 0x306   : > { %6104 = vset.pattern.permute.xlu2 %v10851_v53 }
 0x307   : > { %2534 = vperm.xlu2 %6104, %v7825_v51  }
 0x308   : > { %6103 = vset.pattern.permute.xlu1 %v10851_v53  ;;  %v8051_v2 = vpop.permute.xlu2 %2295 }
 0x309   : > { %10963 = vst [vmem:[#allocation32_spill] sm:$0xff] %v8051_v2  ;;  %2530 = vperm.xlu1 %6103, %v6172_v33  }
 0x30a   : > { %3264 = vperm.xlu0 %6141, %v3146_v59   ;;  %v3135_v59 = vld [vmem:[%s10539_s10 + $0x60] sm:$0xff] }
 0x30c   : > { %v8056_v15 = vpop.permute.xlu1 %2550 }
 0x30d   : > { %10964 = vst [vmem:[#allocation70_spill] sm:$0xff] %v8056_v15 }
 0x30f   : > { %6106 = vset.pattern.permute.xlu2 %v10876_v54 }
 0x310   : > { %2663 = vperm.xlu2 %6106, %v7783_v27   ;;  %v2836_v27 = vld [vmem:[%s10535_s6 + $0x48] sm:$0xff] }
 0x311   : > { %6105 = vset.pattern.permute.xlu1 %v10876_v54 }
 0x312   : > { %2659 = vperm.xlu1 %6105, %v2222_v5   ;;  %3249 = vperm.xlu0 %6141, %v3143_v9   ;;  %v8066_v48 = vpop.permute.xlu2 %2478  ;;  %v8095_v5 = vpop.permute.xlu0 %2390 }
 0x313   : > { %10965 = vst [vmem:[#allocation87_spill] sm:$0xff] %v8066_v48  ;;  %v2091_v9 = vpop.f32.mrf.mxu1 }
 0x316   : > { %v8068_v41 = vpop.permute.xlu1 %2679 }
 0x318   : > { %6108 = vset.pattern.permute.xlu2 %v10847_v0 }
 0x319   : > { %2270 = vperm.xlu2 %6108, %v8073_v61  }
 0x31a   : > { %6107 = vset.pattern.permute.xlu1 %v10847_v0  ;;  %3164 = vperm.xlu0 %6141, %v3126_v60   ;;  %v2301_v21 = vpop.permute.xlu0 %2300  ;;  %v6173_v60 = vld [vmem:[%s10534_s5 + $0xa0] sm:$0xff] }
 0x31b   : > { %2906 = vperm.xlu1 %6107, %v2836_v27   ;;  %v8086_v52 = vpop.permute.xlu2 %3001  ;;  %v2852_v27 = vld [vmem:[%s10535_s6 + $0xc8] sm:$0xff] }
 0x31f   : > { %v8088_v29 = vpop.permute.xlu1 %2290 }
 0x320   : > { %10966 = vst [vmem:[#allocation94_spill] sm:$0xff] %v8088_v29  ;;  %v10981_v29 = vld [vmem:[#allocation46_spill] sm:$0xff] }
 0x321   : > { %6110 = vset.pattern.permute.xlu2 %v10851_v53  ;;  %v2131_v37 = vpop.f32.mrf.mxu3 }
 0x322   : > { %3149 = vperm.xlu0 %6141, %v3123_v6   ;;  %2462 = vperm.xlu2 %6110, %v7902_v17  }
 0x323   : > { %6109 = vset.pattern.permute.xlu1 %v10851_v53  ;;  %v8098_v32 = vpop.permute.xlu2 %2370 }
 0x324   : > { %10967 = vst [vmem:[#allocation4_spill] sm:$0xff] %v8098_v32  ;;  %2458 = vperm.xlu1 %6109, %v8073_v61  }
 0x329   : > { %v8104_v4 = vpop.permute.xlu1 %2474 }
 0x32a   : > { %10968 = vst [vmem:[#allocation17_spill] sm:$0xff] %v8104_v4  ;;  %3234 = vperm.xlu0 %6141, %v3140_v19   ;;  %6112 = vset.pattern.permute.xlu2 %v10847_v0  ;;  %v2111_v19 = vpop.f32.mrf.mxu2 }
 0x32b   : > { %2981 = vperm.xlu2 %6112, %v2851_v3   ;;  %v3134_v3 = vld [vmem:[%s10539_s10 + $0x58] sm:$0xff] }
 0x32c   : > { %v8110_v39 = vpop.permute.xlu2 %2542  ;;  %6111 = vset.pattern.permute.xlu1 %v10876_v54 }
 0x32d   : > { %10969 = vst [vmem:[#allocation79_spill] sm:$0xff] %v8110_v39  ;;  %2727 = vperm.xlu1 %6111, %v7825_v51   ;;  %v8128_v51 = vpop.permute.xlu0 %2926 }
 0x332   : > { %3209 = vperm.xlu0 %6141, %v3135_v59   ;;  %v8117_v33 = vpop.permute.xlu1 %2743  ;;  %v2092_v59 = vadd.f32 %v2091_v9, %v2071_v16  ;;  %v3574_v16 = vld [vmem:[%s10541_s12] sm:$0x7] }
 0x333   : > { %10970 = vst [vmem:[#allocation81_spill] sm:$0xff] %v8117_v33  ;;  %2350 = vperm.xlu2 %6112, %v6173_v60  }
 0x334   : > { %v2112_v7 = vadd.f32 %v2111_v19, %v2092_v59 }
 0x335   : > { %v8125_v6 = vpop.permute.xlu2 %2671  ;;  %6113 = vset.pattern.permute.xlu1 %v10847_v0 }
 0x336   : > { %10971 = vst [vmem:[#allocation6_spill] sm:$0xff] %v8125_v6  ;;  %2986 = vperm.xlu1 %6113, %v2852_v27   ;;  %v2132_v27 = vadd.f32 %v2131_v37, %v2112_v7  ;;  %v3705_v37 = vld [vmem:[%s10543_s14 + $0x10] sm:$0xff] }
 0x338   : > { %v2171_v26 = vpop.f32.mrf.mxu1  ;;  %v2214_v59 = vmul.f32 0.001953125, %v2132_v27 }
 0x339   : > { %v2172_v32 = vadd.f32 %v2171_v26, %v2151_v56 }
 0x33a   : > { %3204 = vperm.xlu0 %6141, %v3134_v3   ;;  %v8143_v3 = vpop.permute.xlu0 %2375  ;;  %v8154_v7 = vperm.slane %v2214_v59, 0 }
 0x33b   : > { %v8133_v62 = vpop.permute.xlu1 %3006  ;;  %6115 = vset.pattern.permute.xlu2 %v10851_v53  ;;  %10972 = vst [vmem:[#allocation78_spill] sm:$0xff] %v8143_v3  ;;  %v10975_v3 = vld [vmem:[#allocation35_spill] sm:$0xff] }
 0x33c   : > { %2526 = vperm.xlu2 %6115, %v7927_v44   ;;  %v2422_v27 = vmul.f32 %v8154_v7, %v8082_v22  ;;  %v2438_v22 = vmul.f32 %v8154_v7, %v7954_v35  ;;  %v10978_v35 = vld [vmem:[#allocation130_spill] sm:$0xff] }
 0x33d   : > { %v2191_v9 = vpop.f32.mrf.mxu2 }
 0x33e   : > { %v8137_v39 = vpop.permute.xlu2 %2280  ;;  %6114 = vset.pattern.permute.xlu1 %v10851_v53  ;;  %v2192_v19 = vadd.f32 %v2191_v9, %v2172_v32  ;;  %v2421_v9 = vmul.f32 %v8154_v7, %v7790_v55 }
 0x33f   : > { %2522 = vperm.xlu1 %6114, %v6173_v60  }
 0x342   : > { %3577 = vperm.xlu0 %6141, %v3574_v16   ;;  %v8160_v16 = vpop.permute.xlu0 %2911 }
 0x344   : > { %6117 = vset.pattern.permute.xlu2 %v10876_v54 }
 0x345   : > { %v8146_v43 = vpop.permute.xlu1 %2538  ;;  %v2211_v6 = vpop.f32.mrf.mxu3  ;;  %2655 = vperm.xlu2 %6117, %v7902_v17   ;;  %v8165_v17 = vmul.f32 %v8154_v7, %v2301_v21  ;;  %v2437_v21 = vmul.f32 %v8154_v7, %v8095_v5 }
 0x346   : > { %10973 = vst [vmem:[#allocation80_spill] sm:$0xff] %v8146_v43  ;;  %v2212_v26 = vadd.f32 %v2211_v6, %v2192_v19  ;;  %v8162_v6 = vperm.slane %v2214_v59, 1  ;;  %v10974_v19 = vld [vmem:[#allocation30_spill] sm:$0xff]  ;;  %v2424_v59 = vmul.f32 %v8154_v7, %v8058_v46 }
 0x347   : > { %v8149_v56 = vpop.permute.xlu2 %2470  ;;  %6116 = vset.pattern.permute.xlu1 %v10876_v54 }
 0x348   : > { %v2215_v60 = vmul.f32 0.001953125, %v2212_v26  ;;  %2651 = vperm.xlu1 %6116, %v8073_v61   ;;  %v8174_v61 = vld [vmem:[%s10534_s5 + $0x10] sm:$0xff]  ;;  %v2423_v26 = vmul.f32 %v8154_v7, %v10974_v19  ;;  %v2777_v4 = vmul.f32 %v8162_v6, %v10981_v29 }
 0x34a   : > { %v8158_v32 = vperm.slane %v2215_v60, 0  ;;  %3723 = vperm.xlu0 %6141, %v3705_v37  }
 0x34c   : > { %v2584_v55 = vmul.f32 %v8158_v32, %v7758_v50  ;;  %v2582_v37 = vmul.f32 %v8158_v32, %v7916_v45  ;;  %v2583_v60 = vmul.f32 %v8158_v32, %v7829_v8  ;;  %v2585_v19 = vmul.f32 %v8158_v32, %v10975_v3  ;;  %v10977_v50 = vld [vmem:[#allocation131_spill] sm:$0xff]  ;;  %v2834_v8 = vld [vmem:[%s10535_s6 + $0x38] sm:$0xff] }
 0x34d   : > { %6119 = vset.pattern.permute.xlu2 %v10847_v0  ;;  %v2598_v5 = vmul.f32 %v8158_v32, %v7907_v25  ;;  %v2599_v43 = vmul.f32 %v8158_v32, %v10977_v50  ;;  %v2600_v2 = vmul.f32 %v8158_v32, %v10978_v35  ;;  %v2601_v45 = vmul.f32 %v8158_v32, %v7853_v57  ;;  %v3708_v57 = vld [vmem:[%s10543_s14 + $0x28] sm:$0xff] }
 0x34e   : > { %v8193_v46 = vpop.permute.xlu1 %2667  ;;  %2260 = vperm.xlu2 %6119, %v8174_v61   ;;  %v2439_v3 = vmul.f32 %v8154_v7, %v7802_v30  ;;  %v2775_v50 = vmul.f32 %v8162_v6, %v7970_v23  ;;  %v2776_v35 = vmul.f32 %v8162_v6, %v7933_v28  ;;  %v2791_v30 = vmul.f32 %v8162_v6, %v7979_v24 }
 0x34f   : > { %10976 = vst [vmem:[#allocation83_spill] sm:$0xff] %v8193_v46  ;;  %v10979_v46 = vld [vmem:[#allocation45_spill] sm:$0xff]  ;;  %v2616_v11 = vadd.f32 %v2584_v55, %v2423_v26  ;;  %v2793_v28 = vmul.f32 %v8162_v6, %v7938_v58  ;;  %v2614_v23 = vadd.f32 %v2582_v37, %v2421_v9  ;;  %v2617_v33 = vadd.f32 %v2585_v19, %v2424_v59  ;;  %v2286_v58 = vpop.permute.xlu0 %2285 }
 0x350   : > { %v2440_v25 = vmul.f32 %v8154_v7, %v10979_v46  ;;  %v8215_v48 = vpop.permute.xlu2 %2991  ;;  %v2792_v46 = vmul.f32 %v8162_v6, %v7944_v49  ;;  %6118 = vset.pattern.permute.xlu1 %v10847_v0  ;;  %v2630_v36 = vadd.f32 %v2598_v5, %v2437_v21  ;;  %v2631_v38 = vadd.f32 %v2599_v43, %v2438_v22 }
 0x351   : > { %10980 = vst [vmem:[#allocation84_spill] sm:$0xff] %v8215_v48  ;;  %v2615_v48 = vadd.f32 %v2583_v60, %v2422_v27  ;;  %2896 = vperm.xlu1 %6118, %v2834_v8   ;;  %v2632_v15 = vadd.f32 %v2600_v2, %v2439_v3  ;;  %v2778_v24 = vmul.f32 %v8162_v6, %v7889_v14 }
 0x352   : > { %v2633_v29 = vadd.f32 %v2601_v45, %v2440_v25  ;;  %3738 = vperm.xlu0 %6141, %v3708_v57   ;;  %v2794_v49 = vmul.f32 %v8162_v6, %v7874_v31  ;;  %v2580_v26 = vmul.f32 %v8158_v32, %v7963_v13  ;;  %v2809_v55 = vadd.f32 %v2777_v4, %v2616_v11 }
 0x353   : > { %v2581_v9 = vmul.f32 %v8158_v32, %v8014_v18  ;;  %v2823_v27 = vadd.f32 %v2791_v30, %v2630_v36  ;;  %v2824_v59 = vadd.f32 %v2792_v46, %v2631_v38  ;;  %v2825_v43 = vadd.f32 %v2793_v28, %v2632_v15 }
 0x354   : > { %v2416_v2 = vmul.f32 %v8154_v7, %v2286_v58  ;;  %v2420_v21 = vmul.f32 %v8154_v7, %v8004_v47  ;;  %v2807_v14 = vadd.f32 %v2775_v50, %v2614_v23  ;;  %v2826_v22 = vadd.f32 %v2794_v49, %v2633_v29 }
 0x355   : > { %v2808_v37 = vadd.f32 %v2776_v35, %v2615_v48  ;;  %v2810_v31 = vadd.f32 %v2778_v24, %v2617_v33  ;;  %v3033_v60 = vadd.f32 %v7987_v12, %v2809_v55  ;;  %v3049_v13 = vadd.f32 %v8029_v40, %v2825_v43 }
 0x356   : > { %6121 = vset.pattern.permute.xlu2 %v10851_v53  ;;  %v3047_v36 = vadd.f32 %v8086_v52, %v2823_v27  ;;  %v3048_v38 = vadd.f32 %v8133_v62, %v2824_v59  ;;  %v3050_v18 = vadd.f32 %v7994_v20, %v2826_v22  ;;  %v2577_v47 = vmul.f32 %v8158_v32, %v8149_v56 }
 0x357   : > { %v2917_v11 = vpop.permute.xlu1 %2916  ;;  %2454 = vperm.xlu2 %6121, %v7952_v34   ;;  %v2773_v12 = vmul.f32 %v8162_v6, %v8025_v1  ;;  %v2612_v40 = vadd.f32 %v2580_v26, %v8165_v17  ;;  %v2613_v48 = vadd.f32 %v2581_v9, %v2420_v21  ;;  %v2774_v52 = vmul.f32 %v8162_v6, %v8068_v41  ;;  %v10982_v9 = vld [vmem:[#allocation133_spill] sm:$0xff] }
 0x358   : > { %v8249_v15 = vpop.permute.xlu2 %2360  ;;  %v8256_v4 = vadd.f32 %v2577_v47, %v2416_v2  ;;  %v3081_v62 = vmax.f32 %v3049_v13, 0.0  ;;  %v3082_v20 = vmax.f32 %v3050_v18, 0.0  ;;  %v3031_v33 = vadd.f32 %v8039_v10, %v2807_v14  ;;  %v2849_v10 = vld [vmem:[%s10535_s6 + $0xb0] sm:$0xff]  ;;  %v10983_v2 = vld [vmem:[#allocation70_spill] sm:$0xff]  ;;  %v10986_v18 = vld [vmem:[#allocation81_spill] sm:$0xff] }
 0x359   : > { %6120 = vset.pattern.permute.xlu1 %v10851_v53  ;;  %v3032_v56 = vadd.f32 %v8128_v51, %v2808_v37  ;;  %v3065_v19 = vmax.f32 %v3033_v60, 0.0  ;;  %v3034_v5 = vadd.f32 %v7947_v63, %v2810_v31  ;;  %v3079_v1 = vmax.f32 %v3047_v36, 0.0  ;;  %v2366_v51 = vpop.permute.xlu0 %2365  ;;  %v2850_v37 = vld [vmem:[%s10535_s6 + $0xb8] sm:$0xff] }
 0x35a   : > { %2450 = vperm.xlu1 %6120, %v8174_v61   ;;  %v3080_v17 = vmax.f32 %v3048_v38, 0.0  ;;  %v3098_v45 = vpack.c.bf16 %v3082_v20, %v3081_v62  ;;  %6144 = vset.pattern.permute.xlu0 %v10876_v54  ;;  %v2805_v41 = vadd.f32 %v2773_v12, %v2612_v40  ;;  %v2806_v8 = vadd.f32 %v2774_v52, %v2613_v48  ;;  %v10984_v31 = vld [vmem:[#allocation76_spill] sm:$0xff]  ;;  %v10988_v62 = vld [vmem:[#allocation49_spill] sm:$0xff] }
 0x35b   : > { %v3066_v3 = vmax.f32 %v3034_v5, 0.0  ;;  %v2415_v25 = vmul.f32 %v8154_v7, %v8137_v39  ;;  %v3063_v63 = vmax.f32 %v3031_v33, 0.0  ;;  %v3064_v50 = vmax.f32 %v3032_v56, 0.0  ;;  %v10985_v60 = vld [vmem:[#allocation48_spill] sm:$0xff] }
 0x35c   : > { %3456 = vmatpush.bf16.msra.mxu1 %v3098_v45  ;;  %v3030_v35 = vadd.f32 %v2917_v11, %v2806_v8  ;;  %v2432_v30 = vmul.f32 %v8154_v7, %v2366_v51  ;;  %v3097_v46 = vpack.c.bf16 %v3080_v17, %v3079_v1  ;;  %v3029_v23 = vadd.f32 %v8160_v16, %v2805_v41  ;;  %v10987_v40 = vld [vmem:[#allocation84_spill] sm:$0xff] }
 0x35d   : > { %v3090_v57 = vpack.c.bf16 %v3066_v3, %v3065_v19  ;;  %v3089_v26 = vpack.c.bf16 %v3064_v50, %v3063_v63  ;;  %v2596_v16 = vmul.f32 %v8158_v32, %v10982_v9  ;;  %v2435_v59 = vmul.f32 %v8154_v7, %v8041_v42  ;;  %v10989_v50 = vld [vmem:[#allocation17_spill] sm:$0xff]  ;;  %v10994_v9 = vld [vmem:[#allocation6_spill] sm:$0xff] }
 0x35e   : > { %v3062_v49 = vmax.f32 %v3030_v35, 0.0  ;;  %v3061_v27 = vmax.f32 %v3029_v23, 0.0  ;;  %v2597_v21 = vmul.f32 %v8158_v32, %v10983_v2  ;;  %v2436_v42 = vmul.f32 %v8154_v7, %v10984_v31  ;;  %v10990_v35 = vld [vmem:[#allocation94_spill] sm:$0xff]  ;;  %v10992_v23 = vld [vmem:[#allocation83_spill] sm:$0xff] }
 0x35f   : > { %6123 = vset.pattern.permute.xlu2 %v10847_v0  ;;  %3387 = vmatpush.bf16.msrb.mxu0 %v3090_v57  ;;  %v2628_v14 = vadd.f32 %v2596_v16, %v2435_v59  ;;  %v2789_v13 = vmul.f32 %v8162_v6, %v10985_v60  ;;  %v2790_v47 = vmul.f32 %v8162_v6, %v10986_v18 }
 0x360   : > { %v2467_v28 = vpop.permute.xlu1 %2466  ;;  %2971 = vperm.xlu2 %6123, %v2849_v10   ;;  %3457 = vmatpush.bf16.msra.mxu1 %v3097_v46  ;;  %v3088_v43 = vpack.c.bf16 %v3062_v49, %v3061_v27  ;;  %v2629_v36 = vadd.f32 %v2597_v21, %v2436_v42  ;;  %v2431_v8 = vmul.f32 %v8154_v7, %v8249_v15  ;;  %v8325_v15 = vld [vmem:[%s10534_s5] sm:$0xff]  ;;  %v10995_v21 = vld [vmem:[#allocation62_spill] sm:$0xff] }
 0x361   : > { %v2576_v39 = vmul.f32 %v8158_v32, %v2467_v28  ;;  %v2535_v29 = vpop.permute.xlu2 %2534  ;;  %v2821_v38 = vadd.f32 %v2789_v13, %v2628_v14  ;;  %v2902_v12 = vpop.permute.xlu0 %2901  ;;  %v2417_v57 = vmul.f32 %v8154_v7, %v10990_v35  ;;  %v2772_v16 = vmul.f32 %v8162_v6, %v10994_v9  ;;  %v2847_v13 = vld [vmem:[%s10535_s6 + $0xa0] sm:$0xff] }
 0x362   : > { %v2593_v24 = vmul.f32 %v8158_v32, %v2535_v29  ;;  %6122 = vset.pattern.permute.xlu1 %v10876_v54  ;;  %v2822_v52 = vadd.f32 %v2790_v47, %v2629_v36  ;;  %v2832_v29 = vld [vmem:[%s10535_s6 + $0x28] sm:$0xff] }
 0x363   : > { %v8274_v55 = vadd.f32 %v2576_v39, %v2415_v25  ;;  %2719 = vperm.xlu1 %6122, %v7927_v44   ;;  %3388 = vmatpush.bf16.msrb.mxu0 %v3089_v26  ;;  %v6174_v44 = vld [vmem:[%s10534_s5 + $0x90] sm:$0xff]  ;;  %v3045_v48 = vadd.f32 %v10987_v40, %v2821_v38 }
 0x364   : > { %v8278_v58 = vadd.f32 %v2593_v24, %v2432_v30  ;;  %v10991_v30 = vld [vmem:[#allocation87_spill] sm:$0xff]  ;;  %v10993_v24 = vld [vmem:[#allocation32_spill] sm:$0xff] }
 0x365   : > { %v3077_v19 = vmax.f32 %v3045_v48, 0.0  ;;  %v2579_v46 = vmul.f32 %v8158_v32, %v10991_v30  ;;  %v2418_v49 = vmul.f32 %v8154_v7, %v10993_v24 }
 0x367   : > { %3389 = vmatpush.bf16.msrb.mxu0 %v3088_v43  ;;  %v2611_v27 = vadd.f32 %v2579_v46, %v2418_v49 }
 0x368   : > { %2340 = vperm.xlu2 %6123, %v6174_v44  }
 0x369   : > { %v8289_v22 = vpop.permute.xlu1 %2735  ;;  %v2276_v17 = vpop.permute.xlu0 %2275  ;;  %v2804_v43 = vadd.f32 %v2772_v16, %v2611_v27 }
 0x36a   : > { %v8298_v11 = vpop.permute.xlu2 %2663  ;;  %v2414_v45 = vmul.f32 %v8154_v7, %v2276_v17  ;;  %v2788_v35 = vmul.f32 %v8162_v6, %v8289_v22 }
 0x36b   : > { %6124 = vset.pattern.permute.xlu1 %v10847_v0 }
 0x36c   : > { %2976 = vperm.xlu1 %6124, %v2850_v37  }
 0x370   : > { %6126 = vset.pattern.permute.xlu2 %v10851_v53 }
 0x371   : > { %2518 = vperm.xlu2 %6126, %v10988_v62   ;;  %v2356_v36 = vpop.permute.xlu0 %2355 }
 0x372   : > { %v2997_v20 = vpop.permute.xlu1 %2996  ;;  %v2430_v18 = vmul.f32 %v8154_v7, %v2356_v36  ;;  %v2846_v36 = vld [vmem:[%s10535_s6 + $0x98] sm:$0xff] }
 0x373   : > { %v3046_v33 = vadd.f32 %v2997_v20, %v2822_v52  ;;  %v2271_v56 = vpop.permute.xlu2 %2270 }
 0x374   : > { %6125 = vset.pattern.permute.xlu1 %v10851_v53  ;;  %v2413_v38 = vmul.f32 %v8154_v7, %v2271_v56  ;;  %v10996_v56 = vld [vmem:[#allocation80_spill] sm:$0xff] }
 0x375   : > { %v3078_v5 = vmax.f32 %v3046_v33, 0.0  ;;  %2514 = vperm.xlu1 %6125, %v6174_v44   ;;  %v2232_v33 = vld [vmem:[%s10534_s5 + $0x80] sm:$0xff] }
 0x377   : > { %v3096_v1 = vpack.c.bf16 %v3078_v5, %v3077_v19  ;;  %v2594_v19 = vmul.f32 %v8158_v32, %v10996_v56  ;;  %v10997_v5 = vld [vmem:[#allocation4_spill] sm:$0xff] }
 0x379   : > { %3458 = vmatpush.bf16.msra.mxu1 %v3096_v1  ;;  %6128 = vset.pattern.permute.xlu2 %v10876_v54  ;;  %v2433_v1 = vmul.f32 %v8154_v7, %v10997_v5  ;;  %v2892_v46 = vpop.permute.xlu0 %2891 }
 0x37a   : > { %2647 = vperm.xlu2 %6128, %v7952_v34   ;;  %v2578_v34 = vmul.f32 %v8158_v32, %v10989_v50  ;;  %v11000_v50 = vld [vmem:[#allocation52_spill] sm:$0xff] }
 0x37b   : > { %v2531_v41 = vpop.permute.xlu1 %2530 }
 0x37c   : > { %v2592_v3 = vmul.f32 %v8158_v32, %v2531_v41  ;;  %v2463_v25 = vpop.permute.xlu2 %2462  ;;  %v2610_v28 = vadd.f32 %v2578_v34, %v2417_v57  ;;  %v2848_v41 = vld [vmem:[%s10535_s6 + $0xa8] sm:$0xff]  ;;  %v2787_v34 = vmul.f32 %v8162_v6, %v11000_v50 }
 0x37d   : > { %v2575_v10 = vmul.f32 %v8158_v32, %v2463_v25  ;;  %6127 = vset.pattern.permute.xlu1 %v10876_v54 }
 0x37e   : > { %v8314_v51 = vadd.f32 %v2592_v3, %v2431_v8  ;;  %2643 = vperm.xlu1 %6127, %v8174_v61   ;;  %v2771_v61 = vmul.f32 %v8162_v6, %v10992_v23  ;;  %v10999_v3 = vld [vmem:[#allocation79_spill] sm:$0xff] }
 0x37f   : > { %v8317_v63 = vadd.f32 %v2575_v10, %v2414_v45  ;;  %v2595_v25 = vmul.f32 %v8158_v32, %v10999_v3  ;;  %v2626_v10 = vadd.f32 %v2594_v19, %v2433_v1 }
 0x380   : > { %v2803_v59 = vadd.f32 %v2771_v61, %v2610_v28  ;;  %v6175_v28 = vld [vmem:[%s10534_s5 + $0x88] sm:$0xff] }
 0x381   : > { %v2819_v30 = vadd.f32 %v2787_v34, %v2626_v10  ;;  %v2266_v27 = vpop.permute.xlu0 %2265  ;;  %v2844_v34 = vld [vmem:[%s10535_s6 + $0x88] sm:$0xff] }
 0x382   : > { %6130 = vset.pattern.permute.xlu2 %v10847_v0  ;;  %v3027_v2 = vadd.f32 %v2902_v12, %v2803_v59 }
 0x383   : > { %2250 = vperm.xlu2 %6130, %v8325_v15  }
 0x384   : > { %v8335_v39 = vpop.permute.xlu1 %2659  ;;  %v3059_v42 = vmax.f32 %v3027_v2, 0.0 }
 0x385   : > { %v2982_v26 = vpop.permute.xlu2 %2981 }
 0x386   : > { %6129 = vset.pattern.permute.xlu1 %v10847_v0  ;;  %v3043_v23 = vadd.f32 %v2982_v26, %v2819_v30  ;;  %v2412_v26 = vmul.f32 %v8154_v7, %v2266_v27  ;;  %v11001_v30 = vld [vmem:[#allocation55_spill] sm:$0xff] }
 0x387   : > { %2886 = vperm.xlu1 %6129, %v2832_v29  }
 0x388   : > { %v3075_v9 = vmax.f32 %v3043_v23, 0.0  ;;  %v3130_v23 = vld [vmem:[%s10539_s10 + $0x38] sm:$0xff] }
 0x389   : > { %v2346_v19 = vpop.permute.xlu0 %2345 }
 0x38b   : > { %6132 = vset.pattern.permute.xlu2 %v10851_v53 }
 0x38c   : > { %2446 = vperm.xlu2 %6132, %v10995_v21  }
 0x38d   : > { %v2907_v14 = vpop.permute.xlu1 %2906  ;;  %v2351_v37 = vpop.permute.xlu2 %2350 }
 0x38e   : > { %v3028_v44 = vadd.f32 %v2907_v14, %v2804_v43  ;;  %v2429_v2 = vmul.f32 %v8154_v7, %v2351_v37  ;;  %v2830_v37 = vld [vmem:[%s10535_s6 + $0x18] sm:$0xff] }
 0x38f   : > { %6131 = vset.pattern.permute.xlu1 %v10851_v53 }
 0x390   : > { %v3060_v31 = vmax.f32 %v3028_v44, 0.0  ;;  %2442 = vperm.xlu1 %6131, %v8325_v15  }
 0x392   : > { %v3087_v60 = vpack.c.bf16 %v3060_v31, %v3059_v42 }
 0x394   : > { %3390 = vmatpush.bf16.msrb.mxu0 %v3087_v60  ;;  %6134 = vset.pattern.permute.xlu2 %v10847_v0 }
 0x395   : > { %2961 = vperm.xlu2 %6134, %v2847_v13  }
 0x396   : > { %v2459_v47 = vpop.permute.xlu1 %2458  ;;  %v2527_v40 = vpop.permute.xlu2 %2526 }
 0x397   : > { %v2574_v12 = vmul.f32 %v8158_v32, %v2459_v47  ;;  %v2591_v48 = vmul.f32 %v8158_v32, %v2527_v40  ;;  %v2845_v47 = vld [vmem:[%s10535_s6 + $0x90] sm:$0xff] }
 0x398   : > { %6133 = vset.pattern.permute.xlu1 %v10876_v54 }
 0x399   : > { %v8357_v52 = vadd.f32 %v2574_v12, %v2413_v38  ;;  %v8360_v20 = vadd.f32 %v2591_v48, %v2430_v18  ;;  %2711 = vperm.xlu1 %6133, %v10988_v62   ;;  %v10998_v62 = vld [vmem:[#allocation78_spill] sm:$0xff] }
 0x39a   : > { %v2434_v8 = vmul.f32 %v8154_v7, %v10998_v62 }
 0x39c   : > { %v2627_v57 = vadd.f32 %v2595_v25, %v2434_v8  ;;  %v3129_v25 = vld [vmem:[%s10539_s10 + $0x30] sm:$0xff] }
 0x39d   : > { %2330 = vperm.xlu2 %6134, %v2232_v33  }
 0x39e   : > { %v2820_v61 = vadd.f32 %v2788_v35, %v2627_v57  ;;  %v3145_v57 = vld [vmem:[%s10539_s10 + $0xb0] sm:$0xff] }
 0x39f   : > { %v8370_v17 = vpop.permute.xlu1 %2727  ;;  %v8372_v45 = vpop.permute.xlu2 %2655 }
 0x3a1   : > { %6135 = vset.pattern.permute.xlu1 %v10847_v0 }
 0x3a2   : > { %2966 = vperm.xlu1 %6135, %v2848_v41   ;;  %v2428_v41 = vmul.f32 %v8154_v7, %v2346_v19 }
 0x3a5   : > { %6137 = vset.pattern.permute.xlu2 %v10851_v53 }
 0x3a6   : > { %2510 = vperm.xlu2 %6137, %v6175_v28   ;;  %v2786_v28 = vmul.f32 %v8162_v6, %v8370_v17  ;;  %v3127_v17 = vld [vmem:[%s10539_s10 + $0x20] sm:$0xff] }
 0x3a8   : > { %v2987_v29 = vpop.permute.xlu1 %2986  ;;  %v2261_v24 = vpop.permute.xlu2 %2260 }
 0x3a9   : > { %v3044_v49 = vadd.f32 %v2987_v29, %v2820_v61  ;;  %v2411_v5 = vmul.f32 %v8154_v7, %v2261_v24  ;;  %v2818_v24 = vadd.f32 %v2786_v28, %v8278_v58  ;;  %v3125_v58 = vld [vmem:[%s10539_s10 + $0x10] sm:$0xff] }
 0x3aa   : > { %6136 = vset.pattern.permute.xlu1 %v10851_v53 }
 0x3ab   : > { %v3076_v16 = vmax.f32 %v3044_v49, 0.0  ;;  %2506 = vperm.xlu1 %6136, %v2232_v33   ;;  %v3128_v49 = vld [vmem:[%s10539_s10 + $0x28] sm:$0xff] }
 0x3ad   : > { %v3095_v22 = vpack.c.bf16 %v3076_v16, %v3075_v9 }
 0x3ae   : > { %6139 = vset.pattern.permute.xlu2 %v10876_v54 }
 0x3af   : > { %3459 = vmatpush.bf16.msra.mxu1 %v3095_v22  ;;  %2639 = vperm.xlu2 %6139, %v10995_v21   ;;  %v2769_v21 = vmul.f32 %v8162_v6, %v8335_v39 }
 0x3b1   : > { %v2523_v59 = vpop.permute.xlu1 %2522  ;;  %v2455_v43 = vpop.permute.xlu2 %2454  ;;  %v2801_v38 = vadd.f32 %v2769_v21, %v8274_v55 }
 0x3b2   : > { %v2590_v14 = vmul.f32 %v8158_v32, %v2523_v59  ;;  %v2573_v44 = vmul.f32 %v8158_v32, %v2455_v43 }
 0x3b3   : > { %6138 = vset.pattern.permute.xlu1 %v10876_v54  ;;  %v3025_v12 = vadd.f32 %v2892_v46, %v2801_v38  ;;  %v2785_v46 = vmul.f32 %v8162_v6, %v11001_v30  ;;  %v2768_v38 = vmul.f32 %v8162_v6, %v8372_v45  ;;  %v3124_v45 = vld [vmem:[%s10539_s10 + $0x8] sm:$0xff]  ;;  %v3131_v30 = vld [vmem:[%s10539_s10 + $0x40] sm:$0xff] }
 0x3b4   : > { %v8398_v31 = vadd.f32 %v2590_v14, %v2429_v2  ;;  %v8400_v42 = vadd.f32 %v2573_v44, %v2412_v26  ;;  %2635 = vperm.xlu1 %6138, %v8325_v15   ;;  %v2770_v15 = vmul.f32 %v8162_v6, %v8298_v11  ;;  %v2828_v11 = vld [vmem:[%s10535_s6 + $0x8] sm:$0xff] }
 0x3b5   : > { %v3057_v55 = vmax.f32 %v3025_v12, 0.0  ;;  %v2817_v61 = vadd.f32 %v2785_v46, %v8314_v51  ;;  %v3144_v44 = vld [vmem:[%s10539_s10 + $0xa8] sm:$0xff]  ;;  %v2882_v12 = vpop.permute.xlu0 %2881 }
 0x3b6   : > { %v2802_v39 = vadd.f32 %v2770_v15, %v8256_v4  ;;  %v2827_v4 = vld [vmem:[%s10535_s6] sm:$0xff]  ;;  %v3141_v15 = vld [vmem:[%s10539_s10 + $0x90] sm:$0xff] }
 0x3b7   : > { %2699 = vperm.xlu2 %6139, %v2232_v33  }
 0x3ba   : > { %v8405_v60 = vpop.permute.xlu1 %2651  ;;  %v2972_v13 = vpop.permute.xlu2 %2971 }
 0x3bb   : > { %v3041_v29 = vadd.f32 %v2972_v13, %v2817_v61  ;;  %v3142_v13 = vld [vmem:[%s10539_s10 + $0x98] sm:$0xff] }
 0x3bc   : > { %6140 = vset.pattern.permute.xlu1 %v10847_v0 }
 0x3bd   : > { %2876 = vperm.xlu1 %6140, %v2830_v37   ;;  %v3073_v22 = vmax.f32 %v3041_v29, 0.0  ;;  %v2767_v37 = vmul.f32 %v8162_v6, %v8405_v60  ;;  %v2800_v60 = vadd.f32 %v2768_v38, %v8317_v63  ;;  %v3137_v63 = vld [vmem:[%s10539_s10 + $0x70] sm:$0xff] }
 0x3bf   : > { %6142 = vset.pattern.permute.xlu2 %v10847_v0 }
 0x3c0   : > { %2956 = vperm.xlu2 %6142, %v2846_v36  }
 0x3c2   : > { %v2341_v18 = vpop.permute.xlu2 %2340 }
 0x3c3   : > { %v2897_v40 = vpop.permute.xlu1 %2896  ;;  %v2427_v26 = vmul.f32 %v8154_v7, %v2341_v18 }
 0x3c4   : > { %v3026_v48 = vadd.f32 %v2897_v40, %v2802_v39  ;;  %v2799_v39 = vadd.f32 %v2767_v37, %v8357_v52  ;;  %v3709_v37 = vld [vmem:[%s10543_s14 + $0x30] sm:$0xff] }
 0x3c5   : > { %2951 = vperm.xlu1 %6140, %v2845_v47   ;;  %v3139_v47 = vld [vmem:[%s10539_s10 + $0x80] sm:$0xff] }
 0x3c6   : > { %v3058_v33 = vmax.f32 %v3026_v48, 0.0  ;;  %v3023_v40 = vadd.f32 %v2882_v12, %v2799_v39 }
 0x3c8   : > { %2866 = vperm.xlu2 %6142, %v2828_v11   ;;  %v3086_v56 = vpack.c.bf16 %v3058_v33, %v3057_v55  ;;  %v3055_v52 = vmax.f32 %v3023_v40, 0.0  ;;  %v3138_v55 = vld [vmem:[%s10539_s10 + $0x78] sm:$0xff] }
 0x3ca   : > { %3391 = vmatpush.bf16.msrb.mxu0 %v3086_v56 }
 0x3cb   : > { %v2519_v1 = vpop.permute.xlu2 %2518 }
 0x3cc   : > { %v2589_v62 = vmul.f32 %v8158_v32, %v2519_v1  ;;  %v2451_v8 = vpop.permute.xlu1 %2450 }
 0x3cd   : > { %v2572_v3 = vmul.f32 %v8158_v32, %v2451_v8  ;;  %2861 = vperm.xlu1 %6140, %v2827_v4   ;;  %v3132_v8 = vld [vmem:[%s10539_s10 + $0x48] sm:$0xff] }
 0x3ce   : > { %v8435_v10 = vadd.f32 %v2589_v62, %v2428_v41  ;;  %v3136_v41 = vld [vmem:[%s10539_s10 + $0x68] sm:$0xff] }
 0x3cf   : > { %v8437_v50 = vadd.f32 %v2572_v3, %v2411_v5  ;;  %v3133_v5 = vld [vmem:[%s10539_s10 + $0x50] sm:$0xff]  ;;  %v11002_v3 = vld [vmem:[#allocation65_spill] sm:$0xff] }
 0x3d0   : > { %3179 = vperm.xlu2 %6142, %v3129_v25   ;;  %v2783_v25 = vmul.f32 %v8162_v6, %v11002_v3 }
 0x3d4   : > { %v8462_v59 = vpop.permute.xlu2 %2647 }
 0x3d5   : > { %2946 = vperm.xlu1 %6140, %v2844_v34   ;;  %v8442_v35 = vpop.permute.xlu1 %2719 }
 0x3d6   : > { %v2784_v34 = vmul.f32 %v8162_v6, %v8442_v35 }
 0x3d8   : > { %3259 = vperm.xlu2 %6142, %v3145_v57   ;;  %v2815_v57 = vadd.f32 %v2783_v25, %v8398_v31 }
 0x3dd   : > { %3184 = vperm.xlu1 %6140, %v3130_v23   ;;  %v8474_v21 = vpop.permute.xlu2 %2250  ;;  %v2816_v23 = vadd.f32 %v2784_v34, %v8360_v20 }
 0x3de   : > { %v2977_v9 = vpop.permute.xlu1 %2976 }
 0x3df   : > { %v3042_v16 = vadd.f32 %v2977_v9, %v2818_v24  ;;  %v3704_v24 = vld [vmem:[%s10543_s14 + $0x8] sm:$0xff]  ;;  %v2256_v9 = vpop.permute.xlu0 %2255 }
 0x3e0   : > { %3174 = vperm.xlu2 %6142, %v3128_v49  }
 0x3e1   : > { %v3074_v27 = vmax.f32 %v3042_v16, 0.0  ;;  %v3703_v16 = vld [vmem:[%s10543_s14] sm:$0xff] }
 0x3e3   : > { %v3094_v51 = vpack.c.bf16 %v3074_v27, %v3073_v22  ;;  %v3707_v27 = vld [vmem:[%s10543_s14 + $0x20] sm:$0xff] }
 0x3e5   : > { %3169 = vperm.xlu1 %6140, %v3127_v17   ;;  %3460 = vmatpush.bf16.msra.mxu1 %v3094_v51  ;;  %v3706_v17 = vld [vmem:[%s10543_s14 + $0x18] sm:$0xff] }
 0x3e6   : > { %v8487_v18 = vpop.permute.xlu2 %2446 }
 0x3e7   : > { %v2515_v43 = vpop.permute.xlu1 %2514  ;;  %v2336_v51 = vpop.permute.xlu0 %2335 }
 0x3e8   : > { %v2588_v2 = vmul.f32 %v8158_v32, %v2515_v43  ;;  %3159 = vperm.xlu2 %6142, %v3125_v58   ;;  %v3710_v58 = vld [vmem:[%s10543_s14 + $0x38] sm:$0xff] }
 0x3ea   : > { %v8469_v14 = vadd.f32 %v2588_v2, %v2427_v26 }
 0x3ed   : > { %3254 = vperm.xlu1 %6140, %v3144_v44   ;;  %v2766_v44 = vmul.f32 %v8162_v6, %v8462_v59 }
 0x3ef   : > { %v2962_v4 = vpop.permute.xlu2 %2961  ;;  %v2798_v38 = vadd.f32 %v2766_v44, %v8400_v42  ;;  %v5924_v44 = vld [vmem:[%s10538_s9 + $0x4] sm:$0xf] }
 0x3f0   : > { %v2644_v36 = vpop.permute.xlu1 %2643  ;;  %3244 = vperm.xlu2 %6142, %v3142_v13   ;;  %v3039_v46 = vadd.f32 %v2962_v4, %v2815_v57 }
 0x3f1   : > { %v2765_v43 = vmul.f32 %v8162_v6, %v2644_v36 }
 0x3f2   : > { %v3071_v49 = vmax.f32 %v3039_v46, 0.0 }
 0x3f3   : > { %v2797_v13 = vadd.f32 %v2765_v43, %v8437_v50 }
 0x3f5   : > { %3239 = vperm.xlu1 %6140, %v3141_v15   ;;  %v2872_v15 = vpop.permute.xlu0 %2871 }
 0x3f6   : > { %v3021_v39 = vadd.f32 %v2872_v15, %v2797_v13  ;;  %v5748_v13 = vld [vmem:[%s10538_s9 + $0x8] sm:$0xf0]  ;;  %v5754_v15 = vld [vmem:[%s10538_s9 + $0x10] sm:$0xf] }
 0x3f7   : > { %v8507_v1 = vpop.permute.xlu2 %2330 }
 0x3f8   : > { %3229 = vperm.xlu2 %6142, %v3139_v47   ;;  %v2425_v25 = vmul.f32 %v8154_v7, %v8507_v1  ;;  %v5746_v1 = vld [vmem:[%s10538_s9] sm:$0xf] }
 0x3f9   : > { %v2887_v48 = vpop.permute.xlu1 %2886 }
 0x3fa   : > { %v3024_v11 = vadd.f32 %v2887_v48, %v2800_v60  ;;  %v3053_v48 = vmax.f32 %v3021_v39, 0.0 }
 0x3fc   : > { %v3056_v33 = vmax.f32 %v3024_v11, 0.0  ;;  %v11003_v11 = vld [vmem:[#allocation66_spill] sm:$0xff] }
 0x3fd   : > { %3154 = vperm.xlu1 %6140, %v3124_v45   ;;  %v2781_v59 = vmul.f32 %v8162_v6, %v11003_v11  ;;  %v5928_v11 = vld [vmem:[%s10538_s9 + $0x24] sm:$0xf] }
 0x3fe   : > { %v3085_v56 = vpack.c.bf16 %v3056_v33, %v3055_v52  ;;  %v2571_v33 = vmul.f32 %v8158_v32, %v8487_v18 }
 0x3ff   : > { %v2813_v42 = vadd.f32 %v2781_v59, %v8469_v14  ;;  %v5764_v59 = vld [vmem:[%s10538_s9 + $0x28] sm:$0xf0] }
 0x400   : > { %3392 = vmatpush.bf16.msrb.mxu0 %v3085_v56  ;;  %3224 = vperm.xlu2 %6142, %v3138_v55   ;;  %v2511_v28 = vpop.permute.xlu2 %2510  ;;  %v2410_v55 = vmul.f32 %v8154_v7, %v2256_v9 }
 0x402   : > { %v8499_v19 = vpop.permute.xlu1 %2442 }
 0x403   : > { %v2570_v4 = vmul.f32 %v8158_v32, %v8499_v19 }
 0x405   : > { %3219 = vperm.xlu1 %6140, %v3137_v63  }
 0x408   : > { %3199 = vperm.xlu2 %6142, %v3133_v5  }
 0x409   : > { %v2640_v22 = vpop.permute.xlu2 %2639 }
 0x40a   : > { %v2764_v63 = vmul.f32 %v8162_v6, %v2640_v22 }
 0x40b   : > { %v2712_v62 = vpop.permute.xlu1 %2711 }
 0x40c   : > { %v2782_v36 = vmul.f32 %v8162_v6, %v2712_v62 }
 0x40d   : > { %3214 = vperm.xlu1 %6140, %v3136_v41   ;;  %v2603_v41 = vadd.f32 %v2571_v33, %v2410_v55  ;;  %v5931_v33 = vld [vmem:[%s10538_s9 + $0x34] sm:$0xf0]  ;;  %v5772_v55 = vld [vmem:[%s10538_s9 + $0x38] sm:$0xf0] }
 0x40e   : > { %v2814_v50 = vadd.f32 %v2782_v36, %v8435_v10  ;;  %v2409_v10 = vmul.f32 %v8154_v7, %v8474_v21  ;;  %v5756_v36 = vld [vmem:[%s10538_s9 + $0x18] sm:$0xf0] }
 0x40f   : > { %v2796_v57 = vadd.f32 %v2764_v63, %v2603_v41  ;;  %v5933_v63 = vld [vmem:[%s10538_s9 + $0x44] sm:$0xf0]  ;;  %v5780_v41 = vld [vmem:[%s10538_s9 + $0x48] sm:$0xf0] }
 0x410   : > { %3194 = vperm.xlu2 %6142, %v3132_v8   ;;  %v2602_v34 = vadd.f32 %v2570_v4, %v2409_v10  ;;  %v5778_v4 = vld [vmem:[%s10538_s9 + $0x40] sm:$0xf]  ;;  %v5932_v10 = vld [vmem:[%s10538_s9 + $0x44] sm:$0xf] }
 0x411   : > { %v2700_v2 = vpop.permute.xlu2 %2699 }
 0x414   : > { %v2967_v61 = vpop.permute.xlu1 %2966 }
 0x415   : > { %v3040_v29 = vadd.f32 %v2967_v61, %v2816_v23  ;;  %3189 = vperm.xlu1 %6140, %v3131_v30   ;;  %v2587_v30 = vmul.f32 %v8158_v32, %v2511_v28  ;;  %v11004_v28 = vld [vmem:[#allocation67_spill] sm:$0xff] }
 0x416   : > { %v2780_v22 = vmul.f32 %v8162_v6, %v11004_v28 }
 0x417   : > { %v3072_v35 = vmax.f32 %v3040_v29, 0.0  ;;  %v2426_v29 = vmul.f32 %v8154_v7, %v2336_v51  ;;  %v2942_v7 = vpop.permute.xlu0 %2941 }
 0x418   : > { %3718 = vperm.xlu2 %6142, %v3704_v24   ;;  %v2779_v24 = vmul.f32 %v8162_v6, %v2700_v2 }
 0x419   : > { %v3093_v31 = vpack.c.bf16 %v3072_v35, %v3071_v49  ;;  %v2619_v35 = vadd.f32 %v2587_v30, %v2426_v29  ;;  %v5939_v29 = vld [vmem:[%s10538_s9 + $0x74] sm:$0xf0] }
 0x41a   : > { %v2957_v60 = vpop.permute.xlu2 %2956 }
 0x41b   : > { %3461 = vmatpush.bf16.msra.mxu1 %v3093_v31  ;;  %v3038_v52 = vadd.f32 %v2957_v60, %v2814_v50  ;;  %v5762_v60 = vld [vmem:[%s10538_s9 + $0x20] sm:$0xf]  ;;  %v5767_v50 = vor.u32 %v5928_v11, %v5764_v59 }
 0x41d   : > { %3713 = vperm.xlu1 %6140, %v3703_v16   ;;  %v2507_v20 = vpop.permute.xlu1 %2506  ;;  %v3070_v62 = vmax.f32 %v3038_v52, 0.0 }
 0x41e   : > { %v2586_v18 = vmul.f32 %v8158_v32, %v2507_v20  ;;  %v5925_v32 = vld [vmem:[%s10538_s9 + $0x4] sm:$0xf0] }
 0x420   : > { %3733 = vperm.xlu2 %6142, %v3707_v27   ;;  %v2618_v46 = vadd.f32 %v2586_v18, %v2425_v25  ;;  %v5747_v27 = vor.u32 %v5925_v32, %v5746_v1  ;;  %v5786_v18 = vld [vmem:[%s10538_s9 + $0x50] sm:$0xf]  ;;  %v5788_v25 = vld [vmem:[%s10538_s9 + $0x58] sm:$0xf0] }
 0x422   : > { %v2867_v14 = vpop.permute.xlu2 %2866  ;;  %v2811_v9 = vadd.f32 %v2779_v24, %v2618_v46  ;;  %v5936_v46 = vld [vmem:[%s10538_s9 + $0x64] sm:$0xf] }
 0x423   : > { %v3020_v23 = vadd.f32 %v2867_v14, %v2796_v57  ;;  %v5934_v14 = vld [vmem:[%s10538_s9 + $0x54] sm:$0xf]  ;;  %v5794_v57 = vld [vmem:[%s10538_s9 + $0x60] sm:$0xf] }
 0x424   : > { %v3035_v51 = vadd.f32 %v2942_v7, %v2811_v9  ;;  %v5812_v7 = vld [vmem:[%s10538_s9 + $0x88] sm:$0xf0] }
 0x425   : > { %3728 = vperm.xlu1 %6140, %v3706_v17   ;;  %v3052_v31 = vmax.f32 %v3020_v23, 0.0  ;;  %v2812_v17 = vadd.f32 %v2780_v22, %v2619_v35  ;;  %v5796_v23 = vld [vmem:[%s10538_s9 + $0x68] sm:$0xf0]  ;;  %v5804_v35 = vld [vmem:[%s10538_s9 + $0x78] sm:$0xf0] }
 0x426   : > { %v2636_v26 = vpop.permute.xlu1 %2635 }
 0x427   : > { %v2763_v8 = vmul.f32 %v8162_v6, %v2636_v26  ;;  %v3067_v26 = vmax.f32 %v3035_v51, 0.0 }
 0x428   : > { %3748 = vperm.xlu2 %6142, %v3710_v58  }
 0x429   : > { %v2795_v21 = vadd.f32 %v2763_v8, %v2602_v34  ;;  %v5935_v8 = vld [vmem:[%s10538_s9 + $0x54] sm:$0xf0]  ;;  %v5791_v34 = vor.u32 %v5934_v14, %v5788_v25 }
 0x42a   : > { %v3180_v1 = vpop.permute.xlu2 %3179 }
 0x42d   : > { %3743 = vperm.xlu1 %6140, %v3709_v37   ;;  %v5751_v37 = vor.u32 %v5924_v44, %v5748_v13 }
 0x42f   : > { %v2877_v47 = vpop.permute.xlu1 %2876 }
 0x430   : > { %v3022_v12 = vadd.f32 %v2877_v47, %v2798_v38  ;;  %v5927_v38 = vld [vmem:[%s10538_s9 + $0x14] sm:$0xf0]  ;;  %v5926_v47 = vld [vmem:[%s10538_s9 + $0x14] sm:$0xf] }
 0x431   : > { %v5755_v39 = vor.u32 %v5927_v38, %v5754_v15  ;;  %v5942_v38 = vld [vmem:[%s10538_s9 + $0x94] sm:$0xf] }
 0x432   : > { %v3054_v40 = vmax.f32 %v3022_v12, 0.0  ;;  %v5759_v12 = vor.u32 %v5926_v47, %v5756_v36 }
 0x434   : > { %v3084_v45 = vpack.c.bf16 %v3054_v40, %v3053_v48  ;;  %v5929_v40 = vld [vmem:[%s10538_s9 + $0x24] sm:$0xf0] }
 0x435   : > { %v5763_v48 = vor.u32 %v5929_v40, %v5762_v60  ;;  %v5826_v40 = vld [vmem:[%s10538_s9 + $0xa0] sm:$0xf] }
 0x436   : > { %3393 = vmatpush.bf16.msrb.mxu0 %v3084_v45  ;;  %v5770_v45 = vld [vmem:[%s10538_s9 + $0x30] sm:$0xf] }
 0x437   : > { %v2952_v56 = vpop.permute.xlu1 %2951  ;;  %v5771_v52 = vor.u32 %v5931_v33, %v5770_v45  ;;  %v8711_v33 = vpop.permute.xlu0 %3264 }
 0x438   : > { %v3037_v5 = vadd.f32 %v2952_v56, %v2813_v42  ;;  %v5930_v42 = vld [vmem:[%s10538_s9 + $0x34] sm:$0xf] }
 0x439   : > { %v5775_v56 = vor.u32 %v5930_v42, %v5772_v55  ;;  %v5828_v42 = vld [vmem:[%s10538_s9 + $0xa8] sm:$0xf0] }
 0x43a   : > { %v3069_v3 = vmax.f32 %v3037_v5, 0.0  ;;  %v5779_v5 = vor.u32 %v5933_v63, %v5778_v4 }
 0x43c   : > { %v3092_v19 = vpack.c.bf16 %v3070_v62, %v3069_v3  ;;  %v5783_v62 = vor.u32 %v5932_v10, %v5780_v41  ;;  %v5787_v3 = vor.u32 %v5935_v8, %v5786_v18  ;;  %v5834_v41 = vld [vmem:[%s10538_s9 + $0xb0] sm:$0xf] }
 0x43e   : > { %3462 = vmatpush.bf16.msra.mxu1 %v3092_v19  ;;  %v5937_v19 = vld [vmem:[%s10538_s9 + $0x64] sm:$0xf0] }
 0x43f   : > { %v2862_v61 = vpop.permute.xlu1 %2861  ;;  %v5795_v30 = vor.u32 %v5937_v19, %v5794_v57  ;;  %v8721_v10 = vpop.permute.xlu0 %3249  ;;  %v5836_v57 = vld [vmem:[%s10538_s9 + $0xb8] sm:$0xf0] }
 0x440   : > { %v3019_v49 = vadd.f32 %v2862_v61, %v2795_v21  ;;  %v5799_v21 = vor.u32 %v5936_v46, %v5796_v23  ;;  %v5802_v61 = vld [vmem:[%s10538_s9 + $0x70] sm:$0xf] }
 0x441   : > { %v5803_v24 = vor.u32 %v5939_v29, %v5802_v61 }
 0x442   : > { %v3051_v16 = vmax.f32 %v3019_v49, 0.0  ;;  %v5938_v49 = vld [vmem:[%s10538_s9 + $0x74] sm:$0xf] }
 0x443   : > { %v5807_v9 = vor.u32 %v5938_v49, %v5804_v35 }
 0x444   : > { %v3083_v20 = vpack.c.bf16 %v3052_v31, %v3051_v16  ;;  %v5810_v31 = vld [vmem:[%s10538_s9 + $0x80] sm:$0xf]  ;;  %v5941_v16 = vld [vmem:[%s10538_s9 + $0x84] sm:$0xf0] }
 0x445   : > { %v5811_v28 = vor.u32 %v5941_v16, %v5810_v31 }
 0x446   : > { %3394 = vmatpush.bf16.msrb.mxu0 %v3083_v20  ;;  %v5940_v20 = vld [vmem:[%s10538_s9 + $0x84] sm:$0xf] }
 0x447   : > { %v2947_v58 = vpop.permute.xlu1 %2946  ;;  %v3165_v19 = vpop.permute.xlu0 %3164 }
 0x448   : > { %v3036_v43 = vadd.f32 %v2947_v58, %v2812_v17  ;;  %v5815_v17 = vor.u32 %v5940_v20, %v5812_v7 }
 0x449   : > { %3395 = vmatmul.bf16.vlgmr.msrb.gmra.mxu0 %v5747_v27  ;;  %v8681_v27 = vpop.permute.xlu2 %3259 }
 0x44a   : > { %v3068_v2 = vmax.f32 %v3036_v43, 0.0 }
 0x44c   : > { %v3091_v6 = vpack.c.bf16 %v3068_v2, %v3067_v26  ;;  %v5818_v26 = vld [vmem:[%s10538_s9 + $0x90] sm:$0xf]  ;;  %v5943_v2 = vld [vmem:[%s10538_s9 + $0x94] sm:$0xf0] }
 0x44d   : > { %v5819_v44 = vor.u32 %v5943_v2, %v5818_v26 }
 0x44e   : > { %3463 = vmatpush.bf16.msra.mxu1 %v3091_v6 }
 0x44f   : > { %v8671_v32 = vpop.permute.xlu1 %3184  ;;  %v3150_v31 = vpop.permute.xlu0 %3149 }
 0x451   : > { %3464 = vmatmul.bf16.vlgmr.msra.gmra.mxu1 %v5751_v37  ;;  %v3175_v37 = vpop.permute.xlu2 %3174 }
 0x457   : > { %v3170_v43 = vpop.permute.xlu1 %3169 }
 0x459   : > { %3400 = vmatmul.bf16.gmra.mxu0 %v5755_v39  ;;  %v5820_v39 = vld [vmem:[%s10538_s9 + $0x98] sm:$0xf0]  ;;  %v3160_v60 = vpop.permute.xlu2 %3159 }
 0x45a   : > { %v5823_v47 = vor.u32 %v5942_v38, %v5820_v39 }
 0x45f   : > { %v8695_v15 = vpop.permute.xlu1 %3254 }
 0x461   : > { %3469 = vmatmul.bf16.gmra.mxu1 %v5759_v12  ;;  %v8719_v55 = vpop.permute.xlu2 %3244 }
 0x467   : > { %v8709_v11 = vpop.permute.xlu1 %3239 }
 0x469   : > { %3405 = vmatmul.bf16.gmra.mxu0 %v5763_v48  ;;  %v5945_v48 = vld [vmem:[%s10538_s9 + $0xa4] sm:$0xf0]  ;;  %v8729_v18 = vpop.permute.xlu2 %3229 }
 0x46a   : > { %v5827_v59 = vor.u32 %v5945_v48, %v5826_v40 }
 0x471   : > { %3474 = vmatmul.bf16.gmra.mxu1 %v5767_v50  ;;  %v8739_v61 = vpop.permute.xlu2 %3224 }
 0x479   : > { %3410 = vmatmul.bf16.gmra.mxu0 %v5771_v52  ;;  %v5944_v52 = vld [vmem:[%s10538_s9 + $0xa4] sm:$0xf] }
 0x47a   : > { %v5831_v4 = vor.u32 %v5944_v52, %v5828_v42 }
 0x481   : > { %3479 = vmatmul.bf16.gmra.mxu1 %v5775_v56  ;;  %v3155_v56 = vpop.permute.xlu1 %3154 }
 0x489   : > { %3415 = vmatmul.bf16.gmra.mxu0 %v5779_v5  ;;  %v8731_v25 = vpop.permute.xlu1 %3219 }
 0x491   : > { %3484 = vmatmul.bf16.gmra.mxu1 %v5783_v62  ;;  %v5947_v62 = vld [vmem:[%s10538_s9 + $0xb4] sm:$0xf0]  ;;  %v8741_v49 = vpop.permute.xlu1 %3214 }
 0x492   : > { %v5835_v8 = vor.u32 %v5947_v62, %v5834_v41 }
 0x499   : > { %3420 = vmatmul.bf16.gmra.mxu0 %v5787_v3 }
 0x4a1   : > { %3489 = vmatmul.bf16.gmra.mxu1 %v5791_v34  ;;  %v5946_v34 = vld [vmem:[%s10538_s9 + $0xb4] sm:$0xf] }
 0x4a9   : > { %3425 = vmatmul.bf16.gmra.mxu0 %v5795_v30  ;;  %v5839_v30 = vor.u32 %v5946_v34, %v5836_v57 }
 0x4b1   : > { %3494 = vmatmul.bf16.gmra.mxu1 %v5799_v21 }
 0x4b9   : > { %3430 = vmatmul.bf16.gmra.mxu0 %v5803_v24 }
 0x4c1   : > { %3499 = vmatmul.bf16.gmra.mxu1 %v5807_v9 }
 0x4c6   : > { %v8673_v22 = vpop.f32.mrf.mxu0 }
 0x4c9   : > { %3435 = vmatmul.bf16.gmra.mxu0 %v5811_v28 }
 0x4ce   : > { %v8683_v51 = vpop.f32.mrf.mxu0  ;;  %v8685_v58 = vpop.f32.mrf.mxu1 }
 0x4d1   : > { %3504 = vmatmul.bf16.gmra.mxu1 %v5815_v17 }
 0x4d6   : > { %v3401_v13 = vpop.f32.mrf.mxu0  ;;  %v8693_v6 = vpop.f32.mrf.mxu1 }
 0x4d7   : > { %v3402_v17 = vadd.f32 %v3401_v13, %v3160_v60  ;;  %v3190_v13 = vpop.permute.xlu1 %3189 }
 0x4d9   : > { %3440 = vmatmul.bf16.gmra.mxu0 %v5819_v44 }
 0x4de   : > { %v3403_v36 = vpop.f32.mrf.mxu0  ;;  %v3470_v12 = vpop.f32.mrf.mxu1 }
 0x4df   : > { %v3404_v16 = vadd.f32 %v3403_v36, %v3165_v19  ;;  %v3471_v39 = vadd.f32 %v3470_v12, %v3402_v17 }
 0x4e1   : > { %3509 = vmatmul.bf16.gmra.mxu1 %v5823_v47 }
 0x4e6   : > { %v3406_v50 = vpop.f32.mrf.mxu0  ;;  %v3472_v45 = vpop.f32.mrf.mxu1 }
 0x4e7   : > { %v3407_v35 = vadd.f32 %v3406_v50, %v3170_v43  ;;  %v3473_v44 = vadd.f32 %v3472_v45, %v3404_v16  ;;  %v3200_v43 = vpop.permute.xlu2 %3199  ;;  %v3527_v45 = vmax.f32 %v3471_v39, 0.0 }
 0x4e9   : > { %3445 = vmatmul.bf16.gmra.mxu0 %v5827_v59  ;;  %v3397_v59 = vadd.f32 %v8673_v22, %v3150_v31  ;;  %v3528_v50 = vmax.f32 %v3473_v44, 0.0 }
 0x4eb   : > { %v3466_v60 = vadd.f32 %v8685_v58, %v3397_v59  ;;  %v3552_v41 = vpack.c.bf16 %v3528_v50, %v3528_v50 }
 0x4ed   : > { %v3591_v58 = vunpack.c.l.b16 %v3552_v41 }
 0x4ee   : > { %v3408_v63 = vpop.f32.mrf.mxu0  ;;  %v3475_v5 = vpop.f32.mrf.mxu1 }
 0x4ef   : > { %v3409_v29 = vadd.f32 %v3408_v63, %v3175_v37  ;;  %v3476_v28 = vadd.f32 %v3475_v5, %v3407_v35  ;;  %v3399_v37 = vadd.f32 %v8683_v51, %v3155_v56 }
 0x4f1   : > { %3514 = vmatmul.bf16.gmra.mxu1 %v5831_v4  ;;  %v3529_v47 = vmax.f32 %v3476_v28, 0.0  ;;  %v3468_v36 = vadd.f32 %v8693_v6, %v3399_v37  ;;  %v3525_v6 = vmax.f32 %v3466_v60, 0.0  ;;  %v3573_v37 = vld [vmem:[%s10540_s11] sm:$0x3] }
 0x4f3   : > { %v3553_v42 = vpack.c.bf16 %v3529_v47, %v3529_v47  ;;  %v3526_v12 = vmax.f32 %v3468_v36, 0.0 }
 0x4f5   : > { %v3592_v34 = vunpack.c.l.b16 %v3553_v42  ;;  %v3550_v57 = vpack.c.bf16 %v3526_v12, %v3526_v12 }
 0x4f6   : > { %v3411_v3 = vpop.f32.mrf.mxu0  ;;  %v3477_v14 = vpop.f32.mrf.mxu1 }
 0x4f7   : > { %v3412_v21 = vadd.f32 %v3411_v3, %v3180_v1  ;;  %v3478_v9 = vadd.f32 %v3477_v14, %v3409_v29  ;;  %v8748_v3 = vpop.permute.xlu0 %3234  ;;  %v3551_v14 = vpack.c.bf16 %v3527_v45, %v3527_v45 }
 0x4f9   : > { %3450 = vmatmul.bf16.gmra.mxu0 %v5835_v8  ;;  %v3530_v1 = vmax.f32 %v3478_v9, 0.0  ;;  %v3589_v9 = vunpack.c.l.b16 %v3550_v57 }
 0x4fe   : > { %v3413_v46 = vpop.f32.mrf.mxu0  ;;  %v3480_v23 = vpop.f32.mrf.mxu1 }
 0x4ff   : > { %v3481_v24 = vadd.f32 %v3480_v23, %v3412_v21  ;;  %v3414_v20 = vadd.f32 %v3413_v46, %v8671_v32  ;;  %v3554_v32 = vpack.c.bf16 %v3530_v1, %v3530_v1  ;;  %v3549_v46 = vpack.c.bf16 %v3525_v6, %v3525_v6  ;;  %v3210_v17 = vpop.permute.xlu0 %3209 }
 0x500   : > { %v3590_v23 = vunpack.c.l.b16 %v3551_v14 }
 0x501   : > { %3519 = vmatmul.bf16.gmra.mxu1 %v5839_v30  ;;  %v3531_v7 = vmax.f32 %v3481_v24, 0.0  ;;  %v3593_v62 = vunpack.c.l.b16 %v3554_v32  ;;  %v3195_v30 = vpop.permute.xlu2 %3194  ;;  %v3588_v28 = vunpack.c.l.b16 %v3549_v46 }
 0x502   : > { %v3597_v16 = vpack.c.b16 %v3591_v58, %v3590_v23 }
 0x503   : > { %v3555_v40 = vpack.c.bf16 %v3531_v7, %v3531_v7  ;;  %v3598_v19 = vpack.c.b16 %v3593_v62, %v3592_v34 }
 0x505   : > { %v3594_v4 = vunpack.c.l.b16 %v3555_v40 }
 0x506   : > { %v3416_v26 = vpop.f32.mrf.mxu0  ;;  %v3482_v2 = vpop.f32.mrf.mxu1 }
 0x507   : > { %v3483_v38 = vadd.f32 %v3482_v2, %v3414_v20  ;;  %v3417_v63 = vadd.f32 %v3416_v26, %v3190_v13  ;;  %v3596_v2 = vpack.c.b16 %v3589_v9, %v3588_v28  ;;  %v3205_v59 = vpop.permute.xlu0 %3204 }
 0x509   : > { %v3532_v48 = vmax.f32 %v3483_v38, 0.0 }
 0x50b   : > { %v3556_v52 = vpack.c.bf16 %v3532_v48, %v3532_v48 }
 0x50d   : > { %v3595_v51 = vunpack.c.l.b16 %v3556_v52 }
 0x50e   : > { %v3418_v56 = vpop.f32.mrf.mxu0  ;;  %v3485_v5 = vpop.f32.mrf.mxu1 }
 0x50f   : > { %v3599_v8 = vpack.c.b16 %v3595_v51, %v3594_v4  ;;  %v3486_v22 = vadd.f32 %v3485_v5, %v3417_v63  ;;  %v3419_v21 = vadd.f32 %v3418_v56, %v3195_v30 }
 0x511   : > { %3612 = vmatpush.bf16.msrb.mxu2 %v3599_v8  ;;  %v3533_v29 = vmax.f32 %v3486_v22, 0.0 }
 0x513   : > { %v3557_v20 = vpack.c.bf16 %v3533_v29, %v3533_v29 }
 0x515   : > { %3613 = vmatpush.bf16.msrb.mxu2 %v3598_v19  ;;  %v3791_v44 = vunpack.c.l.b16 %v3557_v20 }
 0x516   : > { %v3421_v24 = vpop.f32.mrf.mxu0  ;;  %v3487_v35 = vpop.f32.mrf.mxu1 }
 0x517   : > { %v3488_v31 = vadd.f32 %v3487_v35, %v3419_v21  ;;  %v3422_v1 = vadd.f32 %v3421_v24, %v3200_v43 }
 0x519   : > { %v3534_v7 = vmax.f32 %v3488_v31, 0.0  ;;  %3614 = vmatpush.bf16.msrb.mxu2 %v3597_v16 }
 0x51b   : > { %v3558_v26 = vpack.c.bf16 %v3534_v7, %v3534_v7 }
 0x51d   : > { %v3792_v38 = vunpack.c.l.b16 %v3558_v26  ;;  %3615 = vmatpush.bf16.msrb.mxu2 %v3596_v2 }
 0x51e   : > { %v3423_v39 = vpop.f32.mrf.mxu0  ;;  %v3490_v47 = vpop.f32.mrf.mxu1 }
 0x51f   : > { %v3491_v40 = vadd.f32 %v3490_v47, %v3422_v1  ;;  %v8753_v48 = vpack.c.b16 %v3792_v38, %v3791_v44  ;;  %v3424_v36 = vadd.f32 %v3423_v39, %v3205_v59 }
 0x520   : > { %5840 = vmatmul.msk.bf16.vlgmr.msrb.gmra.mxu2 %vm3604_vm0, %v3573_v37 }
 0x521   : > { %v3535_v50 = vmax.f32 %v3491_v40, 0.0 }
 0x523   : > { %v3559_v43 = vpack.c.bf16 %v3535_v50, %v3535_v50  ;;  %v3636_v50 = vld [vmem:[%s10536_s7 + $0x78] sm:$0xff] }
 0x524   : > { %3637 = vmatpush.msra.mxu3 %v3636_v50 }
 0x525   : > { %v3793_v42 = vunpack.c.l.b16 %v3559_v43 }
 0x526   : > { %v3426_v32 = vpop.f32.mrf.mxu0  ;;  %v3492_v52 = vpop.f32.mrf.mxu1 }
 0x527   : > { %v3493_v13 = vadd.f32 %v3492_v52, %v3424_v36  ;;  %v3427_v4 = vadd.f32 %v3426_v32, %v3210_v17  ;;  %v3634_v32 = vld [vmem:[%s10536_s7 + $0x68] sm:$0xff]  ;;  %v3633_v52 = vld [vmem:[%s10536_s7 + $0x60] sm:$0xff] }
 0x529   : > { %v3536_v60 = vmax.f32 %v3493_v13, 0.0  ;;  %v3632_v13 = vld [vmem:[%s10536_s7 + $0x58] sm:$0xff] }
 0x52b   : > { %v3560_v45 = vpack.c.bf16 %v3536_v60, %v3536_v60  ;;  %v3631_v60 = vld [vmem:[%s10536_s7 + $0x50] sm:$0xff] }
 0x52d   : > { %v3794_v63 = vunpack.c.l.b16 %v3560_v45 }
 0x52e   : > { %v3428_v51 = vpop.f32.mrf.mxu0  ;;  %v3495_v12 = vpop.f32.mrf.mxu1 }
 0x52f   : > { %v3496_v56 = vadd.f32 %v3495_v12, %v3427_v4  ;;  %v8755_v5 = vpack.c.b16 %v3794_v63, %v3793_v42  ;;  %v3429_v41 = vadd.f32 %v3428_v51, %v8741_v49  ;;  %v3630_v42 = vld [vmem:[%s10536_s7 + $0x48] sm:$0xff]  ;;  %v3629_v4 = vld [vmem:[%s10536_s7 + $0x40] sm:$0xff]  ;;  %v3628_v63 = vld [vmem:[%s10536_s7 + $0x38] sm:$0xff] }
 0x531   : > { %v3537_v62 = vmax.f32 %v3496_v56, 0.0  ;;  %v3627_v56 = vld [vmem:[%s10536_s7 + $0x30] sm:$0xff] }
 0x533   : > { %v3561_v14 = vpack.c.bf16 %v3537_v62, %v3537_v62 }
 0x535   : > { %v3795_v58 = vunpack.c.l.b16 %v3561_v14 }
 0x536   : > { %v3431_v8 = vpop.f32.mrf.mxu0  ;;  %v3497_v22 = vpop.f32.mrf.mxu1 }
 0x537   : > { %v3498_v6 = vadd.f32 %v3497_v22, %v3429_v41  ;;  %v3432_v19 = vadd.f32 %v3431_v8, %v8731_v25  ;;  %v3626_v8 = vld [vmem:[%s10536_s7 + $0x28] sm:$0xff] }
 0x539   : > { %v3538_v34 = vmax.f32 %v3498_v6, 0.0 }
 0x53b   : > { %v3562_v57 = vpack.c.bf16 %v3538_v34, %v3538_v34 }
 0x53d   : > { %v3796_v30 = vunpack.c.l.b16 %v3562_v57 }
 0x53e   : > { %v3433_v46 = vpop.f32.mrf.mxu0  ;;  %v3500_v23 = vpop.f32.mrf.mxu1 }
 0x53f   : > { %v3501_v21 = vadd.f32 %v3500_v23, %v3432_v19  ;;  %v8759_v29 = vpack.c.b16 %v3796_v30, %v3795_v58  ;;  %v3434_v24 = vadd.f32 %v3433_v46, %v8739_v61  ;;  %v3624_v19 = vld [vmem:[%s10536_s7 + $0x18] sm:$0xff] }
 0x541   : > { %v3539_v35 = vmax.f32 %v3501_v21, 0.0 }
 0x543   : > { %v3563_v16 = vpack.c.bf16 %v3539_v35, %v3539_v35 }
 0x545   : > { %v3797_v7 = vunpack.c.l.b16 %v3563_v16 }
 0x546   : > { %v3436_v49 = vpop.f32.mrf.mxu0  ;;  %v3502_v9 = vpop.f32.mrf.mxu1 }
 0x547   : > { %v3503_v31 = vadd.f32 %v3502_v9, %v3434_v24  ;;  %v3437_v17 = vadd.f32 %v3436_v49, %v8729_v18  ;;  %v3635_v18 = vld [vmem:[%s10536_s7 + $0x70] sm:$0xff] }
 0x548   : > { %3638 = vmatpush.msra.mxu3 %v3635_v18  ;;  %v3623_v24 = vld [vmem:[%s10536_s7 + $0x10] sm:$0xff] }
 0x549   : > { %v3540_v28 = vmax.f32 %v3503_v31, 0.0  ;;  %v3622_v31 = vld [vmem:[%s10536_s7 + $0x8] sm:$0xff] }
 0x54a   : > { %3639 = vmatpush.msra.mxu3 %v3634_v32 }
 0x54b   : > { %v3564_v20 = vpack.c.bf16 %v3540_v28, %v3540_v28 }
 0x54c   : > { %3640 = vmatpush.msra.mxu3 %v3633_v52 }
 0x54d   : > { %v3798_v26 = vunpack.c.l.b16 %v3564_v20 }
 0x54e   : > { %v3438_v25 = vpop.f32.mrf.mxu0  ;;  %v3505_v2 = vpop.f32.mrf.mxu1  ;;  %3641 = vmatpush.msra.mxu3 %v3632_v13 }
 0x54f   : > { %v8763_v44 = vadd.f32 %v3505_v2, %v3437_v17  ;;  %v8765_v1 = vpack.c.b16 %v3798_v26, %v3797_v7  ;;  %v3621_v7 = vld [vmem:[%s10536_s7] sm:$0xff] }
 0x550   : > { %3642 = vmatpush.msra.mxu3 %v3631_v60 }
 0x552   : > { %3643 = vmatpush.msra.mxu3 %v3630_v42 }
 0x554   : > { %3644 = vmatpush.msra.mxu3 %v3629_v4 }
 0x556   : > { %v3441_v38 = vpop.f32.mrf.mxu0  ;;  %v3507_v37 = vpop.f32.mrf.mxu1  ;;  %3645 = vmatpush.msra.mxu3 %v3628_v63  ;;  %v5948_v63 = vld [vmem:[%s10542_s13] sm:$0xff] }
 0x558   : > { %3646 = vmatpush.msra.mxu3 %v3627_v56  ;;  %v3862_v56 = vld [vmem:[%s10537_s8 + $0x50] sm:$0xff] }
 0x55a   : > { %3647 = vmatpush.msra.mxu3 %v3626_v8  ;;  %v3860_v8 = vld [vmem:[%s10537_s8 + $0x40] sm:$0xff] }
 0x55e   : > { %v3443_v61 = vpop.f32.mrf.mxu0  ;;  %v3510_v39 = vpop.f32.mrf.mxu1 }
 0x55f   : > { %v3444_v34 = vadd.f32 %v3443_v61, %v8719_v55  ;;  %v3439_v55 = vadd.f32 %v3438_v25, %v8748_v3 }
 0x566   : > { %v3446_v47 = vpop.f32.mrf.mxu0  ;;  %v3512_v40 = vpop.f32.mrf.mxu1 }
 0x567   : > { %v3447_v6 = vadd.f32 %v3446_v47, %v8721_v10  ;;  %v3442_v10 = vadd.f32 %v3441_v38, %v8709_v11  ;;  %v3513_v46 = vadd.f32 %v3512_v40, %v3444_v34  ;;  %v3508_v11 = vadd.f32 %v3507_v37, %v3439_v55  ;;  %v3856_v34 = vld [vmem:[%s10537_s8 + $0x20] sm:$0xff]  ;;  %v3714_v55 = vpop.permute.xlu1 %3713 }
 0x568   : > { %v3541_v47 = vmax.f32 %v8763_v44, 0.0 }
 0x569   : > { %v3544_v16 = vmax.f32 %v3513_v46, 0.0  ;;  %v3542_v2 = vmax.f32 %v3508_v11, 0.0  ;;  %v3719_v11 = vpop.permute.xlu2 %3718 }
 0x56a   : > { %v3565_v18 = vpack.c.bf16 %v3541_v47, %v3541_v47 }
 0x56b   : > { %v3568_v38 = vpack.c.bf16 %v3544_v16, %v3544_v16 }
 0x56e   : > { %v3448_v59 = vpop.f32.mrf.mxu0  ;;  %v3515_v36 = vpop.f32.mrf.mxu1 }
 0x56f   : > { %v3449_v41 = vadd.f32 %v3448_v59, %v8695_v15  ;;  %v3516_v57 = vadd.f32 %v3515_v36, %v3447_v6  ;;  %v3566_v59 = vpack.c.bf16 %v3542_v2, %v3542_v2  ;;  %v3802_v36 = vunpack.c.l.b16 %v3568_v38  ;;  %v5951_v6 = vld [vmem:[%s10542_s13 + $0x18] sm:$0xff]  ;;  %v3729_v47 = vpop.permute.xlu1 %3728 }
 0x571   : > { %v3545_v35 = vmax.f32 %v3516_v57, 0.0  ;;  %v3800_v52 = vunpack.c.l.b16 %v3566_v59  ;;  %v3855_v57 = vld [vmem:[%s10537_s8 + $0x18] sm:$0xff] }
 0x573   : > { %v3569_v17 = vpack.c.bf16 %v3545_v35, %v3545_v35 }
 0x575   : > { %v3803_v40 = vunpack.c.l.b16 %v3569_v17 }
 0x576   : > { %v3517_v43 = vpop.f32.mrf.mxu1  ;;  %v3451_v45 = vpop.f32.mrf.mxu0 }
 0x577   : > { %v3452_v12 = vadd.f32 %v3451_v45, %v8681_v27  ;;  %v3518_v14 = vadd.f32 %v3517_v43, %v3449_v41  ;;  %v3625_v27 = vld [vmem:[%s10536_s7 + $0x20] sm:$0xff]  ;;  %v3799_v43 = vunpack.c.l.b16 %v3565_v18  ;;  %v3578_v45 = vpop.permute.xlu0 %3577  ;;  %v3861_v41 = vld [vmem:[%s10537_s8 + $0x48] sm:$0xff] }
 0x578   : > { %3648 = vmatpush.msra.mxu3 %v3625_v27  ;;  %v3857_v27 = vld [vmem:[%s10537_s8 + $0x28] sm:$0xff] }
 0x579   : > { %v3546_v23 = vmax.f32 %v3518_v14, 0.0  ;;  %v3811_v60 = vpack.c.b16 %v3800_v52, %v3799_v43  ;;  %v3858_v14 = vld [vmem:[%s10537_s8 + $0x30] sm:$0xff] }
 0x57a   : > { %3649 = vmatpush.msra.mxu3 %v3624_v19  ;;  %v3852_v19 = vld [vmem:[%s10537_s8] sm:$0xff] }
 0x57b   : > { %v3570_v28 = vpack.c.bf16 %v3546_v23, %v3546_v23 }
 0x57c   : > { %3650 = vmatpush.msra.mxu3 %v3623_v24 }
 0x57d   : > { %v3804_v61 = vunpack.c.l.b16 %v3570_v28 }
 0x57e   : > { %v3520_v51 = vpop.f32.mrf.mxu1  ;;  %v3453_v22 = vpop.f32.mrf.mxu0  ;;  %3651 = vmatpush.msra.mxu3 %v3622_v31 }
 0x57f   : > { %v3521_v62 = vadd.f32 %v3520_v51, %v3452_v12  ;;  %v3454_v15 = vadd.f32 %v3453_v22, %v8711_v33  ;;  %v3511_v33 = vadd.f32 %v3510_v39, %v3442_v10  ;;  %v3813_v50 = vpack.c.b16 %v3804_v61, %v3803_v40  ;;  %v3865_v51 = vld [vmem:[%s10537_s8 + $0x68] sm:$0xff]  ;;  %v3863_v12 = vld [vmem:[%s10537_s8 + $0x58] sm:$0xff]  ;;  %v3724_v17 = vpop.permute.xlu0 %3723 }
 0x580   : > { %3652 = vmatpush.msra.mxu3 %v3621_v7  ;;  %v3859_v22 = vld [vmem:[%s10537_s8 + $0x38] sm:$0xff] }
 0x581   : > { %v3547_v58 = vmax.f32 %v3521_v62, 0.0  ;;  %v3543_v3 = vmax.f32 %v3511_v33, 0.0  ;;  %v5950_v62 = vld [vmem:[%s10542_s13 + $0x10] sm:$0xff] }
 0x583   : > { %v3571_v49 = vpack.c.bf16 %v3547_v58, %v3547_v58  ;;  %v3567_v37 = vpack.c.bf16 %v3543_v3, %v3543_v3  ;;  %v3853_v58 = vld [vmem:[%s10537_s8 + $0x8] sm:$0xff] }
 0x585   : > { %v3805_v26 = vunpack.c.l.b16 %v3571_v49  ;;  %v3801_v32 = vunpack.c.l.b16 %v3567_v37 }
 0x586   : > { %v3522_v30 = vpop.f32.mrf.mxu1 }
 0x587   : > { %v3523_v21 = vadd.f32 %v3522_v30, %v3454_v15  ;;  %v3812_v13 = vpack.c.b16 %v3802_v36, %v3801_v32  ;;  %v3854_v15 = vld [vmem:[%s10537_s8 + $0x10] sm:$0xff]  ;;  %v3734_v32 = vpop.permute.xlu2 %3733 }
 0x589   : > { %v3548_v9 = vmax.f32 %v3523_v21, 0.0 }
 0x58b   : > { %v3572_v20 = vpack.c.bf16 %v3548_v9, %v3548_v9 }
 0x58d   : > { %v3806_v25 = vunpack.c.l.b16 %v3572_v20 }
 0x58f   : > { %v3814_v39 = vpack.c.b16 %v3806_v25, %v3805_v26 }
 0x591   : > { %3823 = vmatpush.bf16.msra.mxu2 %v3814_v39 }
 0x595   : > { %3824 = vmatpush.bf16.msra.mxu2 %v3813_v50 }
 0x599   : > { %3825 = vmatpush.bf16.msra.mxu2 %v3812_v13 }
 0x59d   : > { %3826 = vmatpush.bf16.msra.mxu2 %v3811_v60 }
 0x5a1   : > { %3827 = vmatpush.bf16.msra.mxu2 %v8765_v1  ;;  %v5949_v1 = vld [vmem:[%s10542_s13 + $0x8] sm:$0xff] }
 0x5a3   : > { %v3617_v42 = vpop.f32.mrf.mxu2 }
 0x5a4   : > { %v3618_v44 = vadd.f32 %v3617_v42, %v3578_v45 }
 0x5a5   : > { %3828 = vmatpush.bf16.msra.mxu2 %v8759_v29  ;;  %v3867_v29 = vld [vmem:[%s10537_s8 + $0x78] sm:$0xff] }
 0x5a6   : > { %3653 = vmatmul.f32.vlgmr.msra.gmra.mxu3 %v3618_v44  ;;  %v3739_v44 = vpop.permute.xlu0 %3738 }
 0x5a7   : > { %3868 = vmatpush.msrb.mxu3 %v3867_v29 }
 0x5a9   : > { %3829 = vmatpush.bf16.msra.mxu2 %v8755_v5  ;;  %v3866_v5 = vld [vmem:[%s10537_s8 + $0x70] sm:$0xff] }
 0x5aa   : > { %3869 = vmatpush.msrb.mxu3 %v3866_v5 }
 0x5ab   : > { %v3619_v4 = vpop.f32.mrf.mxu2 }
 0x5ac   : > { %3870 = vmatpush.msrb.mxu3 %v3865_v51 }
 0x5ad   : > { %3830 = vmatpush.bf16.msra.mxu2 %v8753_v48  ;;  %v3864_v48 = vld [vmem:[%s10537_s8 + $0x60] sm:$0xff] }
 0x5ae   : > { %3871 = vmatpush.msrb.mxu3 %v3864_v48 }
 0x5b0   : > { %3831 = vmatmul.bf16.vlgmr.msra.gmra.mxu2 %v5948_v63  ;;  %3872 = vmatpush.msrb.mxu3 %v3863_v12 }
 0x5b2   : > { %3873 = vmatpush.msrb.mxu3 %v3862_v56 }
 0x5b4   : > { %3874 = vmatpush.msrb.mxu3 %v3861_v41  ;;  %v3744_v41 = vpop.permute.xlu1 %3743 }
 0x5b6   : > { %3875 = vmatpush.msrb.mxu3 %v3860_v8 }
 0x5b8   : > { %3876 = vmatpush.msrb.mxu3 %v3859_v22  ;;  %v3749_v22 = vpop.permute.xlu2 %3748 }
 0x5ba   : > { %3877 = vmatpush.msrb.mxu3 %v3858_v14 }
 0x5bc   : > { %3878 = vmatpush.msrb.mxu3 %v3857_v27 }
 0x5be   : > { %3879 = vmatpush.msrb.mxu3 %v3856_v34 }
 0x5c0   : > { %3836 = vmatmul.bf16.gmra.mxu2 %v5949_v1  ;;  %3880 = vmatpush.msrb.mxu3 %v3855_v57 }
 0x5c2   : > { %3881 = vmatpush.msrb.mxu3 %v3854_v15 }
 0x5c4   : > { %3882 = vmatpush.msrb.mxu3 %v3853_v58 }
 0x5c6   : > { %3883 = vmatpush.msrb.mxu3 %v3852_v19 }
 0x5d0   : > { %3841 = vmatmul.bf16.gmra.mxu2 %v5950_v62 }
 0x5e0   : > { %3846 = vmatmul.bf16.gmra.mxu2 %v5951_v6 }
 0x629   : > { %v8887_v30 = vpop.f32.mrf.mxu3 }
 0x62a   : > { %v3657_v10 = vmul.f32 %v8887_v30, %v8887_v30 }
 0x62c   : > { %v3659_v46 = vsel %vm3658_vm1, %v3657_v10, 0.0 }
 0x62d   : > { %v3660_v23 = vrot.slane %v3659_v46, 4 }
 0x62f   : > { %v3661_v21 = vadd.f32 %v3660_v23, %v3659_v46  ;;  %v4342_v46 = vld [vmem:[%s10545_s16] sm:$0x7] }
 0x631   : > { %v3662_v24 = vrot.slane %v3661_v21, 2 }
 0x633   : > { %v3663_v33 = vadd.f32 %v3662_v24, %v3661_v21  ;;  %v3832_v35 = vpop.f32.mrf.mxu2 }
 0x634   : > { %v3833_v49 = vadd.f32 %v3832_v35, %v3714_v55 }
 0x635   : > { %v3664_v9 = vrot.slane %v3663_v33, 1 }
 0x636   : > { %3884 = vmatmul.f32.vlgmr.msrb.gmra.mxu3 %v3833_v49 }
 0x637   : > { %v3665_v31 = vadd.f32 %v3664_v9, %v3663_v33 }
 0x639   : > { %6164 = vrsqrt.f32 %v3665_v31  ;;  %vm3673_vm2 = vcmp.eq.f32.partialorder %v3665_v31, inf  ;;  %v3676_v37 = vand.u32 2147483648, %v3665_v31  ;;  %vm3675_vm3 = vcmp.eq.f32.partialorder %v3665_v31, 0.0 }
 0x63b   : > { %v3834_v16 = vpop.f32.mrf.mxu2 }
 0x63c   : > { %v3835_v28 = vadd.f32 %v3834_v16, %v3719_v11 }
 0x63e   : > { %3887 = vmatmul.f32.gmra.mxu3 %v3835_v28 }
 0x63f   : > { %v6165_v20 = vpop.eup %6164 }
 0x640   : > { %v3667_v7 = vmul.f32 %v6165_v20, %v3665_v31 }
 0x642   : > { %v3668_v3 = vmul.f32 %v6165_v20, %v3667_v7 }
 0x643   : > { %v3837_v26 = vpop.f32.mrf.mxu2 }
 0x644   : > { %v3669_v25 = vmul.f32 0.5, %v3668_v3  ;;  %v3838_v2 = vadd.f32 %v3837_v26, %v3724_v17 }
 0x646   : > { %v3670_v38 = vsub.f32 1.5, %v3669_v25  ;;  %3890 = vmatmul.f32.gmra.mxu3 %v3838_v2 }
 0x648   : > { %v3671_v61 = vmul.f32 %v6165_v20, %v3670_v38 }
 0x64a   : > { %v3672_v39 = vmul.f32 %v3671_v61, %v3665_v31 }
 0x64b   : > { %v3839_v40 = vpop.f32.mrf.mxu2 }
 0x64c   : > { %v3674_v59 = vsel %vm3673_vm2, %v3665_v31, %v3672_v39  ;;  %v3840_v36 = vadd.f32 %v3839_v40, %v3729_v47 }
 0x64d   : > { %v3677_v50 = vsel %vm3675_vm3, %v3676_v37, %v3674_v59 }
 0x64e   : > { %v3678_v18 = vmax.f32 %v3677_v50, 1e-06  ;;  %3893 = vmatmul.f32.gmra.mxu3 %v3840_v36 }
 0x650   : > { %6166 = vrcp.f32 %v3678_v18  ;;  %v3690_v42 = vand.u32 2147483648, %v3678_v18  ;;  %v3688_v63 = vand.u32 2147483647, %v3678_v18  ;;  %vm3684_vm5 = vweird.f32 %v3678_v18 }
 0x652   : > { %v3691_v51 = vor.u32 1.1754944e-38, %v3690_v42  ;;  %vm3689_vm7 = vcmp.eq.f32.partialorder %v3688_v63, 8.507059e+37 }
 0x653   : > { %v3842_v52 = vpop.f32.mrf.mxu2 }
 0x654   : > { %v3843_v13 = vadd.f32 %v3842_v52, %v3734_v32 }
 0x656   : > { %v6167_v43 = vpop.eup %6166  ;;  %3896 = vmatmul.f32.gmra.mxu3 %v3843_v13 }
 0x657   : > { %v3680_v60 = vmul.f32 %v6167_v43, %v3678_v18  ;;  %vm3685_vm4 = vweird.f32 %v6167_v43 }
 0x658   : > { %vm3686_vm6 = vmor %vm3684_vm5, %vm3685_vm4 }
 0x659   : > { %v3681_v45 = vsub.f32 1.0, %v3680_v60 }
 0x65b   : > { %v3682_v4 = vmul.f32 %v6167_v43, %v3681_v45  ;;  %v3844_v1 = vpop.f32.mrf.mxu2 }
 0x65c   : > { %v3845_v29 = vadd.f32 %v3844_v1, %v3739_v44 }
 0x65d   : > { %v3683_v5 = vadd.f32 %v6167_v43, %v3682_v4 }
 0x65e   : > { %3899 = vmatmul.f32.gmra.mxu3 %v3845_v29 }
 0x65f   : > { %v3687_v48 = vsel %vm3686_vm6, %v6167_v43, %v3683_v5 }
 0x660   : > { %v3692_v12 = vsel %vm3689_vm7, %v3691_v51, %v3687_v48 }
 0x661   : > { %v3693_v56 = vmul.f32 %v3692_v12, %v8887_v30 }
 0x663   : > { %3694 = vst.msk [vmem:[%s674_s22] sm:$0x7] %vm3658_vm1, %v3693_v56  ;;  %v3847_v62 = vpop.f32.mrf.mxu2  ;;  %s9380_s22 = scalar_lea.vmem %s10547_s18, %s5919_s24 }
 0x664   : > { %v3848_v8 = vadd.f32 %v3847_v62, %v3744_v41 }
 0x666   : > { %3902 = vmatmul.f32.gmra.mxu3 %v3848_v8 }
 0x66b   : > { %v3849_v6 = vpop.f32.mrf.mxu2 }
 0x66c   : > { %v3850_v14 = vadd.f32 %v3849_v6, %v3749_v22 }
 0x66e   : > { %3905 = vmatmul.f32.gmra.mxu3 %v3850_v14 }
 0x6b9   : > { %v3885_v27 = vpop.f32.mrf.mxu3 }
 0x6ba   : > { %3911 = vperm.xlu2 %6142, %v3885_v27  }
 0x6c1   : > { %v3888_v34 = vpop.f32.mrf.mxu3 }
 0x6c9   : > { %v3891_v57 = vpop.f32.mrf.mxu3 }
 0x6ca   : > { %4112 = vperm.xlu0 %6144, %v3891_v57   ;;  %3921 = vperm.xlu1 %6140, %v3891_v57  }
 0x6d1   : > { %v3894_v15 = vpop.f32.mrf.mxu3 }
 0x6d2   : > { %6143 = vset.pattern.permute.xlu1 %v10851_v53  ;;  %3926 = vperm.xlu2 %6142, %v3894_v15  }
 0x6d3   : > { %4004 = vperm.xlu1 %6143, %v3891_v57   ;;  %6148 = vset.pattern.permute.xlu0 %v10851_v53  ;;  %v685_v57 = vld [vmem:[%s8931_s27] sm:$0x77] }
 0x6d9   : > { %v3897_v58 = vpop.f32.mrf.mxu3 }
 0x6da   : > { %6145 = vset.pattern.permute.xlu2 %v10851_v53  ;;  %4012 = vperm.xlu0 %6148, %v3897_v58  }
 0x6db   : > { %6146 = vset.pattern.permute.xlu1 %v10876_v54  ;;  %4008 = vperm.xlu2 %6145, %v3894_v15  }
 0x6dc   : > { %4116 = vperm.xlu1 %6146, %v3894_v15  }
 0x6e1   : > { %v3900_v19 = vpop.f32.mrf.mxu3 }
 0x6e2   : > { %6152 = vset.pattern.permute.xlu0 %v10876_v54 }
 0x6e3   : > { %6149 = vset.pattern.permute.xlu2 %v10876_v54  ;;  %4124 = vperm.xlu0 %6152, %v3900_v19  }
 0x6e4   : > { %6147 = vset.pattern.permute.xlu1 %v10847_v0  ;;  %4120 = vperm.xlu2 %6149, %v3897_v58  }
 0x6e5   : > { %3931 = vperm.xlu1 %6147, %v3897_v58  }
 0x6e9   : > { %v3903_v30 = vpop.f32.mrf.mxu3 }
 0x6eb   : > { %6153 = vset.pattern.permute.xlu0 %v10847_v0 }
 0x6ec   : > { %6150 = vset.pattern.permute.xlu2 %v10847_v0  ;;  %3941 = vperm.xlu0 %6153, %v3903_v30  }
 0x6ed   : > { %6151 = vset.pattern.permute.xlu1 %v10851_v53  ;;  %3936 = vperm.xlu2 %6150, %v3900_v19  }
 0x6ee   : > { %4016 = vperm.xlu1 %6151, %v3900_v19  }
 0x6f1   : > { %v3906_v10 = vpop.f32.mrf.mxu3 }
 0x6f4   : > { %6157 = vset.pattern.permute.xlu0 %v10851_v53 }
 0x6f5   : > { %6154 = vset.pattern.permute.xlu2 %v10851_v53  ;;  %4024 = vperm.xlu0 %6157, %v3906_v10  }
 0x6f6   : > { %6155 = vset.pattern.permute.xlu1 %v10876_v54  ;;  %4020 = vperm.xlu2 %6154, %v3903_v30  }
 0x6f7   : > { %4128 = vperm.xlu1 %6155, %v3903_v30  }
 0x6fd   : > { %6158 = vset.pattern.permute.xlu0 %v10847_v0 }
 0x6fe   : > { %6160 = vset.pattern.permute.xlu2 %v10876_v54  ;;  %3916 = vperm.xlu0 %6158, %v3888_v34  }
 0x6ff   : > { %6156 = vset.pattern.permute.xlu1 %v10847_v0  ;;  %4132 = vperm.xlu2 %6160, %v3906_v10  }
 0x700   : > { %3946 = vperm.xlu1 %6156, %v3906_v10  }
 0x706   : > { %4345 = vperm.xlu0 %6158, %v4342_v46   ;;  %v4243_v46 = vmul.f32 %v685_v57, %v685_v57 }
 0x707   : > { %6161 = vset.pattern.permute.xlu2 %v10851_v53 }
 0x708   : > { %4000 = vperm.xlu2 %6161, %v3888_v34   ;;  %6159 = vset.pattern.permute.xlu1 %v10851_v53  ;;  %v686_v53 = vld [vmem:[%s8931_s27 + $0x8] sm:$0x77] }
 0x709   : > { %3996 = vperm.xlu1 %6159, %v3885_v27   ;;  %v4029_v24 = vperm.slane %v686_v53, 1  ;;  %v4030_v55 = vperm.slane %v686_v53, 5  ;;  %v3953_v33 = vperm.slane %v686_v53, 0  ;;  %v3954_v35 = vperm.slane %v686_v53, 4 }
 0x70a   : > { %v4244_v25 = vmul.f32 %v686_v53, %v686_v53  ;;  %v4137_v2 = vperm.slane %v686_v53, 2  ;;  %v4138_v38 = vperm.slane %v686_v53, 6 }
 0x70b   : > { %v8936_v49 = vperm.slane %v4029_v24, 1  ;;  %v8940_v9 = vperm.slane %v3953_v33, 0  ;;  %v8942_v31 = vperm.slane %v3954_v35, 0 }
 0x70c   : > { %v5858_v61 = vrot.slane %v4244_v25, 9  ;;  %v8956_v39 = vperm.slane %v4137_v2, 2  ;;  %v8958_v47 = vperm.slane %v4138_v38, 2  ;;  %v5860_v36 = vrot.slane %v4244_v25, 10 }
 0x70d   : > { %v3951_v2 = vperm.slane %v685_v57, 0  ;;  %v3952_v38 = vperm.slane %v685_v57, 4 }
 0x70e   : > { %11006 = vst [vmem:[#allocation82_spill] sm:$0xff] %v8958_v47  ;;  %v4254_v59 = vadd.f32 %v5858_v61, %v4244_v25  ;;  %v5859_v25 = vrot.slane %v4243_v46, 10 }
 0x710   : > { %6163 = vset.pattern.permute.xlu2 %v10876_v54  ;;  %v4262_v42 = vadd.f32 %v5860_v36, %v4254_v59  ;;  %v4135_v36 = vperm.slane %v685_v57, 2 }
 0x711   : > { %4108 = vperm.xlu2 %6163, %v3888_v34   ;;  %6162 = vset.pattern.permute.xlu1 %v10876_v54  ;;  %v8938_v54 = vperm.slane %v4030_v55, 1 }
 0x712   : > { %4104 = vperm.xlu1 %6162, %v3885_v27   ;;  %v4267_v29 = vperm.slane %v4262_v42, 0  ;;  %v4268_v5 = vperm.slane %v4262_v42, 4 }
 0x714   : > { %v8923_v23 = vpop.permute.xlu2 %3911  ;;  %v8986_v62 = vperm.slane %v4267_v29, 0  ;;  %v8988_v8 = vperm.slane %v4268_v5, 0 }
 0x716   : > { %11007 = vst [vmem:[#allocation92_spill] sm:$0xff] %v8986_v62 }
 0x717   : > { %11008 = vst [vmem:[#allocation93_spill] sm:$0xff] %v8988_v8 }
 0x72c   : > { %v8933_v21 = vpop.permute.xlu2 %3926 }
 0x72d   : > { %v3977_v16 = vmul.f32 %v8940_v9, %v8933_v21  ;;  %v3978_v28 = vmul.f32 %v8942_v31, %v8933_v21 }
 0x735   : > { %v8944_v11 = vpop.permute.xlu2 %4008 }
 0x736   : > { %v4053_v20 = vmul.f32 %v8936_v49, %v8944_v11  ;;  %v4054_v7 = vmul.f32 %v8938_v54, %v8944_v11 }
 0x738   : > { %v4085_v3 = vadd.f32 %v4053_v20, %v3977_v16  ;;  %v4086_v17 = vadd.f32 %v4054_v7, %v3978_v28  ;;  %v5857_v16 = vrot.slane %v4243_v46, 9  ;;  %v4027_v28 = vperm.slane %v685_v57, 1 }
 0x739   : > { %v4028_v20 = vperm.slane %v685_v57, 5 }
 0x73a   : > { %v9033_v61 = vperm.slane %v4027_v28, 1 }
 0x73b   : > { %v9035_v59 = vperm.slane %v4028_v20, 1 }
 0x73c   : > { %v8954_v26 = vpop.permute.xlu1 %3921  ;;  %v8960_v37 = vpop.permute.xlu0 %4112 }
 0x73d   : > { %v3973_v50 = vmul.f32 %v8940_v9, %v8954_v26  ;;  %v3974_v18 = vmul.f32 %v8942_v31, %v8954_v26  ;;  %v4157_v13 = vmul.f32 %v8956_v39, %v8960_v37  ;;  %v4158_v43 = vmul.f32 %v8958_v47, %v8960_v37 }
 0x73e   : > { %v8976_v63 = vpop.permute.xlu2 %4120 }
 0x745   : > { %v8962_v40 = vpop.permute.xlu1 %4004 }
 0x746   : > { %v4049_v32 = vmul.f32 %v8936_v49, %v8962_v40  ;;  %v4050_v52 = vmul.f32 %v8938_v54, %v8962_v40  ;;  %v4047_v5 = vmul.f32 %v9033_v61, %v8962_v40 }
 0x747   : > { %v8998_v34 = vpop.permute.xlu2 %3936 }
 0x748   : > { %v4081_v60 = vadd.f32 %v4049_v32, %v3973_v50  ;;  %v4082_v45 = vadd.f32 %v4050_v52, %v3974_v18  ;;  %v9041_v32 = vperm.slane %v3951_v2, 0  ;;  %v9043_v52 = vperm.slane %v3952_v38, 0 }
 0x74a   : > { %v4189_v44 = vadd.f32 %v4157_v13, %v4081_v60  ;;  %v4190_v4 = vadd.f32 %v4158_v43, %v4082_v45  ;;  %v4051_v13 = vmul.f32 %v9033_v61, %v8944_v11  ;;  %v4052_v43 = vmul.f32 %v9035_v59, %v8944_v11 }
 0x74b   : > { %v4136_v60 = vperm.slane %v685_v57, 6  ;;  %v9049_v45 = vperm.slane %v4135_v36, 2  ;;  %v3971_v57 = vmul.f32 %v9041_v32, %v8954_v26  ;;  %v3984_v38 = vmul.f32 %v9043_v52, %v8998_v34 }
 0x74c   : > { %v8984_v12 = vpop.permute.xlu0 %4012  ;;  %v8990_v22 = vmul.f32 0.48860252, %v4189_v44  ;;  %v8994_v14 = vmul.f32 0.48860252, %v4190_v4  ;;  %v3975_v44 = vmul.f32 %v9041_v32, %v8933_v21  ;;  %v3976_v4 = vmul.f32 %v9043_v52, %v8933_v21 }
 0x74d   : > { %v3972_v21 = vmul.f32 %v9043_v52, %v8954_v26  ;;  %v4163_v28 = vmul.f32 %v9049_v45, %v8976_v63  ;;  %v4079_v2 = vadd.f32 %v4047_v5, %v3971_v57  ;;  %v3983_v26 = vmul.f32 %v9041_v32, %v8998_v34 }
 0x74e   : > { %v8978_v1 = vpop.permute.xlu1 %4116  ;;  %11009 = vst [vmem:[#allocation3_spill] sm:$0xff] %v8990_v22  ;;  %v9005_v58 = vmul.f32 %v8986_v62, %v8990_v22  ;;  %v9013_v30 = vmul.f32 %v8988_v8, %v8994_v14  ;;  %v9062_v11 = vadd.f32 %v4052_v43, %v3976_v4 }
 0x74f   : > { %v4161_v51 = vmul.f32 %v8956_v39, %v8978_v1  ;;  %v4162_v48 = vmul.f32 %v8958_v47, %v8978_v1  ;;  %11011 = vst [vmem:[#allocation89_spill] sm:$0xff] %v8994_v14  ;;  %v4159_v4 = vmul.f32 %v9049_v45, %v8978_v1 }
 0x750   : > { %11013 = vst [vmem:[#allocation7_spill] sm:$0xff] %v9005_v58  ;;  %v9029_v7 = vpop.permute.xlu2 %4020 }
 0x751   : > { %v4193_v56 = vadd.f32 %v4161_v51, %v4085_v3  ;;  %v4194_v41 = vadd.f32 %v4162_v48, %v4086_v17  ;;  %11015 = vst [vmem:[#allocation85_spill] sm:$0xff] %v9013_v30  ;;  %v4253_v17 = vadd.f32 %v5857_v16, %v4243_v46  ;;  %v4083_v48 = vadd.f32 %v4051_v13, %v3975_v44 }
 0x752   : > { %v4155_v46 = vmul.f32 %v9049_v45, %v8960_v37  ;;  %v4056_v44 = vmul.f32 %v9035_v59, %v8984_v12  ;;  %v4063_v5 = vmul.f32 %v9033_v61, %v9029_v7  ;;  %v4064_v57 = vmul.f32 %v9035_v59, %v9029_v7 }
 0x753   : > { %v8992_v6 = vmul.f32 0.48860252, %v4193_v56  ;;  %v8996_v27 = vmul.f32 0.48860252, %v4194_v41  ;;  %v9039_v18 = vadd.f32 %v5859_v25, %v4253_v17  ;;  %v9064_v56 = vperm.slane %v4136_v60, 2 }
 0x754   : > { %v4048_v17 = vmul.f32 %v9035_v59, %v8962_v40  ;;  %v4187_v47 = vadd.f32 %v4155_v46, %v4079_v2 }
 0x755   : > { %11010 = vst [vmem:[#allocation18_spill] sm:$0xff] %v8992_v6  ;;  %v9009_v19 = vmul.f32 %v8986_v62, %v8992_v6  ;;  %v9017_v10 = vmul.f32 %v8988_v8, %v8996_v27  ;;  %v9027_v35 = vpop.permute.xlu0 %4124  ;;  %v4265_v42 = vperm.slane %v9039_v18, 0  ;;  %v4266_v41 = vperm.slane %v9039_v18, 4 }
 0x756   : > { %11012 = vst [vmem:[#allocation91_spill] sm:$0xff] %v8996_v27  ;;  %v4164_v20 = vmul.f32 %v9064_v56, %v8976_v63  ;;  %v4160_v53 = vmul.f32 %v9064_v56, %v8978_v1  ;;  %v4167_v0 = vmul.f32 %v9049_v45, %v9027_v35  ;;  %v4168_v14 = vmul.f32 %v9064_v56, %v9027_v35 }
 0x757   : > { %v9001_v15 = vpop.permute.xlu1 %3931  ;;  %11014 = vst [vmem:[#allocation31_spill] sm:$0xff] %v9009_v19  ;;  %v9073_v16 = vperm.slane %v4265_v42, 0  ;;  %v4055_v42 = vmul.f32 %v9033_v61, %v8984_v12  ;;  %v4080_v8 = vadd.f32 %v4048_v17, %v3972_v21  ;;  %v9137_v62 = vperm.slane %v4266_v41, 0 }
 0x758   : > { %11016 = vst [vmem:[#allocation88_spill] sm:$0xff] %v9017_v10  ;;  %v3979_v13 = vmul.f32 %v9041_v32, %v9001_v15  ;;  %v3980_v40 = vmul.f32 %v9043_v52, %v9001_v15  ;;  %v9160_v21 = vmul.f32 0.48860252, %v4187_v47 }
 0x759   : > { %11017 = vst [vmem:[#allocation5_spill] sm:$0xff] %v9027_v35  ;;  %v9060_v51 = vpop.permute.xlu2 %4132 }
 0x75a   : > { %v4087_v6 = vadd.f32 %v4055_v42, %v3979_v13 }
 0x75e   : > { %v9037_v50 = vpop.permute.xlu0 %3941 }
 0x75f   : > { %v3987_v43 = vmul.f32 %v9041_v32, %v9037_v50  ;;  %v3988_v60 = vmul.f32 %v9043_v52, %v9037_v50 }
 0x760   : > { %v9031_v3 = vpop.permute.xlu1 %4016 }
 0x761   : > { %11018 = vst [vmem:[#allocation86_spill] sm:$0xff] %v9031_v3  ;;  %v4059_v25 = vmul.f32 %v9033_v61, %v9031_v3  ;;  %v4060_v36 = vmul.f32 %v9035_v59, %v9031_v3  ;;  %v4096_v30 = vadd.f32 %v4064_v57, %v3988_v60  ;;  %v4176_v60 = vmul.f32 %v9064_v56, %v9060_v51 }
 0x762   : > { %v9121_v10 = vpop.permute.xlu2 %4000  ;;  %v4156_v57 = vmul.f32 %v9064_v56, %v8960_v37 }
 0x763   : > { %v4091_v33 = vadd.f32 %v4059_v25, %v3983_v26  ;;  %v4092_v27 = vadd.f32 %v4060_v36, %v3984_v38  ;;  %v4088_v25 = vadd.f32 %v4056_v44, %v3980_v40  ;;  %v4095_v26 = vadd.f32 %v4063_v5, %v3987_v43 }
 0x764   : > { %v4175_v36 = vmul.f32 %v9049_v45, %v9060_v51  ;;  %v4188_v46 = vadd.f32 %v4156_v57, %v4080_v8 }
 0x765   : > { %v4199_v43 = vadd.f32 %v4167_v0, %v4091_v33  ;;  %v4200_v5 = vadd.f32 %v4168_v14, %v4092_v27  ;;  %v4191_v0 = vadd.f32 %v4159_v4, %v4083_v48  ;;  %v4192_v14 = vadd.f32 %v4160_v53, %v9062_v11 }
 0x766   : > { %v4043_v53 = vmul.f32 %v9033_v61, %v9121_v10 }
 0x767   : > { %v9089_v18 = vpop.permute.xlu0 %4024 }
 0x768   : > { %v4067_v58 = vmul.f32 %v9033_v61, %v9089_v18  ;;  %v4068_v1 = vmul.f32 %v9035_v59, %v9089_v18 }
 0x769   : > { %v9056_v29 = vpop.permute.xlu1 %4128 }
 0x76a   : > { %11019 = vst [vmem:[#allocation26_spill] sm:$0xff] %v9056_v29  ;;  %v4171_v55 = vmul.f32 %v9049_v45, %v9056_v29  ;;  %v4172_v24 = vmul.f32 %v9064_v56, %v9056_v29 }
 0x76b   : > { %v9178_v17 = vpop.permute.xlu2 %4108 }
 0x76c   : > { %v4203_v13 = vadd.f32 %v4171_v55, %v4095_v26  ;;  %v4204_v40 = vadd.f32 %v4172_v24, %v4096_v30  ;;  %v4195_v55 = vadd.f32 %v4163_v28, %v4087_v6  ;;  %v4196_v30 = vadd.f32 %v4164_v20, %v4088_v25 }
 0x76d   : > { %v9184_v25 = vmul.f32 0.48860252, %v4191_v0  ;;  %v9186_v26 = vmul.f32 0.48860252, %v4192_v14 }
 0x76e   : > { %v9141_v24 = vmul.f32 0.48860252, %v4203_v13  ;;  %v9143_v33 = vmul.f32 0.48860252, %v4204_v40  ;;  %v9168_v11 = vmul.f32 0.48860252, %v4196_v30 }
 0x76f   : > { %v4289_v30 = vmul.f32 %v9073_v16, %v9184_v25  ;;  %v4290_v0 = vmul.f32 %v9137_v62, %v9186_v26 }
 0x770   : > { %v9139_v29 = vpop.permute.xlu0 %3916  ;;  %v4301_v28 = vmul.f32 %v9073_v16, %v9141_v24  ;;  %v4302_v47 = vmul.f32 %v9137_v62, %v9143_v33 }
 0x771   : > { %v3967_v41 = vmul.f32 %v9041_v32, %v9139_v29  ;;  %v3968_v6 = vmul.f32 %v9043_v52, %v9139_v29 }
 0x772   : > { %v9119_v22 = vpop.permute.xlu1 %3946 }
 0x773   : > { %v3991_v19 = vmul.f32 %v9041_v32, %v9119_v22  ;;  %v3992_v38 = vmul.f32 %v9043_v52, %v9119_v22 }
 0x775   : > { %v4099_v42 = vadd.f32 %v4067_v58, %v3991_v19  ;;  %v4100_v44 = vadd.f32 %v4068_v1, %v3992_v38  ;;  %v9145_v58 = vmul.f32 0.48860252, %v4199_v43  ;;  %v9152_v19 = vmul.f32 0.48860252, %v4200_v5 }
 0x776   : > { %v4075_v1 = vadd.f32 %v4043_v53, %v3967_v41  ;;  %v4152_v5 = vmul.f32 %v9064_v56, %v9178_v17 }
 0x777   : > { %v4207_v35 = vadd.f32 %v4175_v36, %v4099_v42  ;;  %v4208_v3 = vadd.f32 %v4176_v60, %v4100_v44  ;;  %v4297_v2 = vmul.f32 %v9073_v16, %v9145_v58  ;;  %v4298_v4 = vmul.f32 %v9137_v62, %v9152_v19 }
 0x778   : > { %v4294_v60 = vmul.f32 %v9137_v62, %v9168_v11  ;;  %v9194_v42 = vmul.f32 0.48860252, %v4188_v46  ;;  %v4151_v44 = vmul.f32 %v9049_v45, %v9178_v17 }
 0x779   : > { %v9148_v37 = vmul.f32 0.48860252, %v4207_v35  ;;  %v9150_v27 = vmul.f32 0.48860252, %v4208_v3  ;;  %v4044_v35 = vmul.f32 %v9035_v59, %v9121_v10  ;;  %v9166_v3 = vmul.f32 0.48860252, %v4195_v55 }
 0x77a   : > { %v3964_v55 = vmul.f32 %v9043_v52, %v8923_v23  ;;  %v4334_v41 = vpack.c.bf16 %v4298_v4, %v4294_v60 }
 0x77b   : > { %v9158_v48 = vpop.permute.xlu1 %3996  ;;  %v4305_v20 = vmul.f32 %v9073_v16, %v9148_v37  ;;  %v4306_v8 = vmul.f32 %v9137_v62, %v9150_v27  ;;  %v4076_v38 = vadd.f32 %v4044_v35, %v3968_v6  ;;  %v4293_v43 = vmul.f32 %v9073_v16, %v9166_v3 }
 0x77c   : > { %v4039_v40 = vmul.f32 %v9033_v61, %v9158_v48  ;;  %v4040_v57 = vmul.f32 %v9035_v59, %v9158_v48  ;;  %v3963_v61 = vmul.f32 %v9041_v32, %v8923_v23  ;;  %v4183_v6 = vadd.f32 %v4151_v44, %v4075_v1 }
 0x77d   : > { %v4337_v36 = vpack.c.bf16 %v4305_v20, %v4301_v28  ;;  %v4338_v13 = vpack.c.bf16 %v4306_v8, %v4302_v47  ;;  %v4333_v14 = vpack.c.bf16 %v4297_v2, %v4293_v43  ;;  %v4184_v46 = vadd.f32 %v4152_v5, %v4076_v38 }
 0x77e   : > { %v4071_v59 = vadd.f32 %v4039_v40, %v3963_v61  ;;  %v4285_v35 = vmul.f32 %v9073_v16, %v9160_v21  ;;  %v4286_v32 = vmul.f32 %v9137_v62, %v9194_v42  ;;  %v4072_v52 = vadd.f32 %v4040_v57, %v3964_v55 }
 0x77f   : > { %4348 = vmatpush.bf16.msrb.mxu2 %v4337_v36  ;;  %4361 = vmatpush.bf16.msra.mxu3 %v4338_v13  ;;  %v9220_v1 = vmul.f32 0.48860252, %v4183_v6  ;;  %v9222_v38 = vmul.f32 0.48860252, %v4184_v46  ;;  %v4165_v36 = vmul.f32 %v8956_v39, %v8976_v63  ;;  %v3985_v13 = vmul.f32 %v8940_v9, %v8998_v34  ;;  %v11020_v6 = vld [vmem:[#allocation86_spill] sm:$0xff] }
 0x780   : > { %v4329_v47 = vpack.c.bf16 %v4289_v30, %v4285_v35  ;;  %v4330_v8 = vpack.c.bf16 %v4290_v0, %v4286_v32  ;;  %v4058_v40 = vmul.f32 %v8938_v54, %v8984_v12  ;;  %v4065_v43 = vmul.f32 %v8936_v49, %v9029_v7  ;;  %v11021_v35 = vld [vmem:[#allocation5_spill] sm:$0xff] }
 0x781   : > { %v4066_v5 = vmul.f32 %v8938_v54, %v9029_v7  ;;  %v3993_v57 = vmul.f32 %v8940_v9, %v9119_v22  ;;  %v4281_v55 = vmul.f32 %v9073_v16, %v9220_v1  ;;  %v4282_v7 = vmul.f32 %v9137_v62, %v9222_v38 }
 0x782   : > { %v3989_v0 = vmul.f32 %v8940_v9, %v9037_v50  ;;  %v4062_v46 = vmul.f32 %v8938_v54, %v11020_v6  ;;  %v4169_v32 = vmul.f32 %v8956_v39, %v11021_v35 }
 0x783   : > { %4349 = vmatpush.bf16.msrb.mxu2 %v4333_v14  ;;  %4362 = vmatpush.bf16.msra.mxu3 %v4334_v41  ;;  %v3990_v14 = vmul.f32 %v8942_v31, %v9037_v50  ;;  %v4070_v41 = vmul.f32 %v8938_v54, %v9089_v18  ;;  %v3982_v50 = vmul.f32 %v8942_v31, %v9001_v15 }
 0x784   : > { %v9210_v53 = vpop.permute.xlu1 %4104 }
 0x785   : > { %v4147_v28 = vmul.f32 %v9049_v45, %v9210_v53  ;;  %v4148_v20 = vmul.f32 %v9064_v56, %v9210_v53  ;;  %v3986_v45 = vmul.f32 %v8942_v31, %v8998_v34  ;;  %v4057_v56 = vmul.f32 %v8936_v49, %v8984_v12 }
 0x786   : > { %v3981_v34 = vmul.f32 %v8940_v9, %v9001_v15  ;;  %v3994_v12 = vmul.f32 %v8942_v31, %v9119_v22  ;;  %v4069_v22 = vmul.f32 %v8936_v49, %v9089_v18 }
 0x787   : > { %v4179_v2 = vadd.f32 %v4147_v28, %v4071_v59  ;;  %v4180_v4 = vadd.f32 %v4148_v20, %v4072_v52  ;;  %4350 = vmatpush.bf16.msrb.mxu2 %v4329_v47  ;;  %4363 = vmatpush.bf16.msra.mxu3 %v4330_v8  ;;  %v11022_v47 = vld [vmem:[#allocation26_spill] sm:$0xff] }
 0x788   : > { %v4101_v52 = vadd.f32 %v4069_v22, %v3993_v57  ;;  %v4102_v28 = vadd.f32 %v4070_v41, %v3994_v12  ;;  %v4089_v20 = vadd.f32 %v4057_v56, %v3981_v34  ;;  %v4173_v18 = vmul.f32 %v8956_v39, %v11022_v47  ;;  %v11023_v8 = vld [vmem:[#allocation82_spill] sm:$0xff] }
 0x789   : > { %v9236_v60 = vmul.f32 0.48860252, %v4179_v2  ;;  %v9238_v44 = vmul.f32 0.48860252, %v4180_v4  ;;  %v4174_v2 = vmul.f32 %v11023_v8, %v11022_v47  ;;  %v4177_v4 = vmul.f32 %v8956_v39, %v9060_v51 }
 0x78a   : > { %v4094_v57 = vadd.f32 %v4062_v46, %v3986_v45  ;;  %v4321_v56 = vpack.c.bf16 %v9148_v37, %v9141_v24  ;;  %v4322_v34 = vpack.c.bf16 %v9150_v27, %v9143_v33  ;;  %v4170_v12 = vmul.f32 %v11023_v8, %v11021_v35 }
 0x78b   : > { %v4277_v61 = vmul.f32 %v9073_v16, %v9236_v60  ;;  %v4278_v30 = vmul.f32 %v9137_v62, %v9238_v44  ;;  %v4061_v16 = vmul.f32 %v8936_v49, %v11020_v6  ;;  %v4209_v22 = vadd.f32 %v4177_v4, %v4101_v52 }
 0x78c   : > { %v3966_v24 = vmul.f32 %v8942_v31, %v8923_v23  ;;  %v4166_v33 = vmul.f32 %v11023_v8, %v8976_v63  ;;  %v4313_v37 = vpack.c.bf16 %v9184_v25, %v9160_v21  ;;  %v4317_v27 = vpack.c.bf16 %v9145_v58, %v9166_v3 }
 0x78d   : > { %v4325_v59 = vpack.c.bf16 %v4281_v55, %v4277_v61  ;;  %v4326_v62 = vpack.c.bf16 %v4282_v7, %v4278_v30  ;;  %v4178_v61 = vmul.f32 %v11023_v8, %v9060_v51  ;;  %v4097_v55 = vadd.f32 %v4065_v43, %v3989_v0 }
 0x78e   : > { %v4098_v30 = vadd.f32 %v4066_v5, %v3990_v14  ;;  %v4093_v15 = vadd.f32 %v4061_v16, %v3985_v13  ;;  %v4090_v7 = vadd.f32 %v4058_v40, %v3982_v50  ;;  %v4197_v51 = vadd.f32 %v4165_v36, %v4089_v20 }
 0x78f   : > { %4351 = vmatpush.bf16.msrb.mxu2 %v4325_v59  ;;  %4364 = vmatpush.bf16.msra.mxu3 %v4326_v62  ;;  %v4210_v41 = vadd.f32 %v4178_v61, %v4102_v28  ;;  %v4205_v6 = vadd.f32 %v4173_v18, %v4097_v55  ;;  %v3965_v13 = vmul.f32 %v8940_v9, %v8923_v23  ;;  %v9298_v43 = vmul.f32 0.48860252, %v4209_v22  ;;  %v11025_v62 = vld [vmem:[#allocation93_spill] sm:$0xff]  ;;  %v11026_v22 = vld [vmem:[#allocation31_spill] sm:$0xff] }
 0x790   : > { %v4206_v59 = vadd.f32 %v4174_v2, %v4098_v30  ;;  %v4318_v45 = vpack.c.bf16 %v9152_v19, %v9168_v11  ;;  %v4201_v40 = vadd.f32 %v4169_v32, %v4093_v15  ;;  %v4202_v36 = vadd.f32 %v4170_v12, %v4094_v57  ;;  %v4341_v61 = vld [vmem:[%s10544_s15] sm:$0x3] }
 0x791   : > { %v9300_v5 = vmul.f32 0.48860252, %v4210_v41  ;;  %v4314_v23 = vpack.c.bf16 %v9186_v26, %v9194_v42  ;;  %v4198_v0 = vadd.f32 %v4166_v33, %v4090_v7  ;;  %v4045_v63 = vmul.f32 %v8936_v49, %v9121_v10  ;;  %v11027_v41 = vld [vmem:[#allocation7_spill] sm:$0xff] }
 0x792   : > { %v9306_v21 = vmul.f32 0.48860252, %v4205_v6  ;;  %v9308_v25 = vmul.f32 0.48860252, %v4206_v59  ;;  %v9310_v58 = vmul.f32 0.48860252, %v4197_v51  ;;  %v3969_v19 = vmul.f32 %v8940_v9, %v9139_v29 }
 0x793   : > { %4352 = vmatpush.bf16.msrb.mxu2 %v4321_v56  ;;  %4365 = vmatpush.bf16.msra.mxu3 %v4322_v34  ;;  %v3970_v3 = vmul.f32 %v8942_v31, %v9139_v29  ;;  %v4041_v11 = vmul.f32 %v8936_v49, %v9158_v48  ;;  %v4042_v26 = vmul.f32 %v8938_v54, %v9158_v48  ;;  %v4233_v16 = vmul.f32 0.48860252, %v4201_v40  ;;  %v11024_v29 = vld [vmem:[#allocation92_spill] sm:$0xff]  ;;  %v11030_v51 = vld [vmem:[#allocation85_spill] sm:$0xff] }
 0x794   : > { %v4046_v42 = vmul.f32 %v8938_v54, %v9121_v10  ;;  %v4153_v14 = vmul.f32 %v8956_v39, %v9178_v17  ;;  %v4234_v46 = vmul.f32 0.48860252, %v4202_v36  ;;  %v4149_v9 = vmul.f32 %v8956_v39, %v9210_v53  ;;  %v11029_v59 = vld [vmem:[#allocation88_spill] sm:$0xff] }
 0x795   : > { %v4150_v31 = vmul.f32 %v11023_v8, %v9210_v53  ;;  %v4307_v49 = vmul.f32 %v11024_v29, %v9298_v43  ;;  %v4308_v48 = vmul.f32 %v11025_v62, %v9300_v5  ;;  %v4154_v54 = vmul.f32 %v11023_v8, %v9178_v17 }
 0x796   : > { %v4303_v10 = vmul.f32 %v11024_v29, %v9306_v21  ;;  %v4304_v39 = vmul.f32 %v11025_v62, %v9308_v25  ;;  %v4230_v35 = vmul.f32 0.48860252, %v4198_v0  ;;  %v4077_v32 = vadd.f32 %v4045_v63, %v3969_v19  ;;  %v11032_v0 = vld [vmem:[#allocation18_spill] sm:$0xff]  ;;  %v11033_v63 = vld [vmem:[#allocation3_spill] sm:$0xff] }
 0x797   : > { %4353 = vmatpush.bf16.msrb.mxu2 %v4317_v27  ;;  %4366 = vmatpush.bf16.msra.mxu3 %v4318_v45  ;;  %v4078_v53 = vadd.f32 %v4046_v42, %v3970_v3  ;;  %v4073_v50 = vadd.f32 %v4041_v11, %v3965_v13  ;;  %v4074_v52 = vadd.f32 %v4042_v26, %v3966_v24  ;;  %v11035_v3 = vld [vmem:[#allocation91_spill] sm:$0xff]  ;;  %v11036_v11 = vld [vmem:[#allocation89_spill] sm:$0xff] }
 0x798   : > { %v4309_v28 = vpack.c.bf16 %v9220_v1, %v9236_v60  ;;  %v4310_v20 = vpack.c.bf16 %v9222_v38, %v9238_v44  ;;  %v4299_v17 = vmul.f32 %v11024_v29, %v4233_v16  ;;  %v4300_v47 = vmul.f32 %v11025_v62, %v4234_v46 }
 0x799   : > { %v4181_v18 = vadd.f32 %v4149_v9, %v4073_v50  ;;  %v4182_v8 = vadd.f32 %v4150_v31, %v4074_v52  ;;  %v4339_v2 = vpack.c.bf16 %v4307_v49, %v4303_v10  ;;  %v4340_v4 = vpack.c.bf16 %v4308_v48, %v4304_v39 }
 0x79a   : > { %v4295_v1 = vmul.f32 %v11024_v29, %v9310_v58  ;;  %v4296_v38 = vmul.f32 %v11025_v62, %v4230_v35  ;;  %v4185_v60 = vadd.f32 %v4153_v14, %v4077_v32  ;;  %v4186_v44 = vadd.f32 %v4154_v54, %v4078_v53 }
 0x79b   : > { %4354 = vmatpush.bf16.msrb.mxu2 %v4313_v37  ;;  %4367 = vmatpush.bf16.msra.mxu3 %v4314_v23  ;;  %v4213_v55 = vmul.f32 0.48860252, %v4181_v18  ;;  %v4214_v30 = vmul.f32 0.48860252, %v4182_v8  ;;  %v11028_v6 = vpack.c.bf16 %v11026_v22, %v11027_v41  ;;  %v11031_v13 = vpack.c.bf16 %v11029_v59, %v11030_v51 }
 0x79c   : > { %v4335_v15 = vpack.c.bf16 %v4299_v17, %v4295_v1  ;;  %v4336_v57 = vpack.c.bf16 %v4300_v47, %v4296_v38  ;;  %v4217_v56 = vmul.f32 0.48860252, %v4185_v60  ;;  %v4218_v34 = vmul.f32 0.48860252, %v4186_v44 }
 0x79d   : > { %v4279_v12 = vmul.f32 %v11024_v29, %v4213_v55  ;;  %v4280_v7 = vmul.f32 %v11025_v62, %v4214_v30  ;;  %v4323_v45 = vpack.c.bf16 %v9298_v43, %v9306_v21  ;;  %v4324_v40 = vpack.c.bf16 %v9300_v5, %v9308_v25  ;;  %v9371_v5 = vpop.permute.xlu0 %4345 }
 0x79e   : > { %v4283_v24 = vmul.f32 %v11024_v29, %v4217_v56  ;;  %v4284_v33 = vmul.f32 %v11025_v62, %v4218_v34  ;;  %v4319_v36 = vpack.c.bf16 %v4233_v16, %v9310_v58  ;;  %v4320_v23 = vpack.c.bf16 %v4234_v46, %v4230_v35 }
 0x79f   : > { %4355 = vmatpush.bf16.msrb.mxu2 %v4309_v28  ;;  %4368 = vmatpush.bf16.msra.mxu3 %v4310_v20  ;;  %v11034_v19 = vpack.c.bf16 %v11032_v0, %v11033_v63  ;;  %v11037_v26 = vpack.c.bf16 %v11035_v3, %v11036_v11  ;;  %v4311_v43 = vpack.c.bf16 %v4217_v56, %v4213_v55  ;;  %v10612_v20 = vlaneseq }
 0x7a0   : > { %v4327_v37 = vpack.c.bf16 %v4283_v24, %v4279_v12  ;;  %v4328_v27 = vpack.c.bf16 %v4284_v33, %v4280_v7  ;;  %v4312_v21 = vpack.c.bf16 %v4218_v34, %v4214_v30 }
 0x7a2   : > { %4356 = vmatmul.bf16.vlgmr.msrb.gmra.mxu2 %v4341_v61  ;;  %4369 = vmatmul.bf16.vlgmr.msra.gmra.mxu3 %v4341_v61 }
 0x7a3   : > { %4374 = vmatpush.bf16.msra.mxu2 %v4339_v2  ;;  %4387 = vmatpush.bf16.msrb.mxu3 %v4340_v4  ;;  %v6187_v4 = vmov 0.0  }
 0x7a7   : > { %4375 = vmatpush.bf16.msra.mxu2 %v4335_v15  ;;  %4388 = vmatpush.bf16.msrb.mxu3 %v4336_v57  ;;  %v9393_v15 = vshrl.u32 %v10612_v20, 7 }
 0x7ab   : > { %4376 = vmatpush.bf16.msra.mxu2 %v11028_v6  ;;  %4389 = vmatpush.bf16.msrb.mxu3 %v11031_v13 }
 0x7af   : > { %4377 = vmatpush.bf16.msra.mxu2 %v4327_v37  ;;  %4390 = vmatpush.bf16.msrb.mxu3 %v4328_v27 }
 0x7b3   : > { %4378 = vmatpush.bf16.msra.mxu2 %v4323_v45  ;;  %4391 = vmatpush.bf16.msrb.mxu3 %v4324_v40 }
 0x7b7   : > { %4379 = vmatpush.bf16.msra.mxu2 %v4319_v36  ;;  %4392 = vmatpush.bf16.msrb.mxu3 %v4320_v23 }
 0x7bb   : > { %4380 = vmatpush.bf16.msra.mxu2 %v11034_v19  ;;  %4393 = vmatpush.bf16.msrb.mxu3 %v11037_v26 }
 0x7bf   : > { %4381 = vmatpush.bf16.msra.mxu2 %v4311_v43  ;;  %4394 = vmatpush.bf16.msrb.mxu3 %v4312_v21 }
 0x7c2   : > { %4382 = vmatmul.bf16.vlgmr.msra.gmra.mxu2 %v4341_v61  ;;  %4395 = vmatmul.bf16.vlgmr.msrb.gmra.mxu3 %v4341_v61 }
 0x825   : > { %v4357_v25 = vpop.f32.mrf.mxu2  ;;  %v4370_v58 = vpop.f32.mrf.mxu3 }
 0x826   : > { %v4371_v42 = vadd.f32 %v4370_v58, %v9371_v5  ;;  %v4358_v14 = vadd.f32 %v4357_v25, %v9371_v5  ;;  %v9411_v58 = vld [vmem:[%s9405_s3] sm:$0xff] }
 0x828   : > { %v4404_v16 = vrot.slane %v4371_v42, 4  ;;  %v9384_v29 = vadd.f32 1.0, %v4358_v14  ;;  %v9387_v48 = vadd.f32 1.0, %v4371_v42 }
 0x82a   : > { %v4407_v46 = vsel %vm4406_vm8, %v4358_v14, %v4404_v16  ;;  %v4425_v49 = vmul.f32 3.5, %v9384_v29  ;;  %v4426_v10 = vmul.f32 3.5, %v9387_v48 }
 0x82b   : > { %4411 = vst [vmem:[%s9380_s22] sm:$0x77] %v4407_v46 }
 0x82c   : > { %v4437_v62 = vfloor.f32 %v4425_v49  ;;  %v4438_v50 = vfloor.f32 %v4426_v10 }
 0x82d   : > { %v4359_v9 = vpop.f32.mrf.mxu2  ;;  %v4372_v31 = vpop.f32.mrf.mxu3 }
 0x82e   : > { %v4483_v39 = vmax.f32 %v4437_v62, 0.0  ;;  %v4519_v32 = vadd.f32 1.0, %v4437_v62  ;;  %vm4463_vm9 = vcmp.ge.f32.partialorder %v4437_v62, 0.0  ;;  %vm4467_vm10 = vcmp.lt.f32.partialorder %v4437_v62, 8.0 }
 0x82f   : > { %v4449_v53 = vsub.f32 %v4425_v49, %v4437_v62  ;;  %vm4471_vm12 = vmand %vm4463_vm9, %vm4467_vm10  ;;  %vm4464_vm15 = vcmp.ge.f32.partialorder %v4438_v50, 0.0  ;;  %v4484_v8 = vmax.f32 %v4438_v50, 0.0  ;;  %vm4468_vm0 = vcmp.lt.f32.partialorder %v4438_v50, 8.0  ;;  %v9418_v49 = vld [vmem:[%s9405_s3 + $0x8] sm:$0xff]  ;;  %v9425_v62 = vld [vmem:[%s9405_s3 + $0x10] sm:$0xff] }
 0x830   : > { %v4487_v52 = vmin.f32 %v4483_v39, 7.0  ;;  %vm4523_vm11 = vcmp.ge.f32.partialorder %v4519_v32, 0.0  ;;  %vm4527_vm13 = vcmp.lt.f32.partialorder %v4519_v32, 8.0  ;;  %v4543_v17 = vmax.f32 %v4519_v32, 0.0  ;;  %vm4472_vm2 = vmand %vm4464_vm15, %vm4468_vm0 }
 0x831   : > { %v4459_v47 = vsub.f32 1.0, %v4449_v53  ;;  %vm4531_vm14 = vmand %vm4523_vm11, %vm4527_vm13  ;;  %v5861_v61 = vsel %vm4471_vm12, 1.0, %v6187_v4  ;;  %v4520_v38 = vadd.f32 1.0, %v4438_v50  ;;  %v4450_v60 = vsub.f32 %v4426_v10, %v4438_v50  ;;  %v9434_v10 = vld [vmem:[%s9405_s3 + $0x18] sm:$0xff] }
 0x832   : > { %v5954_v18 = vcvt.f32.s32 %v4487_v52  ;;  %v4547_v1 = vmin.f32 %v4543_v17, 7.0  ;;  %v5865_v44 = vsel %vm4531_vm14, 1.0, %v6187_v4  ;;  %v4488_v30 = vmin.f32 %v4484_v8, 7.0  ;;  %v9448_v17 = vld [vmem:[%s9405_s3 + $0x20] sm:$0xff] }
 0x833   : > { %v4503_v56 = vmul.f32 %v5861_v61, %v4459_v47  ;;  %vm4524_vm3 = vcmp.ge.f32.partialorder %v4520_v38, 0.0  ;;  %vm4528_vm4 = vcmp.lt.f32.partialorder %v4520_v38, 8.0  ;;  %v4544_v12 = vmax.f32 %v4520_v38, 0.0 }
 0x834   : > { %vm5961_vm1 = vcmp.lt.s32.totalorder %v4547_v1, 0  ;;  %v5962_v55 = vceil.f32 %v4547_v1  ;;  %v4495_v57 = vperm.slane %v5954_v18, 2  ;;  %v5963_v34 = vfloor.f32 %v4547_v1  ;;  %vm4532_vm5 = vmand %vm4524_vm3, %vm4528_vm4 }
 0x835   : > { %v4460_v7 = vsub.f32 1.0, %v4450_v60  ;;  %v4563_v41 = vmul.f32 %v5865_v44, %v4449_v53  ;;  %v5862_v51 = vsel %vm4472_vm2, 1.0, %v6187_v4  ;;  %v5956_v13 = vcvt.f32.s32 %v4488_v30 }
 0x836   : > { %v5964_v22 = vsel %vm5961_vm1, %v5962_v55, %v5963_v34  ;;  %v4548_v24 = vmin.f32 %v4544_v12, 7.0  ;;  %vm4499_vm6 = vcmp.eq.s32.totalorder %v9393_v15, %v4495_v57  ;;  %v4507_v33 = vperm.slane %v4503_v56, 2 }
 0x837   : > { %v5965_v59 = vcvt.f32.s32 %v5964_v22  ;;  %v5866_v40 = vsel %vm4532_vm5, 1.0, %v6187_v4  ;;  %v4567_v23 = vperm.slane %v4563_v41, 2  ;;  %v4504_v0 = vmul.f32 %v5862_v51, %v4460_v7 }
 0x838   : > { %vm5966_vm7 = vcmp.lt.s32.totalorder %v4548_v24, 0  ;;  %v5967_v36 = vceil.f32 %v4548_v24  ;;  %v5968_v63 = vfloor.f32 %v4548_v24  ;;  %v4496_v19 = vperm.slane %v5956_v13, 2 }
 0x839   : > { %v4555_v45 = vperm.slane %v5965_v59, 2  ;;  %v4511_v11 = vsel %vm4499_vm6, %v4507_v33, 0.0  ;;  %v4564_v21 = vmul.f32 %v5866_v40, %v4450_v60  ;;  %vm4579_vm10 = vcmask 64512  }
 0x83a   : > { %v5969_v43 = vsel %vm5966_vm7, %v5967_v36, %v5968_v63  ;;  %v4508_v42 = vperm.slane %v4504_v0, 2  ;;  %vm4500_vm11 = vcmp.eq.s32.totalorder %v9393_v15, %v4496_v19  ;;  %v4421_v53 = vmul.f32 7.5, %v9384_v29 }
 0x83b   : > { %vm4559_vm9 = vcmp.eq.s32.totalorder %v9393_v15, %v4555_v45  ;;  %v5970_v25 = vcvt.f32.s32 %v5969_v43  ;;  %v4568_v16 = vperm.slane %v4564_v21, 2  ;;  %v9459_v38 = vmul.f32 1.5, %v9387_v48 }
 0x83c   : > { %v4571_v26 = vsel %vm4559_vm9, %v4567_v23, 0.0  ;;  %v4512_v46 = vsel %vm4500_vm11, %v4508_v42, 0.0  ;;  %v9450_v47 = vfloor.f32 %v4421_v53  ;;  %v9462_v44 = vmul.f32 7.5, %v9387_v48  ;;  %v9472_v48 = vld [vmem:[%s9405_s3 + $0x28] sm:$0xff] }
 0x83d   : > { %v4556_v14 = vperm.slane %v5970_v25, 2  ;;  %v11041_v63 = vmov 0  }
 0x83e   : > { %v4795_v1 = vmax.f32 %v9450_v47, 0.0  ;;  %v9466_v34 = vsub.f32 %v4421_v53, %v9450_v47  ;;  %vm4783_vm6 = vcmp.ge.f32.partialorder %v9450_v47, 0.0  ;;  %vm4787_vm7 = vcmp.lt.f32.partialorder %v9450_v47, 16.0 }
 0x840   : > { %v9474_v41 = vmin.f32 %v4795_v1, 15.0 }
 0x845   : > { %v4383_v54 = vpop.f32.mrf.mxu2  ;;  %v4396_v35 = vpop.f32.mrf.mxu3 }
 0x846   : > { %v4397_v6 = vadd.f32 %v4396_v35, %v9371_v5  ;;  %v4384_v37 = vadd.f32 %v4383_v54, %v9371_v5  ;;  %v4575_v5 = vadd.f32 %v4571_v26, %v4511_v11  ;;  %v4417_v35 = vmul.f32 1.5, %v9384_v29 }
 0x848   : > { %v4405_v27 = vrot.slane %v4397_v6, 4  ;;  %4619 = vmatpush.msrb.mxu2 %v4575_v5  ;;  %v9431_v54 = vadd.f32 1.0, %v4384_v37  ;;  %v9443_v50 = vadd.f32 1.0, %v4397_v6  ;;  %v4429_v52 = vfloor.f32 %v4417_v35 }
 0x849   : > { %5869 = vmatmul.msk.f32.vlgmr.msrb.gmra.mxu2 %vm4579_vm10, %v9411_v58 }
 0x84a   : > { %v4408_v3 = vsel %vm4406_vm8, %v4384_v37, %v4405_v27  ;;  %vm4560_vm8 = vcmp.eq.s32.totalorder %v9393_v15, %v4556_v14  ;;  %v4427_v39 = vmul.f32 3.5, %v9431_v54  ;;  %v4428_v18 = vmul.f32 3.5, %v9443_v50 }
 0x84b   : > { %4412 = vst [vmem:[%s9380_s22 + $0x8] sm:$0x77] %v4408_v3  ;;  %v4572_v9 = vsel %vm4560_vm8, %v4568_v16, 0.0  ;;  %v9455_v61 = vsub.f32 %v4417_v35, %v4429_v52  ;;  %vm4815_vm1 = vcmp.ge.f32.partialorder %v4429_v52, 0.0  ;;  %vm4819_vm2 = vcmp.lt.f32.partialorder %v4429_v52, 4.0 }
 0x84c   : > { %v4576_v31 = vadd.f32 %v4572_v9, %v4512_v46  ;;  %v4439_v32 = vfloor.f32 %v4427_v39  ;;  %v4440_v60 = vfloor.f32 %v4428_v18  ;;  %v4827_v7 = vmax.f32 %v4429_v52, 0.0  ;;  %vm9480_vm4 = vmand %vm4815_vm1, %vm4819_vm2  ;;  %v9506_v9 = vld [vmem:[%s9405_s3 + $0x30] sm:$0xff] }
 0x84d   : > { %v4385_v28 = vpop.f32.mrf.mxu2  ;;  %v4398_v2 = vpop.f32.mrf.mxu3  ;;  %v4811_v12 = vsub.f32 1.0, %v9455_v61  ;;  %v9476_v6 = vadd.f32 1.0, %v4429_v52  ;;  %v9489_v27 = vadd.f32 1.0, %v9450_v47  ;;  %v4855_v19 = vsel %vm9480_vm4, 1, %v11041_v63 }
 0x84e   : > { %4660 = vmatpush.msra.mxu3 %v4576_v31  ;;  %v4485_v28 = vmax.f32 %v4439_v32, 0.0  ;;  %vm4465_vm12 = vcmp.ge.f32.partialorder %v4439_v32, 0.0  ;;  %vm4469_vm13 = vcmp.lt.f32.partialorder %v4439_v32, 8.0  ;;  %v4451_v8 = vsub.f32 %v4427_v39, %v4439_v32 }
 0x84f   : > { %5877 = vmatmul.msk.f32.vlgmr.msra.gmra.mxu3 %vm4579_vm10, %v9411_v58  ;;  %v4521_v2 = vadd.f32 1.0, %v4439_v32  ;;  %vm4473_vm14 = vmand %vm4465_vm12, %vm4469_vm13  ;;  %v4486_v51 = vmax.f32 %v4440_v60, 0.0  ;;  %vm4466_vm9 = vcmp.ge.f32.partialorder %v4440_v60, 0.0  ;;  %vm4470_vm11 = vcmp.lt.f32.partialorder %v4440_v60, 8.0 }
 0x850   : > { %v4489_v29 = vmin.f32 %v4485_v28, 7.0  ;;  %v4461_v55 = vsub.f32 1.0, %v4451_v8  ;;  %v5863_v57 = vsel %vm4473_vm14, 1.0, %v6187_v4  ;;  %v4452_v40 = vsub.f32 %v4428_v18, %v4440_v60  ;;  %vm9496_vm13 = vmand %vm4466_vm9, %vm4470_vm11 }
 0x851   : > { %5870 = vmatmul.msk.f32.gmra.mxu2 %vm4579_vm10, %v9418_v49  ;;  %vm4525_vm15 = vcmp.ge.f32.partialorder %v4521_v2, 0.0  ;;  %vm4529_vm0 = vcmp.lt.f32.partialorder %v4521_v2, 8.0  ;;  %v4545_v30 = vmax.f32 %v4521_v2, 0.0  ;;  %v4522_v0 = vadd.f32 1.0, %v4440_v60  ;;  %vm9536_vm9 = vmand %vm4783_vm6, %vm4787_vm7 }
 0x852   : > { %v5958_v56 = vcvt.f32.s32 %v4489_v29  ;;  %vm4533_vm3 = vmand %vm4525_vm15, %vm4529_vm0  ;;  %v4505_v24 = vmul.f32 %v5863_v57, %v4461_v55  ;;  %vm5003_vm8 = vcmp.ge.f32.partialorder %v9476_v6, 0.0  ;;  %v4490_v11 = vmin.f32 %v4486_v51, 7.0 }
 0x853   : > { %v4549_v22 = vmin.f32 %v4545_v30, 7.0  ;;  %v5867_v59 = vsel %vm4533_vm3, 1.0, %v6187_v4  ;;  %vm5007_vm12 = vcmp.lt.f32.partialorder %v9476_v6, 4.0  ;;  %vm4526_vm14 = vcmp.ge.f32.partialorder %v4522_v0, 0.0 }
 0x854   : > { %v4497_v45 = vperm.slane %v5958_v56, 2  ;;  %v4565_v23 = vmul.f32 %v5867_v59, %v4451_v8  ;;  %v4509_v26 = vperm.slane %v4505_v24, 2  ;;  %vm4530_vm15 = vcmp.lt.f32.partialorder %v4522_v0, 8.0  ;;  %vm5011_vm2 = vmand %vm5003_vm8, %vm5007_vm12 }
 0x855   : > { %vm5971_vm5 = vcmp.lt.s32.totalorder %v4549_v22, 0  ;;  %v5972_v33 = vceil.f32 %v4549_v22  ;;  %v5973_v37 = vfloor.f32 %v4549_v22  ;;  %v4831_v21 = vmin.f32 %v4827_v7, 3.0  ;;  %vm4534_vm1 = vmand %vm4526_vm14, %vm4530_vm15 }
 0x856   : > { %vm4501_vm0 = vcmp.eq.s32.totalorder %v9393_v15, %v4497_v45  ;;  %v4546_v25 = vmax.f32 %v4522_v0, 0.0  ;;  %v9501_v42 = vrot.slane %v4811_v12, 7  ;;  %v4859_v14 = vrot.slane %v4855_v19, 7  ;;  %v9560_v45 = vld [vmem:[%s9405_s3 + $0x38] sm:$0xff] }
 0x857   : > { %5878 = vmatmul.msk.f32.gmra.mxu3 %vm4579_vm10, %v9418_v49  ;;  %v5974_v36 = vsel %vm5971_vm5, %v5972_v33, %v5973_v37  ;;  %v4462_v16 = vsub.f32 1.0, %v4452_v40  ;;  %v4569_v46 = vperm.slane %v4565_v23, 2  ;;  %v5864_v31 = vsel %vm9496_vm13, 1.0, %v6187_v4 }
 0x858   : > { %v5975_v3 = vcvt.f32.s32 %v5974_v36  ;;  %v5960_v39 = vcvt.f32.s32 %v4490_v11  ;;  %v4550_v35 = vmin.f32 %v4546_v25, 7.0  ;;  %v5982_v32 = vcvt.f32.s32 %v9474_v41 }
 0x859   : > { %5871 = vmatmul.msk.f32.gmra.mxu2 %vm4579_vm10, %v9425_v62  ;;  %v5015_v53 = vmax.f32 %v9476_v6, 0.0  ;;  %v4513_v52 = vsel %vm4501_vm0, %v4509_v26, 0.0  ;;  %v5868_v8 = vsel %vm4534_vm1, 1.0, %v6187_v4  ;;  %vm9523_vm5 = vcmp.ne.s32.totalorder %v4859_v14, 0 }
 0x85a   : > { %v4557_v5 = vperm.slane %v5975_v3, 2  ;;  %vm5976_vm4 = vcmp.lt.s32.totalorder %v4550_v35, 0  ;;  %v5977_v2 = vceil.f32 %v4550_v35  ;;  %v5043_v1 = vsel %vm5011_vm2, 1, %v11041_v63  ;;  %vm4867_vm6 = vmand %vm9536_vm9, %vm9523_vm5 }
 0x85b   : > { %v4506_v60 = vmul.f32 %v5864_v31, %v4462_v16  ;;  %v5978_v55 = vfloor.f32 %v4550_v35  ;;  %v4779_v30 = vsub.f32 1.0, %v9466_v34  ;;  %v5990_v57 = vcvt.f32.s32 %v4831_v21 }
 0x85c   : > { %vm4561_vm3 = vcmp.eq.s32.totalorder %v9393_v15, %v4557_v5  ;;  %v9530_v56 = vfloor.f32 %v9459_v38  ;;  %v4498_v12 = vperm.slane %v5960_v39, 2  ;;  %v5019_v22 = vmin.f32 %v5015_v53, 3.0 }
 0x85d   : > { %v4573_v28 = vsel %vm4561_vm3, %v4569_v46, 0.0  ;;  %v9541_v41 = vfloor.f32 %v9462_v44  ;;  %v5979_v6 = vsel %vm5976_vm4, %v5977_v2, %v5978_v55  ;;  %v4566_v59 = vmul.f32 %v5868_v8, %v4452_v40 }
 0x85e   : > { %v4577_v18 = vadd.f32 %v4573_v28, %v4513_v52  ;;  %v4851_v51 = vmul.f32 %v9501_v42, %v4779_v30  ;;  %v5047_v47 = vrot.slane %v5043_v1, 7  ;;  %v5199_v13 = vmax.f32 %v9489_v27, 0.0 }
 0x85f   : > { %5879 = vmatmul.msk.f32.gmra.mxu3 %vm4579_vm10, %v9425_v62  ;;  %v5980_v24 = vcvt.f32.s32 %v5979_v6  ;;  %v9553_v33 = vmul.u32 4, %v5982_v32  ;;  %vm5187_vm7 = vcmp.ge.f32.partialorder %v9489_v27, 0.0  ;;  %vm5191_vm11 = vcmp.lt.f32.partialorder %v9489_v27, 16.0 }
 0x860   : > { %4701 = vmatpush.msra.mxu0 %v4577_v18  ;;  %v4510_v37 = vperm.slane %v4506_v60, 2  ;;  %v9562_v40 = vrot.slane %v5990_v57, 7  ;;  %v5000_v36 = vadd.f32 1.0, %v9530_v56  ;;  %vm4502_vm8 = vcmp.eq.s32.totalorder %v9393_v15, %v4498_v12  ;;  %vm9577_vm14 = vmand %vm5187_vm7, %vm5191_vm11 }
 0x861   : > { %5872 = vmatmul.msk.f32.gmra.mxu2 %vm4579_vm10, %v9434_v10  ;;  %5885 = vmatmul.msk.f32.vlgmr.msra.gmra.mxu0 %vm4579_vm10, %v9411_v58  ;;  %v4558_v23 = vperm.slane %v5980_v24, 2  ;;  %v5901_v0 = vsel %vm4867_vm6, 1.0, %v6187_v4  ;;  %vm5997_vm12 = vcmp.lt.s32.totalorder %v5019_v22, 0  ;;  %v5998_v19 = vceil.f32 %v5019_v22  ;;  %vm5215_vm0 = vmand %vm9577_vm14, %vm9523_vm5 }
 0x862   : > { %v4570_v3 = vperm.slane %v4566_v59, 2  ;;  %v5999_v11 = vfloor.f32 %v5019_v22  ;;  %vm9569_vm13 = vcmp.ne.s32.totalorder %v5047_v47, 0  ;;  %v5203_v21 = vmin.f32 %v5199_v13, 15.0 }
 0x863   : > { %vm4562_vm15 = vcmp.eq.s32.totalorder %v9393_v15, %v4558_v23  ;;  %vm4816_vm1 = vcmp.ge.f32.partialorder %v9530_v56, 0.0  ;;  %vm4820_vm2 = vcmp.lt.f32.partialorder %v9530_v56, 4.0  ;;  %v4514_v5 = vsel %vm4502_vm8, %v4510_v37, 0.0  ;;  %vm5055_vm6 = vmand %vm9536_vm9, %vm9569_vm13 }
 0x864   : > { %v4574_v25 = vsel %vm4562_vm15, %v4570_v3, 0.0  ;;  %v5031_v27 = vrot.slane %v9455_v61, 7  ;;  %vm5004_vm3 = vcmp.ge.f32.partialorder %v5000_v36, 0.0  ;;  %vm5008_vm4 = vcmp.lt.f32.partialorder %v5000_v36, 4.0  ;;  %vm9614_vm7 = vmand %vm4816_vm1, %vm4820_vm2 }
 0x865   : > { %v4578_v14 = vadd.f32 %v4574_v25, %v4514_v5  ;;  %v5211_v16 = vmul.f32 %v9501_v42, %v9466_v34  ;;  %v9597_v46 = vsub.f32 %v9459_v38, %v9530_v56  ;;  %v4879_v31 = vmul.f32 %v5901_v0, %v4851_v51  ;;  %vm5012_vm11 = vmand %vm5004_vm3, %vm5008_vm4 }
 0x866   : > { %v4891_v61 = vadd.s32 %v9562_v40, %v9553_v33  ;;  %v6000_v39 = vsel %vm5997_vm12, %v5998_v19, %v5999_v11  ;;  %v5909_v42 = vsel %vm5215_vm0, 1.0, %v6187_v4  ;;  %v6018_v35 = vceil.f32 %v5203_v21  ;;  %vm5347_vm9 = vmand %vm9577_vm14, %vm9569_vm13 }
 0x867   : > { %5880 = vmatmul.msk.f32.gmra.mxu3 %vm4579_vm10, %v9434_v10  ;;  %4742 = vmatpush.msrb.mxu1 %v4578_v14  ;;  %v6019_v32 = vfloor.f32 %v5203_v21  ;;  %v4796_v53 = vmax.f32 %v9541_v41, 0.0  ;;  %v5016_v52 = vmax.f32 %v5000_v36, 0.0  ;;  %v5039_v28 = vmul.f32 %v5031_v27, %v4779_v30 }
 0x868   : > { %5952 = vmatpush.msrb.mxu3 %v4578_v14  ;;  %5893 = vmatmul.msk.f32.vlgmr.msrb.gmra.mxu1 %vm4579_vm10, %v9411_v58  ;;  %vm6017_vm5 = vcmp.lt.s32.totalorder %v5203_v21, 0  ;;  %v4828_v18 = vmax.f32 %v9530_v56, 0.0  ;;  %v5184_v8 = vadd.f32 1.0, %v9541_v41  ;;  %v6001_v2 = vcvt.f32.s32 %v6000_v39 }
 0x869   : > { %5873 = vmatmul.msk.f32.gmra.mxu2 %vm4579_vm10, %v9448_v17  ;;  %5886 = vmatmul.msk.f32.gmra.mxu0 %vm4579_vm10, %v9418_v49  ;;  %v5905_v29 = vsel %vm5055_vm6, 1.0, %v6187_v4  ;;  %v5227_v58 = vmul.f32 %v5909_v42, %v5211_v16  ;;  %v4856_v1 = vsel %vm9614_vm7, 1, %v11041_v63  ;;  %v9638_v60 = vperm.slane %v4891_v61, 1 }
 0x86a   : > { %v9640_v55 = vperm.slane %v4879_v31, 1  ;;  %v5343_v30 = vmul.f32 %v5031_v27, %v9466_v34  ;;  %v5044_v57 = vsel %vm5012_vm11, 1, %v11041_v63  ;;  %v6020_v56 = vsel %vm6017_vm5, %v6018_v35, %v6019_v32 }
 0x86b   : > { %v9650_v12 = vsub.f32 %v9462_v44, %v9541_v41  ;;  %v4800_v7 = vmin.f32 %v4796_v53, 15.0  ;;  %v5020_v22 = vmin.f32 %v5016_v52, 3.0  ;;  %v5067_v6 = vmul.f32 %v5905_v29, %v5039_v28 }
 0x86c   : > { %v4832_v59 = vmin.f32 %v4828_v18, 3.0  ;;  %v4860_v51 = vrot.slane %v4856_v1, 7  ;;  %v5200_v47 = vmax.f32 %v5184_v8, 0.0  ;;  %v5071_v13 = vrot.slane %v6001_v2, 7 }
 0x86d   : > { %v9652_v34 = vperm.slane %v5227_v58, 1  ;;  %v5048_v24 = vrot.slane %v5044_v57, 7  ;;  %v9655_v37 = vmul.f32 1.5, %v9431_v54  ;;  %v6021_v36 = vcvt.f32.s32 %v6020_v56 }
 0x86e   : > { %v5913_v44 = vsel %vm5347_vm9, 1.0, %v6187_v4  ;;  %vm4784_vm8 = vcmp.ge.f32.partialorder %v9541_v41, 0.0  ;;  %vm4788_vm12 = vcmp.lt.f32.partialorder %v9541_v41, 16.0  ;;  %v5984_v23 = vcvt.f32.s32 %v4800_v7 }
 0x86f   : > { %5881 = vmatmul.msk.f32.gmra.mxu3 %vm4579_vm10, %v9448_v17  ;;  %v4812_v0 = vsub.f32 1.0, %v9597_v46  ;;  %v6003_v19 = vceil.f32 %v5020_v22  ;;  %v6004_v3 = vfloor.f32 %v5020_v22  ;;  %v5992_v11 = vcvt.f32.s32 %v4832_v59  ;;  %vm9683_vm0 = vmand %vm4784_vm8, %vm4788_vm12 }
 0x870   : > { %5894 = vmatmul.msk.f32.gmra.mxu1 %vm4579_vm10, %v9418_v49  ;;  %vm9667_vm13 = vcmp.ne.s32.totalorder %v4860_v51, 0  ;;  %vm6002_vm14 = vcmp.lt.s32.totalorder %v5020_v22, 0  ;;  %v5204_v43 = vmin.f32 %v5200_v47, 15.0  ;;  %v5075_v21 = vadd.s32 %v5071_v13, %v9553_v33 }
 0x871   : > { %5874 = vmatmul.msk.f32.gmra.mxu2 %vm4579_vm10, %v9472_v48  ;;  %5887 = vmatmul.msk.f32.gmra.mxu0 %vm4579_vm10, %v9425_v62  ;;  %v5359_v5 = vmul.f32 %v5913_v44, %v5343_v30  ;;  %vm9672_vm15 = vcmp.ne.s32.totalorder %v5048_v24, 0  ;;  %v9677_v27 = vfloor.f32 %v9655_v37  ;;  %v5231_v49 = vmul.u32 4, %v6021_v36  ;;  %vm4868_vm3 = vmand %vm9683_vm0, %vm9667_vm13 }
 0x872   : > { %vm5188_vm1 = vcmp.ge.f32.partialorder %v5184_v8, 0.0  ;;  %vm5192_vm2 = vcmp.lt.f32.partialorder %v5184_v8, 16.0  ;;  %v9688_v33 = vmul.f32 7.5, %v9431_v54  ;;  %v9690_v16 = vperm.slane %v5067_v6, 1  ;;  %vm5056_vm4 = vmand %vm9683_vm0, %vm9672_vm15 }
 0x873   : > { %v4780_v31 = vsub.f32 1.0, %v9650_v12  ;;  %v4844_v61 = vrot.slane %v4812_v0, 7  ;;  %v6005_v41 = vsel %vm6002_vm14, %v6003_v19, %v6004_v3  ;;  %v4884_v39 = vmul.u32 4, %v5984_v23  ;;  %vm9709_vm6 = vmand %vm5188_vm1, %vm5192_vm2 }
 0x874   : > { %v9698_v42 = vrot.slane %v5992_v11, 7  ;;  %v6023_v54 = vceil.f32 %v5204_v43  ;;  %v6024_v38 = vfloor.f32 %v5204_v43  ;;  %v9704_v35 = vperm.slane %v5075_v21, 1  ;;  %vm5216_vm11 = vmand %vm9709_vm6, %vm9667_vm13 }
 0x875   : > { %v9706_v32 = vperm.slane %v5359_v5, 1  ;;  %vm6022_vm7 = vcmp.lt.s32.totalorder %v5204_v43, 0  ;;  %v5001_v52 = vadd.f32 1.0, %v9677_v27  ;;  %v5235_v28 = vadd.s32 %v5231_v49, %v9562_v40  ;;  %vm5348_vm8 = vmand %vm9709_vm6, %vm9672_vm15 }
 0x876   : > { %v6006_v18 = vcvt.f32.s32 %v6005_v41  ;;  %v5032_v2 = vrot.slane %v9597_v46, 7  ;;  %v9723_v8 = vfloor.f32 %v9688_v33  ;;  %v5363_v29 = vadd.s32 %v5231_v49, %v5071_v13 }
 0x877   : > { %5882 = vmatmul.msk.f32.gmra.mxu3 %vm4579_vm10, %v9472_v48  ;;  %v4852_v58 = vmul.f32 %v4844_v61, %v4780_v31  ;;  %v5902_v40 = vsel %vm4868_vm3, 1.0, %v6187_v4  ;;  %v5212_v1 = vmul.f32 %v4844_v61, %v9650_v12  ;;  %v4892_v46 = vadd.s32 %v9698_v42, %v4884_v39 }
 0x878   : > { %5895 = vmatmul.msk.f32.gmra.mxu1 %vm4579_vm10, %v9425_v62  ;;  %v6025_v30 = vsel %vm6022_vm7, %v6023_v54, %v6024_v38  ;;  %vm4817_vm5 = vcmp.ge.f32.partialorder %v9677_v27, 0.0  ;;  %vm4821_vm9 = vcmp.lt.f32.partialorder %v9677_v27, 4.0  ;;  %v5906_v57 = vsel %vm5056_vm4, 1.0, %v6187_v4 }
 0x879   : > { %5875 = vmatmul.msk.f32.gmra.mxu2 %vm4579_vm10, %v9506_v9  ;;  %5888 = vmatmul.msk.f32.gmra.mxu0 %vm4579_vm10, %v9434_v10  ;;  %v5910_v56 = vsel %vm5216_vm11, 1.0, %v6187_v4  ;;  %vm5005_vm12 = vcmp.ge.f32.partialorder %v5001_v52, 0.0  ;;  %vm5009_vm13 = vcmp.lt.f32.partialorder %v5001_v52, 4.0  ;;  %v9750_v62 = vperm.slane %v5235_v28, 1  ;;  %vm4825_vm14 = vmand %vm4817_vm5, %vm4821_vm9 }
 0x87a   : > { %v5040_v7 = vmul.f32 %v5032_v2, %v4780_v31  ;;  %v5072_v22 = vrot.slane %v6006_v18, 7  ;;  %v4797_v6 = vmax.f32 %v9723_v8, 0.0  ;;  %v9753_v59 = vperm.slane %v5363_v29, 1  ;;  %vm5013_vm15 = vmand %vm5005_vm12, %vm5009_vm13 }
 0x87b   : > { %v6026_v51 = vcvt.f32.s32 %v6025_v30  ;;  %v5344_v47 = vmul.f32 %v5032_v2, %v9650_v12  ;;  %v4829_v13 = vmax.f32 %v9677_v27, 0.0  ;;  %v4880_v24 = vmul.f32 %v5902_v40, %v4852_v58 }
 0x87c   : > { %v5068_v36 = vmul.f32 %v5906_v57, %v5040_v7  ;;  %v5228_v44 = vmul.f32 %v5910_v56, %v5212_v1  ;;  %v5914_v23 = vsel %vm5348_vm8, 1.0, %v6187_v4  ;;  %v9759_v0 = vperm.slane %v4892_v46, 1 }
 0x87d   : > { %v9763_v19 = vsub.f32 %v9655_v37, %v9677_v27  ;;  %v5185_v3 = vadd.f32 1.0, %v9723_v8  ;;  %v9767_v12 = vmul.f32 1.5, %v9443_v50  ;;  %v5076_v11 = vadd.s32 %v5072_v22, %v4884_v39 }
 0x87e   : > { %v4801_v26 = vmin.f32 %v4797_v6, 15.0  ;;  %v4857_v43 = vsel %vm4825_vm14, 1, %v11041_v63  ;;  %v5017_v21 = vmax.f32 %v5001_v52, 0.0  ;;  %v5232_v5 = vmul.u32 4, %v6026_v51 }
 0x87f   : > { %5883 = vmatmul.msk.f32.gmra.mxu3 %vm4579_vm10, %v9506_v9  ;;  %v5360_v25 = vmul.f32 %v5914_v23, %v5344_v47  ;;  %v4833_v49 = vmin.f32 %v4829_v13, 3.0  ;;  %v5045_v14 = vsel %vm5013_vm15, 1, %v11041_v63  ;;  %v9777_v37 = vperm.slane %v4880_v24, 1 }
 0x880   : > { %5896 = vmatmul.msk.f32.gmra.mxu1 %vm4579_vm10, %v9434_v10  ;;  %v9779_v27 = vperm.slane %v5068_v36, 1  ;;  %v9781_v31 = vperm.slane %v5228_v44, 1  ;;  %v9784_v61 = vmul.f32 7.5, %v9443_v50  ;;  %v4813_v41 = vsub.f32 1.0, %v9763_v19 }
 0x881   : > { %5876 = vmatmul.msk.f32.gmra.mxu2 %vm4579_vm10, %v9560_v45  ;;  %5889 = vmatmul.msk.f32.gmra.mxu0 %vm4579_vm10, %v9448_v17  ;;  %v4861_v39 = vrot.slane %v4857_v43, 7  ;;  %v5201_v54 = vmax.f32 %v5185_v3, 0.0  ;;  %v9788_v38 = vfloor.f32 %v9767_v12  ;;  %v9790_v10 = vperm.slane %v5076_v11, 1 }
 0x882   : > { %v5986_v53 = vcvt.f32.s32 %v4801_v26  ;;  %v5021_v52 = vmin.f32 %v5017_v21, 3.0  ;;  %v5049_v28 = vrot.slane %v5045_v14, 7  ;;  %v5236_v18 = vadd.s32 %v5232_v5, %v9698_v42 }
 0x883   : > { %v5364_v2 = vadd.s32 %v5232_v5, %v5072_v22  ;;  %v9793_v29 = vperm.slane %v5360_v25, 1  ;;  %v5994_v58 = vcvt.f32.s32 %v4833_v49  ;;  %v4447_v50 = vsub.f32 %v9688_v33, %v9723_v8 }
 0x884   : > { %vm4785_vm0 = vcmp.ge.f32.partialorder %v9723_v8, 0.0  ;;  %vm4789_vm1 = vcmp.lt.f32.partialorder %v9723_v8, 16.0  ;;  %v9800_v40 = vfloor.f32 %v9784_v61  ;;  %v4845_v1 = vrot.slane %v4813_v41, 7 }
 0x885   : > { %vm9802_vm2 = vcmp.ne.s32.totalorder %v4861_v39, 0  ;;  %v5205_v42 = vmin.f32 %v5201_v54, 15.0  ;;  %v5002_v30 = vadd.f32 1.0, %v9788_v38  ;;  %v9809_v57 = vmul.u32 4, %v5986_v53  ;;  %vm9815_vm4 = vmand %vm4785_vm0, %vm4789_vm1 }
 0x886   : > { %v6008_v33 = vceil.f32 %v5021_v52  ;;  %v6009_v56 = vfloor.f32 %v5021_v52  ;;  %vm9811_vm3 = vcmp.ne.s32.totalorder %v5049_v28, 0  ;;  %v9819_v22 = vrot.slane %v5994_v58, 7  ;;  %vm4869_vm5 = vmand %vm9815_vm4, %vm9802_vm2 }
 0x887   : > { %5884 = vmatmul.msk.f32.gmra.mxu3 %vm4579_vm10, %v9560_v45  ;;  %vm6007_vm6 = vcmp.lt.s32.totalorder %v5021_v52, 0  ;;  %vm5189_vm7 = vcmp.ge.f32.partialorder %v5185_v3, 0.0  ;;  %vm5193_vm11 = vcmp.lt.f32.partialorder %v5185_v3, 16.0  ;;  %vm4818_vm9 = vcmp.ge.f32.partialorder %v9788_v38, 0.0  ;;  %vm5057_vm12 = vmand %vm9815_vm4, %vm9811_vm3 }
 0x888   : > { %5897 = vmatmul.msk.f32.gmra.mxu1 %vm4579_vm10, %v9448_v17  ;;  %vm4822_vm8 = vcmp.lt.f32.partialorder %v9788_v38, 4.0  ;;  %v9830_v6 = vadd.f32 1.0, %v9800_v40  ;;  %v6028_v51 = vceil.f32 %v5205_v42  ;;  %v6029_v17 = vfloor.f32 %v5205_v42  ;;  %vm9839_vm15 = vmand %vm5189_vm7, %vm5193_vm11 }
 0x889   : > { %5890 = vmatmul.msk.f32.gmra.mxu0 %vm4579_vm10, %v9472_v48  ;;  %vm5006_vm13 = vcmp.ge.f32.partialorder %v5002_v30, 0.0  ;;  %vm5010_vm14 = vcmp.lt.f32.partialorder %v5002_v30, 4.0  ;;  %v6010_v13 = vsel %vm6007_vm6, %v6008_v33, %v6009_v56  ;;  %v5033_v24 = vrot.slane %v9763_v19, 7  ;;  %vm9852_vm1 = vmand %vm4818_vm9, %vm4822_vm8 }
 0x88a   : > { %vm6027_vm0 = vcmp.lt.s32.totalorder %v5205_v42, 0  ;;  %v9843_v44 = vperm.slane %v5236_v18, 1  ;;  %v5903_v23 = vsel %vm4869_vm5, 1.0, %v6187_v4  ;;  %v4893_v11 = vadd.s32 %v9819_v22, %v9809_v57  ;;  %vm9865_vm6 = vmand %vm5006_vm13, %vm5010_vm14 }
 0x88b   : > { %v5018_v3 = vmax.f32 %v5002_v30, 0.0  ;;  %v9856_v26 = vperm.slane %v5364_v2, 1  ;;  %v5907_v43 = vsel %vm5057_vm12, 1.0, %v6187_v4  ;;  %v5213_v21 = vmul.f32 %v4845_v1, %v4447_v50  ;;  %vm5217_vm7 = vmand %vm9839_vm15, %vm9802_vm2 }
 0x88c   : > { %v5202_v25 = vmax.f32 %v9830_v6, 0.0  ;;  %v6011_v49 = vcvt.f32.s32 %v6010_v13  ;;  %v6030_v14 = vsel %vm6027_vm0, %v6028_v51, %v6029_v17  ;;  %v4798_v41 = vmax.f32 %v9800_v40, 0.0  ;;  %vm5349_vm2 = vmand %vm9839_vm15, %vm9811_vm3 }
 0x88d   : > { %v4830_v39 = vmax.f32 %v9788_v38, 0.0  ;;  %v9880_v52 = vsub.f32 %v9767_v12, %v9788_v38  ;;  %v4858_v28 = vsel %vm9852_vm1, 1, %v11041_v63  ;;  %v9885_v18 = vperm.slane %v4893_v11, 1 }
 0x88e   : > { %v5345_v2 = vmul.f32 %v5033_v24, %v4447_v50  ;;  %v5022_v58 = vmin.f32 %v5018_v3, 3.0  ;;  %v6031_v12 = vcvt.f32.s32 %v6030_v14  ;;  %v5911_v38 = vsel %vm5217_vm7, 1.0, %v6187_v4 }
 0x88f   : > { %5898 = vmatmul.msk.f32.vlgmr.msrb.gmra.mxu3 %vm4579_vm10, %v9472_v48  ;;  %v4781_v48 = vsub.f32 1.0, %v4447_v50  ;;  %v5206_v46 = vmin.f32 %v5202_v25, 15.0  ;;  %v5073_v42 = vrot.slane %v6011_v49, 7  ;;  %v4802_v30 = vmin.f32 %v4798_v41, 15.0 }
 0x890   : > { %v4834_v33 = vmin.f32 %v4830_v39, 3.0  ;;  %v4862_v56 = vrot.slane %v4858_v28, 7  ;;  %v5915_v50 = vsel %vm5349_vm2, 1.0, %v6187_v4  ;;  %v4448_v8 = vsub.f32 %v9784_v61, %v9800_v40 }
 0x891   : > { %v4853_v47 = vmul.f32 %v4845_v1, %v4781_v48  ;;  %5891 = vmatmul.msk.f32.gmra.mxu0 %vm4579_vm10, %v9506_v9  ;;  %v5041_v53 = vmul.f32 %v5033_v24, %v4781_v48  ;;  %v4814_v7 = vsub.f32 1.0, %v9880_v52  ;;  %vm4786_vm3 = vcmp.ge.f32.partialorder %v9800_v40, 0.0 }
 0x892   : > { %vm4790_vm4 = vcmp.lt.f32.partialorder %v9800_v40, 16.0  ;;  %v6014_v51 = vfloor.f32 %v5022_v58  ;;  %v5233_v17 = vmul.u32 4, %v6031_v12  ;;  %vm6012_vm11 = vcmp.lt.s32.totalorder %v5022_v58, 0 }
 0x893   : > { %v4881_v54 = vmul.f32 %v5903_v23, %v4853_v47  ;;  %v5069_v1 = vmul.f32 %v5907_v43, %v5041_v53  ;;  %v6033_v47 = vceil.f32 %v5206_v46  ;;  %v6034_v13 = vfloor.f32 %v5206_v46  ;;  %vm9916_vm12 = vmand %vm4786_vm3, %vm4790_vm4 }
 0x894   : > { %v5988_v24 = vcvt.f32.s32 %v4802_v30  ;;  %v5996_v36 = vcvt.f32.s32 %v4834_v33  ;;  %vm9901_vm5 = vcmp.ne.s32.totalorder %v4862_v56, 0  ;;  %vm6032_vm9 = vcmp.lt.s32.totalorder %v5206_v46, 0 }
 0x895   : > { %v5229_v61 = vmul.f32 %v5911_v38, %v5213_v21  ;;  %v5361_v11 = vmul.f32 %v5915_v50, %v5345_v2  ;;  %v4846_v19 = vrot.slane %v4814_v7, 7  ;;  %v5077_v43 = vadd.s32 %v5073_v42, %v9809_v57  ;;  %vm4870_vm14 = vmand %vm9916_vm12, %vm9901_vm5 }
 0x896   : > { %vm5194_vm13 = vcmp.lt.f32.partialorder %v9830_v6, 16.0  ;;  %v5365_v21 = vadd.s32 %v5233_v17, %v5073_v42  ;;  %v4782_v49 = vsub.f32 1.0, %v4448_v8  ;;  %v6035_v40 = vsel %vm6032_vm9, %v6033_v47, %v6034_v13 }
 0x897   : > { %5899 = vmatmul.msk.f32.gmra.mxu3 %vm4579_vm10, %v9506_v9  ;;  %v5046_v9 = vsel %vm9865_vm6, 1, %v11041_v63  ;;  %v6013_v63 = vceil.f32 %v5022_v58  ;;  %v9928_v57 = vperm.slane %v4881_v54, 1  ;;  %v4886_v14 = vmul.u32 4, %v5988_v24 }
 0x898   : > { %v5050_v48 = vrot.slane %v5046_v9, 7  ;;  %v4890_v41 = vrot.slane %v5996_v36, 7  ;;  %v5034_v39 = vrot.slane %v9880_v52, 7  ;;  %v9937_v53 = vperm.slane %v5229_v61, 1 }
 0x899   : > { %5892 = vmatmul.msk.f32.gmra.mxu0 %vm4579_vm10, %v9560_v45  ;;  %v6015_v25 = vsel %vm6012_vm11, %v6013_v63, %v6014_v51  ;;  %v4854_v28 = vmul.f32 %v4846_v19, %v4782_v49  ;;  %v9947_v52 = vperm.slane %v5361_v11, 1  ;;  %v5904_v58 = vsel %vm4870_vm14, 1.0, %v6187_v4 }
 0x89a   : > { %vm9907_vm8 = vcmp.ne.s32.totalorder %v5050_v48, 0  ;;  %11080 = vst [vmem:[#allocation19_spill] sm:$0xff] %v9937_v53  ;;  %v6016_v2 = vcvt.f32.s32 %v6015_v25  ;;  %v6036_v9 = vcvt.f32.s32 %v6035_v40  ;;  %vm5083_vm6 = vcmp.eq.s32.totalorder %v9393_v15, %v9704_v35 }
 0x89b   : > { %vm5058_vm15 = vmand %vm9916_vm12, %vm9907_vm8  ;;  %11083 = vst [vmem:[#allocation10_spill] sm:$0xff] %v9947_v52  ;;  %v9960_v12 = vperm.slane %v5365_v21, 1  ;;  %v4894_v46 = vadd.s32 %v4890_v41, %v4886_v14  ;;  %v5042_v42 = vmul.f32 %v5034_v39, %v4782_v49  ;;  %v5214_v30 = vmul.f32 %v4846_v19, %v4448_v8 }
 0x89c   : > { %v5908_v38 = vsel %vm5058_vm15, 1.0, %v6187_v4  ;;  %vm4899_vm2 = vcmp.eq.s32.totalorder %v9393_v15, %v9638_v60  ;;  %v4882_v33 = vmul.f32 %v5904_v58, %v4854_v28  ;;  %v5074_v56 = vrot.slane %v6016_v2, 7 }
 0x89d   : > { %11085 = vst [vmem:[#allocation9_spill] sm:$0xff] %v9960_v12  ;;  %v5119_v7 = vsel %vm5083_vm6, %v9690_v16, 0.0  ;;  %v5070_v48 = vmul.f32 %v5908_v38, %v5042_v42  ;;  %v5234_v63 = vmul.u32 4, %v6036_v9  ;;  %vm5084_vm3 = vcmp.eq.s32.totalorder %v9393_v15, %v9790_v10 }
 0x89e   : > { %v4935_v47 = vsel %vm4899_vm2, %v9640_v55, 0.0  ;;  %vm5243_vm4 = vcmp.eq.s32.totalorder %v9393_v15, %v9750_v62  ;;  %v9978_v13 = vadd.s32 8, %v9393_v15  ;;  %v9980_v24 = vperm.slane %v4894_v46, 1 }
 0x89f   : > { %5900 = vmatmul.msk.f32.gmra.mxu3 %vm4579_vm10, %v9560_v45  ;;  %vm5190_vm10 = vcmp.ge.f32.partialorder %v9830_v6, 0.0  ;;  %v5237_v45 = vadd.s32 %v5233_v17, %v9819_v22  ;;  %v9935_v22 = vperm.slane %v5069_v1, 1  ;;  %v9956_v1 = vperm.slane %v5077_v43, 1 }
 0x8a0   : > { %vm9943_vm0 = vmand %vm5190_vm10, %vm5194_vm13  ;;  %v5346_v17 = vmul.f32 %v5034_v39, %v4448_v8  ;;  %v5151_v23 = vadd.f32 %v5119_v7, %v4935_v47  ;;  %vm4900_vm11 = vcmp.eq.s32.totalorder %v9393_v15, %v9759_v0  ;;  %v5120_v11 = vsel %vm5084_vm3, %v9779_v27, 0.0 }
 0x8a1   : > { %vm5218_vm1 = vmand %vm9943_vm0, %vm9901_vm5  ;;  %11084 = vst [vmem:[#allocation122_spill] sm:$0xff] %v9956_v1  ;;  %v9958_v6 = vperm.slane %v5237_v45, 1  ;;  %vm5087_vm5 = vcmp.eq.s32.totalorder %v9978_v13, %v9704_v35  ;;  %v9987_v8 = vperm.slane %v4882_v33, 1  ;;  %v9989_v19 = vperm.slane %v5070_v48, 1 }
 0x8a2   : > { %vm5350_vm7 = vmand %vm9943_vm0, %vm9907_vm8  ;;  %v5912_v50 = vsel %vm5218_vm1, 1.0, %v6187_v4  ;;  %v5238_v3 = vadd.s32 %v5234_v63, %v4890_v41  ;;  %v5279_v43 = vsel %vm5243_vm4, %v9652_v34, 0.0  ;;  %vm5371_vm9 = vcmp.eq.s32.totalorder %v9393_v15, %v9753_v59 }
 0x8a3   : > { %v5916_v51 = vsel %vm5350_vm7, 1.0, %v6187_v4  ;;  %v5230_v36 = vmul.f32 %v5912_v50, %v5214_v30  ;;  %v5078_v4 = vadd.s32 %v5074_v56, %v4886_v14  ;;  %v4936_v5 = vsel %vm4900_vm11, %v9777_v37, 0.0 }
 0x8a4   : > { %v5362_v61 = vmul.f32 %v5916_v51, %v5346_v17  ;;  %vm5244_vm8 = vcmp.eq.s32.totalorder %v9393_v15, %v9843_v44  ;;  %vm4903_vm12 = vcmp.eq.s32.totalorder %v9978_v13, %v9638_v60  ;;  %v5366_v25 = vadd.s32 %v5234_v63, %v5074_v56 }
 0x8a5   : > { %v5311_v45 = vadd.f32 %v5279_v43, %v5151_v23  ;;  %v5152_v21 = vadd.f32 %v5120_v11, %v4936_v5  ;;  %v5123_v49 = vsel %vm5087_vm5, %v9690_v16, 0.0  ;;  %v10000_v40 = vperm.slane %v5078_v4, 1 }
 0x8a6   : > { %v10002_v14 = vperm.slane %v5230_v36, 1  ;;  %v10004_v41 = vperm.slane %v5362_v61, 1  ;;  %vm5372_vm10 = vcmp.eq.s32.totalorder %v9393_v15, %v9856_v26  ;;  %v10008_v39 = vperm.slane %v5238_v3, 1 }
 0x8a7   : > { %v5407_v28 = vsel %vm5371_vm9, %v9706_v32, 0.0  ;;  %v5280_v2 = vsel %vm5244_vm8, %v9781_v31, 0.0  ;;  %v4939_v54 = vsel %vm4903_vm12, %v9640_v55, 0.0  ;;  %vm5247_vm13 = vcmp.eq.s32.totalorder %v9978_v13, %v9750_v62 }
 0x8a8   : > { %11086 = vst [vmem:[#allocation132_spill] sm:$0xff] %v10002_v14  ;;  %v5155_v58 = vadd.f32 %v5123_v49, %v4939_v54  ;;  %vm5088_vm14 = vcmp.eq.s32.totalorder %v9978_v13, %v9790_v10  ;;  %v10018_v9 = vadd.s32 16, %v9393_v15  ;;  %v10020_v38 = vperm.slane %v5366_v25, 1 }
 0x8a9   : > { %v10022_v46 = vadd.f32 %v5407_v28, %v5311_v45  ;;  %v5312_v42 = vadd.f32 %v5280_v2, %v5152_v21  ;;  %v5408_v30 = vsel %vm5372_vm10, %v9793_v29, 0.0  ;;  %vm4904_vm15 = vcmp.eq.s32.totalorder %v9978_v13, %v9759_v0 }
 0x8aa   : > { %vm5091_vm0 = vcmp.eq.s32.totalorder %v10018_v9, %v9704_v35  ;;  %v10030_v33 = vadd.s32 24, %v9393_v15  ;;  %v10033_v56 = vadd.s32 32, %v9393_v15  ;;  %v5283_v50 = vsel %vm5247_vm13, %v9652_v34, 0.0 }
 0x8ab   : > { %vm5375_vm1 = vcmp.eq.s32.totalorder %v9978_v13, %v9753_v59  ;;  %v5124_v7 = vsel %vm5088_vm14, %v9779_v27, 0.0  ;;  %vm5092_vm6 = vcmp.eq.s32.totalorder %v10018_v9, %v9790_v10  ;;  %v5315_v63 = vadd.f32 %v5283_v50, %v5155_v58 }
 0x8ac   : > { %11087 = vst [vmem:[#allocation107_spill] sm:$0xff] %v10030_v33  ;;  %vm5248_vm7 = vcmp.eq.s32.totalorder %v9978_v13, %v9843_v44  ;;  %vm4907_vm2 = vcmp.eq.s32.totalorder %v10018_v9, %v9638_v60  ;;  %v10048_v51 = vadd.s32 40, %v9393_v15  ;;  %v5440_v17 = vadd.f32 %v5408_v30, %v5312_v42 }
 0x8ad   : > { %v4940_v47 = vsel %vm4904_vm15, %v9777_v37, 0.0  ;;  %v5127_v36 = vsel %vm5091_vm0, %v9690_v16, 0.0  ;;  %vm4908_vm3 = vcmp.eq.s32.totalorder %v10018_v9, %v9759_v0  ;;  %v5411_v23 = vsel %vm5375_vm1, %v9706_v32, 0.0 }
 0x8ae   : > { %11088 = vst [vmem:[#allocation115_spill] sm:$0xff] %v10048_v51  ;;  %v5156_v4 = vadd.f32 %v5124_v7, %v4940_v47  ;;  %vm5376_vm4 = vcmp.eq.s32.totalorder %v9978_v13, %v9856_v26  ;;  %v5128_v61 = vsel %vm5092_vm6, %v9779_v27, 0.0  ;;  %v5284_v11 = vsel %vm5248_vm7, %v9781_v31, 0.0 }
 0x8af   : > { %v4943_v3 = vsel %vm4907_vm2, %v9640_v55, 0.0  ;;  %vm5251_vm11 = vcmp.eq.s32.totalorder %v10018_v9, %v9750_v62  ;;  %vm5379_vm5 = vcmp.eq.s32.totalorder %v10018_v9, %v9753_v59  ;;  %v10064_v43 = vadd.f32 %v5411_v23, %v5315_v63 }
 0x8b0   : > { %v5159_v5 = vadd.f32 %v5127_v36, %v4943_v3  ;;  %v4944_v25 = vsel %vm4908_vm3, %v9777_v37, 0.0  ;;  %vm5085_vm9 = vcmp.eq.s32.totalorder %v9393_v15, %v9956_v1  ;;  %v5412_v45 = vsel %vm5376_vm4, %v9793_v29, 0.0 }
 0x8b1   : > { %v5160_v21 = vadd.f32 %v5128_v61, %v4944_v25  ;;  %vm5252_vm8 = vcmp.eq.s32.totalorder %v10018_v9, %v9843_v44  ;;  %vm5086_vm12 = vcmp.eq.s32.totalorder %v9393_v15, %v10000_v40  ;;  %v5316_v28 = vadd.f32 %v5284_v11, %v5156_v4 }
 0x8b2   : > { %v5287_v2 = vsel %vm5251_vm11, %v9652_v34, 0.0  ;;  %v5415_v54 = vsel %vm5379_vm5, %v9706_v32, 0.0  ;;  %vm4901_vm10 = vcmp.eq.s32.totalorder %v9393_v15, %v9885_v18  ;;  %v5121_v42 = vsel %vm5085_vm9, %v9935_v22, 0.0 }
 0x8b3   : > { %vm4902_vm13 = vcmp.eq.s32.totalorder %v9393_v15, %v9980_v24  ;;  %vm5095_vm14 = vcmp.eq.s32.totalorder %v10030_v33, %v9704_v35  ;;  %v5319_v50 = vadd.f32 %v5287_v2, %v5159_v5  ;;  %v5288_v7 = vsel %vm5252_vm8, %v9781_v31, 0.0 }
 0x8b4   : > { %vm5380_vm15 = vcmp.eq.s32.totalorder %v10018_v9, %v9856_v26  ;;  %v5122_v63 = vsel %vm5086_vm12, %v9989_v19, 0.0  ;;  %v5320_v47 = vadd.f32 %v5288_v7, %v5160_v21  ;;  %vm5245_vm0 = vcmp.eq.s32.totalorder %v9393_v15, %v9958_v6 }
 0x8b5   : > { %vm4911_vm1 = vcmp.eq.s32.totalorder %v10030_v33, %v9638_v60  ;;  %vm5373_vm6 = vcmp.eq.s32.totalorder %v9393_v15, %v9960_v12  ;;  %v4938_v23 = vsel %vm4902_vm13, %v9987_v8, 0.0  ;;  %v5131_v4 = vsel %vm5095_vm14, %v9690_v16, 0.0 }
 0x8b6   : > { %v5444_v61 = vadd.f32 %v5412_v45, %v5316_v28  ;;  %v5416_v11 = vsel %vm5380_vm15, %v9793_v29, 0.0  ;;  %v5154_v3 = vadd.f32 %v5122_v63, %v4938_v23  ;;  %vm5246_vm7 = vcmp.eq.s32.totalorder %v9393_v15, %v10008_v39 }
 0x8b7   : > { %v10101_v5 = vadd.f32 %v5415_v54, %v5319_v50  ;;  %v5281_v25 = vsel %vm5245_vm0, %v9937_v53, 0.0  ;;  %v4947_v21 = vsel %vm4911_vm1, %v9640_v55, 0.0  ;;  %vm5096_vm2 = vcmp.eq.s32.totalorder %v10030_v33, %v9790_v10 }
 0x8b8   : > { %vm5374_vm3 = vcmp.eq.s32.totalorder %v9393_v15, %v10020_v38  ;;  %v5163_v45 = vadd.f32 %v5131_v4, %v4947_v21  ;;  %vm5255_vm4 = vcmp.eq.s32.totalorder %v10030_v33, %v9750_v62  ;;  %v5448_v2 = vadd.f32 %v5416_v11, %v5320_v47 }
 0x8b9   : > { %vm4912_vm11 = vcmp.eq.s32.totalorder %v10030_v33, %v9759_v0  ;;  %v5132_v63 = vsel %vm5096_vm2, %v9779_v27, 0.0  ;;  %vm5089_vm5 = vcmp.eq.s32.totalorder %v9978_v13, %v9956_v1  ;;  %v5410_v23 = vsel %vm5374_vm3, %v10004_v41, 0.0 }
 0x8ba   : > { %v5291_v4 = vsel %vm5255_vm4, %v9652_v34, 0.0  ;;  %vm5383_vm9 = vcmp.eq.s32.totalorder %v10030_v33, %v9753_v59  ;;  %vm5256_vm8 = vcmp.eq.s32.totalorder %v10030_v33, %v9843_v44  ;;  %vm4905_vm12 = vcmp.eq.s32.totalorder %v9978_v13, %v9885_v18 }
 0x8bb   : > { %vm5090_vm13 = vcmp.eq.s32.totalorder %v9978_v13, %v10000_v40  ;;  %vm5249_vm14 = vcmp.eq.s32.totalorder %v9978_v13, %v9958_v6  ;;  %vm4906_vm15 = vcmp.eq.s32.totalorder %v9978_v13, %v9980_v24  ;;  %vm5099_vm0 = vcmp.eq.s32.totalorder %v10033_v56, %v9704_v35 }
 0x8bc   : > { %vm5377_vm1 = vcmp.eq.s32.totalorder %v9978_v13, %v9960_v12  ;;  %vm5250_vm2 = vcmp.eq.s32.totalorder %v9978_v13, %v10008_v39  ;;  %vm4916_vm3 = vcmp.eq.s32.totalorder %v10033_v56, %v9759_v0  ;;  %vm5378_vm4 = vcmp.eq.s32.totalorder %v9978_v13, %v10020_v38 }
 0x8cc   : > { %v10041_v48 = vpop.f32.mrf.mxu2 }
 0x8d2   : > { %v4662_v49 = vpop.f32.mrf.mxu3 }
 0x8d3   : > { %v5472_v58 = vmul.f32 %v5440_v17, %v4662_v49  ;;  %v4937_v17 = vsel %vm4901_vm10, %v9928_v57, 0.0  ;;  %v5409_v49 = vsel %vm5373_vm6, %v9947_v52, 0.0  ;;  %vm5384_vm10 = vcmp.eq.s32.totalorder %v10030_v33, %v9856_v26 }
 0x8d4   : > { %v10083_v30 = vpop.f32.mrf.mxu2  ;;  %v5153_v36 = vadd.f32 %v5121_v42, %v4937_v17  ;;  %v5282_v42 = vsel %vm5246_vm7, %v10002_v14, 0.0  ;;  %vm4915_vm6 = vcmp.eq.s32.totalorder %v10033_v56, %v9638_v60  ;;  %vm5100_vm7 = vcmp.eq.s32.totalorder %v10033_v56, %v9790_v10 }
 0x8d5   : > { %v5314_v7 = vadd.f32 %v5282_v42, %v5154_v3  ;;  %v5125_v3 = vsel %vm5089_vm5, %v9935_v22, 0.0  ;;  %v5126_v42 = vsel %vm5090_vm13, %v9989_v19, 0.0  ;;  %vm5093_vm5 = vcmp.eq.s32.totalorder %v10018_v9, %v9956_v1 }
 0x8d6   : > { %v5313_v54 = vadd.f32 %v5281_v25, %v5153_v36  ;;  %v5323_v36 = vadd.f32 %v5291_v4, %v5163_v45  ;;  %v5292_v45 = vsel %vm5256_vm8, %v9781_v31, 0.0  ;;  %v5285_v4 = vsel %vm5249_vm14, %v9937_v53, 0.0 }
 0x8d7   : > { %v10136_v21 = vadd.f32 %v5410_v23, %v5314_v7  ;;  %vm5260_vm8 = vcmp.eq.s32.totalorder %v10033_v56, %v9843_v44  ;;  %vm5253_vm13 = vcmp.eq.s32.totalorder %v10018_v9, %v9958_v6  ;;  %vm5104_vm14 = vcmp.eq.s32.totalorder %v10048_v51, %v9790_v10 }
 0x8d8   : > { %v10134_v25 = vadd.f32 %v5409_v49, %v5313_v54  ;;  %v5420_v49 = vsel %vm5384_vm10, %v9793_v29, 0.0  ;;  %v5296_v1 = vsel %vm5260_vm8, %v9781_v31, 0.0  ;;  %vm5388_vm10 = vcmp.eq.s32.totalorder %v10033_v56, %v9856_v26 }
 0x8d9   : > { %11090 = vst [vmem:[#allocation99_spill] sm:$0xff] %v10136_v21  ;;  %vm5392_vm8 = vcmp.eq.s32.totalorder %v10048_v51, %v9856_v26 }
 0x8da   : > { %v4665_v28 = vpop.f32.mrf.mxu3  ;;  %11089 = vst [vmem:[#allocation135_spill] sm:$0xff] %v10134_v25 }
 0x8db   : > { %v5476_v50 = vmul.f32 %v5444_v61, %v4665_v28  ;;  %v4948_v61 = vsel %vm4912_vm11, %v9777_v37, 0.0  ;;  %v4941_v28 = vsel %vm4905_vm12, %v9928_v57, 0.0  ;;  %vm5259_vm11 = vcmp.eq.s32.totalorder %v10033_v56, %v9750_v62 }
 0x8dc   : > { %v10118_v17 = vpop.f32.mrf.mxu2  ;;  %v5164_v11 = vadd.f32 %v5132_v63, %v4948_v61  ;;  %v5157_v54 = vadd.f32 %v5125_v3, %v4941_v28  ;;  %v4942_v61 = vsel %vm4906_vm15, %v9987_v8, 0.0  ;;  %v5135_v3 = vsel %vm5099_vm0, %v9690_v16, 0.0 }
 0x8dd   : > { %v5516_v47 = vadd.f32 %v5476_v50, %v5472_v58  ;;  %v5419_v58 = vsel %vm5383_vm9, %v9706_v32, 0.0  ;;  %v5413_v28 = vsel %vm5377_vm1, %v9947_v52, 0.0  ;;  %v5158_v20 = vadd.f32 %v5126_v42, %v4942_v61 }
 0x8de   : > { %v10151_v7 = vadd.f32 %v5419_v58, %v5323_v36  ;;  %v5324_v63 = vadd.f32 %v5292_v45, %v5164_v11  ;;  %v5317_v58 = vadd.f32 %v5285_v4, %v5157_v54  ;;  %v5136_v45 = vsel %vm5100_vm7, %v9779_v27, 0.0 }
 0x8df   : > { %v5286_v42 = vsel %vm5250_vm2, %v10002_v14, 0.0  ;;  %vm5387_vm9 = vcmp.eq.s32.totalorder %v10033_v56, %v9753_v59  ;;  %vm4909_vm12 = vcmp.eq.s32.totalorder %v10018_v9, %v9885_v18  ;;  %v5414_v61 = vsel %vm5378_vm4, %v10004_v41, 0.0 }
 0x8e0   : > { %v5452_v54 = vadd.f32 %v5420_v49, %v5324_v63  ;;  %v10183_v4 = vadd.f32 %v5413_v28, %v5317_v58  ;;  %v5423_v33 = vsel %vm5387_vm9, %v9706_v32, 0.0  ;;  %v4945_v49 = vsel %vm4909_vm12, %v9928_v57, 0.0 }
 0x8e1   : > { %vm5381_vm15 = vcmp.eq.s32.totalorder %v10018_v9, %v9960_v12  ;;  %vm5094_vm0 = vcmp.eq.s32.totalorder %v10018_v9, %v10000_v40  ;;  %vm5103_vm1 = vcmp.eq.s32.totalorder %v10048_v51, %v9704_v35  ;;  %vm4910_vm7 = vcmp.eq.s32.totalorder %v10018_v9, %v9980_v24  ;;  %v10275_v12 = vpop.f32.mrf.mxu0 }
 0x8e2   : > { %v4668_v50 = vpop.f32.mrf.mxu3  ;;  %11091 = vst [vmem:[#allocation120_spill] sm:$0xff] %v10183_v4  ;;  %vm5254_vm2 = vcmp.eq.s32.totalorder %v10018_v9, %v10008_v39  ;;  %vm5264_vm4 = vcmp.eq.s32.totalorder %v10048_v51, %v9843_v44  ;;  %vm5263_vm9 = vcmp.eq.s32.totalorder %v10048_v51, %v9750_v62 }
 0x8e3   : > { %v5480_v23 = vmul.f32 %v5448_v2, %v4668_v50  ;;  %v4951_v2 = vsel %vm4915_vm6, %v9640_v55, 0.0  ;;  %vm4920_vm6 = vcmp.eq.s32.totalorder %v10048_v51, %v9759_v0 }
 0x8e4   : > { %v10165_v11 = vpop.f32.mrf.mxu2  ;;  %v5167_v50 = vadd.f32 %v5135_v3, %v4951_v2  ;;  %v5295_v3 = vsel %vm5259_vm11, %v9652_v34, 0.0  ;;  %v5129_v2 = vsel %vm5093_vm5, %v9935_v22, 0.0 }
 0x8e5   : > { %v5517_v36 = vadd.f32 %v5516_v47, %v5480_v23  ;;  %v4952_v47 = vsel %vm4916_vm3, %v9777_v37, 0.0  ;;  %v5318_v23 = vadd.f32 %v5286_v42, %v5158_v20  ;;  %v5161_v58 = vadd.f32 %v5129_v2, %v4945_v49 }
 0x8e6   : > { %v5168_v13 = vadd.f32 %v5136_v45, %v4952_v47  ;;  %v5327_v21 = vadd.f32 %v5295_v3, %v5167_v50  ;;  %v5424_v50 = vsel %vm5388_vm10, %v9793_v29, 0.0  ;;  %v5140_v42 = vsel %vm5104_vm14, %v9779_v27, 0.0 }
 0x8e7   : > { %v10197_v63 = vadd.f32 %v5414_v61, %v5318_v23  ;;  %vm4919_vm3 = vcmp.eq.s32.totalorder %v10048_v51, %v9638_v60  ;;  %v10227_v23 = vadd.s32 48, %v9393_v15 }
 0x8e8   : > { %v5328_v28 = vadd.f32 %v5296_v1, %v5168_v13  ;;  %v5289_v1 = vsel %vm5253_vm13, %v9937_v53, 0.0  ;;  %v4955_v49 = vsel %vm4919_vm3, %v9640_v55, 0.0  ;;  %vm5391_vm13 = vcmp.eq.s32.totalorder %v10048_v51, %v9753_v59 }
 0x8e9   : > { %11092 = vst [vmem:[#allocation24_spill] sm:$0xff] %v10197_v63  ;;  %v10229_v61 = vadd.f32 %v5289_v1, %v5161_v58  ;;  %vm5107_vm11 = vcmp.eq.s32.totalorder %v10227_v23, %v9704_v35  ;;  %vm5108_vm5 = vcmp.eq.s32.totalorder %v10227_v23, %v9790_v10  ;;  %v5300_v58 = vsel %vm5264_vm4, %v9781_v31, 0.0 }
 0x8ea   : > { %v4671_v25 = vpop.f32.mrf.mxu3  ;;  %v5456_v13 = vadd.f32 %v5424_v50, %v5328_v28  ;;  %vm4923_vm12 = vcmp.eq.s32.totalorder %v10227_v23, %v9638_v60  ;;  %vm4924_vm10 = vcmp.eq.s32.totalorder %v10227_v23, %v9759_v0  ;;  %vm5267_vm14 = vcmp.eq.s32.totalorder %v10227_v23, %v9750_v62 }
 0x8eb   : > { %v5484_v20 = vmul.f32 %v5452_v54, %v4671_v25  ;;  %v10207_v25 = vadd.f32 %v5423_v33, %v5327_v21  ;;  %v5130_v33 = vsel %vm5094_vm0, %v9989_v19, 0.0  ;;  %v5139_v21 = vsel %vm5103_vm1, %v9690_v16, 0.0 }
 0x8ec   : > { %v10212_v47 = vpop.f32.mrf.mxu2  ;;  %v4956_v54 = vsel %vm4920_vm6, %v9777_v37, 0.0  ;;  %v5171_v28 = vadd.f32 %v5139_v21, %v4955_v49  ;;  %v5290_v21 = vsel %vm5254_vm2, %v10002_v14, 0.0  ;;  %v5475_v14 = vmul.f32 %v10064_v43, %v10083_v30 }
 0x8ed   : > { %v5518_v45 = vadd.f32 %v5517_v36, %v5484_v20  ;;  %v10215_v36 = vsel %vm5381_vm15, %v9947_v52, 0.0  ;;  %v5172_v3 = vadd.f32 %v5140_v42, %v4956_v54  ;;  %v4946_v20 = vsel %vm4910_vm7, %v9987_v8, 0.0 }
 0x8ee   : > { %v10239_v63 = vadd.f32 %v5130_v33, %v4946_v20  ;;  %v5143_v42 = vsel %vm5107_vm11, %v9690_v16, 0.0  ;;  %v5144_v33 = vsel %vm5108_vm5, %v9779_v27, 0.0  ;;  %v10261_v54 = vadd.s32 56, %v9393_v15 }
 0x8ef   : > { %v5332_v1 = vadd.f32 %v5300_v58, %v5172_v3  ;;  %v4959_v3 = vsel %vm4923_vm12, %v9640_v55, 0.0  ;;  %vm5268_vm15 = vcmp.eq.s32.totalorder %v10227_v23, %v9843_v44  ;;  %v5427_v15 = vsel %vm5391_vm13, %v9706_v32, 0.0 }
 0x8f0   : > { %v5175_v20 = vadd.f32 %v5143_v42, %v4959_v3  ;;  %vm5111_vm0 = vcmp.eq.s32.totalorder %v10261_v54, %v9704_v35  ;;  %v5303_v52 = vsel %vm5267_vm14, %v9652_v34, 0.0  ;;  %vm5395_vm1 = vcmp.eq.s32.totalorder %v10227_v23, %v9753_v59 }
 0x8f1   : > { %vm5396_vm6 = vcmp.eq.s32.totalorder %v10227_v23, %v9856_v26  ;;  %vm4927_vm7 = vcmp.eq.s32.totalorder %v10261_v54, %v9638_v60  ;;  %vm5112_vm2 = vcmp.eq.s32.totalorder %v10261_v54, %v9790_v10  ;;  %v5471_v43 = vmul.f32 %v10022_v46, %v10041_v48 }
 0x8f2   : > { %v4674_v2 = vpop.f32.mrf.mxu3  ;;  %v5479_v30 = vmul.f32 %v10101_v5, %v10118_v17  ;;  %v5335_v42 = vadd.f32 %v5303_v52, %v5175_v20  ;;  %vm5271_vm3 = vcmp.eq.s32.totalorder %v10261_v54, %v9750_v62  ;;  %vm4928_vm4 = vcmp.eq.s32.totalorder %v10261_v54, %v9759_v0 }
 0x8f3   : > { %v5488_v4 = vmul.f32 %v5456_v13, %v4674_v2  ;;  %v5428_v13 = vsel %vm5392_vm8, %v9793_v29, 0.0  ;;  %v4960_v2 = vsel %vm4924_vm10, %v9777_v37, 0.0  ;;  %v5503_v60 = vadd.f32 %v5475_v14, %v5471_v43 }
 0x8f4   : > { %v5176_v49 = vadd.f32 %v5144_v33, %v4960_v2  ;;  %v5460_v51 = vadd.f32 %v5428_v13, %v5332_v1  ;;  %v5147_v1 = vsel %vm5111_vm0, %v9690_v16, 0.0  ;;  %v4963_v13 = vsel %vm4927_vm7, %v9640_v55, 0.0 }
 0x8f5   : > { %v5519_v50 = vadd.f32 %v5518_v45, %v5488_v4  ;;  %v4636_v4 = vpop.f32.mrf.mxu2  ;;  %v5299_v45 = vsel %vm5263_vm9, %v9652_v34, 0.0  ;;  %v5483_v16 = vmul.f32 %v10151_v7, %v10165_v11  ;;  %v5179_v10 = vadd.f32 %v5147_v1, %v4963_v13 }
 0x8f6   : > { %v5331_v58 = vadd.f32 %v5299_v45, %v5171_v28  ;;  %v5304_v28 = vsel %vm5268_vm15, %v9781_v31, 0.0  ;;  %vm5382_vm11 = vcmp.eq.s32.totalorder %v10018_v9, %v10020_v38  ;;  %v5431_v55 = vsel %vm5395_vm1, %v9706_v32, 0.0 }
 0x8f7   : > { %v5336_v33 = vadd.f32 %v5304_v28, %v5176_v49  ;;  %v5432_v0 = vsel %vm5396_vm6, %v9793_v29, 0.0  ;;  %v5504_v14 = vadd.f32 %v5503_v60, %v5479_v30  ;;  %v5487_v48 = vmul.f32 %v10207_v25, %v10212_v47  ;;  %v10331_v25 = vpop.f32.mrf.mxu1  ;;  %v11094_v49 = vld [vmem:[#allocation107_spill] sm:$0xff] }
 0x8f8   : > { %v5459_v52 = vadd.f32 %v5427_v15, %v5331_v58  ;;  %v5307_v17 = vsel %vm5271_vm3, %v9652_v34, 0.0  ;;  %vm5272_vm5 = vcmp.eq.s32.totalorder %v10261_v54, %v9843_v44  ;;  %vm5399_vm9 = vcmp.eq.s32.totalorder %v10261_v54, %v9753_v59 }
 0x8f9   : > { %v5464_v5 = vadd.f32 %v5432_v0, %v5336_v33  ;;  %v5505_v11 = vadd.f32 %v5504_v14, %v5483_v16  ;;  %v5339_v20 = vadd.f32 %v5307_v17, %v5179_v10  ;;  %v5322_v62 = vadd.f32 %v5290_v21, %v10239_v63 }
 0x8fa   : > { %v4677_v53 = vpop.f32.mrf.mxu3  ;;  %v5491_v3 = vmul.f32 %v5459_v52, %v4636_v4  ;;  %v5418_v34 = vsel %vm5382_vm11, %v10004_v41, 0.0  ;;  %v11093_v4 = vld [vmem:[#allocation122_spill] sm:$0xff]  ;;  %v5308_v59 = vsel %vm5272_vm5, %v9781_v31, 0.0  ;;  %vm5400_vm12 = vcmp.eq.s32.totalorder %v10261_v54, %v9856_v26 }
 0x8fb   : > { %v5492_v35 = vmul.f32 %v5460_v51, %v4677_v53  ;;  %v5148_v53 = vsel %vm5112_vm2, %v9779_v27, 0.0  ;;  %v5463_v27 = vadd.f32 %v5431_v55, %v5335_v42  ;;  %v4964_v51 = vsel %vm4928_vm4, %v9777_v37, 0.0 }
 0x8fc   : > { %v5180_v7 = vadd.f32 %v5148_v53, %v4964_v51  ;;  %v10324_v37 = vadd.f32 %v10215_v36, %v10229_v61  ;;  %v5506_v47 = vadd.f32 %v5505_v11, %v5487_v48  ;;  %vm5097_vm8 = vcmp.eq.s32.totalorder %v11094_v49, %v11093_v4  ;;  %v11096_v11 = vld [vmem:[#allocation9_spill] sm:$0xff] }
 0x8fd   : > { %v5520_v45 = vadd.f32 %v5519_v50, %v5492_v35  ;;  %v4639_v46 = vpop.f32.mrf.mxu2  ;;  %v10318_v50 = vpop.f32.mrf.mxu0  ;;  %v5435_v36 = vsel %vm5399_vm9, %v9706_v32, 0.0  ;;  %vm4913_vm10 = vcmp.eq.s32.totalorder %v11094_v49, %v9885_v18  ;;  %vm5098_vm13 = vcmp.eq.s32.totalorder %v11094_v49, %v10000_v40 }
 0x8fe   : > { %v5495_v58 = vmul.f32 %v5463_v27, %v4639_v46  ;;  %v5340_v61 = vadd.f32 %v5308_v59, %v5180_v7  ;;  %v5507_v63 = vadd.f32 %v5506_v47, %v5491_v3  ;;  %v5467_v9 = vadd.f32 %v5435_v36, %v5339_v20  ;;  %v11095_v27 = vld [vmem:[#allocation19_spill] sm:$0xff]  ;;  %v11097_v3 = vld [vmem:[#allocation132_spill] sm:$0xff]  ;;  %v11098_v36 = vld [vmem:[#allocation10_spill] sm:$0xff] }
 0x8ff   : > { %v10343_v21 = vadd.f32 %v5418_v34, %v5322_v62  ;;  %v5133_v35 = vsel %vm5097_vm8, %v9935_v22, 0.0  ;;  %vm4914_vm14 = vcmp.eq.s32.totalorder %v11094_v49, %v9980_v24  ;;  %vm5101_vm15 = vcmp.eq.s32.totalorder %v10033_v56, %v11093_v4  ;;  %v10369_v53 = vpop.f32.mrf.mxu1 }
 0x900   : > { %v5508_v31 = vadd.f32 %v5507_v63, %v5495_v58  ;;  %vm5102_vm0 = vcmp.eq.s32.totalorder %v10033_v56, %v10000_v40  ;;  %v5436_v28 = vsel %vm5400_vm12, %v9793_v29, 0.0  ;;  %v4949_v1 = vsel %vm4913_vm10, %v9928_v57, 0.0 }
 0x901   : > { %v5134_v43 = vsel %vm5098_vm13, %v9989_v19, 0.0  ;;  %vm4917_vm1 = vcmp.eq.s32.totalorder %v10033_v56, %v9885_v18  ;;  %v5468_v30 = vadd.f32 %v5436_v28, %v5340_v61  ;;  %vm5257_vm6 = vcmp.eq.s32.totalorder %v11094_v49, %v9958_v6 }
 0x902   : > { %v4680_v2 = vpop.f32.mrf.mxu3  ;;  %v5137_v33 = vsel %vm5101_vm15, %v9935_v22, 0.0  ;;  %vm4918_vm7 = vcmp.eq.s32.totalorder %v10033_v56, %v9980_v24  ;;  %v5165_v13 = vadd.f32 %v5133_v35, %v4949_v1  ;;  %v4950_v60 = vsel %vm4914_vm14, %v9987_v8, 0.0 }
 0x903   : > { %v5496_v44 = vmul.f32 %v5464_v5, %v4680_v2  ;;  %v5138_v16 = vsel %vm5102_vm0, %v9989_v19, 0.0  ;;  %v5166_v52 = vadd.f32 %v5134_v43, %v4950_v60  ;;  %vm5258_vm2 = vcmp.eq.s32.totalorder %v11094_v49, %v10008_v39 }
 0x904   : > { %v4953_v46 = vsel %vm4917_vm1, %v9928_v57, 0.0  ;;  %vm5261_vm3 = vcmp.eq.s32.totalorder %v10033_v56, %v9958_v6  ;;  %v4954_v14 = vsel %vm4918_vm7, %v9987_v8, 0.0  ;;  %v5293_v51 = vsel %vm5257_vm6, %v11095_v27, 0.0 }
 0x905   : > { %v5521_v15 = vadd.f32 %v5520_v45, %v5496_v44  ;;  %v4642_v32 = vpop.f32.mrf.mxu2  ;;  %v10357_v42 = vpop.f32.mrf.mxu0  ;;  %v5169_v0 = vadd.f32 %v5137_v33, %v4953_v46  ;;  %v5170_v5 = vadd.f32 %v5138_v16, %v4954_v14  ;;  %vm5262_vm4 = vcmp.eq.s32.totalorder %v10033_v56, %v10008_v39 }
 0x906   : > { %v5499_v26 = vmul.f32 %v5467_v9, %v4642_v32  ;;  %v5325_v7 = vadd.f32 %v5293_v51, %v5165_v13  ;;  %vm5385_vm11 = vcmp.eq.s32.totalorder %v11094_v49, %v11096_v11  ;;  %v5294_v2 = vsel %vm5258_vm2, %v11097_v3, 0.0 }
 0x907   : > { %v5326_v62 = vadd.f32 %v5294_v2, %v5166_v52  ;;  %vm5386_vm5 = vcmp.eq.s32.totalorder %v11094_v49, %v10020_v38  ;;  %v5297_v34 = vsel %vm5261_vm3, %v11095_v27, 0.0  ;;  %vm5389_vm9 = vcmp.eq.s32.totalorder %v10033_v56, %v11096_v11  ;;  %v11099_v49 = vld [vmem:[#allocation115_spill] sm:$0xff] }
 0x908   : > { %v5509_v45 = vadd.f32 %v5508_v31, %v5499_v26  ;;  %v5329_v47 = vadd.f32 %v5297_v34, %v5169_v0  ;;  %v5298_v58 = vsel %vm5262_vm4, %v11097_v3, 0.0  ;;  %v5421_v61 = vsel %vm5385_vm11, %v11098_v36, 0.0  ;;  %v4750_v26 = vpop.f32.mrf.mxu1 }
 0x909   : > { %v5330_v63 = vadd.f32 %v5298_v58, %v5170_v5  ;;  %vm5390_vm8 = vcmp.eq.s32.totalorder %v10033_v56, %v10020_v38  ;;  %vm5105_vm12 = vcmp.eq.s32.totalorder %v11099_v49, %v11093_v4  ;;  %v5422_v35 = vsel %vm5386_vm5, %v10004_v41, 0.0 }
 0x90a   : > { %v4683_v29 = vpop.f32.mrf.mxu3  ;;  %v5510_v55 = vrot.slane %v5509_v45, 4  ;;  %vm4921_vm10 = vcmp.eq.s32.totalorder %v11099_v49, %v9885_v18  ;;  %v10404_v28 = vadd.f32 %v5421_v61, %v5325_v7  ;;  %v5454_v1 = vadd.f32 %v5422_v35, %v5326_v62  ;;  %v11101_v61 = vld [vmem:[#allocation99_spill] sm:$0xff] }
 0x90b   : > { %v5500_v10 = vmul.f32 %v5468_v30, %v4683_v29  ;;  %v5425_v43 = vsel %vm5389_vm9, %v11098_v36, 0.0  ;;  %vm5106_vm13 = vcmp.eq.s32.totalorder %v11099_v49, %v10000_v40  ;;  %v5426_v33 = vsel %vm5390_vm8, %v10004_v41, 0.0 }
 0x90c   : > { %v5511_v17 = vadd.f32 %v5510_v55, %v5509_v45  ;;  %v10412_v30 = vadd.f32 %v5425_v43, %v5329_v47  ;;  %v5141_v29 = vsel %vm5105_vm12, %v9935_v22, 0.0  ;;  %v10416_v13 = vadd.f32 %v5426_v33, %v5330_v63 }
 0x90d   : > { %v5522_v48 = vadd.f32 %v5521_v15, %v5500_v10  ;;  %v10392_v15 = vpop.f32.mrf.mxu0  ;;  %v4957_v60 = vsel %vm4921_vm10, %v9928_v57, 0.0  ;;  %vm4922_vm14 = vcmp.eq.s32.totalorder %v11099_v49, %v9980_v24  ;;  %vm5110_vm15 = vcmp.eq.s32.totalorder %v10227_v23, %v10000_v40 }
 0x90e   : > { %v5512_v44 = vrot.slane %v5511_v17, 2  ;;  %vm5265_vm0 = vcmp.eq.s32.totalorder %v11099_v49, %v9958_v6  ;;  %v5142_v10 = vsel %vm5106_vm13, %v9989_v19, 0.0  ;;  %v5173_v52 = vadd.f32 %v5141_v29, %v4957_v60 }
 0x90f   : > { %v5523_v20 = vrot.slane %v5522_v48, 4  ;;  %vm5393_vm1 = vcmp.eq.s32.totalorder %v11099_v49, %v11096_v11  ;;  %vm4926_vm6 = vcmp.eq.s32.totalorder %v10227_v23, %v9980_v24  ;;  %vm5114_vm7 = vcmp.eq.s32.totalorder %v10261_v54, %v10000_v40 }
 0x910   : > { %v5513_v32 = vadd.f32 %v5512_v44, %v5511_v17  ;;  %v4958_v55 = vsel %vm4922_vm14, %v9987_v8, 0.0  ;;  %vm5266_vm2 = vcmp.eq.s32.totalorder %v11099_v49, %v10008_v39  ;;  %v5146_v0 = vsel %vm5110_vm15, %v9989_v19, 0.0  ;;  %v4753_v2 = vpop.f32.mrf.mxu1 }
 0x911   : > { %v5524_v59 = vadd.f32 %v5523_v20, %v5522_v48  ;;  %vm5562_vm3 = vcmask 1040384   ;;  %v5301_v48 = vsel %vm5265_vm0, %v11095_v27, 0.0  ;;  %v5174_v51 = vadd.f32 %v5142_v10, %v4958_v55  ;;  %v11102_v10 = vld [vmem:[#allocation120_spill] sm:$0xff] }
 0x912   : > { %v10399_v9 = vpop.f32.mrf.mxu3  ;;  %v5514_v56 = vrot.slane %v5513_v32, 1  ;;  %vm4930_vm4 = vcmp.eq.s32.totalorder %v10261_v54, %v9980_v24  ;;  %v4962_v40 = vsel %vm4926_vm6, %v9987_v8, 0.0  ;;  %v5150_v7 = vsel %vm5114_vm7, %v9989_v19, 0.0  ;;  %v11100_v24 = vld [vmem:[#allocation24_spill] sm:$0xff] }
 0x913   : > { %v5525_v31 = vrot.slane %v5524_v59, 2  ;;  %v5429_v20 = vsel %vm5393_vm1, %v11098_v36, 0.0  ;;  %v5302_v62 = vsel %vm5266_vm2, %v11097_v3, 0.0  ;;  %v5178_v44 = vadd.f32 %v5146_v0, %v4962_v40 }
 0x914   : > { %v5515_v5 = vadd.f32 %v5514_v56, %v5513_v32  ;;  %vm5270_vm11 = vcmp.eq.s32.totalorder %v10227_v23, %v10008_v39  ;;  %v5478_v47 = vmul.f32 %v11100_v24, %v10369_v53  ;;  %vm5109_vm5 = vcmp.eq.s32.totalorder %v10227_v23, %v11093_v4 }
 0x915   : > { %v5526_v45 = vadd.f32 %v5525_v31, %v5524_v59  ;;  %v10436_v14 = vpop.f32.mrf.mxu0  ;;  %v4966_v19 = vsel %vm4930_vm4, %v9987_v8, 0.0  ;;  %vm5394_vm9 = vcmp.eq.s32.totalorder %v11099_v49, %v10020_v38  ;;  %vm4925_vm8 = vcmp.eq.s32.totalorder %v10227_v23, %v9885_v18 }
 0x916   : > { %v5182_v59 = vadd.f32 %v5150_v7, %v4966_v19  ;;  %vm5274_vm12 = vcmp.eq.s32.totalorder %v10261_v54, %v10008_v39  ;;  %v5474_v53 = vmul.f32 %v11101_v61, %v10331_v25  ;;  %v5482_v63 = vmul.f32 %v10343_v21, %v4750_v26 }
 0x917   : > { %v5527_v16 = vrot.slane %v5526_v45, 1  ;;  %v5334_v35 = vadd.f32 %v5302_v62, %v5174_v51  ;;  %v5306_v32 = vsel %vm5270_vm11, %v11097_v3, 0.0  ;;  %v5145_v8 = vsel %vm5109_vm5, %v9935_v22, 0.0 }
 0x918   : > { %v5338_v31 = vadd.f32 %v5306_v32, %v5178_v44  ;;  %vm5398_vm10 = vcmp.eq.s32.totalorder %v10227_v23, %v10020_v38  ;;  %vm5113_vm13 = vcmp.eq.s32.totalorder %v10261_v54, %v11093_v4  ;;  %v5542_v43 = vadd.f32 %v5478_v47, %v5474_v53  ;;  %v4756_v60 = vpop.f32.mrf.mxu1 }
 0x919   : > { %v5528_v46 = vadd.f32 %v5527_v16, %v5526_v45  ;;  %v5486_v33 = vmul.f32 %v5454_v1, %v4753_v2  ;;  %v5310_v39 = vsel %vm5274_vm12, %v11097_v3, 0.0  ;;  %vm5402_vm14 = vcmp.eq.s32.totalorder %v10261_v54, %v10020_v38 }
 0x91a   : > { %v4762_v34 = vpop.f32.mrf.mxu3  ;;  %v5430_v21 = vsel %vm5394_vm9, %v10004_v41, 0.0  ;;  %v4961_v26 = vsel %vm4925_vm8, %v9928_v57, 0.0  ;;  %vm5269_vm15 = vcmp.eq.s32.totalorder %v10227_v23, %v9958_v6  ;;  %v5342_v1 = vadd.f32 %v5310_v39, %v5182_v59 }
 0x91b   : > { %v5559_v17 = vrot.slane %v5528_v46, 7  ;;  %v5543_v45 = vadd.f32 %v5542_v43, %v5482_v63  ;;  %v5462_v3 = vadd.f32 %v5430_v21, %v5334_v35  ;;  %v5434_v29 = vsel %vm5398_vm10, %v10004_v41, 0.0 }
 0x91c   : > { %vm4929_vm0 = vcmp.eq.s32.totalorder %v10261_v54, %v9885_v18  ;;  %v5177_v56 = vadd.f32 %v5145_v8, %v4961_v26  ;;  %v5466_v38 = vadd.f32 %v5434_v29, %v5338_v31  ;;  %v5149_v49 = vsel %vm5113_vm13, %v9935_v22, 0.0 }
 0x91d   : > { %v10452_v58 = vsel %vm5562_vm3, %v5515_v5, %v5559_v17  ;;  %v4718_v25 = vpop.f32.mrf.mxu0  ;;  %v5438_v16 = vsel %vm5402_vm14, %v10004_v41, 0.0  ;;  %v5477_v46 = vmul.f32 %v11102_v10, %v10318_v50  ;;  %v5544_v55 = vadd.f32 %v5543_v45, %v5486_v33  ;;  %v11103_v41 = vld [vmem:[#allocation135_spill] sm:$0xff] }
 0x91e   : > { %v5490_v0 = vmul.f32 %v10416_v13, %v4756_v60  ;;  %v5494_v51 = vmul.f32 %v5462_v3, %v10399_v9  ;;  %v5333_v5 = vadd.f32 %v5301_v48, %v5173_v52  ;;  %v5305_v18 = vsel %vm5269_vm15, %v11095_v27, 0.0 }
 0x91f   : > { %v4965_v17 = vsel %vm4929_vm0, %v9928_v57, 0.0  ;;  %v5470_v22 = vadd.f32 %v5438_v16, %v5342_v1  ;;  %v5473_v40 = vmul.f32 %v11103_v41, %v10275_v12  ;;  %v5481_v50 = vmul.f32 %v10324_v37, %v10357_v42 }
 0x920   : > { %v5545_v7 = vadd.f32 %v5544_v55, %v5490_v0  ;;  %v5498_v13 = vmul.f32 %v5466_v38, %v4762_v34  ;;  %v5337_v2 = vadd.f32 %v5305_v18, %v5177_v56  ;;  %vm5397_vm1 = vcmp.eq.s32.totalorder %v10227_v23, %v11096_v11 }
 0x921   : > { %v5181_v9 = vadd.f32 %v5149_v49, %v4965_v17  ;;  %vm5273_vm6 = vcmp.eq.s32.totalorder %v10261_v54, %v9958_v6  ;;  %v5529_v52 = vadd.f32 %v5477_v46, %v5473_v40  ;;  %v5485_v57 = vmul.f32 %v10404_v28, %v10392_v15 }
 0x922   : > { %v4765_v4 = vpop.f32.mrf.mxu3  ;;  %v5546_v48 = vadd.f32 %v5545_v7, %v5494_v51  ;;  %v5461_v12 = vadd.f32 %v5429_v20, %v5333_v5  ;;  %v5489_v37 = vmul.f32 %v10412_v30, %v10436_v14  ;;  %v5433_v42 = vsel %vm5397_vm1, %v11098_v36, 0.0 }
 0x923   : > { %v5502_v62 = vmul.f32 %v5470_v22, %v4765_v4  ;;  %v5530_v24 = vadd.f32 %v5529_v52, %v5481_v50  ;;  %v5465_v23 = vadd.f32 %v5433_v42, %v5337_v2  ;;  %v5309_v47 = vsel %vm5273_vm6, %v11095_v27, 0.0 }
 0x924   : > { %v5547_v34 = vadd.f32 %v5546_v48, %v5498_v13  ;;  %vm5401_vm7 = vcmp.eq.s32.totalorder %v10261_v54, %v11096_v11  ;;  %v5493_v19 = vmul.f32 %v5461_v12, %v4718_v25  ;;  %v5341_v15 = vadd.f32 %v5309_v47, %v5181_v9 }
 0x925   : > { %v4721_v44 = vpop.f32.mrf.mxu0  ;;  %v5531_v6 = vadd.f32 %v5530_v24, %v5485_v57  ;;  %v5437_v53 = vsel %vm5401_vm7, %v11098_v36, 0.0  ;;  %vm5564_vm2 = vcmask 1042434   ;;  %vm5566_vm3 = vcmask 1041408  }
 0x926   : > { %v5548_v28 = vadd.f32 %v5547_v34, %v5502_v62  ;;  %v5497_v20 = vmul.f32 %v5465_v23, %v4721_v44  ;;  %v5469_v30 = vadd.f32 %v5437_v53, %v5341_v15  ;;  %v11104_v3 = vlaneseq }
 0x927   : > { %v5532_v59 = vadd.f32 %v5531_v6, %v5489_v37 }
 0x928   : > { %v5549_v61 = vrot.slane %v5548_v28, 4  ;;  %vm5571_vm4 = vcmp.lt.s32.totalorder %v11104_v3, 512 }
 0x929   : > { %v5533_v63 = vadd.f32 %v5532_v59, %v5493_v19 }
 0x92a   : > { %v5550_v14 = vadd.f32 %v5549_v61, %v5548_v28 }
 0x92b   : > { %v5534_v32 = vadd.f32 %v5533_v63, %v5497_v20 }
 0x92c   : > { %v5551_v27 = vrot.slane %v5550_v14, 2 }
 0x92d   : > { %v4724_v35 = vpop.f32.mrf.mxu0 }
 0x92e   : > { %v5501_v8 = vmul.f32 %v5469_v30, %v4724_v35  ;;  %v5552_v43 = vadd.f32 %v5551_v27, %v5550_v14 }
 0x930   : > { %v5535_v31 = vadd.f32 %v5534_v32, %v5501_v8  ;;  %v5553_v33 = vrot.slane %v5552_v43, 1 }
 0x932   : > { %v5536_v54 = vrot.slane %v5535_v31, 4  ;;  %v5554_v21 = vadd.f32 %v5553_v33, %v5552_v43 }
 0x934   : > { %v5537_v11 = vadd.f32 %v5536_v54, %v5535_v31  ;;  %v5561_v45 = vrot.slane %v5554_v21, 5 }
 0x936   : > { %v5538_v39 = vrot.slane %v5537_v11, 2 }
 0x938   : > { %v5539_v25 = vadd.f32 %v5538_v39, %v5537_v11 }
 0x93a   : > { %v5540_v26 = vrot.slane %v5539_v25, 1 }
 0x93c   : > { %v5541_v1 = vadd.f32 %v5540_v26, %v5539_v25 }
 0x93e   : > { %v5560_v36 = vrot.slane %v5541_v1, 6 }
 0x940   : > { %v5565_v29 = vsel %vm5564_vm2, %v5560_v36, %v5561_v45 }
 0x941   : > { %v5567_v60 = vsel %vm5566_vm3, %v10452_v58, %v5565_v29 }
 0x942   : > { %5573 = vst.msk [vmem:[%s683_s28] sm:$0xf] %vm5571_vm4, %v5567_v60 }
 0x943 PF: > { %s30_s0 = sadd.s32 1, %s6182_s0  }
 0x944   : > { %p27_p4 = scmp.ge.s32.totalorder %s30_s0, 4  }
 0x946   :  { %29 = sbr.rel (!%p27_p4) target bundleno = 5 (0x5), region = 151 }

</bundles_post_ra>
